<compile_context>
chip_gen: v7x
topology: tpu7x:2x2x1
jax: 0.10.0
libtpu: 0.0.40
codegen_flags: <defaults>
</compile_context>

<pallas_src>
import numpy as np

import jax
import jax.numpy as jnp
from jax.experimental import pallas as pl
from jax.experimental.pallas import tpu as pltpu


_VMEM = pl.BlockSpec(memory_space=pltpu.MemorySpace.VMEM)


# -----------------------------------------------------------------------------
# In-kernel building blocks (operate on VMEM-resident values)
# -----------------------------------------------------------------------------
def _lstm_cell(g, c, Ht):
    """One direction's cell update for all tracks at once.

    g: (Bp, 4*Ht) pre-activations with column layout [i | f | o | g]
    c: (Bp, Ht) cell state
    """
    s = jax.nn.sigmoid(g[:, :3 * Ht])            # one wide slab: i, f, o gates
    gt = jnp.tanh(g[:, 3 * Ht:])                 # g gate
    c_new = s[:, Ht:2 * Ht] * c + s[:, :Ht] * gt
    h_new = s[:, 2 * Ht:3 * Ht] * jnp.tanh(c_new)
    return h_new, c_new


def _multitrack_bilstm(x, wih, whh, bias, h0, c0, need_seq=True):
    """Fused multi-track bidirectional LSTM layer.

    x:    (T, Bp, D)        time-major input (all tracks' features concatenated)
    wih:  (D, 8*Ht)         block-diagonal input weights,
                            columns = [FWD: i|f|o|g | BWD: i|f|o|g] (track-minor)
    whh:  (2*Ht, 8*Ht)      block-diagonal recurrent weights, rows = [h_fwd | h_bwd]
    bias: (1, 8*Ht)         folded b_ih + b_hh, same column layout
    h0,c0:(Bp, 2*Ht)        [fwd tracks | bwd tracks] initial states
    Returns (out, h_last):
        out:    (T, Bp, 2*Ht) time-aligned [h_fwd(t) | h_bwd(t)]   (or None)
        h_last: (Bp, 2*Ht)    [h_fwd(T-1) | h_bwd(time 0)]
    """
    T, Bp, D = x.shape
    Ht = whh.shape[0] // 2            # total hidden width (sum over tracks)
    G = 4 * Ht                        # per-direction gate width

    # Hoisted input projection: one matmul covers all timesteps, tracks, directions.
    gi = (jnp.dot(x.reshape(T * Bp, D), wih, preferred_element_type=jnp.float32)
          + bias).reshape(T, Bp, 2 * G)

    h_f, h_b = h0[:, :Ht], h0[:, Ht:]
    c_f, c_b = c0[:, :Ht], c0[:, Ht:]
    hf_steps = [None] * T
    hb_steps = [None] * T
    for t in range(T):                                # fully unrolled (T static & small)
        rt = T - 1 - t                                # backward direction walks reversed time
        h2 = h0 if t == 0 else jnp.concatenate([h_f, h_b], axis=-1)
        gh = jnp.dot(h2, whh, preferred_element_type=jnp.float32)   # (Bp, 8*Ht)
        g_f = gh[:, :G] + gi[t, :, :G]                # forward gates at time t
        g_b = gh[:, G:] + gi[rt, :, G:]               # backward gates at time T-1-t
        h_f, c_f = _lstm_cell(g_f, c_f, Ht)
        h_b, c_b = _lstm_cell(g_b, c_b, Ht)
        hf_steps[t] = h_f
        hb_steps[rt] = h_b                            # time-align backward outputs
    h_last = jnp.concatenate([hf_steps[T - 1], hb_steps[0]], axis=-1)
    if not need_seq:
        return None, h_last
    out = jnp.concatenate([jnp.stack(hf_steps, axis=0),
                           jnp.stack(hb_steps, axis=0)], axis=-1)    # (T, Bp, 2*Ht)
    return out, h_last


def _make_fused_kernel(n_branch, n_comb):
    """Builds the single fused kernel for num_layers2=n_branch, num_layers1=n_comb."""

    def kernel(*refs):
        x_ref = refs[0]
        pos = 1
        branch = [refs[pos + 5 * l: pos + 5 * l + 5] for l in range(n_branch)]
        pos += 5 * n_branch
        fc_w, fc_b = refs[pos], refs[pos + 1]
        pos += 2
        comb = [refs[pos + 5 * l: pos + 5 * l + 5] for l in range(n_comb)]
        pos += 5 * n_comb
        out_ref = refs[pos]

        T, Bp, _ = x_ref.shape

        # --- fused seq (+) signal branch BiLSTM stack (2 tracks per layer) ---
        x = x_ref[...]
        for (wih, whh, bias, h0, c0) in branch:
            x, _ = _multitrack_bilstm(x, wih[...], whh[...], bias[...],
                                      h0[...], c0[...], need_seq=True)

        # --- fused block-diagonal dense (fc_seq (+) fc_signal) + ReLU ---
        w2 = x.shape[-1]
        y = (jnp.dot(x.reshape(T * Bp, w2), fc_w[...],
                     preferred_element_type=jnp.float32) + fc_b[...])
        y = jnp.maximum(y, 0.0).reshape(T, Bp, -1)

        # --- stacked combined BiLSTM; only the final [fwd-last | bwd-first] is needed ---
        h_last = None
        for li, (wih, whh, bias, h0, c0) in enumerate(comb):
            y, h_last = _multitrack_bilstm(y, wih[...], whh[...], bias[...],
                                           h0[...], c0[...],
                                           need_seq=(li + 1 < n_comb))
        out_ref[...] = h_last                                     # (Bp, 2*hidden)

    return kernel


# -----------------------------------------------------------------------------
# Parameter init (PyTorch-shaped)
# -----------------------------------------------------------------------------
def _init_lstm_dir(key, input_size, hidden_size):
    k1, k2, k3, k4 = jax.random.split(key, 4)
    stdv = 1.0 / float(hidden_size) ** 0.5
    w_ih = jax.random.uniform(k1, (4 * hidden_size, input_size), jnp.float32, -stdv, stdv)
    w_hh = jax.random.uniform(k2, (4 * hidden_size, hidden_size), jnp.float32, -stdv, stdv)
    b_ih = jax.random.uniform(k3, (4 * hidden_size,), jnp.float32, -stdv, stdv)
    b_hh = jax.random.uniform(k4, (4 * hidden_size,), jnp.float32, -stdv, stdv)
    return (w_ih, w_hh, b_ih, b_hh)


def _init_linear(key, in_features, out_features):
    k1, k2 = jax.random.split(key)
    stdv = 1.0 / float(in_features) ** 0.5
    w = jax.random.uniform(k1, (out_features, in_features), jnp.float32, -stdv, stdv)
    b = jax.random.uniform(k2, (out_features,), jnp.float32, -stdv, stdv)
    return (w, b)


def init_params(key, cfg):
    hs = cfg["hidden_size"]
    nhid_seq = hs // 2
    nhid_signal = hs - nhid_seq
    sigfea_num = 4               # is_signallen=True, is_trace=False; tags always appended
    emb = cfg["embedding_size"]
    n2, n1 = cfg["num_layers2"], cfg["num_layers1"]

    keys = iter(jax.random.split(key, 3 + 4 * n2 + 2 * n1))
    params = {}
    params["embed"] = jax.random.normal(next(keys), (cfg["vocab_size"], emb), jnp.float32)

    layers, d_in = [], emb + sigfea_num
    for _ in range(n2):
        layers.append((_init_lstm_dir(next(keys), d_in, nhid_seq),
                       _init_lstm_dir(next(keys), d_in, nhid_seq)))
        d_in = 2 * nhid_seq
    params["lstm_seq"] = layers
    params["fc_seq"] = _init_linear(next(keys), 2 * nhid_seq, nhid_seq)

    layers, d_in = [], cfg["signal_len"]
    for _ in range(n2):
        layers.append((_init_lstm_dir(next(keys), d_in, nhid_signal),
                       _init_lstm_dir(next(keys), d_in, nhid_signal)))
        d_in = 2 * nhid_signal
    params["lstm_signal"] = layers
    params["fc_signal"] = _init_linear(next(keys), 2 * nhid_signal, nhid_signal)

    layers, d_in = [], hs
    for _ in range(n1):
        layers.append((_init_lstm_dir(next(keys), d_in, hs),
                       _init_lstm_dir(next(keys), d_in, hs)))
        d_in = 2 * hs
    params["lstm_comb"] = layers
    return params


# -----------------------------------------------------------------------------
# Kernel-layout parameter preparation (host side, numpy)
# -----------------------------------------------------------------------------
def _gate_perm(H):
    # PyTorch weight rows are ordered [i | f | g | o]; kernel layout is [i | f | o | g].
    return np.concatenate([np.arange(0, H), np.arange(H, 2 * H),
                           np.arange(3 * H, 4 * H), np.arange(2 * H, 3 * H)])


def _fuse_bilstm(track_params, track_Hs, in_segments, d_tot):
    """Build block-diagonal fused weights for a multi-track bidirectional LSTM layer.

    track_params: per track, (fwd, bwd) with PyTorch tensors (w_ih, w_hh, b_ih, b_hh)
    track_Hs:     per-track hidden sizes
    in_segments:  per track, list of (fused_row_start, torch_col_start, width) mapping
                  that track's PyTorch input columns into the fused input rows
    d_tot:        fused input width
    Column layout: [FWD: i|f|o|g (track-minor) | BWD: i|f|o|g]; hidden rows [fwd | bwd].
    """
    Hs = list(track_Hs)
    H_tot = sum(Hs)
    pre = np.concatenate([[0], np.cumsum(Hs)])[:-1]
    wih = np.zeros((d_tot, 8 * H_tot), np.float32)
    whh = np.zeros((2 * H_tot, 8 * H_tot), np.float32)
    bias = np.zeros((8 * H_tot,), np.float32)
    for k, ((fwd, bwd), H) in enumerate(zip(track_params, Hs)):
        for d, (w_ih, w_hh, b_ih, b_hh) in enumerate((fwd, bwd)):
            w_ih = np.asarray(w_ih)
            w_hh = np.asarray(w_hh)
            b = np.asarray(b_ih) + np.asarray(b_hh)
            perm = _gate_perm(H)
            w_ih_r = w_ih[perm]                 # rows now [i | f | o | g]
            w_hh_r = w_hh[perm]
            b_r = b[perm]
            for q in range(4):                  # target gate blocks: i, f, o, g
                col0 = d * 4 * H_tot + q * H_tot + int(pre[k])
                rows = slice(q * H, (q + 1) * H)
                for (frow0, tcol0, ww) in in_segments[k]:
                    wih[frow0:frow0 + ww, col0:col0 + H] = \
                        w_ih_r[rows, tcol0:tcol0 + ww].T
                r0 = d * H_tot + int(pre[k])
                whh[r0:r0 + H, col0:col0 + H] = w_hh_r[rows].T
                bias[col0:col0 + H] = b_r[rows]
    return (jnp.asarray(wih), jnp.asarray(whh), jnp.asarray(bias)[None, :])


def prepare_params(params, cfg):
    hs = cfg["hidden_size"]
    h_seq = hs // 2
    h_sig = hs - h_seq
    emb = cfg["embedding_size"]
    d_seq = emb + 4
    d_sig = cfg["signal_len"]
    n2, n1 = cfg["num_layers2"], cfg["num_layers1"]
    H_tot = h_seq + h_sig

    prep = {"embed": params["embed"]}

    # ---- fused 2-track branch BiLSTM stack (seq (+) signal) ----
    branch = []
    for l in range(n2):
        if l == 0:
            segs_seq = [(0, 0, d_seq)]
            segs_sig = [(d_seq, 0, d_sig)]
            d_tot = d_seq + d_sig
        else:
            segs_seq = [(0, 0, h_seq), (H_tot, h_seq, h_seq)]
            segs_sig = [(h_seq, 0, h_sig), (H_tot + h_seq, h_sig, h_sig)]
            d_tot = 2 * H_tot
        branch.append(_fuse_bilstm(
            [params["lstm_seq"][l], params["lstm_signal"][l]],
            [h_seq, h_sig], [segs_seq, segs_sig], d_tot))
    prep["branch"] = branch

    # ---- fused block-diagonal dense: fc_seq (+) fc_signal ----
    wq, bq = params["fc_seq"]
    wg, bg = params["fc_signal"]
    wq = np.asarray(wq); wg = np.asarray(wg)
    W = np.zeros((2 * H_tot, h_seq + h_sig), np.float32)
    W[0:h_seq, :h_seq] = wq[:, :h_seq].T                       # seq fwd rows
    W[H_tot:H_tot + h_seq, :h_seq] = wq[:, h_seq:].T           # seq bwd rows
    W[h_seq:H_tot, h_seq:] = wg[:, :h_sig].T                   # sig fwd rows
    W[H_tot + h_seq:, h_seq:] = wg[:, h_sig:].T                # sig bwd rows
    b = np.concatenate([np.asarray(bq), np.asarray(bg)])[None, :]
    prep["fc"] = (jnp.asarray(W), jnp.asarray(b))

    # ---- combined stack (single track) ----
    comb = []
    for l in range(n1):
        d_tot = hs if l == 0 else 2 * hs
        comb.append(_fuse_bilstm([params["lstm_comb"][l]], [hs],
                                 [[(0, 0, d_tot)]], d_tot))
    prep["comb"] = comb
    return prep


def _init_hidden(key, batch_size, num_layers, hidden_size):
    kh, kc = jax.random.split(key)
    h0 = jax.random.normal(kh, (num_layers * 2, batch_size, hidden_size), jnp.float32)
    c0 = jax.random.normal(kc, (num_layers * 2, batch_size, hidden_size), jnp.float32)
    return h0, c0


def _sample_hidden_states(hidden_key, cfg, batch_size):
    hs = cfg["hidden_size"]
    nhid_seq = hs // 2
    nhid_signal = hs - nhid_seq
    k1, k2, k3 = jax.random.split(hidden_key, 3)
    return (_init_hidden(k1, batch_size, cfg["num_layers2"], nhid_seq),
            _init_hidden(k2, batch_size, cfg["num_layers2"], nhid_signal),
            _init_hidden(k3, batch_size, cfg["num_layers1"], hs))


# -----------------------------------------------------------------------------
# Forward pass (mirrors ModelDomainExtraction.forward, inference semantics)
# -----------------------------------------------------------------------------
def model_forward(prep, cfg, kmer, base_means, base_stds, base_signal_lens,
                  signals, tags, hidden_key):
    T = cfg["seq_len"]
    hs = cfg["hidden_size"]
    n1, n2 = cfg["num_layers1"], cfg["num_layers2"]
    B = kmer.shape[0]
    Bp = ((B + 7) // 8) * 8                 # pad batch to the 8-row sublane tile

    f32 = jnp.float32
    feats = [jnp.take(prep["embed"], kmer.astype(jnp.int32), axis=0)]
    for a in (base_means, base_stds, base_signal_lens, tags):
        feats.append(a.reshape(B, T, 1).astype(f32))
    feats.append(signals.astype(f32))
    # Fused 2-track input: [seq features (emb+4) | signal features (signal_len)]
    x = jnp.transpose(jnp.concatenate(feats, axis=2), (1, 0, 2))    # (T, B, D_tot)
    x = jnp.pad(x, ((0, 0), (0, Bp - B), (0, 0)))

    (h0_seq, c0_seq), (h0_sig, c0_sig), (h0_cmb, c0_cmb) = \
        _sample_hidden_states(hidden_key, cfg, B)

    def pad_bh(a):
        return jnp.pad(a, ((0, Bp - B), (0, 0)))

    args = [x]
    for l in range(n2):
        wih, whh, bias = prep["branch"][l]
        h = jnp.concatenate([h0_seq[2 * l], h0_sig[2 * l],
                             h0_seq[2 * l + 1], h0_sig[2 * l + 1]], axis=-1)
        c = jnp.concatenate([c0_seq[2 * l], c0_sig[2 * l],
                             c0_seq[2 * l + 1], c0_sig[2 * l + 1]], axis=-1)
        args += [wih, whh, bias, pad_bh(h), pad_bh(c)]
    args += list(prep["fc"])
    for l in range(n1):
        wih, whh, bias = prep["comb"][l]
        h = jnp.concatenate([h0_cmb[2 * l], h0_cmb[2 * l + 1]], axis=-1)
        c = jnp.concatenate([c0_cmb[2 * l], c0_cmb[2 * l + 1]], axis=-1)
        args += [wih, whh, bias, pad_bh(h), pad_bh(c)]

    out = pl.pallas_call(
        _make_fused_kernel(n2, n1),
        out_shape=jax.ShapeDtypeStruct((Bp, 2 * hs), jnp.float32),
        in_specs=[_VMEM] * len(args),
        out_specs=_VMEM,
    )(*args)
    return out[:B]                                                  # (B, 2*hidden)


# -----------------------------------------------------------------------------
# Pure-JAX reference (mirrors the PyTorch module, used for validation)
# -----------------------------------------------------------------------------
def reference_forward(params, cfg, kmer, base_means, base_stds, base_signal_lens,
                      signals, tags, hidden_key):
    T = cfg["seq_len"]
    hs = cfg["hidden_size"]
    B = kmer.shape[0]
    f32 = jnp.float32

    base_means = base_means.reshape(B, T, 1).astype(f32)
    base_stds = base_stds.reshape(B, T, 1).astype(f32)
    base_signal_lens = base_signal_lens.reshape(B, T, 1).astype(f32)
    tags = tags.reshape(B, T, 1).astype(f32)
    kmer_embed = jnp.take(params["embed"], kmer.astype(jnp.int32), axis=0)
    out_seq = jnp.concatenate([kmer_embed, base_means, base_stds, base_signal_lens, tags], 2)
    out_signal = signals.astype(f32)

    (h0_seq, c0_seq), (h0_sig, c0_sig), (h0_cmb, c0_cmb) = \
        _sample_hidden_states(hidden_key, cfg, B)

    def cell(x_t, h, c, w_ih, w_hh, b_ih, b_hh):
        H = h.shape[-1]
        g = x_t @ w_ih.T + b_ih + h @ w_hh.T + b_hh
        i = jax.nn.sigmoid(g[:, :H])
        f = jax.nn.sigmoid(g[:, H:2 * H])
        gg = jnp.tanh(g[:, 2 * H:3 * H])
        o = jax.nn.sigmoid(g[:, 3 * H:])
        c = f * c + i * gg
        return o * jnp.tanh(c), c

    def bilstm_stack(x, layers, h0, c0):
        for l, (fwd, bwd) in enumerate(layers):
            hf, cf = h0[2 * l], c0[2 * l]
            hb, cb = h0[2 * l + 1], c0[2 * l + 1]
            of, ob = [], [None] * T
            for t in range(T):
                hf, cf = cell(x[:, t], hf, cf, *fwd)
                of.append(hf)
            for t in range(T - 1, -1, -1):
                hb, cb = cell(x[:, t], hb, cb, *bwd)
                ob[t] = hb
            x = jnp.concatenate([jnp.stack(of, axis=1), jnp.stack(ob, axis=1)], axis=-1)
        return x

    out_seq = bilstm_stack(out_seq, params["lstm_seq"], h0_seq, c0_seq)
    w, b = params["fc_seq"]
    out_seq = jax.nn.relu(out_seq @ w.T + b)
    out_signal = bilstm_stack(out_signal, params["lstm_signal"], h0_sig, c0_sig)
    w, b = params["fc_signal"]
    out_signal = jax.nn.relu(out_signal @ w.T + b)
    out = jnp.concatenate([out_seq, out_signal], axis=2)
    out = bilstm_stack(out, params["lstm_comb"], h0_cmb, c0_cmb)
    return jnp.concatenate([out[:, -1, :hs], out[:, 0, hs:]], axis=1)


# -----------------------------------------------------------------------------
# Demo
# -----------------------------------------------------------------------------
if __name__ == "__main__":
    cfg = dict(seq_len=13, signal_len=16, num_layers1=3, num_layers2=1,
               num_classes=2, hidden_size=32, vocab_size=16, embedding_size=4)
    B = 2

    key = jax.random.PRNGKey(0)
    pkey, dkey, hkey = jax.random.split(key, 3)
    params = init_params(pkey, cfg)
    prep = prepare_params(params, cfg)

    ks = jax.random.split(dkey, 6)
    kmer = jax.random.randint(ks[0], (B, cfg["seq_len"]), 0, cfg["vocab_size"], dtype=jnp.int32)
    base_means = jax.random.normal(ks[1], (B, cfg["seq_len"]), jnp.float32)
    base_stds = jax.random.normal(ks[2], (B, cfg["seq_len"]), jnp.float32)
    base_signal_lens = jax.random.normal(ks[3], (B, cfg["seq_len"]), jnp.float32)
    signals = jax.random.normal(ks[4], (B, cfg["seq_len"], cfg["signal_len"]), jnp.float32)
    tags = jax.random.randint(ks[5], (B, cfg["seq_len"]), 0, 2, dtype=jnp.int32).astype(jnp.float32)

    fused = jax.jit(lambda *xs: model_forward(prep, cfg, *xs))
    out = fused(kmer, base_means, base_stds, base_signal_lens, signals, tags, hkey)
    jax.block_until_ready(out)
    assert out.shape == (B, 2 * cfg["hidden_size"])

    ref = jax.jit(lambda *xs: reference_forward(params, cfg, *xs))(
        kmer, base_means, base_stds, base_signal_lens, signals, tags, hkey)
    jax.block_until_ready(ref)
    max_err = float(jnp.max(jnp.abs(out - ref)))
    assert max_err < 5e-2, f"kernel/reference mismatch: max abs err = {max_err}"

    print("KERNEL_OK")
</pallas_src>

<mosaic_0001>
module attributes {stable_mosaic.version = 11 : i64} {
  func.func @kernel(%arg0: memref<13x8x24xf32, #tpu.memory_space<vmem>>, %arg1: memref<24x256xf32, #tpu.memory_space<vmem>>, %arg2: memref<64x256xf32, #tpu.memory_space<vmem>>, %arg3: memref<1x256xf32, #tpu.memory_space<vmem>>, %arg4: memref<8x64xf32, #tpu.memory_space<vmem>>, %arg5: memref<8x64xf32, #tpu.memory_space<vmem>>, %arg6: memref<64x32xf32, #tpu.memory_space<vmem>>, %arg7: memref<1x32xf32, #tpu.memory_space<vmem>>, %arg8: memref<32x256xf32, #tpu.memory_space<vmem>>, %arg9: memref<64x256xf32, #tpu.memory_space<vmem>>, %arg10: memref<1x256xf32, #tpu.memory_space<vmem>>, %arg11: memref<8x64xf32, #tpu.memory_space<vmem>>, %arg12: memref<8x64xf32, #tpu.memory_space<vmem>>, %arg13: memref<64x256xf32, #tpu.memory_space<vmem>>, %arg14: memref<64x256xf32, #tpu.memory_space<vmem>>, %arg15: memref<1x256xf32, #tpu.memory_space<vmem>>, %arg16: memref<8x64xf32, #tpu.memory_space<vmem>>, %arg17: memref<8x64xf32, #tpu.memory_space<vmem>>, %arg18: memref<64x256xf32, #tpu.memory_space<vmem>>, %arg19: memref<64x256xf32, #tpu.memory_space<vmem>>, %arg20: memref<1x256xf32, #tpu.memory_space<vmem>>, %arg21: memref<8x64xf32, #tpu.memory_space<vmem>>, %arg22: memref<8x64xf32, #tpu.memory_space<vmem>>, %arg23: memref<8x64xf32, #tpu.memory_space<vmem>>) attributes {dimension_semantics = [], scalar_prefetch = 0 : i64, scratch_operands = 0 : i64, tpu.core_type = #tpu.core_type<tc>} {
    %c0 = arith.constant 0 : index
    %c0_0 = arith.constant 0 : index
    %c0_1 = arith.constant 0 : index
    %0 = vector.load %arg0[%c0, %c0_0, %c0_1] : memref<13x8x24xf32, #tpu.memory_space<vmem>>, vector<13x8x24xf32>
    %c0_2 = arith.constant 0 : index
    %c0_3 = arith.constant 0 : index
    %1 = vector.load %arg1[%c0_2, %c0_3] : memref<24x256xf32, #tpu.memory_space<vmem>>, vector<24x256xf32>
    %c0_4 = arith.constant 0 : index
    %c0_5 = arith.constant 0 : index
    %2 = vector.load %arg2[%c0_4, %c0_5] : memref<64x256xf32, #tpu.memory_space<vmem>>, vector<64x256xf32>
    %c0_6 = arith.constant 0 : index
    %c0_7 = arith.constant 0 : index
    %3 = vector.load %arg3[%c0_6, %c0_7] : memref<1x256xf32, #tpu.memory_space<vmem>>, vector<1x256xf32>
    %c0_8 = arith.constant 0 : index
    %c0_9 = arith.constant 0 : index
    %4 = vector.load %arg4[%c0_8, %c0_9] : memref<8x64xf32, #tpu.memory_space<vmem>>, vector<8x64xf32>
    %c0_10 = arith.constant 0 : index
    %c0_11 = arith.constant 0 : index
    %5 = vector.load %arg5[%c0_10, %c0_11] : memref<8x64xf32, #tpu.memory_space<vmem>>, vector<8x64xf32>
    %6 = vector.shape_cast %0 : vector<13x8x24xf32> to vector<104x24xf32>
    %cst = arith.constant dense<0.000000e+00> : vector<104x256xf32>
    %7 = tpu.matmul %6, %1, %cst {dimension_numbers = #tpu.dot_dimension_numbers<[1], [0], [0], [1], [0, 0, 1, 1], [], []>} : vector<104x24xf32>, vector<24x256xf32>, vector<104x256xf32> -> vector<104x256xf32>
    %8 = vector.broadcast %3 : vector<1x256xf32> to vector<104x256xf32>
    %9 = arith.addf %7, %8 : vector<104x256xf32>
    %10 = vector.shape_cast %9 : vector<104x256xf32> to vector<13x8x256xf32>
    %11 = vector.extract_strided_slice %5 {offsets = [0, 0], sizes = [8, 32], strides = [1, 1]} : vector<8x64xf32> to vector<8x32xf32>
    %12 = vector.extract_strided_slice %5 {offsets = [0, 32], sizes = [8, 32], strides = [1, 1]} : vector<8x64xf32> to vector<8x32xf32>
    %cst_12 = arith.constant dense<0.000000e+00> : vector<8x256xf32>
    %13 = tpu.matmul %4, %2, %cst_12 {dimension_numbers = #tpu.dot_dimension_numbers<[1], [0], [0], [1], [0, 0, 1, 1], [], []>} : vector<8x64xf32>, vector<64x256xf32>, vector<8x256xf32> -> vector<8x256xf32>
    %14 = vector.extract_strided_slice %13 {offsets = [0, 0], sizes = [8, 128], strides = [1, 1]} : vector<8x256xf32> to vector<8x128xf32>
    %15 = vector.extract_strided_slice %10 {offsets = [0, 0, 0], sizes = [1, 8, 128], strides = [1, 1, 1]} : vector<13x8x256xf32> to vector<1x8x128xf32>
    %16 = vector.shape_cast %15 : vector<1x8x128xf32> to vector<8x128xf32>
    %17 = arith.addf %14, %16 : vector<8x128xf32>
    %18 = vector.extract_strided_slice %13 {offsets = [0, 128], sizes = [8, 128], strides = [1, 1]} : vector<8x256xf32> to vector<8x128xf32>
    %19 = vector.extract_strided_slice %10 {offsets = [12, 0, 128], sizes = [1, 8, 128], strides = [1, 1, 1]} : vector<13x8x256xf32> to vector<1x8x128xf32>
    %20 = vector.shape_cast %19 : vector<1x8x128xf32> to vector<8x128xf32>
    %21 = arith.addf %18, %20 : vector<8x128xf32>
    %22 = vector.extract_strided_slice %17 {offsets = [0, 0], sizes = [8, 96], strides = [1, 1]} : vector<8x128xf32> to vector<8x96xf32>
    %23 = arith.negf %22 : vector<8x96xf32>
    %24 = math.exp %23 : vector<8x96xf32>
    %cst_13 = arith.constant 1.000000e+00 : f32
    %25 = vector.broadcast %cst_13 : f32 to vector<8x96xf32>
    %26 = arith.addf %25, %24 : vector<8x96xf32>
    %27 = arith.divf %25, %26 : vector<8x96xf32>
    %28 = vector.extract_strided_slice %17 {offsets = [0, 96], sizes = [8, 32], strides = [1, 1]} : vector<8x128xf32> to vector<8x32xf32>
    %29 = math.tanh %28 : vector<8x32xf32>
    %30 = vector.extract_strided_slice %27 {offsets = [0, 32], sizes = [8, 32], strides = [1, 1]} : vector<8x96xf32> to vector<8x32xf32>
    %31 = arith.mulf %30, %11 : vector<8x32xf32>
    %32 = vector.extract_strided_slice %27 {offsets = [0, 0], sizes = [8, 32], strides = [1, 1]} : vector<8x96xf32> to vector<8x32xf32>
    %33 = arith.mulf %32, %29 : vector<8x32xf32>
    %34 = arith.addf %31, %33 : vector<8x32xf32>
    %35 = vector.extract_strided_slice %27 {offsets = [0, 64], sizes = [8, 32], strides = [1, 1]} : vector<8x96xf32> to vector<8x32xf32>
    %36 = math.tanh %34 : vector<8x32xf32>
    %37 = arith.mulf %35, %36 : vector<8x32xf32>
    %38 = vector.extract_strided_slice %21 {offsets = [0, 0], sizes = [8, 96], strides = [1, 1]} : vector<8x128xf32> to vector<8x96xf32>
    %39 = arith.negf %38 : vector<8x96xf32>
    %40 = math.exp %39 : vector<8x96xf32>
    %cst_14 = arith.constant 1.000000e+00 : f32
    %41 = vector.broadcast %cst_14 : f32 to vector<8x96xf32>
    %42 = arith.addf %41, %40 : vector<8x96xf32>
    %43 = arith.divf %41, %42 : vector<8x96xf32>
    %44 = vector.extract_strided_slice %21 {offsets = [0, 96], sizes = [8, 32], strides = [1, 1]} : vector<8x128xf32> to vector<8x32xf32>
    %45 = math.tanh %44 : vector<8x32xf32>
    %46 = vector.extract_strided_slice %43 {offsets = [0, 32], sizes = [8, 32], strides = [1, 1]} : vector<8x96xf32> to vector<8x32xf32>
    %47 = arith.mulf %46, %12 : vector<8x32xf32>
    %48 = vector.extract_strided_slice %43 {offsets = [0, 0], sizes = [8, 32], strides = [1, 1]} : vector<8x96xf32> to vector<8x32xf32>
    %49 = arith.mulf %48, %45 : vector<8x32xf32>
    %50 = arith.addf %47, %49 : vector<8x32xf32>
    %51 = vector.extract_strided_slice %43 {offsets = [0, 64], sizes = [8, 32], strides = [1, 1]} : vector<8x96xf32> to vector<8x32xf32>
    %52 = math.tanh %50 : vector<8x32xf32>
    %53 = arith.mulf %51, %52 : vector<8x32xf32>
    %54 = tpu.concatenate %37, %53 in 1 : vector<8x32xf32>, vector<8x32xf32> -> vector<8x64xf32>
    %cst_15 = arith.constant dense<0.000000e+00> : vector<8x256xf32>
    %55 = tpu.matmul %54, %2, %cst_15 {dimension_numbers = #tpu.dot_dimension_numbers<[1], [0], [0], [1], [0, 0, 1, 1], [], []>} : vector<8x64xf32>, vector<64x256xf32>, vector<8x256xf32> -> vector<8x256xf32>
    %56 = vector.extract_strided_slice %55 {offsets = [0, 0], sizes = [8, 128], strides = [1, 1]} : vector<8x256xf32> to vector<8x128xf32>
    %57 = vector.extract_strided_slice %10 {offsets = [1, 0, 0], sizes = [1, 8, 128], strides = [1, 1, 1]} : vector<13x8x256xf32> to vector<1x8x128xf32>
    %58 = vector.shape_cast %57 : vector<1x8x128xf32> to vector<8x128xf32>
    %59 = arith.addf %56, %58 : vector<8x128xf32>
    %60 = vector.extract_strided_slice %55 {offsets = [0, 128], sizes = [8, 128], strides = [1, 1]} : vector<8x256xf32> to vector<8x128xf32>
    %61 = vector.extract_strided_slice %10 {offsets = [11, 0, 128], sizes = [1, 8, 128], strides = [1, 1, 1]} : vector<13x8x256xf32> to vector<1x8x128xf32>
    %62 = vector.shape_cast %61 : vector<1x8x128xf32> to vector<8x128xf32>
    %63 = arith.addf %60, %62 : vector<8x128xf32>
    %64 = vector.extract_strided_slice %59 {offsets = [0, 0], sizes = [8, 96], strides = [1, 1]} : vector<8x128xf32> to vector<8x96xf32>
    %65 = arith.negf %64 : vector<8x96xf32>
    %66 = math.exp %65 : vector<8x96xf32>
    %cst_16 = arith.constant 1.000000e+00 : f32
    %67 = vector.broadcast %cst_16 : f32 to vector<8x96xf32>
    %68 = arith.addf %67, %66 : vector<8x96xf32>
    %69 = arith.divf %67, %68 : vector<8x96xf32>
    %70 = vector.extract_strided_slice %59 {offsets = [0, 96], sizes = [8, 32], strides = [1, 1]} : vector<8x128xf32> to vector<8x32xf32>
    %71 = math.tanh %70 : vector<8x32xf32>
    %72 = vector.extract_strided_slice %69 {offsets = [0, 32], sizes = [8, 32], strides = [1, 1]} : vector<8x96xf32> to vector<8x32xf32>
    %73 = arith.mulf %72, %34 : vector<8x32xf32>
    %74 = vector.extract_strided_slice %69 {offsets = [0, 0], sizes = [8, 32], strides = [1, 1]} : vector<8x96xf32> to vector<8x32xf32>
    %75 = arith.mulf %74, %71 : vector<8x32xf32>
    %76 = arith.addf %73, %75 : vector<8x32xf32>
    %77 = vector.extract_strided_slice %69 {offsets = [0, 64], sizes = [8, 32], strides = [1, 1]} : vector<8x96xf32> to vector<8x32xf32>
    %78 = math.tanh %76 : vector<8x32xf32>
    %79 = arith.mulf %77, %78 : vector<8x32xf32>
    %80 = vector.extract_strided_slice %63 {offsets = [0, 0], sizes = [8, 96], strides = [1, 1]} : vector<8x128xf32> to vector<8x96xf32>
    %81 = arith.negf %80 : vector<8x96xf32>
    %82 = math.exp %81 : vector<8x96xf32>
    %cst_17 = arith.constant 1.000000e+00 : f32
    %83 = vector.broadcast %cst_17 : f32 to vector<8x96xf32>
    %84 = arith.addf %83, %82 : vector<8x96xf32>
    %85 = arith.divf %83, %84 : vector<8x96xf32>
    %86 = vector.extract_strided_slice %63 {offsets = [0, 96], sizes = [8, 32], strides = [1, 1]} : vector<8x128xf32> to vector<8x32xf32>
    %87 = math.tanh %86 : vector<8x32xf32>
    %88 = vector.extract_strided_slice %85 {offsets = [0, 32], sizes = [8, 32], strides = [1, 1]} : vector<8x96xf32> to vector<8x32xf32>
    %89 = arith.mulf %88, %50 : vector<8x32xf32>
    %90 = vector.extract_strided_slice %85 {offsets = [0, 0], sizes = [8, 32], strides = [1, 1]} : vector<8x96xf32> to vector<8x32xf32>
    %91 = arith.mulf %90, %87 : vector<8x32xf32>
    %92 = arith.addf %89, %91 : vector<8x32xf32>
    %93 = vector.extract_strided_slice %85 {offsets = [0, 64], sizes = [8, 32], strides = [1, 1]} : vector<8x96xf32> to vector<8x32xf32>
    %94 = math.tanh %92 : vector<8x32xf32>
    %95 = arith.mulf %93, %94 : vector<8x32xf32>
    %96 = tpu.concatenate %79, %95 in 1 : vector<8x32xf32>, vector<8x32xf32> -> vector<8x64xf32>
    %cst_18 = arith.constant dense<0.000000e+00> : vector<8x256xf32>
    %97 = tpu.matmul %96, %2, %cst_18 {dimension_numbers = #tpu.dot_dimension_numbers<[1], [0], [0], [1], [0, 0, 1, 1], [], []>} : vector<8x64xf32>, vector<64x256xf32>, vector<8x256xf32> -> vector<8x256xf32>
    %98 = vector.extract_strided_slice %97 {offsets = [0, 0], sizes = [8, 128], strides = [1, 1]} : vector<8x256xf32> to vector<8x128xf32>
    %99 = vector.extract_strided_slice %10 {offsets = [2, 0, 0], sizes = [1, 8, 128], strides = [1, 1, 1]} : vector<13x8x256xf32> to vector<1x8x128xf32>
    %100 = vector.shape_cast %99 : vector<1x8x128xf32> to vector<8x128xf32>
    %101 = arith.addf %98, %100 : vector<8x128xf32>
    %102 = vector.extract_strided_slice %97 {offsets = [0, 128], sizes = [8, 128], strides = [1, 1]} : vector<8x256xf32> to vector<8x128xf32>
    %103 = vector.extract_strided_slice %10 {offsets = [10, 0, 128], sizes = [1, 8, 128], strides = [1, 1, 1]} : vector<13x8x256xf32> to vector<1x8x128xf32>
    %104 = vector.shape_cast %103 : vector<1x8x128xf32> to vector<8x128xf32>
    %105 = arith.addf %102, %104 : vector<8x128xf32>
    %106 = vector.extract_strided_slice %101 {offsets = [0, 0], sizes = [8, 96], strides = [1, 1]} : vector<8x128xf32> to vector<8x96xf32>
    %107 = arith.negf %106 : vector<8x96xf32>
    %108 = math.exp %107 : vector<8x96xf32>
    %cst_19 = arith.constant 1.000000e+00 : f32
    %109 = vector.broadcast %cst_19 : f32 to vector<8x96xf32>
    %110 = arith.addf %109, %108 : vector<8x96xf32>
    %111 = arith.divf %109, %110 : vector<8x96xf32>
    %112 = vector.extract_strided_slice %101 {offsets = [0, 96], sizes = [8, 32], strides = [1, 1]} : vector<8x128xf32> to vector<8x32xf32>
    %113 = math.tanh %112 : vector<8x32xf32>
    %114 = vector.extract_strided_slice %111 {offsets = [0, 32], sizes = [8, 32], strides = [1, 1]} : vector<8x96xf32> to vector<8x32xf32>
    %115 = arith.mulf %114, %76 : vector<8x32xf32>
    %116 = vector.extract_strided_slice %111 {offsets = [0, 0], sizes = [8, 32], strides = [1, 1]} : vector<8x96xf32> to vector<8x32xf32>
    %117 = arith.mulf %116, %113 : vector<8x32xf32>
    %118 = arith.addf %115, %117 : vector<8x32xf32>
    %119 = vector.extract_strided_slice %111 {offsets = [0, 64], sizes = [8, 32], strides = [1, 1]} : vector<8x96xf32> to vector<8x32xf32>
    %120 = math.tanh %118 : vector<8x32xf32>
    %121 = arith.mulf %119, %120 : vector<8x32xf32>
    %122 = vector.extract_strided_slice %105 {offsets = [0, 0], sizes = [8, 96], strides = [1, 1]} : vector<8x128xf32> to vector<8x96xf32>
    %123 = arith.negf %122 : vector<8x96xf32>
    %124 = math.exp %123 : vector<8x96xf32>
    %cst_20 = arith.constant 1.000000e+00 : f32
    %125 = vector.broadcast %cst_20 : f32 to vector<8x96xf32>
    %126 = arith.addf %125, %124 : vector<8x96xf32>
    %127 = arith.divf %125, %126 : vector<8x96xf32>
    %128 = vector.extract_strided_slice %105 {offsets = [0, 96], sizes = [8, 32], strides = [1, 1]} : vector<8x128xf32> to vector<8x32xf32>
    %129 = math.tanh %128 : vector<8x32xf32>
    %130 = vector.extract_strided_slice %127 {offsets = [0, 32], sizes = [8, 32], strides = [1, 1]} : vector<8x96xf32> to vector<8x32xf32>
    %131 = arith.mulf %130, %92 : vector<8x32xf32>
    %132 = vector.extract_strided_slice %127 {offsets = [0, 0], sizes = [8, 32], strides = [1, 1]} : vector<8x96xf32> to vector<8x32xf32>
    %133 = arith.mulf %132, %129 : vector<8x32xf32>
    %134 = arith.addf %131, %133 : vector<8x32xf32>
    %135 = vector.extract_strided_slice %127 {offsets = [0, 64], sizes = [8, 32], strides = [1, 1]} : vector<8x96xf32> to vector<8x32xf32>
    %136 = math.tanh %134 : vector<8x32xf32>
    %137 = arith.mulf %135, %136 : vector<8x32xf32>
    %138 = tpu.concatenate %121, %137 in 1 : vector<8x32xf32>, vector<8x32xf32> -> vector<8x64xf32>
    %cst_21 = arith.constant dense<0.000000e+00> : vector<8x256xf32>
    %139 = tpu.matmul %138, %2, %cst_21 {dimension_numbers = #tpu.dot_dimension_numbers<[1], [0], [0], [1], [0, 0, 1, 1], [], []>} : vector<8x64xf32>, vector<64x256xf32>, vector<8x256xf32> -> vector<8x256xf32>
    %140 = vector.extract_strided_slice %139 {offsets = [0, 0], sizes = [8, 128], strides = [1, 1]} : vector<8x256xf32> to vector<8x128xf32>
    %141 = vector.extract_strided_slice %10 {offsets = [3, 0, 0], sizes = [1, 8, 128], strides = [1, 1, 1]} : vector<13x8x256xf32> to vector<1x8x128xf32>
    %142 = vector.shape_cast %141 : vector<1x8x128xf32> to vector<8x128xf32>
    %143 = arith.addf %140, %142 : vector<8x128xf32>
    %144 = vector.extract_strided_slice %139 {offsets = [0, 128], sizes = [8, 128], strides = [1, 1]} : vector<8x256xf32> to vector<8x128xf32>
    %145 = vector.extract_strided_slice %10 {offsets = [9, 0, 128], sizes = [1, 8, 128], strides = [1, 1, 1]} : vector<13x8x256xf32> to vector<1x8x128xf32>
    %146 = vector.shape_cast %145 : vector<1x8x128xf32> to vector<8x128xf32>
    %147 = arith.addf %144, %146 : vector<8x128xf32>
    %148 = vector.extract_strided_slice %143 {offsets = [0, 0], sizes = [8, 96], strides = [1, 1]} : vector<8x128xf32> to vector<8x96xf32>
    %149 = arith.negf %148 : vector<8x96xf32>
    %150 = math.exp %149 : vector<8x96xf32>
    %cst_22 = arith.constant 1.000000e+00 : f32
    %151 = vector.broadcast %cst_22 : f32 to vector<8x96xf32>
    %152 = arith.addf %151, %150 : vector<8x96xf32>
    %153 = arith.divf %151, %152 : vector<8x96xf32>
    %154 = vector.extract_strided_slice %143 {offsets = [0, 96], sizes = [8, 32], strides = [1, 1]} : vector<8x128xf32> to vector<8x32xf32>
    %155 = math.tanh %154 : vector<8x32xf32>
    %156 = vector.extract_strided_slice %153 {offsets = [0, 32], sizes = [8, 32], strides = [1, 1]} : vector<8x96xf32> to vector<8x32xf32>
    %157 = arith.mulf %156, %118 : vector<8x32xf32>
    %158 = vector.extract_strided_slice %153 {offsets = [0, 0], sizes = [8, 32], strides = [1, 1]} : vector<8x96xf32> to vector<8x32xf32>
    %159 = arith.mulf %158, %155 : vector<8x32xf32>
    %160 = arith.addf %157, %159 : vector<8x32xf32>
    %161 = vector.extract_strided_slice %153 {offsets = [0, 64], sizes = [8, 32], strides = [1, 1]} : vector<8x96xf32> to vector<8x32xf32>
    %162 = math.tanh %160 : vector<8x32xf32>
    %163 = arith.mulf %161, %162 : vector<8x32xf32>
    %164 = vector.extract_strided_slice %147 {offsets = [0, 0], sizes = [8, 96], strides = [1, 1]} : vector<8x128xf32> to vector<8x96xf32>
    %165 = arith.negf %164 : vector<8x96xf32>
    %166 = math.exp %165 : vector<8x96xf32>
    %cst_23 = arith.constant 1.000000e+00 : f32
    %167 = vector.broadcast %cst_23 : f32 to vector<8x96xf32>
    %168 = arith.addf %167, %166 : vector<8x96xf32>
    %169 = arith.divf %167, %168 : vector<8x96xf32>
    %170 = vector.extract_strided_slice %147 {offsets = [0, 96], sizes = [8, 32], strides = [1, 1]} : vector<8x128xf32> to vector<8x32xf32>
    %171 = math.tanh %170 : vector<8x32xf32>
    %172 = vector.extract_strided_slice %169 {offsets = [0, 32], sizes = [8, 32], strides = [1, 1]} : vector<8x96xf32> to vector<8x32xf32>
    %173 = arith.mulf %172, %134 : vector<8x32xf32>
    %174 = vector.extract_strided_slice %169 {offsets = [0, 0], sizes = [8, 32], strides = [1, 1]} : vector<8x96xf32> to vector<8x32xf32>
    %175 = arith.mulf %174, %171 : vector<8x32xf32>
    %176 = arith.addf %173, %175 : vector<8x32xf32>
    %177 = vector.extract_strided_slice %169 {offsets = [0, 64], sizes = [8, 32], strides = [1, 1]} : vector<8x96xf32> to vector<8x32xf32>
    %178 = math.tanh %176 : vector<8x32xf32>
    %179 = arith.mulf %177, %178 : vector<8x32xf32>
    %180 = tpu.concatenate %163, %179 in 1 : vector<8x32xf32>, vector<8x32xf32> -> vector<8x64xf32>
    %cst_24 = arith.constant dense<0.000000e+00> : vector<8x256xf32>
    %181 = tpu.matmul %180, %2, %cst_24 {dimension_numbers = #tpu.dot_dimension_numbers<[1], [0], [0], [1], [0, 0, 1, 1], [], []>} : vector<8x64xf32>, vector<64x256xf32>, vector<8x256xf32> -> vector<8x256xf32>
    %182 = vector.extract_strided_slice %181 {offsets = [0, 0], sizes = [8, 128], strides = [1, 1]} : vector<8x256xf32> to vector<8x128xf32>
    %183 = vector.extract_strided_slice %10 {offsets = [4, 0, 0], sizes = [1, 8, 128], strides = [1, 1, 1]} : vector<13x8x256xf32> to vector<1x8x128xf32>
    %184 = vector.shape_cast %183 : vector<1x8x128xf32> to vector<8x128xf32>
    %185 = arith.addf %182, %184 : vector<8x128xf32>
    %186 = vector.extract_strided_slice %181 {offsets = [0, 128], sizes = [8, 128], strides = [1, 1]} : vector<8x256xf32> to vector<8x128xf32>
    %187 = vector.extract_strided_slice %10 {offsets = [8, 0, 128], sizes = [1, 8, 128], strides = [1, 1, 1]} : vector<13x8x256xf32> to vector<1x8x128xf32>
    %188 = vector.shape_cast %187 : vector<1x8x128xf32> to vector<8x128xf32>
    %189 = arith.addf %186, %188 : vector<8x128xf32>
    %190 = vector.extract_strided_slice %185 {offsets = [0, 0], sizes = [8, 96], strides = [1, 1]} : vector<8x128xf32> to vector<8x96xf32>
    %191 = arith.negf %190 : vector<8x96xf32>
    %192 = math.exp %191 : vector<8x96xf32>
    %cst_25 = arith.constant 1.000000e+00 : f32
    %193 = vector.broadcast %cst_25 : f32 to vector<8x96xf32>
    %194 = arith.addf %193, %192 : vector<8x96xf32>
    %195 = arith.divf %193, %194 : vector<8x96xf32>
    %196 = vector.extract_strided_slice %185 {offsets = [0, 96], sizes = [8, 32], strides = [1, 1]} : vector<8x128xf32> to vector<8x32xf32>
    %197 = math.tanh %196 : vector<8x32xf32>
    %198 = vector.extract_strided_slice %195 {offsets = [0, 32], sizes = [8, 32], strides = [1, 1]} : vector<8x96xf32> to vector<8x32xf32>
    %199 = arith.mulf %198, %160 : vector<8x32xf32>
    %200 = vector.extract_strided_slice %195 {offsets = [0, 0], sizes = [8, 32], strides = [1, 1]} : vector<8x96xf32> to vector<8x32xf32>
    %201 = arith.mulf %200, %197 : vector<8x32xf32>
    %202 = arith.addf %199, %201 : vector<8x32xf32>
    %203 = vector.extract_strided_slice %195 {offsets = [0, 64], sizes = [8, 32], strides = [1, 1]} : vector<8x96xf32> to vector<8x32xf32>
    %204 = math.tanh %202 : vector<8x32xf32>
    %205 = arith.mulf %203, %204 : vector<8x32xf32>
    %206 = vector.extract_strided_slice %189 {offsets = [0, 0], sizes = [8, 96], strides = [1, 1]} : vector<8x128xf32> to vector<8x96xf32>
    %207 = arith.negf %206 : vector<8x96xf32>
    %208 = math.exp %207 : vector<8x96xf32>
    %cst_26 = arith.constant 1.000000e+00 : f32
    %209 = vector.broadcast %cst_26 : f32 to vector<8x96xf32>
    %210 = arith.addf %209, %208 : vector<8x96xf32>
    %211 = arith.divf %209, %210 : vector<8x96xf32>
    %212 = vector.extract_strided_slice %189 {offsets = [0, 96], sizes = [8, 32], strides = [1, 1]} : vector<8x128xf32> to vector<8x32xf32>
    %213 = math.tanh %212 : vector<8x32xf32>
    %214 = vector.extract_strided_slice %211 {offsets = [0, 32], sizes = [8, 32], strides = [1, 1]} : vector<8x96xf32> to vector<8x32xf32>
    %215 = arith.mulf %214, %176 : vector<8x32xf32>
    %216 = vector.extract_strided_slice %211 {offsets = [0, 0], sizes = [8, 32], strides = [1, 1]} : vector<8x96xf32> to vector<8x32xf32>
    %217 = arith.mulf %216, %213 : vector<8x32xf32>
    %218 = arith.addf %215, %217 : vector<8x32xf32>
    %219 = vector.extract_strided_slice %211 {offsets = [0, 64], sizes = [8, 32], strides = [1, 1]} : vector<8x96xf32> to vector<8x32xf32>
    %220 = math.tanh %218 : vector<8x32xf32>
    %221 = arith.mulf %219, %220 : vector<8x32xf32>
    %222 = tpu.concatenate %205, %221 in 1 : vector<8x32xf32>, vector<8x32xf32> -> vector<8x64xf32>
    %cst_27 = arith.constant dense<0.000000e+00> : vector<8x256xf32>
    %223 = tpu.matmul %222, %2, %cst_27 {dimension_numbers = #tpu.dot_dimension_numbers<[1], [0], [0], [1], [0, 0, 1, 1], [], []>} : vector<8x64xf32>, vector<64x256xf32>, vector<8x256xf32> -> vector<8x256xf32>
    %224 = vector.extract_strided_slice %223 {offsets = [0, 0], sizes = [8, 128], strides = [1, 1]} : vector<8x256xf32> to vector<8x128xf32>
    %225 = vector.extract_strided_slice %10 {offsets = [5, 0, 0], sizes = [1, 8, 128], strides = [1, 1, 1]} : vector<13x8x256xf32> to vector<1x8x128xf32>
    %226 = vector.shape_cast %225 : vector<1x8x128xf32> to vector<8x128xf32>
    %227 = arith.addf %224, %226 : vector<8x128xf32>
    %228 = vector.extract_strided_slice %223 {offsets = [0, 128], sizes = [8, 128], strides = [1, 1]} : vector<8x256xf32> to vector<8x128xf32>
    %229 = vector.extract_strided_slice %10 {offsets = [7, 0, 128], sizes = [1, 8, 128], strides = [1, 1, 1]} : vector<13x8x256xf32> to vector<1x8x128xf32>
    %230 = vector.shape_cast %229 : vector<1x8x128xf32> to vector<8x128xf32>
    %231 = arith.addf %228, %230 : vector<8x128xf32>
    %232 = vector.extract_strided_slice %227 {offsets = [0, 0], sizes = [8, 96], strides = [1, 1]} : vector<8x128xf32> to vector<8x96xf32>
    %233 = arith.negf %232 : vector<8x96xf32>
    %234 = math.exp %233 : vector<8x96xf32>
    %cst_28 = arith.constant 1.000000e+00 : f32
    %235 = vector.broadcast %cst_28 : f32 to vector<8x96xf32>
    %236 = arith.addf %235, %234 : vector<8x96xf32>
    %237 = arith.divf %235, %236 : vector<8x96xf32>
    %238 = vector.extract_strided_slice %227 {offsets = [0, 96], sizes = [8, 32], strides = [1, 1]} : vector<8x128xf32> to vector<8x32xf32>
    %239 = math.tanh %238 : vector<8x32xf32>
    %240 = vector.extract_strided_slice %237 {offsets = [0, 32], sizes = [8, 32], strides = [1, 1]} : vector<8x96xf32> to vector<8x32xf32>
    %241 = arith.mulf %240, %202 : vector<8x32xf32>
    %242 = vector.extract_strided_slice %237 {offsets = [0, 0], sizes = [8, 32], strides = [1, 1]} : vector<8x96xf32> to vector<8x32xf32>
    %243 = arith.mulf %242, %239 : vector<8x32xf32>
    %244 = arith.addf %241, %243 : vector<8x32xf32>
    %245 = vector.extract_strided_slice %237 {offsets = [0, 64], sizes = [8, 32], strides = [1, 1]} : vector<8x96xf32> to vector<8x32xf32>
    %246 = math.tanh %244 : vector<8x32xf32>
    %247 = arith.mulf %245, %246 : vector<8x32xf32>
    %248 = vector.extract_strided_slice %231 {offsets = [0, 0], sizes = [8, 96], strides = [1, 1]} : vector<8x128xf32> to vector<8x96xf32>
    %249 = arith.negf %248 : vector<8x96xf32>
    %250 = math.exp %249 : vector<8x96xf32>
    %cst_29 = arith.constant 1.000000e+00 : f32
    %251 = vector.broadcast %cst_29 : f32 to vector<8x96xf32>
    %252 = arith.addf %251, %250 : vector<8x96xf32>
    %253 = arith.divf %251, %252 : vector<8x96xf32>
    %254 = vector.extract_strided_slice %231 {offsets = [0, 96], sizes = [8, 32], strides = [1, 1]} : vector<8x128xf32> to vector<8x32xf32>
    %255 = math.tanh %254 : vector<8x32xf32>
    %256 = vector.extract_strided_slice %253 {offsets = [0, 32], sizes = [8, 32], strides = [1, 1]} : vector<8x96xf32> to vector<8x32xf32>
    %257 = arith.mulf %256, %218 : vector<8x32xf32>
    %258 = vector.extract_strided_slice %253 {offsets = [0, 0], sizes = [8, 32], strides = [1, 1]} : vector<8x96xf32> to vector<8x32xf32>
    %259 = arith.mulf %258, %255 : vector<8x32xf32>
    %260 = arith.addf %257, %259 : vector<8x32xf32>
    %261 = vector.extract_strided_slice %253 {offsets = [0, 64], sizes = [8, 32], strides = [1, 1]} : vector<8x96xf32> to vector<8x32xf32>
    %262 = math.tanh %260 : vector<8x32xf32>
    %263 = arith.mulf %261, %262 : vector<8x32xf32>
    %264 = tpu.concatenate %247, %263 in 1 : vector<8x32xf32>, vector<8x32xf32> -> vector<8x64xf32>
    %cst_30 = arith.constant dense<0.000000e+00> : vector<8x256xf32>
    %265 = tpu.matmul %264, %2, %cst_30 {dimension_numbers = #tpu.dot_dimension_numbers<[1], [0], [0], [1], [0, 0, 1, 1], [], []>} : vector<8x64xf32>, vector<64x256xf32>, vector<8x256xf32> -> vector<8x256xf32>
    %266 = vector.extract_strided_slice %265 {offsets = [0, 0], sizes = [8, 128], strides = [1, 1]} : vector<8x256xf32> to vector<8x128xf32>
    %267 = vector.extract_strided_slice %10 {offsets = [6, 0, 0], sizes = [1, 8, 128], strides = [1, 1, 1]} : vector<13x8x256xf32> to vector<1x8x128xf32>
    %268 = vector.shape_cast %267 : vector<1x8x128xf32> to vector<8x128xf32>
    %269 = arith.addf %266, %268 : vector<8x128xf32>
    %270 = vector.extract_strided_slice %265 {offsets = [0, 128], sizes = [8, 128], strides = [1, 1]} : vector<8x256xf32> to vector<8x128xf32>
    %271 = vector.extract_strided_slice %10 {offsets = [6, 0, 128], sizes = [1, 8, 128], strides = [1, 1, 1]} : vector<13x8x256xf32> to vector<1x8x128xf32>
    %272 = vector.shape_cast %271 : vector<1x8x128xf32> to vector<8x128xf32>
    %273 = arith.addf %270, %272 : vector<8x128xf32>
    %274 = vector.extract_strided_slice %269 {offsets = [0, 0], sizes = [8, 96], strides = [1, 1]} : vector<8x128xf32> to vector<8x96xf32>
    %275 = arith.negf %274 : vector<8x96xf32>
    %276 = math.exp %275 : vector<8x96xf32>
    %cst_31 = arith.constant 1.000000e+00 : f32
    %277 = vector.broadcast %cst_31 : f32 to vector<8x96xf32>
    %278 = arith.addf %277, %276 : vector<8x96xf32>
    %279 = arith.divf %277, %278 : vector<8x96xf32>
    %280 = vector.extract_strided_slice %269 {offsets = [0, 96], sizes = [8, 32], strides = [1, 1]} : vector<8x128xf32> to vector<8x32xf32>
    %281 = math.tanh %280 : vector<8x32xf32>
    %282 = vector.extract_strided_slice %279 {offsets = [0, 32], sizes = [8, 32], strides = [1, 1]} : vector<8x96xf32> to vector<8x32xf32>
    %283 = arith.mulf %282, %244 : vector<8x32xf32>
    %284 = vector.extract_strided_slice %279 {offsets = [0, 0], sizes = [8, 32], strides = [1, 1]} : vector<8x96xf32> to vector<8x32xf32>
    %285 = arith.mulf %284, %281 : vector<8x32xf32>
    %286 = arith.addf %283, %285 : vector<8x32xf32>
    %287 = vector.extract_strided_slice %279 {offsets = [0, 64], sizes = [8, 32], strides = [1, 1]} : vector<8x96xf32> to vector<8x32xf32>
    %288 = math.tanh %286 : vector<8x32xf32>
    %289 = arith.mulf %287, %288 : vector<8x32xf32>
    %290 = vector.extract_strided_slice %273 {offsets = [0, 0], sizes = [8, 96], strides = [1, 1]} : vector<8x128xf32> to vector<8x96xf32>
    %291 = arith.negf %290 : vector<8x96xf32>
    %292 = math.exp %291 : vector<8x96xf32>
    %cst_32 = arith.constant 1.000000e+00 : f32
    %293 = vector.broadcast %cst_32 : f32 to vector<8x96xf32>
    %294 = arith.addf %293, %292 : vector<8x96xf32>
    %295 = arith.divf %293, %294 : vector<8x96xf32>
    %296 = vector.extract_strided_slice %273 {offsets = [0, 96], sizes = [8, 32], strides = [1, 1]} : vector<8x128xf32> to vector<8x32xf32>
    %297 = math.tanh %296 : vector<8x32xf32>
    %298 = vector.extract_strided_slice %295 {offsets = [0, 32], sizes = [8, 32], strides = [1, 1]} : vector<8x96xf32> to vector<8x32xf32>
    %299 = arith.mulf %298, %260 : vector<8x32xf32>
    %300 = vector.extract_strided_slice %295 {offsets = [0, 0], sizes = [8, 32], strides = [1, 1]} : vector<8x96xf32> to vector<8x32xf32>
    %301 = arith.mulf %300, %297 : vector<8x32xf32>
    %302 = arith.addf %299, %301 : vector<8x32xf32>
    %303 = vector.extract_strided_slice %295 {offsets = [0, 64], sizes = [8, 32], strides = [1, 1]} : vector<8x96xf32> to vector<8x32xf32>
    %304 = math.tanh %302 : vector<8x32xf32>
    %305 = arith.mulf %303, %304 : vector<8x32xf32>
    %306 = tpu.concatenate %289, %305 in 1 : vector<8x32xf32>, vector<8x32xf32> -> vector<8x64xf32>
    %cst_33 = arith.constant dense<0.000000e+00> : vector<8x256xf32>
    %307 = tpu.matmul %306, %2, %cst_33 {dimension_numbers = #tpu.dot_dimension_numbers<[1], [0], [0], [1], [0, 0, 1, 1], [], []>} : vector<8x64xf32>, vector<64x256xf32>, vector<8x256xf32> -> vector<8x256xf32>
    %308 = vector.extract_strided_slice %307 {offsets = [0, 0], sizes = [8, 128], strides = [1, 1]} : vector<8x256xf32> to vector<8x128xf32>
    %309 = vector.extract_strided_slice %10 {offsets = [7, 0, 0], sizes = [1, 8, 128], strides = [1, 1, 1]} : vector<13x8x256xf32> to vector<1x8x128xf32>
    %310 = vector.shape_cast %309 : vector<1x8x128xf32> to vector<8x128xf32>
    %311 = arith.addf %308, %310 : vector<8x128xf32>
    %312 = vector.extract_strided_slice %307 {offsets = [0, 128], sizes = [8, 128], strides = [1, 1]} : vector<8x256xf32> to vector<8x128xf32>
    %313 = vector.extract_strided_slice %10 {offsets = [5, 0, 128], sizes = [1, 8, 128], strides = [1, 1, 1]} : vector<13x8x256xf32> to vector<1x8x128xf32>
    %314 = vector.shape_cast %313 : vector<1x8x128xf32> to vector<8x128xf32>
    %315 = arith.addf %312, %314 : vector<8x128xf32>
    %316 = vector.extract_strided_slice %311 {offsets = [0, 0], sizes = [8, 96], strides = [1, 1]} : vector<8x128xf32> to vector<8x96xf32>
    %317 = arith.negf %316 : vector<8x96xf32>
    %318 = math.exp %317 : vector<8x96xf32>
    %cst_34 = arith.constant 1.000000e+00 : f32
    %319 = vector.broadcast %cst_34 : f32 to vector<8x96xf32>
    %320 = arith.addf %319, %318 : vector<8x96xf32>
    %321 = arith.divf %319, %320 : vector<8x96xf32>
    %322 = vector.extract_strided_slice %311 {offsets = [0, 96], sizes = [8, 32], strides = [1, 1]} : vector<8x128xf32> to vector<8x32xf32>
    %323 = math.tanh %322 : vector<8x32xf32>
    %324 = vector.extract_strided_slice %321 {offsets = [0, 32], sizes = [8, 32], strides = [1, 1]} : vector<8x96xf32> to vector<8x32xf32>
    %325 = arith.mulf %324, %286 : vector<8x32xf32>
    %326 = vector.extract_strided_slice %321 {offsets = [0, 0], sizes = [8, 32], strides = [1, 1]} : vector<8x96xf32> to vector<8x32xf32>
    %327 = arith.mulf %326, %323 : vector<8x32xf32>
    %328 = arith.addf %325, %327 : vector<8x32xf32>
    %329 = vector.extract_strided_slice %321 {offsets = [0, 64], sizes = [8, 32], strides = [1, 1]} : vector<8x96xf32> to vector<8x32xf32>
    %330 = math.tanh %328 : vector<8x32xf32>
    %331 = arith.mulf %329, %330 : vector<8x32xf32>
    %332 = vector.extract_strided_slice %315 {offsets = [0, 0], sizes = [8, 96], strides = [1, 1]} : vector<8x128xf32> to vector<8x96xf32>
    %333 = arith.negf %332 : vector<8x96xf32>
    %334 = math.exp %333 : vector<8x96xf32>
    %cst_35 = arith.constant 1.000000e+00 : f32
    %335 = vector.broadcast %cst_35 : f32 to vector<8x96xf32>
    %336 = arith.addf %335, %334 : vector<8x96xf32>
    %337 = arith.divf %335, %336 : vector<8x96xf32>
    %338 = vector.extract_strided_slice %315 {offsets = [0, 96], sizes = [8, 32], strides = [1, 1]} : vector<8x128xf32> to vector<8x32xf32>
    %339 = math.tanh %338 : vector<8x32xf32>
    %340 = vector.extract_strided_slice %337 {offsets = [0, 32], sizes = [8, 32], strides = [1, 1]} : vector<8x96xf32> to vector<8x32xf32>
    %341 = arith.mulf %340, %302 : vector<8x32xf32>
    %342 = vector.extract_strided_slice %337 {offsets = [0, 0], sizes = [8, 32], strides = [1, 1]} : vector<8x96xf32> to vector<8x32xf32>
    %343 = arith.mulf %342, %339 : vector<8x32xf32>
    %344 = arith.addf %341, %343 : vector<8x32xf32>
    %345 = vector.extract_strided_slice %337 {offsets = [0, 64], sizes = [8, 32], strides = [1, 1]} : vector<8x96xf32> to vector<8x32xf32>
    %346 = math.tanh %344 : vector<8x32xf32>
    %347 = arith.mulf %345, %346 : vector<8x32xf32>
    %348 = tpu.concatenate %331, %347 in 1 : vector<8x32xf32>, vector<8x32xf32> -> vector<8x64xf32>
    %cst_36 = arith.constant dense<0.000000e+00> : vector<8x256xf32>
    %349 = tpu.matmul %348, %2, %cst_36 {dimension_numbers = #tpu.dot_dimension_numbers<[1], [0], [0], [1], [0, 0, 1, 1], [], []>} : vector<8x64xf32>, vector<64x256xf32>, vector<8x256xf32> -> vector<8x256xf32>
    %350 = vector.extract_strided_slice %349 {offsets = [0, 0], sizes = [8, 128], strides = [1, 1]} : vector<8x256xf32> to vector<8x128xf32>
    %351 = vector.extract_strided_slice %10 {offsets = [8, 0, 0], sizes = [1, 8, 128], strides = [1, 1, 1]} : vector<13x8x256xf32> to vector<1x8x128xf32>
    %352 = vector.shape_cast %351 : vector<1x8x128xf32> to vector<8x128xf32>
    %353 = arith.addf %350, %352 : vector<8x128xf32>
    %354 = vector.extract_strided_slice %349 {offsets = [0, 128], sizes = [8, 128], strides = [1, 1]} : vector<8x256xf32> to vector<8x128xf32>
    %355 = vector.extract_strided_slice %10 {offsets = [4, 0, 128], sizes = [1, 8, 128], strides = [1, 1, 1]} : vector<13x8x256xf32> to vector<1x8x128xf32>
    %356 = vector.shape_cast %355 : vector<1x8x128xf32> to vector<8x128xf32>
    %357 = arith.addf %354, %356 : vector<8x128xf32>
    %358 = vector.extract_strided_slice %353 {offsets = [0, 0], sizes = [8, 96], strides = [1, 1]} : vector<8x128xf32> to vector<8x96xf32>
    %359 = arith.negf %358 : vector<8x96xf32>
    %360 = math.exp %359 : vector<8x96xf32>
    %cst_37 = arith.constant 1.000000e+00 : f32
    %361 = vector.broadcast %cst_37 : f32 to vector<8x96xf32>
    %362 = arith.addf %361, %360 : vector<8x96xf32>
    %363 = arith.divf %361, %362 : vector<8x96xf32>
    %364 = vector.extract_strided_slice %353 {offsets = [0, 96], sizes = [8, 32], strides = [1, 1]} : vector<8x128xf32> to vector<8x32xf32>
    %365 = math.tanh %364 : vector<8x32xf32>
    %366 = vector.extract_strided_slice %363 {offsets = [0, 32], sizes = [8, 32], strides = [1, 1]} : vector<8x96xf32> to vector<8x32xf32>
    %367 = arith.mulf %366, %328 : vector<8x32xf32>
    %368 = vector.extract_strided_slice %363 {offsets = [0, 0], sizes = [8, 32], strides = [1, 1]} : vector<8x96xf32> to vector<8x32xf32>
    %369 = arith.mulf %368, %365 : vector<8x32xf32>
    %370 = arith.addf %367, %369 : vector<8x32xf32>
    %371 = vector.extract_strided_slice %363 {offsets = [0, 64], sizes = [8, 32], strides = [1, 1]} : vector<8x96xf32> to vector<8x32xf32>
    %372 = math.tanh %370 : vector<8x32xf32>
    %373 = arith.mulf %371, %372 : vector<8x32xf32>
    %374 = vector.extract_strided_slice %357 {offsets = [0, 0], sizes = [8, 96], strides = [1, 1]} : vector<8x128xf32> to vector<8x96xf32>
    %375 = arith.negf %374 : vector<8x96xf32>
    %376 = math.exp %375 : vector<8x96xf32>
    %cst_38 = arith.constant 1.000000e+00 : f32
    %377 = vector.broadcast %cst_38 : f32 to vector<8x96xf32>
    %378 = arith.addf %377, %376 : vector<8x96xf32>
    %379 = arith.divf %377, %378 : vector<8x96xf32>
    %380 = vector.extract_strided_slice %357 {offsets = [0, 96], sizes = [8, 32], strides = [1, 1]} : vector<8x128xf32> to vector<8x32xf32>
    %381 = math.tanh %380 : vector<8x32xf32>
    %382 = vector.extract_strided_slice %379 {offsets = [0, 32], sizes = [8, 32], strides = [1, 1]} : vector<8x96xf32> to vector<8x32xf32>
    %383 = arith.mulf %382, %344 : vector<8x32xf32>
    %384 = vector.extract_strided_slice %379 {offsets = [0, 0], sizes = [8, 32], strides = [1, 1]} : vector<8x96xf32> to vector<8x32xf32>
    %385 = arith.mulf %384, %381 : vector<8x32xf32>
    %386 = arith.addf %383, %385 : vector<8x32xf32>
    %387 = vector.extract_strided_slice %379 {offsets = [0, 64], sizes = [8, 32], strides = [1, 1]} : vector<8x96xf32> to vector<8x32xf32>
    %388 = math.tanh %386 : vector<8x32xf32>
    %389 = arith.mulf %387, %388 : vector<8x32xf32>
    %390 = tpu.concatenate %373, %389 in 1 : vector<8x32xf32>, vector<8x32xf32> -> vector<8x64xf32>
    %cst_39 = arith.constant dense<0.000000e+00> : vector<8x256xf32>
    %391 = tpu.matmul %390, %2, %cst_39 {dimension_numbers = #tpu.dot_dimension_numbers<[1], [0], [0], [1], [0, 0, 1, 1], [], []>} : vector<8x64xf32>, vector<64x256xf32>, vector<8x256xf32> -> vector<8x256xf32>
    %392 = vector.extract_strided_slice %391 {offsets = [0, 0], sizes = [8, 128], strides = [1, 1]} : vector<8x256xf32> to vector<8x128xf32>
    %393 = vector.extract_strided_slice %10 {offsets = [9, 0, 0], sizes = [1, 8, 128], strides = [1, 1, 1]} : vector<13x8x256xf32> to vector<1x8x128xf32>
    %394 = vector.shape_cast %393 : vector<1x8x128xf32> to vector<8x128xf32>
    %395 = arith.addf %392, %394 : vector<8x128xf32>
    %396 = vector.extract_strided_slice %391 {offsets = [0, 128], sizes = [8, 128], strides = [1, 1]} : vector<8x256xf32> to vector<8x128xf32>
    %397 = vector.extract_strided_slice %10 {offsets = [3, 0, 128], sizes = [1, 8, 128], strides = [1, 1, 1]} : vector<13x8x256xf32> to vector<1x8x128xf32>
    %398 = vector.shape_cast %397 : vector<1x8x128xf32> to vector<8x128xf32>
    %399 = arith.addf %396, %398 : vector<8x128xf32>
    %400 = vector.extract_strided_slice %395 {offsets = [0, 0], sizes = [8, 96], strides = [1, 1]} : vector<8x128xf32> to vector<8x96xf32>
    %401 = arith.negf %400 : vector<8x96xf32>
    %402 = math.exp %401 : vector<8x96xf32>
    %cst_40 = arith.constant 1.000000e+00 : f32
    %403 = vector.broadcast %cst_40 : f32 to vector<8x96xf32>
    %404 = arith.addf %403, %402 : vector<8x96xf32>
    %405 = arith.divf %403, %404 : vector<8x96xf32>
    %406 = vector.extract_strided_slice %395 {offsets = [0, 96], sizes = [8, 32], strides = [1, 1]} : vector<8x128xf32> to vector<8x32xf32>
    %407 = math.tanh %406 : vector<8x32xf32>
    %408 = vector.extract_strided_slice %405 {offsets = [0, 32], sizes = [8, 32], strides = [1, 1]} : vector<8x96xf32> to vector<8x32xf32>
    %409 = arith.mulf %408, %370 : vector<8x32xf32>
    %410 = vector.extract_strided_slice %405 {offsets = [0, 0], sizes = [8, 32], strides = [1, 1]} : vector<8x96xf32> to vector<8x32xf32>
    %411 = arith.mulf %410, %407 : vector<8x32xf32>
    %412 = arith.addf %409, %411 : vector<8x32xf32>
    %413 = vector.extract_strided_slice %405 {offsets = [0, 64], sizes = [8, 32], strides = [1, 1]} : vector<8x96xf32> to vector<8x32xf32>
    %414 = math.tanh %412 : vector<8x32xf32>
    %415 = arith.mulf %413, %414 : vector<8x32xf32>
    %416 = vector.extract_strided_slice %399 {offsets = [0, 0], sizes = [8, 96], strides = [1, 1]} : vector<8x128xf32> to vector<8x96xf32>
    %417 = arith.negf %416 : vector<8x96xf32>
    %418 = math.exp %417 : vector<8x96xf32>
    %cst_41 = arith.constant 1.000000e+00 : f32
    %419 = vector.broadcast %cst_41 : f32 to vector<8x96xf32>
    %420 = arith.addf %419, %418 : vector<8x96xf32>
    %421 = arith.divf %419, %420 : vector<8x96xf32>
    %422 = vector.extract_strided_slice %399 {offsets = [0, 96], sizes = [8, 32], strides = [1, 1]} : vector<8x128xf32> to vector<8x32xf32>
    %423 = math.tanh %422 : vector<8x32xf32>
    %424 = vector.extract_strided_slice %421 {offsets = [0, 32], sizes = [8, 32], strides = [1, 1]} : vector<8x96xf32> to vector<8x32xf32>
    %425 = arith.mulf %424, %386 : vector<8x32xf32>
    %426 = vector.extract_strided_slice %421 {offsets = [0, 0], sizes = [8, 32], strides = [1, 1]} : vector<8x96xf32> to vector<8x32xf32>
    %427 = arith.mulf %426, %423 : vector<8x32xf32>
    %428 = arith.addf %425, %427 : vector<8x32xf32>
    %429 = vector.extract_strided_slice %421 {offsets = [0, 64], sizes = [8, 32], strides = [1, 1]} : vector<8x96xf32> to vector<8x32xf32>
    %430 = math.tanh %428 : vector<8x32xf32>
    %431 = arith.mulf %429, %430 : vector<8x32xf32>
    %432 = tpu.concatenate %415, %431 in 1 : vector<8x32xf32>, vector<8x32xf32> -> vector<8x64xf32>
    %cst_42 = arith.constant dense<0.000000e+00> : vector<8x256xf32>
    %433 = tpu.matmul %432, %2, %cst_42 {dimension_numbers = #tpu.dot_dimension_numbers<[1], [0], [0], [1], [0, 0, 1, 1], [], []>} : vector<8x64xf32>, vector<64x256xf32>, vector<8x256xf32> -> vector<8x256xf32>
    %434 = vector.extract_strided_slice %433 {offsets = [0, 0], sizes = [8, 128], strides = [1, 1]} : vector<8x256xf32> to vector<8x128xf32>
    %435 = vector.extract_strided_slice %10 {offsets = [10, 0, 0], sizes = [1, 8, 128], strides = [1, 1, 1]} : vector<13x8x256xf32> to vector<1x8x128xf32>
    %436 = vector.shape_cast %435 : vector<1x8x128xf32> to vector<8x128xf32>
    %437 = arith.addf %434, %436 : vector<8x128xf32>
    %438 = vector.extract_strided_slice %433 {offsets = [0, 128], sizes = [8, 128], strides = [1, 1]} : vector<8x256xf32> to vector<8x128xf32>
    %439 = vector.extract_strided_slice %10 {offsets = [2, 0, 128], sizes = [1, 8, 128], strides = [1, 1, 1]} : vector<13x8x256xf32> to vector<1x8x128xf32>
    %440 = vector.shape_cast %439 : vector<1x8x128xf32> to vector<8x128xf32>
    %441 = arith.addf %438, %440 : vector<8x128xf32>
    %442 = vector.extract_strided_slice %437 {offsets = [0, 0], sizes = [8, 96], strides = [1, 1]} : vector<8x128xf32> to vector<8x96xf32>
    %443 = arith.negf %442 : vector<8x96xf32>
    %444 = math.exp %443 : vector<8x96xf32>
    %cst_43 = arith.constant 1.000000e+00 : f32
    %445 = vector.broadcast %cst_43 : f32 to vector<8x96xf32>
    %446 = arith.addf %445, %444 : vector<8x96xf32>
    %447 = arith.divf %445, %446 : vector<8x96xf32>
    %448 = vector.extract_strided_slice %437 {offsets = [0, 96], sizes = [8, 32], strides = [1, 1]} : vector<8x128xf32> to vector<8x32xf32>
    %449 = math.tanh %448 : vector<8x32xf32>
    %450 = vector.extract_strided_slice %447 {offsets = [0, 32], sizes = [8, 32], strides = [1, 1]} : vector<8x96xf32> to vector<8x32xf32>
    %451 = arith.mulf %450, %412 : vector<8x32xf32>
    %452 = vector.extract_strided_slice %447 {offsets = [0, 0], sizes = [8, 32], strides = [1, 1]} : vector<8x96xf32> to vector<8x32xf32>
    %453 = arith.mulf %452, %449 : vector<8x32xf32>
    %454 = arith.addf %451, %453 : vector<8x32xf32>
    %455 = vector.extract_strided_slice %447 {offsets = [0, 64], sizes = [8, 32], strides = [1, 1]} : vector<8x96xf32> to vector<8x32xf32>
    %456 = math.tanh %454 : vector<8x32xf32>
    %457 = arith.mulf %455, %456 : vector<8x32xf32>
    %458 = vector.extract_strided_slice %441 {offsets = [0, 0], sizes = [8, 96], strides = [1, 1]} : vector<8x128xf32> to vector<8x96xf32>
    %459 = arith.negf %458 : vector<8x96xf32>
    %460 = math.exp %459 : vector<8x96xf32>
    %cst_44 = arith.constant 1.000000e+00 : f32
    %461 = vector.broadcast %cst_44 : f32 to vector<8x96xf32>
    %462 = arith.addf %461, %460 : vector<8x96xf32>
    %463 = arith.divf %461, %462 : vector<8x96xf32>
    %464 = vector.extract_strided_slice %441 {offsets = [0, 96], sizes = [8, 32], strides = [1, 1]} : vector<8x128xf32> to vector<8x32xf32>
    %465 = math.tanh %464 : vector<8x32xf32>
    %466 = vector.extract_strided_slice %463 {offsets = [0, 32], sizes = [8, 32], strides = [1, 1]} : vector<8x96xf32> to vector<8x32xf32>
    %467 = arith.mulf %466, %428 : vector<8x32xf32>
    %468 = vector.extract_strided_slice %463 {offsets = [0, 0], sizes = [8, 32], strides = [1, 1]} : vector<8x96xf32> to vector<8x32xf32>
    %469 = arith.mulf %468, %465 : vector<8x32xf32>
    %470 = arith.addf %467, %469 : vector<8x32xf32>
    %471 = vector.extract_strided_slice %463 {offsets = [0, 64], sizes = [8, 32], strides = [1, 1]} : vector<8x96xf32> to vector<8x32xf32>
    %472 = math.tanh %470 : vector<8x32xf32>
    %473 = arith.mulf %471, %472 : vector<8x32xf32>
    %474 = tpu.concatenate %457, %473 in 1 : vector<8x32xf32>, vector<8x32xf32> -> vector<8x64xf32>
    %cst_45 = arith.constant dense<0.000000e+00> : vector<8x256xf32>
    %475 = tpu.matmul %474, %2, %cst_45 {dimension_numbers = #tpu.dot_dimension_numbers<[1], [0], [0], [1], [0, 0, 1, 1], [], []>} : vector<8x64xf32>, vector<64x256xf32>, vector<8x256xf32> -> vector<8x256xf32>
    %476 = vector.extract_strided_slice %475 {offsets = [0, 0], sizes = [8, 128], strides = [1, 1]} : vector<8x256xf32> to vector<8x128xf32>
    %477 = vector.extract_strided_slice %10 {offsets = [11, 0, 0], sizes = [1, 8, 128], strides = [1, 1, 1]} : vector<13x8x256xf32> to vector<1x8x128xf32>
    %478 = vector.shape_cast %477 : vector<1x8x128xf32> to vector<8x128xf32>
    %479 = arith.addf %476, %478 : vector<8x128xf32>
    %480 = vector.extract_strided_slice %475 {offsets = [0, 128], sizes = [8, 128], strides = [1, 1]} : vector<8x256xf32> to vector<8x128xf32>
    %481 = vector.extract_strided_slice %10 {offsets = [1, 0, 128], sizes = [1, 8, 128], strides = [1, 1, 1]} : vector<13x8x256xf32> to vector<1x8x128xf32>
    %482 = vector.shape_cast %481 : vector<1x8x128xf32> to vector<8x128xf32>
    %483 = arith.addf %480, %482 : vector<8x128xf32>
    %484 = vector.extract_strided_slice %479 {offsets = [0, 0], sizes = [8, 96], strides = [1, 1]} : vector<8x128xf32> to vector<8x96xf32>
    %485 = arith.negf %484 : vector<8x96xf32>
    %486 = math.exp %485 : vector<8x96xf32>
    %cst_46 = arith.constant 1.000000e+00 : f32
    %487 = vector.broadcast %cst_46 : f32 to vector<8x96xf32>
    %488 = arith.addf %487, %486 : vector<8x96xf32>
    %489 = arith.divf %487, %488 : vector<8x96xf32>
    %490 = vector.extract_strided_slice %479 {offsets = [0, 96], sizes = [8, 32], strides = [1, 1]} : vector<8x128xf32> to vector<8x32xf32>
    %491 = math.tanh %490 : vector<8x32xf32>
    %492 = vector.extract_strided_slice %489 {offsets = [0, 32], sizes = [8, 32], strides = [1, 1]} : vector<8x96xf32> to vector<8x32xf32>
    %493 = arith.mulf %492, %454 : vector<8x32xf32>
    %494 = vector.extract_strided_slice %489 {offsets = [0, 0], sizes = [8, 32], strides = [1, 1]} : vector<8x96xf32> to vector<8x32xf32>
    %495 = arith.mulf %494, %491 : vector<8x32xf32>
    %496 = arith.addf %493, %495 : vector<8x32xf32>
    %497 = vector.extract_strided_slice %489 {offsets = [0, 64], sizes = [8, 32], strides = [1, 1]} : vector<8x96xf32> to vector<8x32xf32>
    %498 = math.tanh %496 : vector<8x32xf32>
    %499 = arith.mulf %497, %498 : vector<8x32xf32>
    %500 = vector.extract_strided_slice %483 {offsets = [0, 0], sizes = [8, 96], strides = [1, 1]} : vector<8x128xf32> to vector<8x96xf32>
    %501 = arith.negf %500 : vector<8x96xf32>
    %502 = math.exp %501 : vector<8x96xf32>
    %cst_47 = arith.constant 1.000000e+00 : f32
    %503 = vector.broadcast %cst_47 : f32 to vector<8x96xf32>
    %504 = arith.addf %503, %502 : vector<8x96xf32>
    %505 = arith.divf %503, %504 : vector<8x96xf32>
    %506 = vector.extract_strided_slice %483 {offsets = [0, 96], sizes = [8, 32], strides = [1, 1]} : vector<8x128xf32> to vector<8x32xf32>
    %507 = math.tanh %506 : vector<8x32xf32>
    %508 = vector.extract_strided_slice %505 {offsets = [0, 32], sizes = [8, 32], strides = [1, 1]} : vector<8x96xf32> to vector<8x32xf32>
    %509 = arith.mulf %508, %470 : vector<8x32xf32>
    %510 = vector.extract_strided_slice %505 {offsets = [0, 0], sizes = [8, 32], strides = [1, 1]} : vector<8x96xf32> to vector<8x32xf32>
    %511 = arith.mulf %510, %507 : vector<8x32xf32>
    %512 = arith.addf %509, %511 : vector<8x32xf32>
    %513 = vector.extract_strided_slice %505 {offsets = [0, 64], sizes = [8, 32], strides = [1, 1]} : vector<8x96xf32> to vector<8x32xf32>
    %514 = math.tanh %512 : vector<8x32xf32>
    %515 = arith.mulf %513, %514 : vector<8x32xf32>
    %516 = tpu.concatenate %499, %515 in 1 : vector<8x32xf32>, vector<8x32xf32> -> vector<8x64xf32>
    %cst_48 = arith.constant dense<0.000000e+00> : vector<8x256xf32>
    %517 = tpu.matmul %516, %2, %cst_48 {dimension_numbers = #tpu.dot_dimension_numbers<[1], [0], [0], [1], [0, 0, 1, 1], [], []>} : vector<8x64xf32>, vector<64x256xf32>, vector<8x256xf32> -> vector<8x256xf32>
    %518 = vector.extract_strided_slice %517 {offsets = [0, 0], sizes = [8, 128], strides = [1, 1]} : vector<8x256xf32> to vector<8x128xf32>
    %519 = vector.extract_strided_slice %10 {offsets = [12, 0, 0], sizes = [1, 8, 128], strides = [1, 1, 1]} : vector<13x8x256xf32> to vector<1x8x128xf32>
    %520 = vector.shape_cast %519 : vector<1x8x128xf32> to vector<8x128xf32>
    %521 = arith.addf %518, %520 : vector<8x128xf32>
    %522 = vector.extract_strided_slice %517 {offsets = [0, 128], sizes = [8, 128], strides = [1, 1]} : vector<8x256xf32> to vector<8x128xf32>
    %523 = vector.extract_strided_slice %10 {offsets = [0, 0, 128], sizes = [1, 8, 128], strides = [1, 1, 1]} : vector<13x8x256xf32> to vector<1x8x128xf32>
    %524 = vector.shape_cast %523 : vector<1x8x128xf32> to vector<8x128xf32>
    %525 = arith.addf %522, %524 : vector<8x128xf32>
    %526 = vector.extract_strided_slice %521 {offsets = [0, 0], sizes = [8, 96], strides = [1, 1]} : vector<8x128xf32> to vector<8x96xf32>
    %527 = arith.negf %526 : vector<8x96xf32>
    %528 = math.exp %527 : vector<8x96xf32>
    %cst_49 = arith.constant 1.000000e+00 : f32
    %529 = vector.broadcast %cst_49 : f32 to vector<8x96xf32>
    %530 = arith.addf %529, %528 : vector<8x96xf32>
    %531 = arith.divf %529, %530 : vector<8x96xf32>
    %532 = vector.extract_strided_slice %521 {offsets = [0, 96], sizes = [8, 32], strides = [1, 1]} : vector<8x128xf32> to vector<8x32xf32>
    %533 = math.tanh %532 : vector<8x32xf32>
    %534 = vector.extract_strided_slice %531 {offsets = [0, 32], sizes = [8, 32], strides = [1, 1]} : vector<8x96xf32> to vector<8x32xf32>
    %535 = arith.mulf %534, %496 : vector<8x32xf32>
    %536 = vector.extract_strided_slice %531 {offsets = [0, 0], sizes = [8, 32], strides = [1, 1]} : vector<8x96xf32> to vector<8x32xf32>
    %537 = arith.mulf %536, %533 : vector<8x32xf32>
    %538 = arith.addf %535, %537 : vector<8x32xf32>
    %539 = vector.extract_strided_slice %531 {offsets = [0, 64], sizes = [8, 32], strides = [1, 1]} : vector<8x96xf32> to vector<8x32xf32>
    %540 = math.tanh %538 : vector<8x32xf32>
    %541 = arith.mulf %539, %540 : vector<8x32xf32>
    %542 = vector.extract_strided_slice %525 {offsets = [0, 0], sizes = [8, 96], strides = [1, 1]} : vector<8x128xf32> to vector<8x96xf32>
    %543 = arith.negf %542 : vector<8x96xf32>
    %544 = math.exp %543 : vector<8x96xf32>
    %cst_50 = arith.constant 1.000000e+00 : f32
    %545 = vector.broadcast %cst_50 : f32 to vector<8x96xf32>
    %546 = arith.addf %545, %544 : vector<8x96xf32>
    %547 = arith.divf %545, %546 : vector<8x96xf32>
    %548 = vector.extract_strided_slice %525 {offsets = [0, 96], sizes = [8, 32], strides = [1, 1]} : vector<8x128xf32> to vector<8x32xf32>
    %549 = math.tanh %548 : vector<8x32xf32>
    %550 = vector.extract_strided_slice %547 {offsets = [0, 32], sizes = [8, 32], strides = [1, 1]} : vector<8x96xf32> to vector<8x32xf32>
    %551 = arith.mulf %550, %512 : vector<8x32xf32>
    %552 = vector.extract_strided_slice %547 {offsets = [0, 0], sizes = [8, 32], strides = [1, 1]} : vector<8x96xf32> to vector<8x32xf32>
    %553 = arith.mulf %552, %549 : vector<8x32xf32>
    %554 = arith.addf %551, %553 : vector<8x32xf32>
    %555 = vector.extract_strided_slice %547 {offsets = [0, 64], sizes = [8, 32], strides = [1, 1]} : vector<8x96xf32> to vector<8x32xf32>
    %556 = math.tanh %554 : vector<8x32xf32>
    %557 = arith.mulf %555, %556 : vector<8x32xf32>
    %558 = vector.shape_cast %37 : vector<8x32xf32> to vector<1x8x32xf32>
    %559 = vector.shape_cast %79 : vector<8x32xf32> to vector<1x8x32xf32>
    %560 = vector.shape_cast %121 : vector<8x32xf32> to vector<1x8x32xf32>
    %561 = vector.shape_cast %163 : vector<8x32xf32> to vector<1x8x32xf32>
    %562 = vector.shape_cast %205 : vector<8x32xf32> to vector<1x8x32xf32>
    %563 = vector.shape_cast %247 : vector<8x32xf32> to vector<1x8x32xf32>
    %564 = vector.shape_cast %289 : vector<8x32xf32> to vector<1x8x32xf32>
    %565 = vector.shape_cast %331 : vector<8x32xf32> to vector<1x8x32xf32>
    %566 = vector.shape_cast %373 : vector<8x32xf32> to vector<1x8x32xf32>
    %567 = vector.shape_cast %415 : vector<8x32xf32> to vector<1x8x32xf32>
    %568 = vector.shape_cast %457 : vector<8x32xf32> to vector<1x8x32xf32>
    %569 = vector.shape_cast %499 : vector<8x32xf32> to vector<1x8x32xf32>
    %570 = vector.shape_cast %541 : vector<8x32xf32> to vector<1x8x32xf32>
    %571 = tpu.concatenate %558, %559, %560, %561, %562, %563, %564, %565, %566, %567, %568, %569, %570 in 0 : vector<1x8x32xf32>, vector<1x8x32xf32>, vector<1x8x32xf32>, vector<1x8x32xf32>, vector<1x8x32xf32>, vector<1x8x32xf32>, vector<1x8x32xf32>, vector<1x8x32xf32>, vector<1x8x32xf32>, vector<1x8x32xf32>, vector<1x8x32xf32>, vector<1x8x32xf32>, vector<1x8x32xf32> -> vector<13x8x32xf32>
    %572 = vector.shape_cast %557 : vector<8x32xf32> to vector<1x8x32xf32>
    %573 = vector.shape_cast %515 : vector<8x32xf32> to vector<1x8x32xf32>
    %574 = vector.shape_cast %473 : vector<8x32xf32> to vector<1x8x32xf32>
    %575 = vector.shape_cast %431 : vector<8x32xf32> to vector<1x8x32xf32>
    %576 = vector.shape_cast %389 : vector<8x32xf32> to vector<1x8x32xf32>
    %577 = vector.shape_cast %347 : vector<8x32xf32> to vector<1x8x32xf32>
    %578 = vector.shape_cast %305 : vector<8x32xf32> to vector<1x8x32xf32>
    %579 = vector.shape_cast %263 : vector<8x32xf32> to vector<1x8x32xf32>
    %580 = vector.shape_cast %221 : vector<8x32xf32> to vector<1x8x32xf32>
    %581 = vector.shape_cast %179 : vector<8x32xf32> to vector<1x8x32xf32>
    %582 = vector.shape_cast %137 : vector<8x32xf32> to vector<1x8x32xf32>
    %583 = vector.shape_cast %95 : vector<8x32xf32> to vector<1x8x32xf32>
    %584 = vector.shape_cast %53 : vector<8x32xf32> to vector<1x8x32xf32>
    %585 = tpu.concatenate %572, %573, %574, %575, %576, %577, %578, %579, %580, %581, %582, %583, %584 in 0 : vector<1x8x32xf32>, vector<1x8x32xf32>, vector<1x8x32xf32>, vector<1x8x32xf32>, vector<1x8x32xf32>, vector<1x8x32xf32>, vector<1x8x32xf32>, vector<1x8x32xf32>, vector<1x8x32xf32>, vector<1x8x32xf32>, vector<1x8x32xf32>, vector<1x8x32xf32>, vector<1x8x32xf32> -> vector<13x8x32xf32>
    %586 = tpu.concatenate %571, %585 in 2 : vector<13x8x32xf32>, vector<13x8x32xf32> -> vector<13x8x64xf32>
    %587 = vector.shape_cast %586 : vector<13x8x64xf32> to vector<104x64xf32>
    %c0_51 = arith.constant 0 : index
    %c0_52 = arith.constant 0 : index
    %588 = vector.load %arg6[%c0_51, %c0_52] : memref<64x32xf32, #tpu.memory_space<vmem>>, vector<64x32xf32>
    %cst_53 = arith.constant dense<0.000000e+00> : vector<104x32xf32>
    %589 = tpu.matmul %587, %588, %cst_53 {dimension_numbers = #tpu.dot_dimension_numbers<[1], [0], [0], [1], [0, 0, 1, 1], [], []>} : vector<104x64xf32>, vector<64x32xf32>, vector<104x32xf32> -> vector<104x32xf32>
    %c0_54 = arith.constant 0 : index
    %c0_55 = arith.constant 0 : index
    %590 = vector.load %arg7[%c0_54, %c0_55] : memref<1x32xf32, #tpu.memory_space<vmem>>, vector<1x32xf32>
    %591 = vector.broadcast %590 : vector<1x32xf32> to vector<104x32xf32>
    %592 = arith.addf %589, %591 : vector<104x32xf32>
    %cst_56 = arith.constant 0.000000e+00 : f32
    %593 = vector.broadcast %cst_56 : f32 to vector<104x32xf32>
    %594 = arith.maximumf %592, %593 : vector<104x32xf32>
    %595 = vector.shape_cast %594 : vector<104x32xf32> to vector<13x8x32xf32>
    %c0_57 = arith.constant 0 : index
    %c0_58 = arith.constant 0 : index
    %596 = vector.load %arg8[%c0_57, %c0_58] : memref<32x256xf32, #tpu.memory_space<vmem>>, vector<32x256xf32>
    %c0_59 = arith.constant 0 : index
    %c0_60 = arith.constant 0 : index
    %597 = vector.load %arg9[%c0_59, %c0_60] : memref<64x256xf32, #tpu.memory_space<vmem>>, vector<64x256xf32>
    %c0_61 = arith.constant 0 : index
    %c0_62 = arith.constant 0 : index
    %598 = vector.load %arg10[%c0_61, %c0_62] : memref<1x256xf32, #tpu.memory_space<vmem>>, vector<1x256xf32>
    %c0_63 = arith.constant 0 : index
    %c0_64 = arith.constant 0 : index
    %599 = vector.load %arg11[%c0_63, %c0_64] : memref<8x64xf32, #tpu.memory_space<vmem>>, vector<8x64xf32>
    %c0_65 = arith.constant 0 : index
    %c0_66 = arith.constant 0 : index
    %600 = vector.load %arg12[%c0_65, %c0_66] : memref<8x64xf32, #tpu.memory_space<vmem>>, vector<8x64xf32>
    %601 = vector.shape_cast %595 : vector<13x8x32xf32> to vector<104x32xf32>
    %cst_67 = arith.constant dense<0.000000e+00> : vector<104x256xf32>
    %602 = tpu.matmul %601, %596, %cst_67 {dimension_numbers = #tpu.dot_dimension_numbers<[1], [0], [0], [1], [0, 0, 1, 1], [], []>} : vector<104x32xf32>, vector<32x256xf32>, vector<104x256xf32> -> vector<104x256xf32>
    %603 = vector.broadcast %598 : vector<1x256xf32> to vector<104x256xf32>
    %604 = arith.addf %602, %603 : vector<104x256xf32>
    %605 = vector.shape_cast %604 : vector<104x256xf32> to vector<13x8x256xf32>
    %606 = vector.extract_strided_slice %600 {offsets = [0, 0], sizes = [8, 32], strides = [1, 1]} : vector<8x64xf32> to vector<8x32xf32>
    %607 = vector.extract_strided_slice %600 {offsets = [0, 32], sizes = [8, 32], strides = [1, 1]} : vector<8x64xf32> to vector<8x32xf32>
    %cst_68 = arith.constant dense<0.000000e+00> : vector<8x256xf32>
    %608 = tpu.matmul %599, %597, %cst_68 {dimension_numbers = #tpu.dot_dimension_numbers<[1], [0], [0], [1], [0, 0, 1, 1], [], []>} : vector<8x64xf32>, vector<64x256xf32>, vector<8x256xf32> -> vector<8x256xf32>
    %609 = vector.extract_strided_slice %608 {offsets = [0, 0], sizes = [8, 128], strides = [1, 1]} : vector<8x256xf32> to vector<8x128xf32>
    %610 = vector.extract_strided_slice %605 {offsets = [0, 0, 0], sizes = [1, 8, 128], strides = [1, 1, 1]} : vector<13x8x256xf32> to vector<1x8x128xf32>
    %611 = vector.shape_cast %610 : vector<1x8x128xf32> to vector<8x128xf32>
    %612 = arith.addf %609, %611 : vector<8x128xf32>
    %613 = vector.extract_strided_slice %608 {offsets = [0, 128], sizes = [8, 128], strides = [1, 1]} : vector<8x256xf32> to vector<8x128xf32>
    %614 = vector.extract_strided_slice %605 {offsets = [12, 0, 128], sizes = [1, 8, 128], strides = [1, 1, 1]} : vector<13x8x256xf32> to vector<1x8x128xf32>
    %615 = vector.shape_cast %614 : vector<1x8x128xf32> to vector<8x128xf32>
    %616 = arith.addf %613, %615 : vector<8x128xf32>
    %617 = vector.extract_strided_slice %612 {offsets = [0, 0], sizes = [8, 96], strides = [1, 1]} : vector<8x128xf32> to vector<8x96xf32>
    %618 = arith.negf %617 : vector<8x96xf32>
    %619 = math.exp %618 : vector<8x96xf32>
    %cst_69 = arith.constant 1.000000e+00 : f32
    %620 = vector.broadcast %cst_69 : f32 to vector<8x96xf32>
    %621 = arith.addf %620, %619 : vector<8x96xf32>
    %622 = arith.divf %620, %621 : vector<8x96xf32>
    %623 = vector.extract_strided_slice %612 {offsets = [0, 96], sizes = [8, 32], strides = [1, 1]} : vector<8x128xf32> to vector<8x32xf32>
    %624 = math.tanh %623 : vector<8x32xf32>
    %625 = vector.extract_strided_slice %622 {offsets = [0, 32], sizes = [8, 32], strides = [1, 1]} : vector<8x96xf32> to vector<8x32xf32>
    %626 = arith.mulf %625, %606 : vector<8x32xf32>
    %627 = vector.extract_strided_slice %622 {offsets = [0, 0], sizes = [8, 32], strides = [1, 1]} : vector<8x96xf32> to vector<8x32xf32>
    %628 = arith.mulf %627, %624 : vector<8x32xf32>
    %629 = arith.addf %626, %628 : vector<8x32xf32>
    %630 = vector.extract_strided_slice %622 {offsets = [0, 64], sizes = [8, 32], strides = [1, 1]} : vector<8x96xf32> to vector<8x32xf32>
    %631 = math.tanh %629 : vector<8x32xf32>
    %632 = arith.mulf %630, %631 : vector<8x32xf32>
    %633 = vector.extract_strided_slice %616 {offsets = [0, 0], sizes = [8, 96], strides = [1, 1]} : vector<8x128xf32> to vector<8x96xf32>
    %634 = arith.negf %633 : vector<8x96xf32>
    %635 = math.exp %634 : vector<8x96xf32>
    %cst_70 = arith.constant 1.000000e+00 : f32
    %636 = vector.broadcast %cst_70 : f32 to vector<8x96xf32>
    %637 = arith.addf %636, %635 : vector<8x96xf32>
    %638 = arith.divf %636, %637 : vector<8x96xf32>
    %639 = vector.extract_strided_slice %616 {offsets = [0, 96], sizes = [8, 32], strides = [1, 1]} : vector<8x128xf32> to vector<8x32xf32>
    %640 = math.tanh %639 : vector<8x32xf32>
    %641 = vector.extract_strided_slice %638 {offsets = [0, 32], sizes = [8, 32], strides = [1, 1]} : vector<8x96xf32> to vector<8x32xf32>
    %642 = arith.mulf %641, %607 : vector<8x32xf32>
    %643 = vector.extract_strided_slice %638 {offsets = [0, 0], sizes = [8, 32], strides = [1, 1]} : vector<8x96xf32> to vector<8x32xf32>
    %644 = arith.mulf %643, %640 : vector<8x32xf32>
    %645 = arith.addf %642, %644 : vector<8x32xf32>
    %646 = vector.extract_strided_slice %638 {offsets = [0, 64], sizes = [8, 32], strides = [1, 1]} : vector<8x96xf32> to vector<8x32xf32>
    %647 = math.tanh %645 : vector<8x32xf32>
    %648 = arith.mulf %646, %647 : vector<8x32xf32>
    %649 = tpu.concatenate %632, %648 in 1 : vector<8x32xf32>, vector<8x32xf32> -> vector<8x64xf32>
    %cst_71 = arith.constant dense<0.000000e+00> : vector<8x256xf32>
    %650 = tpu.matmul %649, %597, %cst_71 {dimension_numbers = #tpu.dot_dimension_numbers<[1], [0], [0], [1], [0, 0, 1, 1], [], []>} : vector<8x64xf32>, vector<64x256xf32>, vector<8x256xf32> -> vector<8x256xf32>
    %651 = vector.extract_strided_slice %650 {offsets = [0, 0], sizes = [8, 128], strides = [1, 1]} : vector<8x256xf32> to vector<8x128xf32>
    %652 = vector.extract_strided_slice %605 {offsets = [1, 0, 0], sizes = [1, 8, 128], strides = [1, 1, 1]} : vector<13x8x256xf32> to vector<1x8x128xf32>
    %653 = vector.shape_cast %652 : vector<1x8x128xf32> to vector<8x128xf32>
    %654 = arith.addf %651, %653 : vector<8x128xf32>
    %655 = vector.extract_strided_slice %650 {offsets = [0, 128], sizes = [8, 128], strides = [1, 1]} : vector<8x256xf32> to vector<8x128xf32>
    %656 = vector.extract_strided_slice %605 {offsets = [11, 0, 128], sizes = [1, 8, 128], strides = [1, 1, 1]} : vector<13x8x256xf32> to vector<1x8x128xf32>
    %657 = vector.shape_cast %656 : vector<1x8x128xf32> to vector<8x128xf32>
    %658 = arith.addf %655, %657 : vector<8x128xf32>
    %659 = vector.extract_strided_slice %654 {offsets = [0, 0], sizes = [8, 96], strides = [1, 1]} : vector<8x128xf32> to vector<8x96xf32>
    %660 = arith.negf %659 : vector<8x96xf32>
    %661 = math.exp %660 : vector<8x96xf32>
    %cst_72 = arith.constant 1.000000e+00 : f32
    %662 = vector.broadcast %cst_72 : f32 to vector<8x96xf32>
    %663 = arith.addf %662, %661 : vector<8x96xf32>
    %664 = arith.divf %662, %663 : vector<8x96xf32>
    %665 = vector.extract_strided_slice %654 {offsets = [0, 96], sizes = [8, 32], strides = [1, 1]} : vector<8x128xf32> to vector<8x32xf32>
    %666 = math.tanh %665 : vector<8x32xf32>
    %667 = vector.extract_strided_slice %664 {offsets = [0, 32], sizes = [8, 32], strides = [1, 1]} : vector<8x96xf32> to vector<8x32xf32>
    %668 = arith.mulf %667, %629 : vector<8x32xf32>
    %669 = vector.extract_strided_slice %664 {offsets = [0, 0], sizes = [8, 32], strides = [1, 1]} : vector<8x96xf32> to vector<8x32xf32>
    %670 = arith.mulf %669, %666 : vector<8x32xf32>
    %671 = arith.addf %668, %670 : vector<8x32xf32>
    %672 = vector.extract_strided_slice %664 {offsets = [0, 64], sizes = [8, 32], strides = [1, 1]} : vector<8x96xf32> to vector<8x32xf32>
    %673 = math.tanh %671 : vector<8x32xf32>
    %674 = arith.mulf %672, %673 : vector<8x32xf32>
    %675 = vector.extract_strided_slice %658 {offsets = [0, 0], sizes = [8, 96], strides = [1, 1]} : vector<8x128xf32> to vector<8x96xf32>
    %676 = arith.negf %675 : vector<8x96xf32>
    %677 = math.exp %676 : vector<8x96xf32>
    %cst_73 = arith.constant 1.000000e+00 : f32
    %678 = vector.broadcast %cst_73 : f32 to vector<8x96xf32>
    %679 = arith.addf %678, %677 : vector<8x96xf32>
    %680 = arith.divf %678, %679 : vector<8x96xf32>
    %681 = vector.extract_strided_slice %658 {offsets = [0, 96], sizes = [8, 32], strides = [1, 1]} : vector<8x128xf32> to vector<8x32xf32>
    %682 = math.tanh %681 : vector<8x32xf32>
    %683 = vector.extract_strided_slice %680 {offsets = [0, 32], sizes = [8, 32], strides = [1, 1]} : vector<8x96xf32> to vector<8x32xf32>
    %684 = arith.mulf %683, %645 : vector<8x32xf32>
    %685 = vector.extract_strided_slice %680 {offsets = [0, 0], sizes = [8, 32], strides = [1, 1]} : vector<8x96xf32> to vector<8x32xf32>
    %686 = arith.mulf %685, %682 : vector<8x32xf32>
    %687 = arith.addf %684, %686 : vector<8x32xf32>
    %688 = vector.extract_strided_slice %680 {offsets = [0, 64], sizes = [8, 32], strides = [1, 1]} : vector<8x96xf32> to vector<8x32xf32>
    %689 = math.tanh %687 : vector<8x32xf32>
    %690 = arith.mulf %688, %689 : vector<8x32xf32>
    %691 = tpu.concatenate %674, %690 in 1 : vector<8x32xf32>, vector<8x32xf32> -> vector<8x64xf32>
    %cst_74 = arith.constant dense<0.000000e+00> : vector<8x256xf32>
    %692 = tpu.matmul %691, %597, %cst_74 {dimension_numbers = #tpu.dot_dimension_numbers<[1], [0], [0], [1], [0, 0, 1, 1], [], []>} : vector<8x64xf32>, vector<64x256xf32>, vector<8x256xf32> -> vector<8x256xf32>
    %693 = vector.extract_strided_slice %692 {offsets = [0, 0], sizes = [8, 128], strides = [1, 1]} : vector<8x256xf32> to vector<8x128xf32>
    %694 = vector.extract_strided_slice %605 {offsets = [2, 0, 0], sizes = [1, 8, 128], strides = [1, 1, 1]} : vector<13x8x256xf32> to vector<1x8x128xf32>
    %695 = vector.shape_cast %694 : vector<1x8x128xf32> to vector<8x128xf32>
    %696 = arith.addf %693, %695 : vector<8x128xf32>
    %697 = vector.extract_strided_slice %692 {offsets = [0, 128], sizes = [8, 128], strides = [1, 1]} : vector<8x256xf32> to vector<8x128xf32>
    %698 = vector.extract_strided_slice %605 {offsets = [10, 0, 128], sizes = [1, 8, 128], strides = [1, 1, 1]} : vector<13x8x256xf32> to vector<1x8x128xf32>
    %699 = vector.shape_cast %698 : vector<1x8x128xf32> to vector<8x128xf32>
    %700 = arith.addf %697, %699 : vector<8x128xf32>
    %701 = vector.extract_strided_slice %696 {offsets = [0, 0], sizes = [8, 96], strides = [1, 1]} : vector<8x128xf32> to vector<8x96xf32>
    %702 = arith.negf %701 : vector<8x96xf32>
    %703 = math.exp %702 : vector<8x96xf32>
    %cst_75 = arith.constant 1.000000e+00 : f32
    %704 = vector.broadcast %cst_75 : f32 to vector<8x96xf32>
    %705 = arith.addf %704, %703 : vector<8x96xf32>
    %706 = arith.divf %704, %705 : vector<8x96xf32>
    %707 = vector.extract_strided_slice %696 {offsets = [0, 96], sizes = [8, 32], strides = [1, 1]} : vector<8x128xf32> to vector<8x32xf32>
    %708 = math.tanh %707 : vector<8x32xf32>
    %709 = vector.extract_strided_slice %706 {offsets = [0, 32], sizes = [8, 32], strides = [1, 1]} : vector<8x96xf32> to vector<8x32xf32>
    %710 = arith.mulf %709, %671 : vector<8x32xf32>
    %711 = vector.extract_strided_slice %706 {offsets = [0, 0], sizes = [8, 32], strides = [1, 1]} : vector<8x96xf32> to vector<8x32xf32>
    %712 = arith.mulf %711, %708 : vector<8x32xf32>
    %713 = arith.addf %710, %712 : vector<8x32xf32>
    %714 = vector.extract_strided_slice %706 {offsets = [0, 64], sizes = [8, 32], strides = [1, 1]} : vector<8x96xf32> to vector<8x32xf32>
    %715 = math.tanh %713 : vector<8x32xf32>
    %716 = arith.mulf %714, %715 : vector<8x32xf32>
    %717 = vector.extract_strided_slice %700 {offsets = [0, 0], sizes = [8, 96], strides = [1, 1]} : vector<8x128xf32> to vector<8x96xf32>
    %718 = arith.negf %717 : vector<8x96xf32>
    %719 = math.exp %718 : vector<8x96xf32>
    %cst_76 = arith.constant 1.000000e+00 : f32
    %720 = vector.broadcast %cst_76 : f32 to vector<8x96xf32>
    %721 = arith.addf %720, %719 : vector<8x96xf32>
    %722 = arith.divf %720, %721 : vector<8x96xf32>
    %723 = vector.extract_strided_slice %700 {offsets = [0, 96], sizes = [8, 32], strides = [1, 1]} : vector<8x128xf32> to vector<8x32xf32>
    %724 = math.tanh %723 : vector<8x32xf32>
    %725 = vector.extract_strided_slice %722 {offsets = [0, 32], sizes = [8, 32], strides = [1, 1]} : vector<8x96xf32> to vector<8x32xf32>
    %726 = arith.mulf %725, %687 : vector<8x32xf32>
    %727 = vector.extract_strided_slice %722 {offsets = [0, 0], sizes = [8, 32], strides = [1, 1]} : vector<8x96xf32> to vector<8x32xf32>
    %728 = arith.mulf %727, %724 : vector<8x32xf32>
    %729 = arith.addf %726, %728 : vector<8x32xf32>
    %730 = vector.extract_strided_slice %722 {offsets = [0, 64], sizes = [8, 32], strides = [1, 1]} : vector<8x96xf32> to vector<8x32xf32>
    %731 = math.tanh %729 : vector<8x32xf32>
    %732 = arith.mulf %730, %731 : vector<8x32xf32>
    %733 = tpu.concatenate %716, %732 in 1 : vector<8x32xf32>, vector<8x32xf32> -> vector<8x64xf32>
    %cst_77 = arith.constant dense<0.000000e+00> : vector<8x256xf32>
    %734 = tpu.matmul %733, %597, %cst_77 {dimension_numbers = #tpu.dot_dimension_numbers<[1], [0], [0], [1], [0, 0, 1, 1], [], []>} : vector<8x64xf32>, vector<64x256xf32>, vector<8x256xf32> -> vector<8x256xf32>
    %735 = vector.extract_strided_slice %734 {offsets = [0, 0], sizes = [8, 128], strides = [1, 1]} : vector<8x256xf32> to vector<8x128xf32>
    %736 = vector.extract_strided_slice %605 {offsets = [3, 0, 0], sizes = [1, 8, 128], strides = [1, 1, 1]} : vector<13x8x256xf32> to vector<1x8x128xf32>
    %737 = vector.shape_cast %736 : vector<1x8x128xf32> to vector<8x128xf32>
    %738 = arith.addf %735, %737 : vector<8x128xf32>
    %739 = vector.extract_strided_slice %734 {offsets = [0, 128], sizes = [8, 128], strides = [1, 1]} : vector<8x256xf32> to vector<8x128xf32>
    %740 = vector.extract_strided_slice %605 {offsets = [9, 0, 128], sizes = [1, 8, 128], strides = [1, 1, 1]} : vector<13x8x256xf32> to vector<1x8x128xf32>
    %741 = vector.shape_cast %740 : vector<1x8x128xf32> to vector<8x128xf32>
    %742 = arith.addf %739, %741 : vector<8x128xf32>
    %743 = vector.extract_strided_slice %738 {offsets = [0, 0], sizes = [8, 96], strides = [1, 1]} : vector<8x128xf32> to vector<8x96xf32>
    %744 = arith.negf %743 : vector<8x96xf32>
    %745 = math.exp %744 : vector<8x96xf32>
    %cst_78 = arith.constant 1.000000e+00 : f32
    %746 = vector.broadcast %cst_78 : f32 to vector<8x96xf32>
    %747 = arith.addf %746, %745 : vector<8x96xf32>
    %748 = arith.divf %746, %747 : vector<8x96xf32>
    %749 = vector.extract_strided_slice %738 {offsets = [0, 96], sizes = [8, 32], strides = [1, 1]} : vector<8x128xf32> to vector<8x32xf32>
    %750 = math.tanh %749 : vector<8x32xf32>
    %751 = vector.extract_strided_slice %748 {offsets = [0, 32], sizes = [8, 32], strides = [1, 1]} : vector<8x96xf32> to vector<8x32xf32>
    %752 = arith.mulf %751, %713 : vector<8x32xf32>
    %753 = vector.extract_strided_slice %748 {offsets = [0, 0], sizes = [8, 32], strides = [1, 1]} : vector<8x96xf32> to vector<8x32xf32>
    %754 = arith.mulf %753, %750 : vector<8x32xf32>
    %755 = arith.addf %752, %754 : vector<8x32xf32>
    %756 = vector.extract_strided_slice %748 {offsets = [0, 64], sizes = [8, 32], strides = [1, 1]} : vector<8x96xf32> to vector<8x32xf32>
    %757 = math.tanh %755 : vector<8x32xf32>
    %758 = arith.mulf %756, %757 : vector<8x32xf32>
    %759 = vector.extract_strided_slice %742 {offsets = [0, 0], sizes = [8, 96], strides = [1, 1]} : vector<8x128xf32> to vector<8x96xf32>
    %760 = arith.negf %759 : vector<8x96xf32>
    %761 = math.exp %760 : vector<8x96xf32>
    %cst_79 = arith.constant 1.000000e+00 : f32
    %762 = vector.broadcast %cst_79 : f32 to vector<8x96xf32>
    %763 = arith.addf %762, %761 : vector<8x96xf32>
    %764 = arith.divf %762, %763 : vector<8x96xf32>
    %765 = vector.extract_strided_slice %742 {offsets = [0, 96], sizes = [8, 32], strides = [1, 1]} : vector<8x128xf32> to vector<8x32xf32>
    %766 = math.tanh %765 : vector<8x32xf32>
    %767 = vector.extract_strided_slice %764 {offsets = [0, 32], sizes = [8, 32], strides = [1, 1]} : vector<8x96xf32> to vector<8x32xf32>
    %768 = arith.mulf %767, %729 : vector<8x32xf32>
    %769 = vector.extract_strided_slice %764 {offsets = [0, 0], sizes = [8, 32], strides = [1, 1]} : vector<8x96xf32> to vector<8x32xf32>
    %770 = arith.mulf %769, %766 : vector<8x32xf32>
    %771 = arith.addf %768, %770 : vector<8x32xf32>
    %772 = vector.extract_strided_slice %764 {offsets = [0, 64], sizes = [8, 32], strides = [1, 1]} : vector<8x96xf32> to vector<8x32xf32>
    %773 = math.tanh %771 : vector<8x32xf32>
    %774 = arith.mulf %772, %773 : vector<8x32xf32>
    %775 = tpu.concatenate %758, %774 in 1 : vector<8x32xf32>, vector<8x32xf32> -> vector<8x64xf32>
    %cst_80 = arith.constant dense<0.000000e+00> : vector<8x256xf32>
    %776 = tpu.matmul %775, %597, %cst_80 {dimension_numbers = #tpu.dot_dimension_numbers<[1], [0], [0], [1], [0, 0, 1, 1], [], []>} : vector<8x64xf32>, vector<64x256xf32>, vector<8x256xf32> -> vector<8x256xf32>
    %777 = vector.extract_strided_slice %776 {offsets = [0, 0], sizes = [8, 128], strides = [1, 1]} : vector<8x256xf32> to vector<8x128xf32>
    %778 = vector.extract_strided_slice %605 {offsets = [4, 0, 0], sizes = [1, 8, 128], strides = [1, 1, 1]} : vector<13x8x256xf32> to vector<1x8x128xf32>
    %779 = vector.shape_cast %778 : vector<1x8x128xf32> to vector<8x128xf32>
    %780 = arith.addf %777, %779 : vector<8x128xf32>
    %781 = vector.extract_strided_slice %776 {offsets = [0, 128], sizes = [8, 128], strides = [1, 1]} : vector<8x256xf32> to vector<8x128xf32>
    %782 = vector.extract_strided_slice %605 {offsets = [8, 0, 128], sizes = [1, 8, 128], strides = [1, 1, 1]} : vector<13x8x256xf32> to vector<1x8x128xf32>
    %783 = vector.shape_cast %782 : vector<1x8x128xf32> to vector<8x128xf32>
    %784 = arith.addf %781, %783 : vector<8x128xf32>
    %785 = vector.extract_strided_slice %780 {offsets = [0, 0], sizes = [8, 96], strides = [1, 1]} : vector<8x128xf32> to vector<8x96xf32>
    %786 = arith.negf %785 : vector<8x96xf32>
    %787 = math.exp %786 : vector<8x96xf32>
    %cst_81 = arith.constant 1.000000e+00 : f32
    %788 = vector.broadcast %cst_81 : f32 to vector<8x96xf32>
    %789 = arith.addf %788, %787 : vector<8x96xf32>
    %790 = arith.divf %788, %789 : vector<8x96xf32>
    %791 = vector.extract_strided_slice %780 {offsets = [0, 96], sizes = [8, 32], strides = [1, 1]} : vector<8x128xf32> to vector<8x32xf32>
    %792 = math.tanh %791 : vector<8x32xf32>
    %793 = vector.extract_strided_slice %790 {offsets = [0, 32], sizes = [8, 32], strides = [1, 1]} : vector<8x96xf32> to vector<8x32xf32>
    %794 = arith.mulf %793, %755 : vector<8x32xf32>
    %795 = vector.extract_strided_slice %790 {offsets = [0, 0], sizes = [8, 32], strides = [1, 1]} : vector<8x96xf32> to vector<8x32xf32>
    %796 = arith.mulf %795, %792 : vector<8x32xf32>
    %797 = arith.addf %794, %796 : vector<8x32xf32>
    %798 = vector.extract_strided_slice %790 {offsets = [0, 64], sizes = [8, 32], strides = [1, 1]} : vector<8x96xf32> to vector<8x32xf32>
    %799 = math.tanh %797 : vector<8x32xf32>
    %800 = arith.mulf %798, %799 : vector<8x32xf32>
    %801 = vector.extract_strided_slice %784 {offsets = [0, 0], sizes = [8, 96], strides = [1, 1]} : vector<8x128xf32> to vector<8x96xf32>
    %802 = arith.negf %801 : vector<8x96xf32>
    %803 = math.exp %802 : vector<8x96xf32>
    %cst_82 = arith.constant 1.000000e+00 : f32
    %804 = vector.broadcast %cst_82 : f32 to vector<8x96xf32>
    %805 = arith.addf %804, %803 : vector<8x96xf32>
    %806 = arith.divf %804, %805 : vector<8x96xf32>
    %807 = vector.extract_strided_slice %784 {offsets = [0, 96], sizes = [8, 32], strides = [1, 1]} : vector<8x128xf32> to vector<8x32xf32>
    %808 = math.tanh %807 : vector<8x32xf32>
    %809 = vector.extract_strided_slice %806 {offsets = [0, 32], sizes = [8, 32], strides = [1, 1]} : vector<8x96xf32> to vector<8x32xf32>
    %810 = arith.mulf %809, %771 : vector<8x32xf32>
    %811 = vector.extract_strided_slice %806 {offsets = [0, 0], sizes = [8, 32], strides = [1, 1]} : vector<8x96xf32> to vector<8x32xf32>
    %812 = arith.mulf %811, %808 : vector<8x32xf32>
    %813 = arith.addf %810, %812 : vector<8x32xf32>
    %814 = vector.extract_strided_slice %806 {offsets = [0, 64], sizes = [8, 32], strides = [1, 1]} : vector<8x96xf32> to vector<8x32xf32>
    %815 = math.tanh %813 : vector<8x32xf32>
    %816 = arith.mulf %814, %815 : vector<8x32xf32>
    %817 = tpu.concatenate %800, %816 in 1 : vector<8x32xf32>, vector<8x32xf32> -> vector<8x64xf32>
    %cst_83 = arith.constant dense<0.000000e+00> : vector<8x256xf32>
    %818 = tpu.matmul %817, %597, %cst_83 {dimension_numbers = #tpu.dot_dimension_numbers<[1], [0], [0], [1], [0, 0, 1, 1], [], []>} : vector<8x64xf32>, vector<64x256xf32>, vector<8x256xf32> -> vector<8x256xf32>
    %819 = vector.extract_strided_slice %818 {offsets = [0, 0], sizes = [8, 128], strides = [1, 1]} : vector<8x256xf32> to vector<8x128xf32>
    %820 = vector.extract_strided_slice %605 {offsets = [5, 0, 0], sizes = [1, 8, 128], strides = [1, 1, 1]} : vector<13x8x256xf32> to vector<1x8x128xf32>
    %821 = vector.shape_cast %820 : vector<1x8x128xf32> to vector<8x128xf32>
    %822 = arith.addf %819, %821 : vector<8x128xf32>
    %823 = vector.extract_strided_slice %818 {offsets = [0, 128], sizes = [8, 128], strides = [1, 1]} : vector<8x256xf32> to vector<8x128xf32>
    %824 = vector.extract_strided_slice %605 {offsets = [7, 0, 128], sizes = [1, 8, 128], strides = [1, 1, 1]} : vector<13x8x256xf32> to vector<1x8x128xf32>
    %825 = vector.shape_cast %824 : vector<1x8x128xf32> to vector<8x128xf32>
    %826 = arith.addf %823, %825 : vector<8x128xf32>
    %827 = vector.extract_strided_slice %822 {offsets = [0, 0], sizes = [8, 96], strides = [1, 1]} : vector<8x128xf32> to vector<8x96xf32>
    %828 = arith.negf %827 : vector<8x96xf32>
    %829 = math.exp %828 : vector<8x96xf32>
    %cst_84 = arith.constant 1.000000e+00 : f32
    %830 = vector.broadcast %cst_84 : f32 to vector<8x96xf32>
    %831 = arith.addf %830, %829 : vector<8x96xf32>
    %832 = arith.divf %830, %831 : vector<8x96xf32>
    %833 = vector.extract_strided_slice %822 {offsets = [0, 96], sizes = [8, 32], strides = [1, 1]} : vector<8x128xf32> to vector<8x32xf32>
    %834 = math.tanh %833 : vector<8x32xf32>
    %835 = vector.extract_strided_slice %832 {offsets = [0, 32], sizes = [8, 32], strides = [1, 1]} : vector<8x96xf32> to vector<8x32xf32>
    %836 = arith.mulf %835, %797 : vector<8x32xf32>
    %837 = vector.extract_strided_slice %832 {offsets = [0, 0], sizes = [8, 32], strides = [1, 1]} : vector<8x96xf32> to vector<8x32xf32>
    %838 = arith.mulf %837, %834 : vector<8x32xf32>
    %839 = arith.addf %836, %838 : vector<8x32xf32>
    %840 = vector.extract_strided_slice %832 {offsets = [0, 64], sizes = [8, 32], strides = [1, 1]} : vector<8x96xf32> to vector<8x32xf32>
    %841 = math.tanh %839 : vector<8x32xf32>
    %842 = arith.mulf %840, %841 : vector<8x32xf32>
    %843 = vector.extract_strided_slice %826 {offsets = [0, 0], sizes = [8, 96], strides = [1, 1]} : vector<8x128xf32> to vector<8x96xf32>
    %844 = arith.negf %843 : vector<8x96xf32>
    %845 = math.exp %844 : vector<8x96xf32>
    %cst_85 = arith.constant 1.000000e+00 : f32
    %846 = vector.broadcast %cst_85 : f32 to vector<8x96xf32>
    %847 = arith.addf %846, %845 : vector<8x96xf32>
    %848 = arith.divf %846, %847 : vector<8x96xf32>
    %849 = vector.extract_strided_slice %826 {offsets = [0, 96], sizes = [8, 32], strides = [1, 1]} : vector<8x128xf32> to vector<8x32xf32>
    %850 = math.tanh %849 : vector<8x32xf32>
    %851 = vector.extract_strided_slice %848 {offsets = [0, 32], sizes = [8, 32], strides = [1, 1]} : vector<8x96xf32> to vector<8x32xf32>
    %852 = arith.mulf %851, %813 : vector<8x32xf32>
    %853 = vector.extract_strided_slice %848 {offsets = [0, 0], sizes = [8, 32], strides = [1, 1]} : vector<8x96xf32> to vector<8x32xf32>
    %854 = arith.mulf %853, %850 : vector<8x32xf32>
    %855 = arith.addf %852, %854 : vector<8x32xf32>
    %856 = vector.extract_strided_slice %848 {offsets = [0, 64], sizes = [8, 32], strides = [1, 1]} : vector<8x96xf32> to vector<8x32xf32>
    %857 = math.tanh %855 : vector<8x32xf32>
    %858 = arith.mulf %856, %857 : vector<8x32xf32>
    %859 = tpu.concatenate %842, %858 in 1 : vector<8x32xf32>, vector<8x32xf32> -> vector<8x64xf32>
    %cst_86 = arith.constant dense<0.000000e+00> : vector<8x256xf32>
    %860 = tpu.matmul %859, %597, %cst_86 {dimension_numbers = #tpu.dot_dimension_numbers<[1], [0], [0], [1], [0, 0, 1, 1], [], []>} : vector<8x64xf32>, vector<64x256xf32>, vector<8x256xf32> -> vector<8x256xf32>
    %861 = vector.extract_strided_slice %860 {offsets = [0, 0], sizes = [8, 128], strides = [1, 1]} : vector<8x256xf32> to vector<8x128xf32>
    %862 = vector.extract_strided_slice %605 {offsets = [6, 0, 0], sizes = [1, 8, 128], strides = [1, 1, 1]} : vector<13x8x256xf32> to vector<1x8x128xf32>
    %863 = vector.shape_cast %862 : vector<1x8x128xf32> to vector<8x128xf32>
    %864 = arith.addf %861, %863 : vector<8x128xf32>
    %865 = vector.extract_strided_slice %860 {offsets = [0, 128], sizes = [8, 128], strides = [1, 1]} : vector<8x256xf32> to vector<8x128xf32>
    %866 = vector.extract_strided_slice %605 {offsets = [6, 0, 128], sizes = [1, 8, 128], strides = [1, 1, 1]} : vector<13x8x256xf32> to vector<1x8x128xf32>
    %867 = vector.shape_cast %866 : vector<1x8x128xf32> to vector<8x128xf32>
    %868 = arith.addf %865, %867 : vector<8x128xf32>
    %869 = vector.extract_strided_slice %864 {offsets = [0, 0], sizes = [8, 96], strides = [1, 1]} : vector<8x128xf32> to vector<8x96xf32>
    %870 = arith.negf %869 : vector<8x96xf32>
    %871 = math.exp %870 : vector<8x96xf32>
    %cst_87 = arith.constant 1.000000e+00 : f32
    %872 = vector.broadcast %cst_87 : f32 to vector<8x96xf32>
    %873 = arith.addf %872, %871 : vector<8x96xf32>
    %874 = arith.divf %872, %873 : vector<8x96xf32>
    %875 = vector.extract_strided_slice %864 {offsets = [0, 96], sizes = [8, 32], strides = [1, 1]} : vector<8x128xf32> to vector<8x32xf32>
    %876 = math.tanh %875 : vector<8x32xf32>
    %877 = vector.extract_strided_slice %874 {offsets = [0, 32], sizes = [8, 32], strides = [1, 1]} : vector<8x96xf32> to vector<8x32xf32>
    %878 = arith.mulf %877, %839 : vector<8x32xf32>
    %879 = vector.extract_strided_slice %874 {offsets = [0, 0], sizes = [8, 32], strides = [1, 1]} : vector<8x96xf32> to vector<8x32xf32>
    %880 = arith.mulf %879, %876 : vector<8x32xf32>
    %881 = arith.addf %878, %880 : vector<8x32xf32>
    %882 = vector.extract_strided_slice %874 {offsets = [0, 64], sizes = [8, 32], strides = [1, 1]} : vector<8x96xf32> to vector<8x32xf32>
    %883 = math.tanh %881 : vector<8x32xf32>
    %884 = arith.mulf %882, %883 : vector<8x32xf32>
    %885 = vector.extract_strided_slice %868 {offsets = [0, 0], sizes = [8, 96], strides = [1, 1]} : vector<8x128xf32> to vector<8x96xf32>
    %886 = arith.negf %885 : vector<8x96xf32>
    %887 = math.exp %886 : vector<8x96xf32>
    %cst_88 = arith.constant 1.000000e+00 : f32
    %888 = vector.broadcast %cst_88 : f32 to vector<8x96xf32>
    %889 = arith.addf %888, %887 : vector<8x96xf32>
    %890 = arith.divf %888, %889 : vector<8x96xf32>
    %891 = vector.extract_strided_slice %868 {offsets = [0, 96], sizes = [8, 32], strides = [1, 1]} : vector<8x128xf32> to vector<8x32xf32>
    %892 = math.tanh %891 : vector<8x32xf32>
    %893 = vector.extract_strided_slice %890 {offsets = [0, 32], sizes = [8, 32], strides = [1, 1]} : vector<8x96xf32> to vector<8x32xf32>
    %894 = arith.mulf %893, %855 : vector<8x32xf32>
    %895 = vector.extract_strided_slice %890 {offsets = [0, 0], sizes = [8, 32], strides = [1, 1]} : vector<8x96xf32> to vector<8x32xf32>
    %896 = arith.mulf %895, %892 : vector<8x32xf32>
    %897 = arith.addf %894, %896 : vector<8x32xf32>
    %898 = vector.extract_strided_slice %890 {offsets = [0, 64], sizes = [8, 32], strides = [1, 1]} : vector<8x96xf32> to vector<8x32xf32>
    %899 = math.tanh %897 : vector<8x32xf32>
    %900 = arith.mulf %898, %899 : vector<8x32xf32>
    %901 = tpu.concatenate %884, %900 in 1 : vector<8x32xf32>, vector<8x32xf32> -> vector<8x64xf32>
    %cst_89 = arith.constant dense<0.000000e+00> : vector<8x256xf32>
    %902 = tpu.matmul %901, %597, %cst_89 {dimension_numbers = #tpu.dot_dimension_numbers<[1], [0], [0], [1], [0, 0, 1, 1], [], []>} : vector<8x64xf32>, vector<64x256xf32>, vector<8x256xf32> -> vector<8x256xf32>
    %903 = vector.extract_strided_slice %902 {offsets = [0, 0], sizes = [8, 128], strides = [1, 1]} : vector<8x256xf32> to vector<8x128xf32>
    %904 = vector.extract_strided_slice %605 {offsets = [7, 0, 0], sizes = [1, 8, 128], strides = [1, 1, 1]} : vector<13x8x256xf32> to vector<1x8x128xf32>
    %905 = vector.shape_cast %904 : vector<1x8x128xf32> to vector<8x128xf32>
    %906 = arith.addf %903, %905 : vector<8x128xf32>
    %907 = vector.extract_strided_slice %902 {offsets = [0, 128], sizes = [8, 128], strides = [1, 1]} : vector<8x256xf32> to vector<8x128xf32>
    %908 = vector.extract_strided_slice %605 {offsets = [5, 0, 128], sizes = [1, 8, 128], strides = [1, 1, 1]} : vector<13x8x256xf32> to vector<1x8x128xf32>
    %909 = vector.shape_cast %908 : vector<1x8x128xf32> to vector<8x128xf32>
    %910 = arith.addf %907, %909 : vector<8x128xf32>
    %911 = vector.extract_strided_slice %906 {offsets = [0, 0], sizes = [8, 96], strides = [1, 1]} : vector<8x128xf32> to vector<8x96xf32>
    %912 = arith.negf %911 : vector<8x96xf32>
    %913 = math.exp %912 : vector<8x96xf32>
    %cst_90 = arith.constant 1.000000e+00 : f32
    %914 = vector.broadcast %cst_90 : f32 to vector<8x96xf32>
    %915 = arith.addf %914, %913 : vector<8x96xf32>
    %916 = arith.divf %914, %915 : vector<8x96xf32>
    %917 = vector.extract_strided_slice %906 {offsets = [0, 96], sizes = [8, 32], strides = [1, 1]} : vector<8x128xf32> to vector<8x32xf32>
    %918 = math.tanh %917 : vector<8x32xf32>
    %919 = vector.extract_strided_slice %916 {offsets = [0, 32], sizes = [8, 32], strides = [1, 1]} : vector<8x96xf32> to vector<8x32xf32>
    %920 = arith.mulf %919, %881 : vector<8x32xf32>
    %921 = vector.extract_strided_slice %916 {offsets = [0, 0], sizes = [8, 32], strides = [1, 1]} : vector<8x96xf32> to vector<8x32xf32>
    %922 = arith.mulf %921, %918 : vector<8x32xf32>
    %923 = arith.addf %920, %922 : vector<8x32xf32>
    %924 = vector.extract_strided_slice %916 {offsets = [0, 64], sizes = [8, 32], strides = [1, 1]} : vector<8x96xf32> to vector<8x32xf32>
    %925 = math.tanh %923 : vector<8x32xf32>
    %926 = arith.mulf %924, %925 : vector<8x32xf32>
    %927 = vector.extract_strided_slice %910 {offsets = [0, 0], sizes = [8, 96], strides = [1, 1]} : vector<8x128xf32> to vector<8x96xf32>
    %928 = arith.negf %927 : vector<8x96xf32>
    %929 = math.exp %928 : vector<8x96xf32>
    %cst_91 = arith.constant 1.000000e+00 : f32
    %930 = vector.broadcast %cst_91 : f32 to vector<8x96xf32>
    %931 = arith.addf %930, %929 : vector<8x96xf32>
    %932 = arith.divf %930, %931 : vector<8x96xf32>
    %933 = vector.extract_strided_slice %910 {offsets = [0, 96], sizes = [8, 32], strides = [1, 1]} : vector<8x128xf32> to vector<8x32xf32>
    %934 = math.tanh %933 : vector<8x32xf32>
    %935 = vector.extract_strided_slice %932 {offsets = [0, 32], sizes = [8, 32], strides = [1, 1]} : vector<8x96xf32> to vector<8x32xf32>
    %936 = arith.mulf %935, %897 : vector<8x32xf32>
    %937 = vector.extract_strided_slice %932 {offsets = [0, 0], sizes = [8, 32], strides = [1, 1]} : vector<8x96xf32> to vector<8x32xf32>
    %938 = arith.mulf %937, %934 : vector<8x32xf32>
    %939 = arith.addf %936, %938 : vector<8x32xf32>
    %940 = vector.extract_strided_slice %932 {offsets = [0, 64], sizes = [8, 32], strides = [1, 1]} : vector<8x96xf32> to vector<8x32xf32>
    %941 = math.tanh %939 : vector<8x32xf32>
    %942 = arith.mulf %940, %941 : vector<8x32xf32>
    %943 = tpu.concatenate %926, %942 in 1 : vector<8x32xf32>, vector<8x32xf32> -> vector<8x64xf32>
    %cst_92 = arith.constant dense<0.000000e+00> : vector<8x256xf32>
    %944 = tpu.matmul %943, %597, %cst_92 {dimension_numbers = #tpu.dot_dimension_numbers<[1], [0], [0], [1], [0, 0, 1, 1], [], []>} : vector<8x64xf32>, vector<64x256xf32>, vector<8x256xf32> -> vector<8x256xf32>
    %945 = vector.extract_strided_slice %944 {offsets = [0, 0], sizes = [8, 128], strides = [1, 1]} : vector<8x256xf32> to vector<8x128xf32>
    %946 = vector.extract_strided_slice %605 {offsets = [8, 0, 0], sizes = [1, 8, 128], strides = [1, 1, 1]} : vector<13x8x256xf32> to vector<1x8x128xf32>
    %947 = vector.shape_cast %946 : vector<1x8x128xf32> to vector<8x128xf32>
    %948 = arith.addf %945, %947 : vector<8x128xf32>
    %949 = vector.extract_strided_slice %944 {offsets = [0, 128], sizes = [8, 128], strides = [1, 1]} : vector<8x256xf32> to vector<8x128xf32>
    %950 = vector.extract_strided_slice %605 {offsets = [4, 0, 128], sizes = [1, 8, 128], strides = [1, 1, 1]} : vector<13x8x256xf32> to vector<1x8x128xf32>
    %951 = vector.shape_cast %950 : vector<1x8x128xf32> to vector<8x128xf32>
    %952 = arith.addf %949, %951 : vector<8x128xf32>
    %953 = vector.extract_strided_slice %948 {offsets = [0, 0], sizes = [8, 96], strides = [1, 1]} : vector<8x128xf32> to vector<8x96xf32>
    %954 = arith.negf %953 : vector<8x96xf32>
    %955 = math.exp %954 : vector<8x96xf32>
    %cst_93 = arith.constant 1.000000e+00 : f32
    %956 = vector.broadcast %cst_93 : f32 to vector<8x96xf32>
    %957 = arith.addf %956, %955 : vector<8x96xf32>
    %958 = arith.divf %956, %957 : vector<8x96xf32>
    %959 = vector.extract_strided_slice %948 {offsets = [0, 96], sizes = [8, 32], strides = [1, 1]} : vector<8x128xf32> to vector<8x32xf32>
    %960 = math.tanh %959 : vector<8x32xf32>
    %961 = vector.extract_strided_slice %958 {offsets = [0, 32], sizes = [8, 32], strides = [1, 1]} : vector<8x96xf32> to vector<8x32xf32>
    %962 = arith.mulf %961, %923 : vector<8x32xf32>
    %963 = vector.extract_strided_slice %958 {offsets = [0, 0], sizes = [8, 32], strides = [1, 1]} : vector<8x96xf32> to vector<8x32xf32>
    %964 = arith.mulf %963, %960 : vector<8x32xf32>
    %965 = arith.addf %962, %964 : vector<8x32xf32>
    %966 = vector.extract_strided_slice %958 {offsets = [0, 64], sizes = [8, 32], strides = [1, 1]} : vector<8x96xf32> to vector<8x32xf32>
    %967 = math.tanh %965 : vector<8x32xf32>
    %968 = arith.mulf %966, %967 : vector<8x32xf32>
    %969 = vector.extract_strided_slice %952 {offsets = [0, 0], sizes = [8, 96], strides = [1, 1]} : vector<8x128xf32> to vector<8x96xf32>
    %970 = arith.negf %969 : vector<8x96xf32>
    %971 = math.exp %970 : vector<8x96xf32>
    %cst_94 = arith.constant 1.000000e+00 : f32
    %972 = vector.broadcast %cst_94 : f32 to vector<8x96xf32>
    %973 = arith.addf %972, %971 : vector<8x96xf32>
    %974 = arith.divf %972, %973 : vector<8x96xf32>
    %975 = vector.extract_strided_slice %952 {offsets = [0, 96], sizes = [8, 32], strides = [1, 1]} : vector<8x128xf32> to vector<8x32xf32>
    %976 = math.tanh %975 : vector<8x32xf32>
    %977 = vector.extract_strided_slice %974 {offsets = [0, 32], sizes = [8, 32], strides = [1, 1]} : vector<8x96xf32> to vector<8x32xf32>
    %978 = arith.mulf %977, %939 : vector<8x32xf32>
    %979 = vector.extract_strided_slice %974 {offsets = [0, 0], sizes = [8, 32], strides = [1, 1]} : vector<8x96xf32> to vector<8x32xf32>
    %980 = arith.mulf %979, %976 : vector<8x32xf32>
    %981 = arith.addf %978, %980 : vector<8x32xf32>
    %982 = vector.extract_strided_slice %974 {offsets = [0, 64], sizes = [8, 32], strides = [1, 1]} : vector<8x96xf32> to vector<8x32xf32>
    %983 = math.tanh %981 : vector<8x32xf32>
    %984 = arith.mulf %982, %983 : vector<8x32xf32>
    %985 = tpu.concatenate %968, %984 in 1 : vector<8x32xf32>, vector<8x32xf32> -> vector<8x64xf32>
    %cst_95 = arith.constant dense<0.000000e+00> : vector<8x256xf32>
    %986 = tpu.matmul %985, %597, %cst_95 {dimension_numbers = #tpu.dot_dimension_numbers<[1], [0], [0], [1], [0, 0, 1, 1], [], []>} : vector<8x64xf32>, vector<64x256xf32>, vector<8x256xf32> -> vector<8x256xf32>
    %987 = vector.extract_strided_slice %986 {offsets = [0, 0], sizes = [8, 128], strides = [1, 1]} : vector<8x256xf32> to vector<8x128xf32>
    %988 = vector.extract_strided_slice %605 {offsets = [9, 0, 0], sizes = [1, 8, 128], strides = [1, 1, 1]} : vector<13x8x256xf32> to vector<1x8x128xf32>
    %989 = vector.shape_cast %988 : vector<1x8x128xf32> to vector<8x128xf32>
    %990 = arith.addf %987, %989 : vector<8x128xf32>
    %991 = vector.extract_strided_slice %986 {offsets = [0, 128], sizes = [8, 128], strides = [1, 1]} : vector<8x256xf32> to vector<8x128xf32>
    %992 = vector.extract_strided_slice %605 {offsets = [3, 0, 128], sizes = [1, 8, 128], strides = [1, 1, 1]} : vector<13x8x256xf32> to vector<1x8x128xf32>
    %993 = vector.shape_cast %992 : vector<1x8x128xf32> to vector<8x128xf32>
    %994 = arith.addf %991, %993 : vector<8x128xf32>
    %995 = vector.extract_strided_slice %990 {offsets = [0, 0], sizes = [8, 96], strides = [1, 1]} : vector<8x128xf32> to vector<8x96xf32>
    %996 = arith.negf %995 : vector<8x96xf32>
    %997 = math.exp %996 : vector<8x96xf32>
    %cst_96 = arith.constant 1.000000e+00 : f32
    %998 = vector.broadcast %cst_96 : f32 to vector<8x96xf32>
    %999 = arith.addf %998, %997 : vector<8x96xf32>
    %1000 = arith.divf %998, %999 : vector<8x96xf32>
    %1001 = vector.extract_strided_slice %990 {offsets = [0, 96], sizes = [8, 32], strides = [1, 1]} : vector<8x128xf32> to vector<8x32xf32>
    %1002 = math.tanh %1001 : vector<8x32xf32>
    %1003 = vector.extract_strided_slice %1000 {offsets = [0, 32], sizes = [8, 32], strides = [1, 1]} : vector<8x96xf32> to vector<8x32xf32>
    %1004 = arith.mulf %1003, %965 : vector<8x32xf32>
    %1005 = vector.extract_strided_slice %1000 {offsets = [0, 0], sizes = [8, 32], strides = [1, 1]} : vector<8x96xf32> to vector<8x32xf32>
    %1006 = arith.mulf %1005, %1002 : vector<8x32xf32>
    %1007 = arith.addf %1004, %1006 : vector<8x32xf32>
    %1008 = vector.extract_strided_slice %1000 {offsets = [0, 64], sizes = [8, 32], strides = [1, 1]} : vector<8x96xf32> to vector<8x32xf32>
    %1009 = math.tanh %1007 : vector<8x32xf32>
    %1010 = arith.mulf %1008, %1009 : vector<8x32xf32>
    %1011 = vector.extract_strided_slice %994 {offsets = [0, 0], sizes = [8, 96], strides = [1, 1]} : vector<8x128xf32> to vector<8x96xf32>
    %1012 = arith.negf %1011 : vector<8x96xf32>
    %1013 = math.exp %1012 : vector<8x96xf32>
    %cst_97 = arith.constant 1.000000e+00 : f32
    %1014 = vector.broadcast %cst_97 : f32 to vector<8x96xf32>
    %1015 = arith.addf %1014, %1013 : vector<8x96xf32>
    %1016 = arith.divf %1014, %1015 : vector<8x96xf32>
    %1017 = vector.extract_strided_slice %994 {offsets = [0, 96], sizes = [8, 32], strides = [1, 1]} : vector<8x128xf32> to vector<8x32xf32>
    %1018 = math.tanh %1017 : vector<8x32xf32>
    %1019 = vector.extract_strided_slice %1016 {offsets = [0, 32], sizes = [8, 32], strides = [1, 1]} : vector<8x96xf32> to vector<8x32xf32>
    %1020 = arith.mulf %1019, %981 : vector<8x32xf32>
    %1021 = vector.extract_strided_slice %1016 {offsets = [0, 0], sizes = [8, 32], strides = [1, 1]} : vector<8x96xf32> to vector<8x32xf32>
    %1022 = arith.mulf %1021, %1018 : vector<8x32xf32>
    %1023 = arith.addf %1020, %1022 : vector<8x32xf32>
    %1024 = vector.extract_strided_slice %1016 {offsets = [0, 64], sizes = [8, 32], strides = [1, 1]} : vector<8x96xf32> to vector<8x32xf32>
    %1025 = math.tanh %1023 : vector<8x32xf32>
    %1026 = arith.mulf %1024, %1025 : vector<8x32xf32>
    %1027 = tpu.concatenate %1010, %1026 in 1 : vector<8x32xf32>, vector<8x32xf32> -> vector<8x64xf32>
    %cst_98 = arith.constant dense<0.000000e+00> : vector<8x256xf32>
    %1028 = tpu.matmul %1027, %597, %cst_98 {dimension_numbers = #tpu.dot_dimension_numbers<[1], [0], [0], [1], [0, 0, 1, 1], [], []>} : vector<8x64xf32>, vector<64x256xf32>, vector<8x256xf32> -> vector<8x256xf32>
    %1029 = vector.extract_strided_slice %1028 {offsets = [0, 0], sizes = [8, 128], strides = [1, 1]} : vector<8x256xf32> to vector<8x128xf32>
    %1030 = vector.extract_strided_slice %605 {offsets = [10, 0, 0], sizes = [1, 8, 128], strides = [1, 1, 1]} : vector<13x8x256xf32> to vector<1x8x128xf32>
    %1031 = vector.shape_cast %1030 : vector<1x8x128xf32> to vector<8x128xf32>
    %1032 = arith.addf %1029, %1031 : vector<8x128xf32>
    %1033 = vector.extract_strided_slice %1028 {offsets = [0, 128], sizes = [8, 128], strides = [1, 1]} : vector<8x256xf32> to vector<8x128xf32>
    %1034 = vector.extract_strided_slice %605 {offsets = [2, 0, 128], sizes = [1, 8, 128], strides = [1, 1, 1]} : vector<13x8x256xf32> to vector<1x8x128xf32>
    %1035 = vector.shape_cast %1034 : vector<1x8x128xf32> to vector<8x128xf32>
    %1036 = arith.addf %1033, %1035 : vector<8x128xf32>
    %1037 = vector.extract_strided_slice %1032 {offsets = [0, 0], sizes = [8, 96], strides = [1, 1]} : vector<8x128xf32> to vector<8x96xf32>
    %1038 = arith.negf %1037 : vector<8x96xf32>
    %1039 = math.exp %1038 : vector<8x96xf32>
    %cst_99 = arith.constant 1.000000e+00 : f32
    %1040 = vector.broadcast %cst_99 : f32 to vector<8x96xf32>
    %1041 = arith.addf %1040, %1039 : vector<8x96xf32>
    %1042 = arith.divf %1040, %1041 : vector<8x96xf32>
    %1043 = vector.extract_strided_slice %1032 {offsets = [0, 96], sizes = [8, 32], strides = [1, 1]} : vector<8x128xf32> to vector<8x32xf32>
    %1044 = math.tanh %1043 : vector<8x32xf32>
    %1045 = vector.extract_strided_slice %1042 {offsets = [0, 32], sizes = [8, 32], strides = [1, 1]} : vector<8x96xf32> to vector<8x32xf32>
    %1046 = arith.mulf %1045, %1007 : vector<8x32xf32>
    %1047 = vector.extract_strided_slice %1042 {offsets = [0, 0], sizes = [8, 32], strides = [1, 1]} : vector<8x96xf32> to vector<8x32xf32>
    %1048 = arith.mulf %1047, %1044 : vector<8x32xf32>
    %1049 = arith.addf %1046, %1048 : vector<8x32xf32>
    %1050 = vector.extract_strided_slice %1042 {offsets = [0, 64], sizes = [8, 32], strides = [1, 1]} : vector<8x96xf32> to vector<8x32xf32>
    %1051 = math.tanh %1049 : vector<8x32xf32>
    %1052 = arith.mulf %1050, %1051 : vector<8x32xf32>
    %1053 = vector.extract_strided_slice %1036 {offsets = [0, 0], sizes = [8, 96], strides = [1, 1]} : vector<8x128xf32> to vector<8x96xf32>
    %1054 = arith.negf %1053 : vector<8x96xf32>
    %1055 = math.exp %1054 : vector<8x96xf32>
    %cst_100 = arith.constant 1.000000e+00 : f32
    %1056 = vector.broadcast %cst_100 : f32 to vector<8x96xf32>
    %1057 = arith.addf %1056, %1055 : vector<8x96xf32>
    %1058 = arith.divf %1056, %1057 : vector<8x96xf32>
    %1059 = vector.extract_strided_slice %1036 {offsets = [0, 96], sizes = [8, 32], strides = [1, 1]} : vector<8x128xf32> to vector<8x32xf32>
    %1060 = math.tanh %1059 : vector<8x32xf32>
    %1061 = vector.extract_strided_slice %1058 {offsets = [0, 32], sizes = [8, 32], strides = [1, 1]} : vector<8x96xf32> to vector<8x32xf32>
    %1062 = arith.mulf %1061, %1023 : vector<8x32xf32>
    %1063 = vector.extract_strided_slice %1058 {offsets = [0, 0], sizes = [8, 32], strides = [1, 1]} : vector<8x96xf32> to vector<8x32xf32>
    %1064 = arith.mulf %1063, %1060 : vector<8x32xf32>
    %1065 = arith.addf %1062, %1064 : vector<8x32xf32>
    %1066 = vector.extract_strided_slice %1058 {offsets = [0, 64], sizes = [8, 32], strides = [1, 1]} : vector<8x96xf32> to vector<8x32xf32>
    %1067 = math.tanh %1065 : vector<8x32xf32>
    %1068 = arith.mulf %1066, %1067 : vector<8x32xf32>
    %1069 = tpu.concatenate %1052, %1068 in 1 : vector<8x32xf32>, vector<8x32xf32> -> vector<8x64xf32>
    %cst_101 = arith.constant dense<0.000000e+00> : vector<8x256xf32>
    %1070 = tpu.matmul %1069, %597, %cst_101 {dimension_numbers = #tpu.dot_dimension_numbers<[1], [0], [0], [1], [0, 0, 1, 1], [], []>} : vector<8x64xf32>, vector<64x256xf32>, vector<8x256xf32> -> vector<8x256xf32>
    %1071 = vector.extract_strided_slice %1070 {offsets = [0, 0], sizes = [8, 128], strides = [1, 1]} : vector<8x256xf32> to vector<8x128xf32>
    %1072 = vector.extract_strided_slice %605 {offsets = [11, 0, 0], sizes = [1, 8, 128], strides = [1, 1, 1]} : vector<13x8x256xf32> to vector<1x8x128xf32>
    %1073 = vector.shape_cast %1072 : vector<1x8x128xf32> to vector<8x128xf32>
    %1074 = arith.addf %1071, %1073 : vector<8x128xf32>
    %1075 = vector.extract_strided_slice %1070 {offsets = [0, 128], sizes = [8, 128], strides = [1, 1]} : vector<8x256xf32> to vector<8x128xf32>
    %1076 = vector.extract_strided_slice %605 {offsets = [1, 0, 128], sizes = [1, 8, 128], strides = [1, 1, 1]} : vector<13x8x256xf32> to vector<1x8x128xf32>
    %1077 = vector.shape_cast %1076 : vector<1x8x128xf32> to vector<8x128xf32>
    %1078 = arith.addf %1075, %1077 : vector<8x128xf32>
    %1079 = vector.extract_strided_slice %1074 {offsets = [0, 0], sizes = [8, 96], strides = [1, 1]} : vector<8x128xf32> to vector<8x96xf32>
    %1080 = arith.negf %1079 : vector<8x96xf32>
    %1081 = math.exp %1080 : vector<8x96xf32>
    %cst_102 = arith.constant 1.000000e+00 : f32
    %1082 = vector.broadcast %cst_102 : f32 to vector<8x96xf32>
    %1083 = arith.addf %1082, %1081 : vector<8x96xf32>
    %1084 = arith.divf %1082, %1083 : vector<8x96xf32>
    %1085 = vector.extract_strided_slice %1074 {offsets = [0, 96], sizes = [8, 32], strides = [1, 1]} : vector<8x128xf32> to vector<8x32xf32>
    %1086 = math.tanh %1085 : vector<8x32xf32>
    %1087 = vector.extract_strided_slice %1084 {offsets = [0, 32], sizes = [8, 32], strides = [1, 1]} : vector<8x96xf32> to vector<8x32xf32>
    %1088 = arith.mulf %1087, %1049 : vector<8x32xf32>
    %1089 = vector.extract_strided_slice %1084 {offsets = [0, 0], sizes = [8, 32], strides = [1, 1]} : vector<8x96xf32> to vector<8x32xf32>
    %1090 = arith.mulf %1089, %1086 : vector<8x32xf32>
    %1091 = arith.addf %1088, %1090 : vector<8x32xf32>
    %1092 = vector.extract_strided_slice %1084 {offsets = [0, 64], sizes = [8, 32], strides = [1, 1]} : vector<8x96xf32> to vector<8x32xf32>
    %1093 = math.tanh %1091 : vector<8x32xf32>
    %1094 = arith.mulf %1092, %1093 : vector<8x32xf32>
    %1095 = vector.extract_strided_slice %1078 {offsets = [0, 0], sizes = [8, 96], strides = [1, 1]} : vector<8x128xf32> to vector<8x96xf32>
    %1096 = arith.negf %1095 : vector<8x96xf32>
    %1097 = math.exp %1096 : vector<8x96xf32>
    %cst_103 = arith.constant 1.000000e+00 : f32
    %1098 = vector.broadcast %cst_103 : f32 to vector<8x96xf32>
    %1099 = arith.addf %1098, %1097 : vector<8x96xf32>
    %1100 = arith.divf %1098, %1099 : vector<8x96xf32>
    %1101 = vector.extract_strided_slice %1078 {offsets = [0, 96], sizes = [8, 32], strides = [1, 1]} : vector<8x128xf32> to vector<8x32xf32>
    %1102 = math.tanh %1101 : vector<8x32xf32>
    %1103 = vector.extract_strided_slice %1100 {offsets = [0, 32], sizes = [8, 32], strides = [1, 1]} : vector<8x96xf32> to vector<8x32xf32>
    %1104 = arith.mulf %1103, %1065 : vector<8x32xf32>
    %1105 = vector.extract_strided_slice %1100 {offsets = [0, 0], sizes = [8, 32], strides = [1, 1]} : vector<8x96xf32> to vector<8x32xf32>
    %1106 = arith.mulf %1105, %1102 : vector<8x32xf32>
    %1107 = arith.addf %1104, %1106 : vector<8x32xf32>
    %1108 = vector.extract_strided_slice %1100 {offsets = [0, 64], sizes = [8, 32], strides = [1, 1]} : vector<8x96xf32> to vector<8x32xf32>
    %1109 = math.tanh %1107 : vector<8x32xf32>
    %1110 = arith.mulf %1108, %1109 : vector<8x32xf32>
    %1111 = tpu.concatenate %1094, %1110 in 1 : vector<8x32xf32>, vector<8x32xf32> -> vector<8x64xf32>
    %cst_104 = arith.constant dense<0.000000e+00> : vector<8x256xf32>
    %1112 = tpu.matmul %1111, %597, %cst_104 {dimension_numbers = #tpu.dot_dimension_numbers<[1], [0], [0], [1], [0, 0, 1, 1], [], []>} : vector<8x64xf32>, vector<64x256xf32>, vector<8x256xf32> -> vector<8x256xf32>
    %1113 = vector.extract_strided_slice %1112 {offsets = [0, 0], sizes = [8, 128], strides = [1, 1]} : vector<8x256xf32> to vector<8x128xf32>
    %1114 = vector.extract_strided_slice %605 {offsets = [12, 0, 0], sizes = [1, 8, 128], strides = [1, 1, 1]} : vector<13x8x256xf32> to vector<1x8x128xf32>
    %1115 = vector.shape_cast %1114 : vector<1x8x128xf32> to vector<8x128xf32>
    %1116 = arith.addf %1113, %1115 : vector<8x128xf32>
    %1117 = vector.extract_strided_slice %1112 {offsets = [0, 128], sizes = [8, 128], strides = [1, 1]} : vector<8x256xf32> to vector<8x128xf32>
    %1118 = vector.extract_strided_slice %605 {offsets = [0, 0, 128], sizes = [1, 8, 128], strides = [1, 1, 1]} : vector<13x8x256xf32> to vector<1x8x128xf32>
    %1119 = vector.shape_cast %1118 : vector<1x8x128xf32> to vector<8x128xf32>
    %1120 = arith.addf %1117, %1119 : vector<8x128xf32>
    %1121 = vector.extract_strided_slice %1116 {offsets = [0, 0], sizes = [8, 96], strides = [1, 1]} : vector<8x128xf32> to vector<8x96xf32>
    %1122 = arith.negf %1121 : vector<8x96xf32>
    %1123 = math.exp %1122 : vector<8x96xf32>
    %cst_105 = arith.constant 1.000000e+00 : f32
    %1124 = vector.broadcast %cst_105 : f32 to vector<8x96xf32>
    %1125 = arith.addf %1124, %1123 : vector<8x96xf32>
    %1126 = arith.divf %1124, %1125 : vector<8x96xf32>
    %1127 = vector.extract_strided_slice %1116 {offsets = [0, 96], sizes = [8, 32], strides = [1, 1]} : vector<8x128xf32> to vector<8x32xf32>
    %1128 = math.tanh %1127 : vector<8x32xf32>
    %1129 = vector.extract_strided_slice %1126 {offsets = [0, 32], sizes = [8, 32], strides = [1, 1]} : vector<8x96xf32> to vector<8x32xf32>
    %1130 = arith.mulf %1129, %1091 : vector<8x32xf32>
    %1131 = vector.extract_strided_slice %1126 {offsets = [0, 0], sizes = [8, 32], strides = [1, 1]} : vector<8x96xf32> to vector<8x32xf32>
    %1132 = arith.mulf %1131, %1128 : vector<8x32xf32>
    %1133 = arith.addf %1130, %1132 : vector<8x32xf32>
    %1134 = vector.extract_strided_slice %1126 {offsets = [0, 64], sizes = [8, 32], strides = [1, 1]} : vector<8x96xf32> to vector<8x32xf32>
    %1135 = math.tanh %1133 : vector<8x32xf32>
    %1136 = arith.mulf %1134, %1135 : vector<8x32xf32>
    %1137 = vector.extract_strided_slice %1120 {offsets = [0, 0], sizes = [8, 96], strides = [1, 1]} : vector<8x128xf32> to vector<8x96xf32>
    %1138 = arith.negf %1137 : vector<8x96xf32>
    %1139 = math.exp %1138 : vector<8x96xf32>
    %cst_106 = arith.constant 1.000000e+00 : f32
    %1140 = vector.broadcast %cst_106 : f32 to vector<8x96xf32>
    %1141 = arith.addf %1140, %1139 : vector<8x96xf32>
    %1142 = arith.divf %1140, %1141 : vector<8x96xf32>
    %1143 = vector.extract_strided_slice %1120 {offsets = [0, 96], sizes = [8, 32], strides = [1, 1]} : vector<8x128xf32> to vector<8x32xf32>
    %1144 = math.tanh %1143 : vector<8x32xf32>
    %1145 = vector.extract_strided_slice %1142 {offsets = [0, 32], sizes = [8, 32], strides = [1, 1]} : vector<8x96xf32> to vector<8x32xf32>
    %1146 = arith.mulf %1145, %1107 : vector<8x32xf32>
    %1147 = vector.extract_strided_slice %1142 {offsets = [0, 0], sizes = [8, 32], strides = [1, 1]} : vector<8x96xf32> to vector<8x32xf32>
    %1148 = arith.mulf %1147, %1144 : vector<8x32xf32>
    %1149 = arith.addf %1146, %1148 : vector<8x32xf32>
    %1150 = vector.extract_strided_slice %1142 {offsets = [0, 64], sizes = [8, 32], strides = [1, 1]} : vector<8x96xf32> to vector<8x32xf32>
    %1151 = math.tanh %1149 : vector<8x32xf32>
    %1152 = arith.mulf %1150, %1151 : vector<8x32xf32>
    %1153 = vector.shape_cast %632 : vector<8x32xf32> to vector<1x8x32xf32>
    %1154 = vector.shape_cast %674 : vector<8x32xf32> to vector<1x8x32xf32>
    %1155 = vector.shape_cast %716 : vector<8x32xf32> to vector<1x8x32xf32>
    %1156 = vector.shape_cast %758 : vector<8x32xf32> to vector<1x8x32xf32>
    %1157 = vector.shape_cast %800 : vector<8x32xf32> to vector<1x8x32xf32>
    %1158 = vector.shape_cast %842 : vector<8x32xf32> to vector<1x8x32xf32>
    %1159 = vector.shape_cast %884 : vector<8x32xf32> to vector<1x8x32xf32>
    %1160 = vector.shape_cast %926 : vector<8x32xf32> to vector<1x8x32xf32>
    %1161 = vector.shape_cast %968 : vector<8x32xf32> to vector<1x8x32xf32>
    %1162 = vector.shape_cast %1010 : vector<8x32xf32> to vector<1x8x32xf32>
    %1163 = vector.shape_cast %1052 : vector<8x32xf32> to vector<1x8x32xf32>
    %1164 = vector.shape_cast %1094 : vector<8x32xf32> to vector<1x8x32xf32>
    %1165 = vector.shape_cast %1136 : vector<8x32xf32> to vector<1x8x32xf32>
    %1166 = tpu.concatenate %1153, %1154, %1155, %1156, %1157, %1158, %1159, %1160, %1161, %1162, %1163, %1164, %1165 in 0 : vector<1x8x32xf32>, vector<1x8x32xf32>, vector<1x8x32xf32>, vector<1x8x32xf32>, vector<1x8x32xf32>, vector<1x8x32xf32>, vector<1x8x32xf32>, vector<1x8x32xf32>, vector<1x8x32xf32>, vector<1x8x32xf32>, vector<1x8x32xf32>, vector<1x8x32xf32>, vector<1x8x32xf32> -> vector<13x8x32xf32>
    %1167 = vector.shape_cast %1152 : vector<8x32xf32> to vector<1x8x32xf32>
    %1168 = vector.shape_cast %1110 : vector<8x32xf32> to vector<1x8x32xf32>
    %1169 = vector.shape_cast %1068 : vector<8x32xf32> to vector<1x8x32xf32>
    %1170 = vector.shape_cast %1026 : vector<8x32xf32> to vector<1x8x32xf32>
    %1171 = vector.shape_cast %984 : vector<8x32xf32> to vector<1x8x32xf32>
    %1172 = vector.shape_cast %942 : vector<8x32xf32> to vector<1x8x32xf32>
    %1173 = vector.shape_cast %900 : vector<8x32xf32> to vector<1x8x32xf32>
    %1174 = vector.shape_cast %858 : vector<8x32xf32> to vector<1x8x32xf32>
    %1175 = vector.shape_cast %816 : vector<8x32xf32> to vector<1x8x32xf32>
    %1176 = vector.shape_cast %774 : vector<8x32xf32> to vector<1x8x32xf32>
    %1177 = vector.shape_cast %732 : vector<8x32xf32> to vector<1x8x32xf32>
    %1178 = vector.shape_cast %690 : vector<8x32xf32> to vector<1x8x32xf32>
    %1179 = vector.shape_cast %648 : vector<8x32xf32> to vector<1x8x32xf32>
    %1180 = tpu.concatenate %1167, %1168, %1169, %1170, %1171, %1172, %1173, %1174, %1175, %1176, %1177, %1178, %1179 in 0 : vector<1x8x32xf32>, vector<1x8x32xf32>, vector<1x8x32xf32>, vector<1x8x32xf32>, vector<1x8x32xf32>, vector<1x8x32xf32>, vector<1x8x32xf32>, vector<1x8x32xf32>, vector<1x8x32xf32>, vector<1x8x32xf32>, vector<1x8x32xf32>, vector<1x8x32xf32>, vector<1x8x32xf32> -> vector<13x8x32xf32>
    %1181 = tpu.concatenate %1166, %1180 in 2 : vector<13x8x32xf32>, vector<13x8x32xf32> -> vector<13x8x64xf32>
    %c0_107 = arith.constant 0 : index
    %c0_108 = arith.constant 0 : index
    %1182 = vector.load %arg13[%c0_107, %c0_108] : memref<64x256xf32, #tpu.memory_space<vmem>>, vector<64x256xf32>
    %c0_109 = arith.constant 0 : index
    %c0_110 = arith.constant 0 : index
    %1183 = vector.load %arg14[%c0_109, %c0_110] : memref<64x256xf32, #tpu.memory_space<vmem>>, vector<64x256xf32>
    %c0_111 = arith.constant 0 : index
    %c0_112 = arith.constant 0 : index
    %1184 = vector.load %arg15[%c0_111, %c0_112] : memref<1x256xf32, #tpu.memory_space<vmem>>, vector<1x256xf32>
    %c0_113 = arith.constant 0 : index
    %c0_114 = arith.constant 0 : index
    %1185 = vector.load %arg16[%c0_113, %c0_114] : memref<8x64xf32, #tpu.memory_space<vmem>>, vector<8x64xf32>
    %c0_115 = arith.constant 0 : index
    %c0_116 = arith.constant 0 : index
    %1186 = vector.load %arg17[%c0_115, %c0_116] : memref<8x64xf32, #tpu.memory_space<vmem>>, vector<8x64xf32>
    %1187 = vector.shape_cast %1181 : vector<13x8x64xf32> to vector<104x64xf32>
    %cst_117 = arith.constant dense<0.000000e+00> : vector<104x256xf32>
    %1188 = tpu.matmul %1187, %1182, %cst_117 {dimension_numbers = #tpu.dot_dimension_numbers<[1], [0], [0], [1], [0, 0, 1, 1], [], []>} : vector<104x64xf32>, vector<64x256xf32>, vector<104x256xf32> -> vector<104x256xf32>
    %1189 = vector.broadcast %1184 : vector<1x256xf32> to vector<104x256xf32>
    %1190 = arith.addf %1188, %1189 : vector<104x256xf32>
    %1191 = vector.shape_cast %1190 : vector<104x256xf32> to vector<13x8x256xf32>
    %1192 = vector.extract_strided_slice %1186 {offsets = [0, 0], sizes = [8, 32], strides = [1, 1]} : vector<8x64xf32> to vector<8x32xf32>
    %1193 = vector.extract_strided_slice %1186 {offsets = [0, 32], sizes = [8, 32], strides = [1, 1]} : vector<8x64xf32> to vector<8x32xf32>
    %cst_118 = arith.constant dense<0.000000e+00> : vector<8x256xf32>
    %1194 = tpu.matmul %1185, %1183, %cst_118 {dimension_numbers = #tpu.dot_dimension_numbers<[1], [0], [0], [1], [0, 0, 1, 1], [], []>} : vector<8x64xf32>, vector<64x256xf32>, vector<8x256xf32> -> vector<8x256xf32>
    %1195 = vector.extract_strided_slice %1194 {offsets = [0, 0], sizes = [8, 128], strides = [1, 1]} : vector<8x256xf32> to vector<8x128xf32>
    %1196 = vector.extract_strided_slice %1191 {offsets = [0, 0, 0], sizes = [1, 8, 128], strides = [1, 1, 1]} : vector<13x8x256xf32> to vector<1x8x128xf32>
    %1197 = vector.shape_cast %1196 : vector<1x8x128xf32> to vector<8x128xf32>
    %1198 = arith.addf %1195, %1197 : vector<8x128xf32>
    %1199 = vector.extract_strided_slice %1194 {offsets = [0, 128], sizes = [8, 128], strides = [1, 1]} : vector<8x256xf32> to vector<8x128xf32>
    %1200 = vector.extract_strided_slice %1191 {offsets = [12, 0, 128], sizes = [1, 8, 128], strides = [1, 1, 1]} : vector<13x8x256xf32> to vector<1x8x128xf32>
    %1201 = vector.shape_cast %1200 : vector<1x8x128xf32> to vector<8x128xf32>
    %1202 = arith.addf %1199, %1201 : vector<8x128xf32>
    %1203 = vector.extract_strided_slice %1198 {offsets = [0, 0], sizes = [8, 96], strides = [1, 1]} : vector<8x128xf32> to vector<8x96xf32>
    %1204 = arith.negf %1203 : vector<8x96xf32>
    %1205 = math.exp %1204 : vector<8x96xf32>
    %cst_119 = arith.constant 1.000000e+00 : f32
    %1206 = vector.broadcast %cst_119 : f32 to vector<8x96xf32>
    %1207 = arith.addf %1206, %1205 : vector<8x96xf32>
    %1208 = arith.divf %1206, %1207 : vector<8x96xf32>
    %1209 = vector.extract_strided_slice %1198 {offsets = [0, 96], sizes = [8, 32], strides = [1, 1]} : vector<8x128xf32> to vector<8x32xf32>
    %1210 = math.tanh %1209 : vector<8x32xf32>
    %1211 = vector.extract_strided_slice %1208 {offsets = [0, 32], sizes = [8, 32], strides = [1, 1]} : vector<8x96xf32> to vector<8x32xf32>
    %1212 = arith.mulf %1211, %1192 : vector<8x32xf32>
    %1213 = vector.extract_strided_slice %1208 {offsets = [0, 0], sizes = [8, 32], strides = [1, 1]} : vector<8x96xf32> to vector<8x32xf32>
    %1214 = arith.mulf %1213, %1210 : vector<8x32xf32>
    %1215 = arith.addf %1212, %1214 : vector<8x32xf32>
    %1216 = vector.extract_strided_slice %1208 {offsets = [0, 64], sizes = [8, 32], strides = [1, 1]} : vector<8x96xf32> to vector<8x32xf32>
    %1217 = math.tanh %1215 : vector<8x32xf32>
    %1218 = arith.mulf %1216, %1217 : vector<8x32xf32>
    %1219 = vector.extract_strided_slice %1202 {offsets = [0, 0], sizes = [8, 96], strides = [1, 1]} : vector<8x128xf32> to vector<8x96xf32>
    %1220 = arith.negf %1219 : vector<8x96xf32>
    %1221 = math.exp %1220 : vector<8x96xf32>
    %cst_120 = arith.constant 1.000000e+00 : f32
    %1222 = vector.broadcast %cst_120 : f32 to vector<8x96xf32>
    %1223 = arith.addf %1222, %1221 : vector<8x96xf32>
    %1224 = arith.divf %1222, %1223 : vector<8x96xf32>
    %1225 = vector.extract_strided_slice %1202 {offsets = [0, 96], sizes = [8, 32], strides = [1, 1]} : vector<8x128xf32> to vector<8x32xf32>
    %1226 = math.tanh %1225 : vector<8x32xf32>
    %1227 = vector.extract_strided_slice %1224 {offsets = [0, 32], sizes = [8, 32], strides = [1, 1]} : vector<8x96xf32> to vector<8x32xf32>
    %1228 = arith.mulf %1227, %1193 : vector<8x32xf32>
    %1229 = vector.extract_strided_slice %1224 {offsets = [0, 0], sizes = [8, 32], strides = [1, 1]} : vector<8x96xf32> to vector<8x32xf32>
    %1230 = arith.mulf %1229, %1226 : vector<8x32xf32>
    %1231 = arith.addf %1228, %1230 : vector<8x32xf32>
    %1232 = vector.extract_strided_slice %1224 {offsets = [0, 64], sizes = [8, 32], strides = [1, 1]} : vector<8x96xf32> to vector<8x32xf32>
    %1233 = math.tanh %1231 : vector<8x32xf32>
    %1234 = arith.mulf %1232, %1233 : vector<8x32xf32>
    %1235 = tpu.concatenate %1218, %1234 in 1 : vector<8x32xf32>, vector<8x32xf32> -> vector<8x64xf32>
    %cst_121 = arith.constant dense<0.000000e+00> : vector<8x256xf32>
    %1236 = tpu.matmul %1235, %1183, %cst_121 {dimension_numbers = #tpu.dot_dimension_numbers<[1], [0], [0], [1], [0, 0, 1, 1], [], []>} : vector<8x64xf32>, vector<64x256xf32>, vector<8x256xf32> -> vector<8x256xf32>
    %1237 = vector.extract_strided_slice %1236 {offsets = [0, 0], sizes = [8, 128], strides = [1, 1]} : vector<8x256xf32> to vector<8x128xf32>
    %1238 = vector.extract_strided_slice %1191 {offsets = [1, 0, 0], sizes = [1, 8, 128], strides = [1, 1, 1]} : vector<13x8x256xf32> to vector<1x8x128xf32>
    %1239 = vector.shape_cast %1238 : vector<1x8x128xf32> to vector<8x128xf32>
    %1240 = arith.addf %1237, %1239 : vector<8x128xf32>
    %1241 = vector.extract_strided_slice %1236 {offsets = [0, 128], sizes = [8, 128], strides = [1, 1]} : vector<8x256xf32> to vector<8x128xf32>
    %1242 = vector.extract_strided_slice %1191 {offsets = [11, 0, 128], sizes = [1, 8, 128], strides = [1, 1, 1]} : vector<13x8x256xf32> to vector<1x8x128xf32>
    %1243 = vector.shape_cast %1242 : vector<1x8x128xf32> to vector<8x128xf32>
    %1244 = arith.addf %1241, %1243 : vector<8x128xf32>
    %1245 = vector.extract_strided_slice %1240 {offsets = [0, 0], sizes = [8, 96], strides = [1, 1]} : vector<8x128xf32> to vector<8x96xf32>
    %1246 = arith.negf %1245 : vector<8x96xf32>
    %1247 = math.exp %1246 : vector<8x96xf32>
    %cst_122 = arith.constant 1.000000e+00 : f32
    %1248 = vector.broadcast %cst_122 : f32 to vector<8x96xf32>
    %1249 = arith.addf %1248, %1247 : vector<8x96xf32>
    %1250 = arith.divf %1248, %1249 : vector<8x96xf32>
    %1251 = vector.extract_strided_slice %1240 {offsets = [0, 96], sizes = [8, 32], strides = [1, 1]} : vector<8x128xf32> to vector<8x32xf32>
    %1252 = math.tanh %1251 : vector<8x32xf32>
    %1253 = vector.extract_strided_slice %1250 {offsets = [0, 32], sizes = [8, 32], strides = [1, 1]} : vector<8x96xf32> to vector<8x32xf32>
    %1254 = arith.mulf %1253, %1215 : vector<8x32xf32>
    %1255 = vector.extract_strided_slice %1250 {offsets = [0, 0], sizes = [8, 32], strides = [1, 1]} : vector<8x96xf32> to vector<8x32xf32>
    %1256 = arith.mulf %1255, %1252 : vector<8x32xf32>
    %1257 = arith.addf %1254, %1256 : vector<8x32xf32>
    %1258 = vector.extract_strided_slice %1250 {offsets = [0, 64], sizes = [8, 32], strides = [1, 1]} : vector<8x96xf32> to vector<8x32xf32>
    %1259 = math.tanh %1257 : vector<8x32xf32>
    %1260 = arith.mulf %1258, %1259 : vector<8x32xf32>
    %1261 = vector.extract_strided_slice %1244 {offsets = [0, 0], sizes = [8, 96], strides = [1, 1]} : vector<8x128xf32> to vector<8x96xf32>
    %1262 = arith.negf %1261 : vector<8x96xf32>
    %1263 = math.exp %1262 : vector<8x96xf32>
    %cst_123 = arith.constant 1.000000e+00 : f32
    %1264 = vector.broadcast %cst_123 : f32 to vector<8x96xf32>
    %1265 = arith.addf %1264, %1263 : vector<8x96xf32>
    %1266 = arith.divf %1264, %1265 : vector<8x96xf32>
    %1267 = vector.extract_strided_slice %1244 {offsets = [0, 96], sizes = [8, 32], strides = [1, 1]} : vector<8x128xf32> to vector<8x32xf32>
    %1268 = math.tanh %1267 : vector<8x32xf32>
    %1269 = vector.extract_strided_slice %1266 {offsets = [0, 32], sizes = [8, 32], strides = [1, 1]} : vector<8x96xf32> to vector<8x32xf32>
    %1270 = arith.mulf %1269, %1231 : vector<8x32xf32>
    %1271 = vector.extract_strided_slice %1266 {offsets = [0, 0], sizes = [8, 32], strides = [1, 1]} : vector<8x96xf32> to vector<8x32xf32>
    %1272 = arith.mulf %1271, %1268 : vector<8x32xf32>
    %1273 = arith.addf %1270, %1272 : vector<8x32xf32>
    %1274 = vector.extract_strided_slice %1266 {offsets = [0, 64], sizes = [8, 32], strides = [1, 1]} : vector<8x96xf32> to vector<8x32xf32>
    %1275 = math.tanh %1273 : vector<8x32xf32>
    %1276 = arith.mulf %1274, %1275 : vector<8x32xf32>
    %1277 = tpu.concatenate %1260, %1276 in 1 : vector<8x32xf32>, vector<8x32xf32> -> vector<8x64xf32>
    %cst_124 = arith.constant dense<0.000000e+00> : vector<8x256xf32>
    %1278 = tpu.matmul %1277, %1183, %cst_124 {dimension_numbers = #tpu.dot_dimension_numbers<[1], [0], [0], [1], [0, 0, 1, 1], [], []>} : vector<8x64xf32>, vector<64x256xf32>, vector<8x256xf32> -> vector<8x256xf32>
    %1279 = vector.extract_strided_slice %1278 {offsets = [0, 0], sizes = [8, 128], strides = [1, 1]} : vector<8x256xf32> to vector<8x128xf32>
    %1280 = vector.extract_strided_slice %1191 {offsets = [2, 0, 0], sizes = [1, 8, 128], strides = [1, 1, 1]} : vector<13x8x256xf32> to vector<1x8x128xf32>
    %1281 = vector.shape_cast %1280 : vector<1x8x128xf32> to vector<8x128xf32>
    %1282 = arith.addf %1279, %1281 : vector<8x128xf32>
    %1283 = vector.extract_strided_slice %1278 {offsets = [0, 128], sizes = [8, 128], strides = [1, 1]} : vector<8x256xf32> to vector<8x128xf32>
    %1284 = vector.extract_strided_slice %1191 {offsets = [10, 0, 128], sizes = [1, 8, 128], strides = [1, 1, 1]} : vector<13x8x256xf32> to vector<1x8x128xf32>
    %1285 = vector.shape_cast %1284 : vector<1x8x128xf32> to vector<8x128xf32>
    %1286 = arith.addf %1283, %1285 : vector<8x128xf32>
    %1287 = vector.extract_strided_slice %1282 {offsets = [0, 0], sizes = [8, 96], strides = [1, 1]} : vector<8x128xf32> to vector<8x96xf32>
    %1288 = arith.negf %1287 : vector<8x96xf32>
    %1289 = math.exp %1288 : vector<8x96xf32>
    %cst_125 = arith.constant 1.000000e+00 : f32
    %1290 = vector.broadcast %cst_125 : f32 to vector<8x96xf32>
    %1291 = arith.addf %1290, %1289 : vector<8x96xf32>
    %1292 = arith.divf %1290, %1291 : vector<8x96xf32>
    %1293 = vector.extract_strided_slice %1282 {offsets = [0, 96], sizes = [8, 32], strides = [1, 1]} : vector<8x128xf32> to vector<8x32xf32>
    %1294 = math.tanh %1293 : vector<8x32xf32>
    %1295 = vector.extract_strided_slice %1292 {offsets = [0, 32], sizes = [8, 32], strides = [1, 1]} : vector<8x96xf32> to vector<8x32xf32>
    %1296 = arith.mulf %1295, %1257 : vector<8x32xf32>
    %1297 = vector.extract_strided_slice %1292 {offsets = [0, 0], sizes = [8, 32], strides = [1, 1]} : vector<8x96xf32> to vector<8x32xf32>
    %1298 = arith.mulf %1297, %1294 : vector<8x32xf32>
    %1299 = arith.addf %1296, %1298 : vector<8x32xf32>
    %1300 = vector.extract_strided_slice %1292 {offsets = [0, 64], sizes = [8, 32], strides = [1, 1]} : vector<8x96xf32> to vector<8x32xf32>
    %1301 = math.tanh %1299 : vector<8x32xf32>
    %1302 = arith.mulf %1300, %1301 : vector<8x32xf32>
    %1303 = vector.extract_strided_slice %1286 {offsets = [0, 0], sizes = [8, 96], strides = [1, 1]} : vector<8x128xf32> to vector<8x96xf32>
    %1304 = arith.negf %1303 : vector<8x96xf32>
    %1305 = math.exp %1304 : vector<8x96xf32>
    %cst_126 = arith.constant 1.000000e+00 : f32
    %1306 = vector.broadcast %cst_126 : f32 to vector<8x96xf32>
    %1307 = arith.addf %1306, %1305 : vector<8x96xf32>
    %1308 = arith.divf %1306, %1307 : vector<8x96xf32>
    %1309 = vector.extract_strided_slice %1286 {offsets = [0, 96], sizes = [8, 32], strides = [1, 1]} : vector<8x128xf32> to vector<8x32xf32>
    %1310 = math.tanh %1309 : vector<8x32xf32>
    %1311 = vector.extract_strided_slice %1308 {offsets = [0, 32], sizes = [8, 32], strides = [1, 1]} : vector<8x96xf32> to vector<8x32xf32>
    %1312 = arith.mulf %1311, %1273 : vector<8x32xf32>
    %1313 = vector.extract_strided_slice %1308 {offsets = [0, 0], sizes = [8, 32], strides = [1, 1]} : vector<8x96xf32> to vector<8x32xf32>
    %1314 = arith.mulf %1313, %1310 : vector<8x32xf32>
    %1315 = arith.addf %1312, %1314 : vector<8x32xf32>
    %1316 = vector.extract_strided_slice %1308 {offsets = [0, 64], sizes = [8, 32], strides = [1, 1]} : vector<8x96xf32> to vector<8x32xf32>
    %1317 = math.tanh %1315 : vector<8x32xf32>
    %1318 = arith.mulf %1316, %1317 : vector<8x32xf32>
    %1319 = tpu.concatenate %1302, %1318 in 1 : vector<8x32xf32>, vector<8x32xf32> -> vector<8x64xf32>
    %cst_127 = arith.constant dense<0.000000e+00> : vector<8x256xf32>
    %1320 = tpu.matmul %1319, %1183, %cst_127 {dimension_numbers = #tpu.dot_dimension_numbers<[1], [0], [0], [1], [0, 0, 1, 1], [], []>} : vector<8x64xf32>, vector<64x256xf32>, vector<8x256xf32> -> vector<8x256xf32>
    %1321 = vector.extract_strided_slice %1320 {offsets = [0, 0], sizes = [8, 128], strides = [1, 1]} : vector<8x256xf32> to vector<8x128xf32>
    %1322 = vector.extract_strided_slice %1191 {offsets = [3, 0, 0], sizes = [1, 8, 128], strides = [1, 1, 1]} : vector<13x8x256xf32> to vector<1x8x128xf32>
    %1323 = vector.shape_cast %1322 : vector<1x8x128xf32> to vector<8x128xf32>
    %1324 = arith.addf %1321, %1323 : vector<8x128xf32>
    %1325 = vector.extract_strided_slice %1320 {offsets = [0, 128], sizes = [8, 128], strides = [1, 1]} : vector<8x256xf32> to vector<8x128xf32>
    %1326 = vector.extract_strided_slice %1191 {offsets = [9, 0, 128], sizes = [1, 8, 128], strides = [1, 1, 1]} : vector<13x8x256xf32> to vector<1x8x128xf32>
    %1327 = vector.shape_cast %1326 : vector<1x8x128xf32> to vector<8x128xf32>
    %1328 = arith.addf %1325, %1327 : vector<8x128xf32>
    %1329 = vector.extract_strided_slice %1324 {offsets = [0, 0], sizes = [8, 96], strides = [1, 1]} : vector<8x128xf32> to vector<8x96xf32>
    %1330 = arith.negf %1329 : vector<8x96xf32>
    %1331 = math.exp %1330 : vector<8x96xf32>
    %cst_128 = arith.constant 1.000000e+00 : f32
    %1332 = vector.broadcast %cst_128 : f32 to vector<8x96xf32>
    %1333 = arith.addf %1332, %1331 : vector<8x96xf32>
    %1334 = arith.divf %1332, %1333 : vector<8x96xf32>
    %1335 = vector.extract_strided_slice %1324 {offsets = [0, 96], sizes = [8, 32], strides = [1, 1]} : vector<8x128xf32> to vector<8x32xf32>
    %1336 = math.tanh %1335 : vector<8x32xf32>
    %1337 = vector.extract_strided_slice %1334 {offsets = [0, 32], sizes = [8, 32], strides = [1, 1]} : vector<8x96xf32> to vector<8x32xf32>
    %1338 = arith.mulf %1337, %1299 : vector<8x32xf32>
    %1339 = vector.extract_strided_slice %1334 {offsets = [0, 0], sizes = [8, 32], strides = [1, 1]} : vector<8x96xf32> to vector<8x32xf32>
    %1340 = arith.mulf %1339, %1336 : vector<8x32xf32>
    %1341 = arith.addf %1338, %1340 : vector<8x32xf32>
    %1342 = vector.extract_strided_slice %1334 {offsets = [0, 64], sizes = [8, 32], strides = [1, 1]} : vector<8x96xf32> to vector<8x32xf32>
    %1343 = math.tanh %1341 : vector<8x32xf32>
    %1344 = arith.mulf %1342, %1343 : vector<8x32xf32>
    %1345 = vector.extract_strided_slice %1328 {offsets = [0, 0], sizes = [8, 96], strides = [1, 1]} : vector<8x128xf32> to vector<8x96xf32>
    %1346 = arith.negf %1345 : vector<8x96xf32>
    %1347 = math.exp %1346 : vector<8x96xf32>
    %cst_129 = arith.constant 1.000000e+00 : f32
    %1348 = vector.broadcast %cst_129 : f32 to vector<8x96xf32>
    %1349 = arith.addf %1348, %1347 : vector<8x96xf32>
    %1350 = arith.divf %1348, %1349 : vector<8x96xf32>
    %1351 = vector.extract_strided_slice %1328 {offsets = [0, 96], sizes = [8, 32], strides = [1, 1]} : vector<8x128xf32> to vector<8x32xf32>
    %1352 = math.tanh %1351 : vector<8x32xf32>
    %1353 = vector.extract_strided_slice %1350 {offsets = [0, 32], sizes = [8, 32], strides = [1, 1]} : vector<8x96xf32> to vector<8x32xf32>
    %1354 = arith.mulf %1353, %1315 : vector<8x32xf32>
    %1355 = vector.extract_strided_slice %1350 {offsets = [0, 0], sizes = [8, 32], strides = [1, 1]} : vector<8x96xf32> to vector<8x32xf32>
    %1356 = arith.mulf %1355, %1352 : vector<8x32xf32>
    %1357 = arith.addf %1354, %1356 : vector<8x32xf32>
    %1358 = vector.extract_strided_slice %1350 {offsets = [0, 64], sizes = [8, 32], strides = [1, 1]} : vector<8x96xf32> to vector<8x32xf32>
    %1359 = math.tanh %1357 : vector<8x32xf32>
    %1360 = arith.mulf %1358, %1359 : vector<8x32xf32>
    %1361 = tpu.concatenate %1344, %1360 in 1 : vector<8x32xf32>, vector<8x32xf32> -> vector<8x64xf32>
    %cst_130 = arith.constant dense<0.000000e+00> : vector<8x256xf32>
    %1362 = tpu.matmul %1361, %1183, %cst_130 {dimension_numbers = #tpu.dot_dimension_numbers<[1], [0], [0], [1], [0, 0, 1, 1], [], []>} : vector<8x64xf32>, vector<64x256xf32>, vector<8x256xf32> -> vector<8x256xf32>
    %1363 = vector.extract_strided_slice %1362 {offsets = [0, 0], sizes = [8, 128], strides = [1, 1]} : vector<8x256xf32> to vector<8x128xf32>
    %1364 = vector.extract_strided_slice %1191 {offsets = [4, 0, 0], sizes = [1, 8, 128], strides = [1, 1, 1]} : vector<13x8x256xf32> to vector<1x8x128xf32>
    %1365 = vector.shape_cast %1364 : vector<1x8x128xf32> to vector<8x128xf32>
    %1366 = arith.addf %1363, %1365 : vector<8x128xf32>
    %1367 = vector.extract_strided_slice %1362 {offsets = [0, 128], sizes = [8, 128], strides = [1, 1]} : vector<8x256xf32> to vector<8x128xf32>
    %1368 = vector.extract_strided_slice %1191 {offsets = [8, 0, 128], sizes = [1, 8, 128], strides = [1, 1, 1]} : vector<13x8x256xf32> to vector<1x8x128xf32>
    %1369 = vector.shape_cast %1368 : vector<1x8x128xf32> to vector<8x128xf32>
    %1370 = arith.addf %1367, %1369 : vector<8x128xf32>
    %1371 = vector.extract_strided_slice %1366 {offsets = [0, 0], sizes = [8, 96], strides = [1, 1]} : vector<8x128xf32> to vector<8x96xf32>
    %1372 = arith.negf %1371 : vector<8x96xf32>
    %1373 = math.exp %1372 : vector<8x96xf32>
    %cst_131 = arith.constant 1.000000e+00 : f32
    %1374 = vector.broadcast %cst_131 : f32 to vector<8x96xf32>
    %1375 = arith.addf %1374, %1373 : vector<8x96xf32>
    %1376 = arith.divf %1374, %1375 : vector<8x96xf32>
    %1377 = vector.extract_strided_slice %1366 {offsets = [0, 96], sizes = [8, 32], strides = [1, 1]} : vector<8x128xf32> to vector<8x32xf32>
    %1378 = math.tanh %1377 : vector<8x32xf32>
    %1379 = vector.extract_strided_slice %1376 {offsets = [0, 32], sizes = [8, 32], strides = [1, 1]} : vector<8x96xf32> to vector<8x32xf32>
    %1380 = arith.mulf %1379, %1341 : vector<8x32xf32>
    %1381 = vector.extract_strided_slice %1376 {offsets = [0, 0], sizes = [8, 32], strides = [1, 1]} : vector<8x96xf32> to vector<8x32xf32>
    %1382 = arith.mulf %1381, %1378 : vector<8x32xf32>
    %1383 = arith.addf %1380, %1382 : vector<8x32xf32>
    %1384 = vector.extract_strided_slice %1376 {offsets = [0, 64], sizes = [8, 32], strides = [1, 1]} : vector<8x96xf32> to vector<8x32xf32>
    %1385 = math.tanh %1383 : vector<8x32xf32>
    %1386 = arith.mulf %1384, %1385 : vector<8x32xf32>
    %1387 = vector.extract_strided_slice %1370 {offsets = [0, 0], sizes = [8, 96], strides = [1, 1]} : vector<8x128xf32> to vector<8x96xf32>
    %1388 = arith.negf %1387 : vector<8x96xf32>
    %1389 = math.exp %1388 : vector<8x96xf32>
    %cst_132 = arith.constant 1.000000e+00 : f32
    %1390 = vector.broadcast %cst_132 : f32 to vector<8x96xf32>
    %1391 = arith.addf %1390, %1389 : vector<8x96xf32>
    %1392 = arith.divf %1390, %1391 : vector<8x96xf32>
    %1393 = vector.extract_strided_slice %1370 {offsets = [0, 96], sizes = [8, 32], strides = [1, 1]} : vector<8x128xf32> to vector<8x32xf32>
    %1394 = math.tanh %1393 : vector<8x32xf32>
    %1395 = vector.extract_strided_slice %1392 {offsets = [0, 32], sizes = [8, 32], strides = [1, 1]} : vector<8x96xf32> to vector<8x32xf32>
    %1396 = arith.mulf %1395, %1357 : vector<8x32xf32>
    %1397 = vector.extract_strided_slice %1392 {offsets = [0, 0], sizes = [8, 32], strides = [1, 1]} : vector<8x96xf32> to vector<8x32xf32>
    %1398 = arith.mulf %1397, %1394 : vector<8x32xf32>
    %1399 = arith.addf %1396, %1398 : vector<8x32xf32>
    %1400 = vector.extract_strided_slice %1392 {offsets = [0, 64], sizes = [8, 32], strides = [1, 1]} : vector<8x96xf32> to vector<8x32xf32>
    %1401 = math.tanh %1399 : vector<8x32xf32>
    %1402 = arith.mulf %1400, %1401 : vector<8x32xf32>
    %1403 = tpu.concatenate %1386, %1402 in 1 : vector<8x32xf32>, vector<8x32xf32> -> vector<8x64xf32>
    %cst_133 = arith.constant dense<0.000000e+00> : vector<8x256xf32>
    %1404 = tpu.matmul %1403, %1183, %cst_133 {dimension_numbers = #tpu.dot_dimension_numbers<[1], [0], [0], [1], [0, 0, 1, 1], [], []>} : vector<8x64xf32>, vector<64x256xf32>, vector<8x256xf32> -> vector<8x256xf32>
    %1405 = vector.extract_strided_slice %1404 {offsets = [0, 0], sizes = [8, 128], strides = [1, 1]} : vector<8x256xf32> to vector<8x128xf32>
    %1406 = vector.extract_strided_slice %1191 {offsets = [5, 0, 0], sizes = [1, 8, 128], strides = [1, 1, 1]} : vector<13x8x256xf32> to vector<1x8x128xf32>
    %1407 = vector.shape_cast %1406 : vector<1x8x128xf32> to vector<8x128xf32>
    %1408 = arith.addf %1405, %1407 : vector<8x128xf32>
    %1409 = vector.extract_strided_slice %1404 {offsets = [0, 128], sizes = [8, 128], strides = [1, 1]} : vector<8x256xf32> to vector<8x128xf32>
    %1410 = vector.extract_strided_slice %1191 {offsets = [7, 0, 128], sizes = [1, 8, 128], strides = [1, 1, 1]} : vector<13x8x256xf32> to vector<1x8x128xf32>
    %1411 = vector.shape_cast %1410 : vector<1x8x128xf32> to vector<8x128xf32>
    %1412 = arith.addf %1409, %1411 : vector<8x128xf32>
    %1413 = vector.extract_strided_slice %1408 {offsets = [0, 0], sizes = [8, 96], strides = [1, 1]} : vector<8x128xf32> to vector<8x96xf32>
    %1414 = arith.negf %1413 : vector<8x96xf32>
    %1415 = math.exp %1414 : vector<8x96xf32>
    %cst_134 = arith.constant 1.000000e+00 : f32
    %1416 = vector.broadcast %cst_134 : f32 to vector<8x96xf32>
    %1417 = arith.addf %1416, %1415 : vector<8x96xf32>
    %1418 = arith.divf %1416, %1417 : vector<8x96xf32>
    %1419 = vector.extract_strided_slice %1408 {offsets = [0, 96], sizes = [8, 32], strides = [1, 1]} : vector<8x128xf32> to vector<8x32xf32>
    %1420 = math.tanh %1419 : vector<8x32xf32>
    %1421 = vector.extract_strided_slice %1418 {offsets = [0, 32], sizes = [8, 32], strides = [1, 1]} : vector<8x96xf32> to vector<8x32xf32>
    %1422 = arith.mulf %1421, %1383 : vector<8x32xf32>
    %1423 = vector.extract_strided_slice %1418 {offsets = [0, 0], sizes = [8, 32], strides = [1, 1]} : vector<8x96xf32> to vector<8x32xf32>
    %1424 = arith.mulf %1423, %1420 : vector<8x32xf32>
    %1425 = arith.addf %1422, %1424 : vector<8x32xf32>
    %1426 = vector.extract_strided_slice %1418 {offsets = [0, 64], sizes = [8, 32], strides = [1, 1]} : vector<8x96xf32> to vector<8x32xf32>
    %1427 = math.tanh %1425 : vector<8x32xf32>
    %1428 = arith.mulf %1426, %1427 : vector<8x32xf32>
    %1429 = vector.extract_strided_slice %1412 {offsets = [0, 0], sizes = [8, 96], strides = [1, 1]} : vector<8x128xf32> to vector<8x96xf32>
    %1430 = arith.negf %1429 : vector<8x96xf32>
    %1431 = math.exp %1430 : vector<8x96xf32>
    %cst_135 = arith.constant 1.000000e+00 : f32
    %1432 = vector.broadcast %cst_135 : f32 to vector<8x96xf32>
    %1433 = arith.addf %1432, %1431 : vector<8x96xf32>
    %1434 = arith.divf %1432, %1433 : vector<8x96xf32>
    %1435 = vector.extract_strided_slice %1412 {offsets = [0, 96], sizes = [8, 32], strides = [1, 1]} : vector<8x128xf32> to vector<8x32xf32>
    %1436 = math.tanh %1435 : vector<8x32xf32>
    %1437 = vector.extract_strided_slice %1434 {offsets = [0, 32], sizes = [8, 32], strides = [1, 1]} : vector<8x96xf32> to vector<8x32xf32>
    %1438 = arith.mulf %1437, %1399 : vector<8x32xf32>
    %1439 = vector.extract_strided_slice %1434 {offsets = [0, 0], sizes = [8, 32], strides = [1, 1]} : vector<8x96xf32> to vector<8x32xf32>
    %1440 = arith.mulf %1439, %1436 : vector<8x32xf32>
    %1441 = arith.addf %1438, %1440 : vector<8x32xf32>
    %1442 = vector.extract_strided_slice %1434 {offsets = [0, 64], sizes = [8, 32], strides = [1, 1]} : vector<8x96xf32> to vector<8x32xf32>
    %1443 = math.tanh %1441 : vector<8x32xf32>
    %1444 = arith.mulf %1442, %1443 : vector<8x32xf32>
    %1445 = tpu.concatenate %1428, %1444 in 1 : vector<8x32xf32>, vector<8x32xf32> -> vector<8x64xf32>
    %cst_136 = arith.constant dense<0.000000e+00> : vector<8x256xf32>
    %1446 = tpu.matmul %1445, %1183, %cst_136 {dimension_numbers = #tpu.dot_dimension_numbers<[1], [0], [0], [1], [0, 0, 1, 1], [], []>} : vector<8x64xf32>, vector<64x256xf32>, vector<8x256xf32> -> vector<8x256xf32>
    %1447 = vector.extract_strided_slice %1446 {offsets = [0, 0], sizes = [8, 128], strides = [1, 1]} : vector<8x256xf32> to vector<8x128xf32>
    %1448 = vector.extract_strided_slice %1191 {offsets = [6, 0, 0], sizes = [1, 8, 128], strides = [1, 1, 1]} : vector<13x8x256xf32> to vector<1x8x128xf32>
    %1449 = vector.shape_cast %1448 : vector<1x8x128xf32> to vector<8x128xf32>
    %1450 = arith.addf %1447, %1449 : vector<8x128xf32>
    %1451 = vector.extract_strided_slice %1446 {offsets = [0, 128], sizes = [8, 128], strides = [1, 1]} : vector<8x256xf32> to vector<8x128xf32>
    %1452 = vector.extract_strided_slice %1191 {offsets = [6, 0, 128], sizes = [1, 8, 128], strides = [1, 1, 1]} : vector<13x8x256xf32> to vector<1x8x128xf32>
    %1453 = vector.shape_cast %1452 : vector<1x8x128xf32> to vector<8x128xf32>
    %1454 = arith.addf %1451, %1453 : vector<8x128xf32>
    %1455 = vector.extract_strided_slice %1450 {offsets = [0, 0], sizes = [8, 96], strides = [1, 1]} : vector<8x128xf32> to vector<8x96xf32>
    %1456 = arith.negf %1455 : vector<8x96xf32>
    %1457 = math.exp %1456 : vector<8x96xf32>
    %cst_137 = arith.constant 1.000000e+00 : f32
    %1458 = vector.broadcast %cst_137 : f32 to vector<8x96xf32>
    %1459 = arith.addf %1458, %1457 : vector<8x96xf32>
    %1460 = arith.divf %1458, %1459 : vector<8x96xf32>
    %1461 = vector.extract_strided_slice %1450 {offsets = [0, 96], sizes = [8, 32], strides = [1, 1]} : vector<8x128xf32> to vector<8x32xf32>
    %1462 = math.tanh %1461 : vector<8x32xf32>
    %1463 = vector.extract_strided_slice %1460 {offsets = [0, 32], sizes = [8, 32], strides = [1, 1]} : vector<8x96xf32> to vector<8x32xf32>
    %1464 = arith.mulf %1463, %1425 : vector<8x32xf32>
    %1465 = vector.extract_strided_slice %1460 {offsets = [0, 0], sizes = [8, 32], strides = [1, 1]} : vector<8x96xf32> to vector<8x32xf32>
    %1466 = arith.mulf %1465, %1462 : vector<8x32xf32>
    %1467 = arith.addf %1464, %1466 : vector<8x32xf32>
    %1468 = vector.extract_strided_slice %1460 {offsets = [0, 64], sizes = [8, 32], strides = [1, 1]} : vector<8x96xf32> to vector<8x32xf32>
    %1469 = math.tanh %1467 : vector<8x32xf32>
    %1470 = arith.mulf %1468, %1469 : vector<8x32xf32>
    %1471 = vector.extract_strided_slice %1454 {offsets = [0, 0], sizes = [8, 96], strides = [1, 1]} : vector<8x128xf32> to vector<8x96xf32>
    %1472 = arith.negf %1471 : vector<8x96xf32>
    %1473 = math.exp %1472 : vector<8x96xf32>
    %cst_138 = arith.constant 1.000000e+00 : f32
    %1474 = vector.broadcast %cst_138 : f32 to vector<8x96xf32>
    %1475 = arith.addf %1474, %1473 : vector<8x96xf32>
    %1476 = arith.divf %1474, %1475 : vector<8x96xf32>
    %1477 = vector.extract_strided_slice %1454 {offsets = [0, 96], sizes = [8, 32], strides = [1, 1]} : vector<8x128xf32> to vector<8x32xf32>
    %1478 = math.tanh %1477 : vector<8x32xf32>
    %1479 = vector.extract_strided_slice %1476 {offsets = [0, 32], sizes = [8, 32], strides = [1, 1]} : vector<8x96xf32> to vector<8x32xf32>
    %1480 = arith.mulf %1479, %1441 : vector<8x32xf32>
    %1481 = vector.extract_strided_slice %1476 {offsets = [0, 0], sizes = [8, 32], strides = [1, 1]} : vector<8x96xf32> to vector<8x32xf32>
    %1482 = arith.mulf %1481, %1478 : vector<8x32xf32>
    %1483 = arith.addf %1480, %1482 : vector<8x32xf32>
    %1484 = vector.extract_strided_slice %1476 {offsets = [0, 64], sizes = [8, 32], strides = [1, 1]} : vector<8x96xf32> to vector<8x32xf32>
    %1485 = math.tanh %1483 : vector<8x32xf32>
    %1486 = arith.mulf %1484, %1485 : vector<8x32xf32>
    %1487 = tpu.concatenate %1470, %1486 in 1 : vector<8x32xf32>, vector<8x32xf32> -> vector<8x64xf32>
    %cst_139 = arith.constant dense<0.000000e+00> : vector<8x256xf32>
    %1488 = tpu.matmul %1487, %1183, %cst_139 {dimension_numbers = #tpu.dot_dimension_numbers<[1], [0], [0], [1], [0, 0, 1, 1], [], []>} : vector<8x64xf32>, vector<64x256xf32>, vector<8x256xf32> -> vector<8x256xf32>
    %1489 = vector.extract_strided_slice %1488 {offsets = [0, 0], sizes = [8, 128], strides = [1, 1]} : vector<8x256xf32> to vector<8x128xf32>
    %1490 = vector.extract_strided_slice %1191 {offsets = [7, 0, 0], sizes = [1, 8, 128], strides = [1, 1, 1]} : vector<13x8x256xf32> to vector<1x8x128xf32>
    %1491 = vector.shape_cast %1490 : vector<1x8x128xf32> to vector<8x128xf32>
    %1492 = arith.addf %1489, %1491 : vector<8x128xf32>
    %1493 = vector.extract_strided_slice %1488 {offsets = [0, 128], sizes = [8, 128], strides = [1, 1]} : vector<8x256xf32> to vector<8x128xf32>
    %1494 = vector.extract_strided_slice %1191 {offsets = [5, 0, 128], sizes = [1, 8, 128], strides = [1, 1, 1]} : vector<13x8x256xf32> to vector<1x8x128xf32>
    %1495 = vector.shape_cast %1494 : vector<1x8x128xf32> to vector<8x128xf32>
    %1496 = arith.addf %1493, %1495 : vector<8x128xf32>
    %1497 = vector.extract_strided_slice %1492 {offsets = [0, 0], sizes = [8, 96], strides = [1, 1]} : vector<8x128xf32> to vector<8x96xf32>
    %1498 = arith.negf %1497 : vector<8x96xf32>
    %1499 = math.exp %1498 : vector<8x96xf32>
    %cst_140 = arith.constant 1.000000e+00 : f32
    %1500 = vector.broadcast %cst_140 : f32 to vector<8x96xf32>
    %1501 = arith.addf %1500, %1499 : vector<8x96xf32>
    %1502 = arith.divf %1500, %1501 : vector<8x96xf32>
    %1503 = vector.extract_strided_slice %1492 {offsets = [0, 96], sizes = [8, 32], strides = [1, 1]} : vector<8x128xf32> to vector<8x32xf32>
    %1504 = math.tanh %1503 : vector<8x32xf32>
    %1505 = vector.extract_strided_slice %1502 {offsets = [0, 32], sizes = [8, 32], strides = [1, 1]} : vector<8x96xf32> to vector<8x32xf32>
    %1506 = arith.mulf %1505, %1467 : vector<8x32xf32>
    %1507 = vector.extract_strided_slice %1502 {offsets = [0, 0], sizes = [8, 32], strides = [1, 1]} : vector<8x96xf32> to vector<8x32xf32>
    %1508 = arith.mulf %1507, %1504 : vector<8x32xf32>
    %1509 = arith.addf %1506, %1508 : vector<8x32xf32>
    %1510 = vector.extract_strided_slice %1502 {offsets = [0, 64], sizes = [8, 32], strides = [1, 1]} : vector<8x96xf32> to vector<8x32xf32>
    %1511 = math.tanh %1509 : vector<8x32xf32>
    %1512 = arith.mulf %1510, %1511 : vector<8x32xf32>
    %1513 = vector.extract_strided_slice %1496 {offsets = [0, 0], sizes = [8, 96], strides = [1, 1]} : vector<8x128xf32> to vector<8x96xf32>
    %1514 = arith.negf %1513 : vector<8x96xf32>
    %1515 = math.exp %1514 : vector<8x96xf32>
    %cst_141 = arith.constant 1.000000e+00 : f32
    %1516 = vector.broadcast %cst_141 : f32 to vector<8x96xf32>
    %1517 = arith.addf %1516, %1515 : vector<8x96xf32>
    %1518 = arith.divf %1516, %1517 : vector<8x96xf32>
    %1519 = vector.extract_strided_slice %1496 {offsets = [0, 96], sizes = [8, 32], strides = [1, 1]} : vector<8x128xf32> to vector<8x32xf32>
    %1520 = math.tanh %1519 : vector<8x32xf32>
    %1521 = vector.extract_strided_slice %1518 {offsets = [0, 32], sizes = [8, 32], strides = [1, 1]} : vector<8x96xf32> to vector<8x32xf32>
    %1522 = arith.mulf %1521, %1483 : vector<8x32xf32>
    %1523 = vector.extract_strided_slice %1518 {offsets = [0, 0], sizes = [8, 32], strides = [1, 1]} : vector<8x96xf32> to vector<8x32xf32>
    %1524 = arith.mulf %1523, %1520 : vector<8x32xf32>
    %1525 = arith.addf %1522, %1524 : vector<8x32xf32>
    %1526 = vector.extract_strided_slice %1518 {offsets = [0, 64], sizes = [8, 32], strides = [1, 1]} : vector<8x96xf32> to vector<8x32xf32>
    %1527 = math.tanh %1525 : vector<8x32xf32>
    %1528 = arith.mulf %1526, %1527 : vector<8x32xf32>
    %1529 = tpu.concatenate %1512, %1528 in 1 : vector<8x32xf32>, vector<8x32xf32> -> vector<8x64xf32>
    %cst_142 = arith.constant dense<0.000000e+00> : vector<8x256xf32>
    %1530 = tpu.matmul %1529, %1183, %cst_142 {dimension_numbers = #tpu.dot_dimension_numbers<[1], [0], [0], [1], [0, 0, 1, 1], [], []>} : vector<8x64xf32>, vector<64x256xf32>, vector<8x256xf32> -> vector<8x256xf32>
    %1531 = vector.extract_strided_slice %1530 {offsets = [0, 0], sizes = [8, 128], strides = [1, 1]} : vector<8x256xf32> to vector<8x128xf32>
    %1532 = vector.extract_strided_slice %1191 {offsets = [8, 0, 0], sizes = [1, 8, 128], strides = [1, 1, 1]} : vector<13x8x256xf32> to vector<1x8x128xf32>
    %1533 = vector.shape_cast %1532 : vector<1x8x128xf32> to vector<8x128xf32>
    %1534 = arith.addf %1531, %1533 : vector<8x128xf32>
    %1535 = vector.extract_strided_slice %1530 {offsets = [0, 128], sizes = [8, 128], strides = [1, 1]} : vector<8x256xf32> to vector<8x128xf32>
    %1536 = vector.extract_strided_slice %1191 {offsets = [4, 0, 128], sizes = [1, 8, 128], strides = [1, 1, 1]} : vector<13x8x256xf32> to vector<1x8x128xf32>
    %1537 = vector.shape_cast %1536 : vector<1x8x128xf32> to vector<8x128xf32>
    %1538 = arith.addf %1535, %1537 : vector<8x128xf32>
    %1539 = vector.extract_strided_slice %1534 {offsets = [0, 0], sizes = [8, 96], strides = [1, 1]} : vector<8x128xf32> to vector<8x96xf32>
    %1540 = arith.negf %1539 : vector<8x96xf32>
    %1541 = math.exp %1540 : vector<8x96xf32>
    %cst_143 = arith.constant 1.000000e+00 : f32
    %1542 = vector.broadcast %cst_143 : f32 to vector<8x96xf32>
    %1543 = arith.addf %1542, %1541 : vector<8x96xf32>
    %1544 = arith.divf %1542, %1543 : vector<8x96xf32>
    %1545 = vector.extract_strided_slice %1534 {offsets = [0, 96], sizes = [8, 32], strides = [1, 1]} : vector<8x128xf32> to vector<8x32xf32>
    %1546 = math.tanh %1545 : vector<8x32xf32>
    %1547 = vector.extract_strided_slice %1544 {offsets = [0, 32], sizes = [8, 32], strides = [1, 1]} : vector<8x96xf32> to vector<8x32xf32>
    %1548 = arith.mulf %1547, %1509 : vector<8x32xf32>
    %1549 = vector.extract_strided_slice %1544 {offsets = [0, 0], sizes = [8, 32], strides = [1, 1]} : vector<8x96xf32> to vector<8x32xf32>
    %1550 = arith.mulf %1549, %1546 : vector<8x32xf32>
    %1551 = arith.addf %1548, %1550 : vector<8x32xf32>
    %1552 = vector.extract_strided_slice %1544 {offsets = [0, 64], sizes = [8, 32], strides = [1, 1]} : vector<8x96xf32> to vector<8x32xf32>
    %1553 = math.tanh %1551 : vector<8x32xf32>
    %1554 = arith.mulf %1552, %1553 : vector<8x32xf32>
    %1555 = vector.extract_strided_slice %1538 {offsets = [0, 0], sizes = [8, 96], strides = [1, 1]} : vector<8x128xf32> to vector<8x96xf32>
    %1556 = arith.negf %1555 : vector<8x96xf32>
    %1557 = math.exp %1556 : vector<8x96xf32>
    %cst_144 = arith.constant 1.000000e+00 : f32
    %1558 = vector.broadcast %cst_144 : f32 to vector<8x96xf32>
    %1559 = arith.addf %1558, %1557 : vector<8x96xf32>
    %1560 = arith.divf %1558, %1559 : vector<8x96xf32>
    %1561 = vector.extract_strided_slice %1538 {offsets = [0, 96], sizes = [8, 32], strides = [1, 1]} : vector<8x128xf32> to vector<8x32xf32>
    %1562 = math.tanh %1561 : vector<8x32xf32>
    %1563 = vector.extract_strided_slice %1560 {offsets = [0, 32], sizes = [8, 32], strides = [1, 1]} : vector<8x96xf32> to vector<8x32xf32>
    %1564 = arith.mulf %1563, %1525 : vector<8x32xf32>
    %1565 = vector.extract_strided_slice %1560 {offsets = [0, 0], sizes = [8, 32], strides = [1, 1]} : vector<8x96xf32> to vector<8x32xf32>
    %1566 = arith.mulf %1565, %1562 : vector<8x32xf32>
    %1567 = arith.addf %1564, %1566 : vector<8x32xf32>
    %1568 = vector.extract_strided_slice %1560 {offsets = [0, 64], sizes = [8, 32], strides = [1, 1]} : vector<8x96xf32> to vector<8x32xf32>
    %1569 = math.tanh %1567 : vector<8x32xf32>
    %1570 = arith.mulf %1568, %1569 : vector<8x32xf32>
    %1571 = tpu.concatenate %1554, %1570 in 1 : vector<8x32xf32>, vector<8x32xf32> -> vector<8x64xf32>
    %cst_145 = arith.constant dense<0.000000e+00> : vector<8x256xf32>
    %1572 = tpu.matmul %1571, %1183, %cst_145 {dimension_numbers = #tpu.dot_dimension_numbers<[1], [0], [0], [1], [0, 0, 1, 1], [], []>} : vector<8x64xf32>, vector<64x256xf32>, vector<8x256xf32> -> vector<8x256xf32>
    %1573 = vector.extract_strided_slice %1572 {offsets = [0, 0], sizes = [8, 128], strides = [1, 1]} : vector<8x256xf32> to vector<8x128xf32>
    %1574 = vector.extract_strided_slice %1191 {offsets = [9, 0, 0], sizes = [1, 8, 128], strides = [1, 1, 1]} : vector<13x8x256xf32> to vector<1x8x128xf32>
    %1575 = vector.shape_cast %1574 : vector<1x8x128xf32> to vector<8x128xf32>
    %1576 = arith.addf %1573, %1575 : vector<8x128xf32>
    %1577 = vector.extract_strided_slice %1572 {offsets = [0, 128], sizes = [8, 128], strides = [1, 1]} : vector<8x256xf32> to vector<8x128xf32>
    %1578 = vector.extract_strided_slice %1191 {offsets = [3, 0, 128], sizes = [1, 8, 128], strides = [1, 1, 1]} : vector<13x8x256xf32> to vector<1x8x128xf32>
    %1579 = vector.shape_cast %1578 : vector<1x8x128xf32> to vector<8x128xf32>
    %1580 = arith.addf %1577, %1579 : vector<8x128xf32>
    %1581 = vector.extract_strided_slice %1576 {offsets = [0, 0], sizes = [8, 96], strides = [1, 1]} : vector<8x128xf32> to vector<8x96xf32>
    %1582 = arith.negf %1581 : vector<8x96xf32>
    %1583 = math.exp %1582 : vector<8x96xf32>
    %cst_146 = arith.constant 1.000000e+00 : f32
    %1584 = vector.broadcast %cst_146 : f32 to vector<8x96xf32>
    %1585 = arith.addf %1584, %1583 : vector<8x96xf32>
    %1586 = arith.divf %1584, %1585 : vector<8x96xf32>
    %1587 = vector.extract_strided_slice %1576 {offsets = [0, 96], sizes = [8, 32], strides = [1, 1]} : vector<8x128xf32> to vector<8x32xf32>
    %1588 = math.tanh %1587 : vector<8x32xf32>
    %1589 = vector.extract_strided_slice %1586 {offsets = [0, 32], sizes = [8, 32], strides = [1, 1]} : vector<8x96xf32> to vector<8x32xf32>
    %1590 = arith.mulf %1589, %1551 : vector<8x32xf32>
    %1591 = vector.extract_strided_slice %1586 {offsets = [0, 0], sizes = [8, 32], strides = [1, 1]} : vector<8x96xf32> to vector<8x32xf32>
    %1592 = arith.mulf %1591, %1588 : vector<8x32xf32>
    %1593 = arith.addf %1590, %1592 : vector<8x32xf32>
    %1594 = vector.extract_strided_slice %1586 {offsets = [0, 64], sizes = [8, 32], strides = [1, 1]} : vector<8x96xf32> to vector<8x32xf32>
    %1595 = math.tanh %1593 : vector<8x32xf32>
    %1596 = arith.mulf %1594, %1595 : vector<8x32xf32>
    %1597 = vector.extract_strided_slice %1580 {offsets = [0, 0], sizes = [8, 96], strides = [1, 1]} : vector<8x128xf32> to vector<8x96xf32>
    %1598 = arith.negf %1597 : vector<8x96xf32>
    %1599 = math.exp %1598 : vector<8x96xf32>
    %cst_147 = arith.constant 1.000000e+00 : f32
    %1600 = vector.broadcast %cst_147 : f32 to vector<8x96xf32>
    %1601 = arith.addf %1600, %1599 : vector<8x96xf32>
    %1602 = arith.divf %1600, %1601 : vector<8x96xf32>
    %1603 = vector.extract_strided_slice %1580 {offsets = [0, 96], sizes = [8, 32], strides = [1, 1]} : vector<8x128xf32> to vector<8x32xf32>
    %1604 = math.tanh %1603 : vector<8x32xf32>
    %1605 = vector.extract_strided_slice %1602 {offsets = [0, 32], sizes = [8, 32], strides = [1, 1]} : vector<8x96xf32> to vector<8x32xf32>
    %1606 = arith.mulf %1605, %1567 : vector<8x32xf32>
    %1607 = vector.extract_strided_slice %1602 {offsets = [0, 0], sizes = [8, 32], strides = [1, 1]} : vector<8x96xf32> to vector<8x32xf32>
    %1608 = arith.mulf %1607, %1604 : vector<8x32xf32>
    %1609 = arith.addf %1606, %1608 : vector<8x32xf32>
    %1610 = vector.extract_strided_slice %1602 {offsets = [0, 64], sizes = [8, 32], strides = [1, 1]} : vector<8x96xf32> to vector<8x32xf32>
    %1611 = math.tanh %1609 : vector<8x32xf32>
    %1612 = arith.mulf %1610, %1611 : vector<8x32xf32>
    %1613 = tpu.concatenate %1596, %1612 in 1 : vector<8x32xf32>, vector<8x32xf32> -> vector<8x64xf32>
    %cst_148 = arith.constant dense<0.000000e+00> : vector<8x256xf32>
    %1614 = tpu.matmul %1613, %1183, %cst_148 {dimension_numbers = #tpu.dot_dimension_numbers<[1], [0], [0], [1], [0, 0, 1, 1], [], []>} : vector<8x64xf32>, vector<64x256xf32>, vector<8x256xf32> -> vector<8x256xf32>
    %1615 = vector.extract_strided_slice %1614 {offsets = [0, 0], sizes = [8, 128], strides = [1, 1]} : vector<8x256xf32> to vector<8x128xf32>
    %1616 = vector.extract_strided_slice %1191 {offsets = [10, 0, 0], sizes = [1, 8, 128], strides = [1, 1, 1]} : vector<13x8x256xf32> to vector<1x8x128xf32>
    %1617 = vector.shape_cast %1616 : vector<1x8x128xf32> to vector<8x128xf32>
    %1618 = arith.addf %1615, %1617 : vector<8x128xf32>
    %1619 = vector.extract_strided_slice %1614 {offsets = [0, 128], sizes = [8, 128], strides = [1, 1]} : vector<8x256xf32> to vector<8x128xf32>
    %1620 = vector.extract_strided_slice %1191 {offsets = [2, 0, 128], sizes = [1, 8, 128], strides = [1, 1, 1]} : vector<13x8x256xf32> to vector<1x8x128xf32>
    %1621 = vector.shape_cast %1620 : vector<1x8x128xf32> to vector<8x128xf32>
    %1622 = arith.addf %1619, %1621 : vector<8x128xf32>
    %1623 = vector.extract_strided_slice %1618 {offsets = [0, 0], sizes = [8, 96], strides = [1, 1]} : vector<8x128xf32> to vector<8x96xf32>
    %1624 = arith.negf %1623 : vector<8x96xf32>
    %1625 = math.exp %1624 : vector<8x96xf32>
    %cst_149 = arith.constant 1.000000e+00 : f32
    %1626 = vector.broadcast %cst_149 : f32 to vector<8x96xf32>
    %1627 = arith.addf %1626, %1625 : vector<8x96xf32>
    %1628 = arith.divf %1626, %1627 : vector<8x96xf32>
    %1629 = vector.extract_strided_slice %1618 {offsets = [0, 96], sizes = [8, 32], strides = [1, 1]} : vector<8x128xf32> to vector<8x32xf32>
    %1630 = math.tanh %1629 : vector<8x32xf32>
    %1631 = vector.extract_strided_slice %1628 {offsets = [0, 32], sizes = [8, 32], strides = [1, 1]} : vector<8x96xf32> to vector<8x32xf32>
    %1632 = arith.mulf %1631, %1593 : vector<8x32xf32>
    %1633 = vector.extract_strided_slice %1628 {offsets = [0, 0], sizes = [8, 32], strides = [1, 1]} : vector<8x96xf32> to vector<8x32xf32>
    %1634 = arith.mulf %1633, %1630 : vector<8x32xf32>
    %1635 = arith.addf %1632, %1634 : vector<8x32xf32>
    %1636 = vector.extract_strided_slice %1628 {offsets = [0, 64], sizes = [8, 32], strides = [1, 1]} : vector<8x96xf32> to vector<8x32xf32>
    %1637 = math.tanh %1635 : vector<8x32xf32>
    %1638 = arith.mulf %1636, %1637 : vector<8x32xf32>
    %1639 = vector.extract_strided_slice %1622 {offsets = [0, 0], sizes = [8, 96], strides = [1, 1]} : vector<8x128xf32> to vector<8x96xf32>
    %1640 = arith.negf %1639 : vector<8x96xf32>
    %1641 = math.exp %1640 : vector<8x96xf32>
    %cst_150 = arith.constant 1.000000e+00 : f32
    %1642 = vector.broadcast %cst_150 : f32 to vector<8x96xf32>
    %1643 = arith.addf %1642, %1641 : vector<8x96xf32>
    %1644 = arith.divf %1642, %1643 : vector<8x96xf32>
    %1645 = vector.extract_strided_slice %1622 {offsets = [0, 96], sizes = [8, 32], strides = [1, 1]} : vector<8x128xf32> to vector<8x32xf32>
    %1646 = math.tanh %1645 : vector<8x32xf32>
    %1647 = vector.extract_strided_slice %1644 {offsets = [0, 32], sizes = [8, 32], strides = [1, 1]} : vector<8x96xf32> to vector<8x32xf32>
    %1648 = arith.mulf %1647, %1609 : vector<8x32xf32>
    %1649 = vector.extract_strided_slice %1644 {offsets = [0, 0], sizes = [8, 32], strides = [1, 1]} : vector<8x96xf32> to vector<8x32xf32>
    %1650 = arith.mulf %1649, %1646 : vector<8x32xf32>
    %1651 = arith.addf %1648, %1650 : vector<8x32xf32>
    %1652 = vector.extract_strided_slice %1644 {offsets = [0, 64], sizes = [8, 32], strides = [1, 1]} : vector<8x96xf32> to vector<8x32xf32>
    %1653 = math.tanh %1651 : vector<8x32xf32>
    %1654 = arith.mulf %1652, %1653 : vector<8x32xf32>
    %1655 = tpu.concatenate %1638, %1654 in 1 : vector<8x32xf32>, vector<8x32xf32> -> vector<8x64xf32>
    %cst_151 = arith.constant dense<0.000000e+00> : vector<8x256xf32>
    %1656 = tpu.matmul %1655, %1183, %cst_151 {dimension_numbers = #tpu.dot_dimension_numbers<[1], [0], [0], [1], [0, 0, 1, 1], [], []>} : vector<8x64xf32>, vector<64x256xf32>, vector<8x256xf32> -> vector<8x256xf32>
    %1657 = vector.extract_strided_slice %1656 {offsets = [0, 0], sizes = [8, 128], strides = [1, 1]} : vector<8x256xf32> to vector<8x128xf32>
    %1658 = vector.extract_strided_slice %1191 {offsets = [11, 0, 0], sizes = [1, 8, 128], strides = [1, 1, 1]} : vector<13x8x256xf32> to vector<1x8x128xf32>
    %1659 = vector.shape_cast %1658 : vector<1x8x128xf32> to vector<8x128xf32>
    %1660 = arith.addf %1657, %1659 : vector<8x128xf32>
    %1661 = vector.extract_strided_slice %1656 {offsets = [0, 128], sizes = [8, 128], strides = [1, 1]} : vector<8x256xf32> to vector<8x128xf32>
    %1662 = vector.extract_strided_slice %1191 {offsets = [1, 0, 128], sizes = [1, 8, 128], strides = [1, 1, 1]} : vector<13x8x256xf32> to vector<1x8x128xf32>
    %1663 = vector.shape_cast %1662 : vector<1x8x128xf32> to vector<8x128xf32>
    %1664 = arith.addf %1661, %1663 : vector<8x128xf32>
    %1665 = vector.extract_strided_slice %1660 {offsets = [0, 0], sizes = [8, 96], strides = [1, 1]} : vector<8x128xf32> to vector<8x96xf32>
    %1666 = arith.negf %1665 : vector<8x96xf32>
    %1667 = math.exp %1666 : vector<8x96xf32>
    %cst_152 = arith.constant 1.000000e+00 : f32
    %1668 = vector.broadcast %cst_152 : f32 to vector<8x96xf32>
    %1669 = arith.addf %1668, %1667 : vector<8x96xf32>
    %1670 = arith.divf %1668, %1669 : vector<8x96xf32>
    %1671 = vector.extract_strided_slice %1660 {offsets = [0, 96], sizes = [8, 32], strides = [1, 1]} : vector<8x128xf32> to vector<8x32xf32>
    %1672 = math.tanh %1671 : vector<8x32xf32>
    %1673 = vector.extract_strided_slice %1670 {offsets = [0, 32], sizes = [8, 32], strides = [1, 1]} : vector<8x96xf32> to vector<8x32xf32>
    %1674 = arith.mulf %1673, %1635 : vector<8x32xf32>
    %1675 = vector.extract_strided_slice %1670 {offsets = [0, 0], sizes = [8, 32], strides = [1, 1]} : vector<8x96xf32> to vector<8x32xf32>
    %1676 = arith.mulf %1675, %1672 : vector<8x32xf32>
    %1677 = arith.addf %1674, %1676 : vector<8x32xf32>
    %1678 = vector.extract_strided_slice %1670 {offsets = [0, 64], sizes = [8, 32], strides = [1, 1]} : vector<8x96xf32> to vector<8x32xf32>
    %1679 = math.tanh %1677 : vector<8x32xf32>
    %1680 = arith.mulf %1678, %1679 : vector<8x32xf32>
    %1681 = vector.extract_strided_slice %1664 {offsets = [0, 0], sizes = [8, 96], strides = [1, 1]} : vector<8x128xf32> to vector<8x96xf32>
    %1682 = arith.negf %1681 : vector<8x96xf32>
    %1683 = math.exp %1682 : vector<8x96xf32>
    %cst_153 = arith.constant 1.000000e+00 : f32
    %1684 = vector.broadcast %cst_153 : f32 to vector<8x96xf32>
    %1685 = arith.addf %1684, %1683 : vector<8x96xf32>
    %1686 = arith.divf %1684, %1685 : vector<8x96xf32>
    %1687 = vector.extract_strided_slice %1664 {offsets = [0, 96], sizes = [8, 32], strides = [1, 1]} : vector<8x128xf32> to vector<8x32xf32>
    %1688 = math.tanh %1687 : vector<8x32xf32>
    %1689 = vector.extract_strided_slice %1686 {offsets = [0, 32], sizes = [8, 32], strides = [1, 1]} : vector<8x96xf32> to vector<8x32xf32>
    %1690 = arith.mulf %1689, %1651 : vector<8x32xf32>
    %1691 = vector.extract_strided_slice %1686 {offsets = [0, 0], sizes = [8, 32], strides = [1, 1]} : vector<8x96xf32> to vector<8x32xf32>
    %1692 = arith.mulf %1691, %1688 : vector<8x32xf32>
    %1693 = arith.addf %1690, %1692 : vector<8x32xf32>
    %1694 = vector.extract_strided_slice %1686 {offsets = [0, 64], sizes = [8, 32], strides = [1, 1]} : vector<8x96xf32> to vector<8x32xf32>
    %1695 = math.tanh %1693 : vector<8x32xf32>
    %1696 = arith.mulf %1694, %1695 : vector<8x32xf32>
    %1697 = tpu.concatenate %1680, %1696 in 1 : vector<8x32xf32>, vector<8x32xf32> -> vector<8x64xf32>
    %cst_154 = arith.constant dense<0.000000e+00> : vector<8x256xf32>
    %1698 = tpu.matmul %1697, %1183, %cst_154 {dimension_numbers = #tpu.dot_dimension_numbers<[1], [0], [0], [1], [0, 0, 1, 1], [], []>} : vector<8x64xf32>, vector<64x256xf32>, vector<8x256xf32> -> vector<8x256xf32>
    %1699 = vector.extract_strided_slice %1698 {offsets = [0, 0], sizes = [8, 128], strides = [1, 1]} : vector<8x256xf32> to vector<8x128xf32>
    %1700 = vector.extract_strided_slice %1191 {offsets = [12, 0, 0], sizes = [1, 8, 128], strides = [1, 1, 1]} : vector<13x8x256xf32> to vector<1x8x128xf32>
    %1701 = vector.shape_cast %1700 : vector<1x8x128xf32> to vector<8x128xf32>
    %1702 = arith.addf %1699, %1701 : vector<8x128xf32>
    %1703 = vector.extract_strided_slice %1698 {offsets = [0, 128], sizes = [8, 128], strides = [1, 1]} : vector<8x256xf32> to vector<8x128xf32>
    %1704 = vector.extract_strided_slice %1191 {offsets = [0, 0, 128], sizes = [1, 8, 128], strides = [1, 1, 1]} : vector<13x8x256xf32> to vector<1x8x128xf32>
    %1705 = vector.shape_cast %1704 : vector<1x8x128xf32> to vector<8x128xf32>
    %1706 = arith.addf %1703, %1705 : vector<8x128xf32>
    %1707 = vector.extract_strided_slice %1702 {offsets = [0, 0], sizes = [8, 96], strides = [1, 1]} : vector<8x128xf32> to vector<8x96xf32>
    %1708 = arith.negf %1707 : vector<8x96xf32>
    %1709 = math.exp %1708 : vector<8x96xf32>
    %cst_155 = arith.constant 1.000000e+00 : f32
    %1710 = vector.broadcast %cst_155 : f32 to vector<8x96xf32>
    %1711 = arith.addf %1710, %1709 : vector<8x96xf32>
    %1712 = arith.divf %1710, %1711 : vector<8x96xf32>
    %1713 = vector.extract_strided_slice %1702 {offsets = [0, 96], sizes = [8, 32], strides = [1, 1]} : vector<8x128xf32> to vector<8x32xf32>
    %1714 = math.tanh %1713 : vector<8x32xf32>
    %1715 = vector.extract_strided_slice %1712 {offsets = [0, 32], sizes = [8, 32], strides = [1, 1]} : vector<8x96xf32> to vector<8x32xf32>
    %1716 = arith.mulf %1715, %1677 : vector<8x32xf32>
    %1717 = vector.extract_strided_slice %1712 {offsets = [0, 0], sizes = [8, 32], strides = [1, 1]} : vector<8x96xf32> to vector<8x32xf32>
    %1718 = arith.mulf %1717, %1714 : vector<8x32xf32>
    %1719 = arith.addf %1716, %1718 : vector<8x32xf32>
    %1720 = vector.extract_strided_slice %1712 {offsets = [0, 64], sizes = [8, 32], strides = [1, 1]} : vector<8x96xf32> to vector<8x32xf32>
    %1721 = math.tanh %1719 : vector<8x32xf32>
    %1722 = arith.mulf %1720, %1721 : vector<8x32xf32>
    %1723 = vector.extract_strided_slice %1706 {offsets = [0, 0], sizes = [8, 96], strides = [1, 1]} : vector<8x128xf32> to vector<8x96xf32>
    %1724 = arith.negf %1723 : vector<8x96xf32>
    %1725 = math.exp %1724 : vector<8x96xf32>
    %cst_156 = arith.constant 1.000000e+00 : f32
    %1726 = vector.broadcast %cst_156 : f32 to vector<8x96xf32>
    %1727 = arith.addf %1726, %1725 : vector<8x96xf32>
    %1728 = arith.divf %1726, %1727 : vector<8x96xf32>
    %1729 = vector.extract_strided_slice %1706 {offsets = [0, 96], sizes = [8, 32], strides = [1, 1]} : vector<8x128xf32> to vector<8x32xf32>
    %1730 = math.tanh %1729 : vector<8x32xf32>
    %1731 = vector.extract_strided_slice %1728 {offsets = [0, 32], sizes = [8, 32], strides = [1, 1]} : vector<8x96xf32> to vector<8x32xf32>
    %1732 = arith.mulf %1731, %1693 : vector<8x32xf32>
    %1733 = vector.extract_strided_slice %1728 {offsets = [0, 0], sizes = [8, 32], strides = [1, 1]} : vector<8x96xf32> to vector<8x32xf32>
    %1734 = arith.mulf %1733, %1730 : vector<8x32xf32>
    %1735 = arith.addf %1732, %1734 : vector<8x32xf32>
    %1736 = vector.extract_strided_slice %1728 {offsets = [0, 64], sizes = [8, 32], strides = [1, 1]} : vector<8x96xf32> to vector<8x32xf32>
    %1737 = math.tanh %1735 : vector<8x32xf32>
    %1738 = arith.mulf %1736, %1737 : vector<8x32xf32>
    %1739 = vector.shape_cast %1218 : vector<8x32xf32> to vector<1x8x32xf32>
    %1740 = vector.shape_cast %1260 : vector<8x32xf32> to vector<1x8x32xf32>
    %1741 = vector.shape_cast %1302 : vector<8x32xf32> to vector<1x8x32xf32>
    %1742 = vector.shape_cast %1344 : vector<8x32xf32> to vector<1x8x32xf32>
    %1743 = vector.shape_cast %1386 : vector<8x32xf32> to vector<1x8x32xf32>
    %1744 = vector.shape_cast %1428 : vector<8x32xf32> to vector<1x8x32xf32>
    %1745 = vector.shape_cast %1470 : vector<8x32xf32> to vector<1x8x32xf32>
    %1746 = vector.shape_cast %1512 : vector<8x32xf32> to vector<1x8x32xf32>
    %1747 = vector.shape_cast %1554 : vector<8x32xf32> to vector<1x8x32xf32>
    %1748 = vector.shape_cast %1596 : vector<8x32xf32> to vector<1x8x32xf32>
    %1749 = vector.shape_cast %1638 : vector<8x32xf32> to vector<1x8x32xf32>
    %1750 = vector.shape_cast %1680 : vector<8x32xf32> to vector<1x8x32xf32>
    %1751 = vector.shape_cast %1722 : vector<8x32xf32> to vector<1x8x32xf32>
    %1752 = tpu.concatenate %1739, %1740, %1741, %1742, %1743, %1744, %1745, %1746, %1747, %1748, %1749, %1750, %1751 in 0 : vector<1x8x32xf32>, vector<1x8x32xf32>, vector<1x8x32xf32>, vector<1x8x32xf32>, vector<1x8x32xf32>, vector<1x8x32xf32>, vector<1x8x32xf32>, vector<1x8x32xf32>, vector<1x8x32xf32>, vector<1x8x32xf32>, vector<1x8x32xf32>, vector<1x8x32xf32>, vector<1x8x32xf32> -> vector<13x8x32xf32>
    %1753 = vector.shape_cast %1738 : vector<8x32xf32> to vector<1x8x32xf32>
    %1754 = vector.shape_cast %1696 : vector<8x32xf32> to vector<1x8x32xf32>
    %1755 = vector.shape_cast %1654 : vector<8x32xf32> to vector<1x8x32xf32>
    %1756 = vector.shape_cast %1612 : vector<8x32xf32> to vector<1x8x32xf32>
    %1757 = vector.shape_cast %1570 : vector<8x32xf32> to vector<1x8x32xf32>
    %1758 = vector.shape_cast %1528 : vector<8x32xf32> to vector<1x8x32xf32>
    %1759 = vector.shape_cast %1486 : vector<8x32xf32> to vector<1x8x32xf32>
    %1760 = vector.shape_cast %1444 : vector<8x32xf32> to vector<1x8x32xf32>
    %1761 = vector.shape_cast %1402 : vector<8x32xf32> to vector<1x8x32xf32>
    %1762 = vector.shape_cast %1360 : vector<8x32xf32> to vector<1x8x32xf32>
    %1763 = vector.shape_cast %1318 : vector<8x32xf32> to vector<1x8x32xf32>
    %1764 = vector.shape_cast %1276 : vector<8x32xf32> to vector<1x8x32xf32>
    %1765 = vector.shape_cast %1234 : vector<8x32xf32> to vector<1x8x32xf32>
    %1766 = tpu.concatenate %1753, %1754, %1755, %1756, %1757, %1758, %1759, %1760, %1761, %1762, %1763, %1764, %1765 in 0 : vector<1x8x32xf32>, vector<1x8x32xf32>, vector<1x8x32xf32>, vector<1x8x32xf32>, vector<1x8x32xf32>, vector<1x8x32xf32>, vector<1x8x32xf32>, vector<1x8x32xf32>, vector<1x8x32xf32>, vector<1x8x32xf32>, vector<1x8x32xf32>, vector<1x8x32xf32>, vector<1x8x32xf32> -> vector<13x8x32xf32>
    %1767 = tpu.concatenate %1752, %1766 in 2 : vector<13x8x32xf32>, vector<13x8x32xf32> -> vector<13x8x64xf32>
    %c0_157 = arith.constant 0 : index
    %c0_158 = arith.constant 0 : index
    %1768 = vector.load %arg18[%c0_157, %c0_158] : memref<64x256xf32, #tpu.memory_space<vmem>>, vector<64x256xf32>
    %c0_159 = arith.constant 0 : index
    %c0_160 = arith.constant 0 : index
    %1769 = vector.load %arg19[%c0_159, %c0_160] : memref<64x256xf32, #tpu.memory_space<vmem>>, vector<64x256xf32>
    %c0_161 = arith.constant 0 : index
    %c0_162 = arith.constant 0 : index
    %1770 = vector.load %arg20[%c0_161, %c0_162] : memref<1x256xf32, #tpu.memory_space<vmem>>, vector<1x256xf32>
    %c0_163 = arith.constant 0 : index
    %c0_164 = arith.constant 0 : index
    %1771 = vector.load %arg21[%c0_163, %c0_164] : memref<8x64xf32, #tpu.memory_space<vmem>>, vector<8x64xf32>
    %c0_165 = arith.constant 0 : index
    %c0_166 = arith.constant 0 : index
    %1772 = vector.load %arg22[%c0_165, %c0_166] : memref<8x64xf32, #tpu.memory_space<vmem>>, vector<8x64xf32>
    %1773 = vector.shape_cast %1767 : vector<13x8x64xf32> to vector<104x64xf32>
    %cst_167 = arith.constant dense<0.000000e+00> : vector<104x256xf32>
    %1774 = tpu.matmul %1773, %1768, %cst_167 {dimension_numbers = #tpu.dot_dimension_numbers<[1], [0], [0], [1], [0, 0, 1, 1], [], []>} : vector<104x64xf32>, vector<64x256xf32>, vector<104x256xf32> -> vector<104x256xf32>
    %1775 = vector.broadcast %1770 : vector<1x256xf32> to vector<104x256xf32>
    %1776 = arith.addf %1774, %1775 : vector<104x256xf32>
    %1777 = vector.shape_cast %1776 : vector<104x256xf32> to vector<13x8x256xf32>
    %1778 = vector.extract_strided_slice %1772 {offsets = [0, 0], sizes = [8, 32], strides = [1, 1]} : vector<8x64xf32> to vector<8x32xf32>
    %1779 = vector.extract_strided_slice %1772 {offsets = [0, 32], sizes = [8, 32], strides = [1, 1]} : vector<8x64xf32> to vector<8x32xf32>
    %cst_168 = arith.constant dense<0.000000e+00> : vector<8x256xf32>
    %1780 = tpu.matmul %1771, %1769, %cst_168 {dimension_numbers = #tpu.dot_dimension_numbers<[1], [0], [0], [1], [0, 0, 1, 1], [], []>} : vector<8x64xf32>, vector<64x256xf32>, vector<8x256xf32> -> vector<8x256xf32>
    %1781 = vector.extract_strided_slice %1780 {offsets = [0, 0], sizes = [8, 128], strides = [1, 1]} : vector<8x256xf32> to vector<8x128xf32>
    %1782 = vector.extract_strided_slice %1777 {offsets = [0, 0, 0], sizes = [1, 8, 128], strides = [1, 1, 1]} : vector<13x8x256xf32> to vector<1x8x128xf32>
    %1783 = vector.shape_cast %1782 : vector<1x8x128xf32> to vector<8x128xf32>
    %1784 = arith.addf %1781, %1783 : vector<8x128xf32>
    %1785 = vector.extract_strided_slice %1780 {offsets = [0, 128], sizes = [8, 128], strides = [1, 1]} : vector<8x256xf32> to vector<8x128xf32>
    %1786 = vector.extract_strided_slice %1777 {offsets = [12, 0, 128], sizes = [1, 8, 128], strides = [1, 1, 1]} : vector<13x8x256xf32> to vector<1x8x128xf32>
    %1787 = vector.shape_cast %1786 : vector<1x8x128xf32> to vector<8x128xf32>
    %1788 = arith.addf %1785, %1787 : vector<8x128xf32>
    %1789 = vector.extract_strided_slice %1784 {offsets = [0, 0], sizes = [8, 96], strides = [1, 1]} : vector<8x128xf32> to vector<8x96xf32>
    %1790 = arith.negf %1789 : vector<8x96xf32>
    %1791 = math.exp %1790 : vector<8x96xf32>
    %cst_169 = arith.constant 1.000000e+00 : f32
    %1792 = vector.broadcast %cst_169 : f32 to vector<8x96xf32>
    %1793 = arith.addf %1792, %1791 : vector<8x96xf32>
    %1794 = arith.divf %1792, %1793 : vector<8x96xf32>
    %1795 = vector.extract_strided_slice %1784 {offsets = [0, 96], sizes = [8, 32], strides = [1, 1]} : vector<8x128xf32> to vector<8x32xf32>
    %1796 = math.tanh %1795 : vector<8x32xf32>
    %1797 = vector.extract_strided_slice %1794 {offsets = [0, 32], sizes = [8, 32], strides = [1, 1]} : vector<8x96xf32> to vector<8x32xf32>
    %1798 = arith.mulf %1797, %1778 : vector<8x32xf32>
    %1799 = vector.extract_strided_slice %1794 {offsets = [0, 0], sizes = [8, 32], strides = [1, 1]} : vector<8x96xf32> to vector<8x32xf32>
    %1800 = arith.mulf %1799, %1796 : vector<8x32xf32>
    %1801 = arith.addf %1798, %1800 : vector<8x32xf32>
    %1802 = vector.extract_strided_slice %1794 {offsets = [0, 64], sizes = [8, 32], strides = [1, 1]} : vector<8x96xf32> to vector<8x32xf32>
    %1803 = math.tanh %1801 : vector<8x32xf32>
    %1804 = arith.mulf %1802, %1803 : vector<8x32xf32>
    %1805 = vector.extract_strided_slice %1788 {offsets = [0, 0], sizes = [8, 96], strides = [1, 1]} : vector<8x128xf32> to vector<8x96xf32>
    %1806 = arith.negf %1805 : vector<8x96xf32>
    %1807 = math.exp %1806 : vector<8x96xf32>
    %cst_170 = arith.constant 1.000000e+00 : f32
    %1808 = vector.broadcast %cst_170 : f32 to vector<8x96xf32>
    %1809 = arith.addf %1808, %1807 : vector<8x96xf32>
    %1810 = arith.divf %1808, %1809 : vector<8x96xf32>
    %1811 = vector.extract_strided_slice %1788 {offsets = [0, 96], sizes = [8, 32], strides = [1, 1]} : vector<8x128xf32> to vector<8x32xf32>
    %1812 = math.tanh %1811 : vector<8x32xf32>
    %1813 = vector.extract_strided_slice %1810 {offsets = [0, 32], sizes = [8, 32], strides = [1, 1]} : vector<8x96xf32> to vector<8x32xf32>
    %1814 = arith.mulf %1813, %1779 : vector<8x32xf32>
    %1815 = vector.extract_strided_slice %1810 {offsets = [0, 0], sizes = [8, 32], strides = [1, 1]} : vector<8x96xf32> to vector<8x32xf32>
    %1816 = arith.mulf %1815, %1812 : vector<8x32xf32>
    %1817 = arith.addf %1814, %1816 : vector<8x32xf32>
    %1818 = vector.extract_strided_slice %1810 {offsets = [0, 64], sizes = [8, 32], strides = [1, 1]} : vector<8x96xf32> to vector<8x32xf32>
    %1819 = math.tanh %1817 : vector<8x32xf32>
    %1820 = arith.mulf %1818, %1819 : vector<8x32xf32>
    %1821 = tpu.concatenate %1804, %1820 in 1 : vector<8x32xf32>, vector<8x32xf32> -> vector<8x64xf32>
    %cst_171 = arith.constant dense<0.000000e+00> : vector<8x256xf32>
    %1822 = tpu.matmul %1821, %1769, %cst_171 {dimension_numbers = #tpu.dot_dimension_numbers<[1], [0], [0], [1], [0, 0, 1, 1], [], []>} : vector<8x64xf32>, vector<64x256xf32>, vector<8x256xf32> -> vector<8x256xf32>
    %1823 = vector.extract_strided_slice %1822 {offsets = [0, 0], sizes = [8, 128], strides = [1, 1]} : vector<8x256xf32> to vector<8x128xf32>
    %1824 = vector.extract_strided_slice %1777 {offsets = [1, 0, 0], sizes = [1, 8, 128], strides = [1, 1, 1]} : vector<13x8x256xf32> to vector<1x8x128xf32>
    %1825 = vector.shape_cast %1824 : vector<1x8x128xf32> to vector<8x128xf32>
    %1826 = arith.addf %1823, %1825 : vector<8x128xf32>
    %1827 = vector.extract_strided_slice %1822 {offsets = [0, 128], sizes = [8, 128], strides = [1, 1]} : vector<8x256xf32> to vector<8x128xf32>
    %1828 = vector.extract_strided_slice %1777 {offsets = [11, 0, 128], sizes = [1, 8, 128], strides = [1, 1, 1]} : vector<13x8x256xf32> to vector<1x8x128xf32>
    %1829 = vector.shape_cast %1828 : vector<1x8x128xf32> to vector<8x128xf32>
    %1830 = arith.addf %1827, %1829 : vector<8x128xf32>
    %1831 = vector.extract_strided_slice %1826 {offsets = [0, 0], sizes = [8, 96], strides = [1, 1]} : vector<8x128xf32> to vector<8x96xf32>
    %1832 = arith.negf %1831 : vector<8x96xf32>
    %1833 = math.exp %1832 : vector<8x96xf32>
    %cst_172 = arith.constant 1.000000e+00 : f32
    %1834 = vector.broadcast %cst_172 : f32 to vector<8x96xf32>
    %1835 = arith.addf %1834, %1833 : vector<8x96xf32>
    %1836 = arith.divf %1834, %1835 : vector<8x96xf32>
    %1837 = vector.extract_strided_slice %1826 {offsets = [0, 96], sizes = [8, 32], strides = [1, 1]} : vector<8x128xf32> to vector<8x32xf32>
    %1838 = math.tanh %1837 : vector<8x32xf32>
    %1839 = vector.extract_strided_slice %1836 {offsets = [0, 32], sizes = [8, 32], strides = [1, 1]} : vector<8x96xf32> to vector<8x32xf32>
    %1840 = arith.mulf %1839, %1801 : vector<8x32xf32>
    %1841 = vector.extract_strided_slice %1836 {offsets = [0, 0], sizes = [8, 32], strides = [1, 1]} : vector<8x96xf32> to vector<8x32xf32>
    %1842 = arith.mulf %1841, %1838 : vector<8x32xf32>
    %1843 = arith.addf %1840, %1842 : vector<8x32xf32>
    %1844 = vector.extract_strided_slice %1836 {offsets = [0, 64], sizes = [8, 32], strides = [1, 1]} : vector<8x96xf32> to vector<8x32xf32>
    %1845 = math.tanh %1843 : vector<8x32xf32>
    %1846 = arith.mulf %1844, %1845 : vector<8x32xf32>
    %1847 = vector.extract_strided_slice %1830 {offsets = [0, 0], sizes = [8, 96], strides = [1, 1]} : vector<8x128xf32> to vector<8x96xf32>
    %1848 = arith.negf %1847 : vector<8x96xf32>
    %1849 = math.exp %1848 : vector<8x96xf32>
    %cst_173 = arith.constant 1.000000e+00 : f32
    %1850 = vector.broadcast %cst_173 : f32 to vector<8x96xf32>
    %1851 = arith.addf %1850, %1849 : vector<8x96xf32>
    %1852 = arith.divf %1850, %1851 : vector<8x96xf32>
    %1853 = vector.extract_strided_slice %1830 {offsets = [0, 96], sizes = [8, 32], strides = [1, 1]} : vector<8x128xf32> to vector<8x32xf32>
    %1854 = math.tanh %1853 : vector<8x32xf32>
    %1855 = vector.extract_strided_slice %1852 {offsets = [0, 32], sizes = [8, 32], strides = [1, 1]} : vector<8x96xf32> to vector<8x32xf32>
    %1856 = arith.mulf %1855, %1817 : vector<8x32xf32>
    %1857 = vector.extract_strided_slice %1852 {offsets = [0, 0], sizes = [8, 32], strides = [1, 1]} : vector<8x96xf32> to vector<8x32xf32>
    %1858 = arith.mulf %1857, %1854 : vector<8x32xf32>
    %1859 = arith.addf %1856, %1858 : vector<8x32xf32>
    %1860 = vector.extract_strided_slice %1852 {offsets = [0, 64], sizes = [8, 32], strides = [1, 1]} : vector<8x96xf32> to vector<8x32xf32>
    %1861 = math.tanh %1859 : vector<8x32xf32>
    %1862 = arith.mulf %1860, %1861 : vector<8x32xf32>
    %1863 = tpu.concatenate %1846, %1862 in 1 : vector<8x32xf32>, vector<8x32xf32> -> vector<8x64xf32>
    %cst_174 = arith.constant dense<0.000000e+00> : vector<8x256xf32>
    %1864 = tpu.matmul %1863, %1769, %cst_174 {dimension_numbers = #tpu.dot_dimension_numbers<[1], [0], [0], [1], [0, 0, 1, 1], [], []>} : vector<8x64xf32>, vector<64x256xf32>, vector<8x256xf32> -> vector<8x256xf32>
    %1865 = vector.extract_strided_slice %1864 {offsets = [0, 0], sizes = [8, 128], strides = [1, 1]} : vector<8x256xf32> to vector<8x128xf32>
    %1866 = vector.extract_strided_slice %1777 {offsets = [2, 0, 0], sizes = [1, 8, 128], strides = [1, 1, 1]} : vector<13x8x256xf32> to vector<1x8x128xf32>
    %1867 = vector.shape_cast %1866 : vector<1x8x128xf32> to vector<8x128xf32>
    %1868 = arith.addf %1865, %1867 : vector<8x128xf32>
    %1869 = vector.extract_strided_slice %1864 {offsets = [0, 128], sizes = [8, 128], strides = [1, 1]} : vector<8x256xf32> to vector<8x128xf32>
    %1870 = vector.extract_strided_slice %1777 {offsets = [10, 0, 128], sizes = [1, 8, 128], strides = [1, 1, 1]} : vector<13x8x256xf32> to vector<1x8x128xf32>
    %1871 = vector.shape_cast %1870 : vector<1x8x128xf32> to vector<8x128xf32>
    %1872 = arith.addf %1869, %1871 : vector<8x128xf32>
    %1873 = vector.extract_strided_slice %1868 {offsets = [0, 0], sizes = [8, 96], strides = [1, 1]} : vector<8x128xf32> to vector<8x96xf32>
    %1874 = arith.negf %1873 : vector<8x96xf32>
    %1875 = math.exp %1874 : vector<8x96xf32>
    %cst_175 = arith.constant 1.000000e+00 : f32
    %1876 = vector.broadcast %cst_175 : f32 to vector<8x96xf32>
    %1877 = arith.addf %1876, %1875 : vector<8x96xf32>
    %1878 = arith.divf %1876, %1877 : vector<8x96xf32>
    %1879 = vector.extract_strided_slice %1868 {offsets = [0, 96], sizes = [8, 32], strides = [1, 1]} : vector<8x128xf32> to vector<8x32xf32>
    %1880 = math.tanh %1879 : vector<8x32xf32>
    %1881 = vector.extract_strided_slice %1878 {offsets = [0, 32], sizes = [8, 32], strides = [1, 1]} : vector<8x96xf32> to vector<8x32xf32>
    %1882 = arith.mulf %1881, %1843 : vector<8x32xf32>
    %1883 = vector.extract_strided_slice %1878 {offsets = [0, 0], sizes = [8, 32], strides = [1, 1]} : vector<8x96xf32> to vector<8x32xf32>
    %1884 = arith.mulf %1883, %1880 : vector<8x32xf32>
    %1885 = arith.addf %1882, %1884 : vector<8x32xf32>
    %1886 = vector.extract_strided_slice %1878 {offsets = [0, 64], sizes = [8, 32], strides = [1, 1]} : vector<8x96xf32> to vector<8x32xf32>
    %1887 = math.tanh %1885 : vector<8x32xf32>
    %1888 = arith.mulf %1886, %1887 : vector<8x32xf32>
    %1889 = vector.extract_strided_slice %1872 {offsets = [0, 0], sizes = [8, 96], strides = [1, 1]} : vector<8x128xf32> to vector<8x96xf32>
    %1890 = arith.negf %1889 : vector<8x96xf32>
    %1891 = math.exp %1890 : vector<8x96xf32>
    %cst_176 = arith.constant 1.000000e+00 : f32
    %1892 = vector.broadcast %cst_176 : f32 to vector<8x96xf32>
    %1893 = arith.addf %1892, %1891 : vector<8x96xf32>
    %1894 = arith.divf %1892, %1893 : vector<8x96xf32>
    %1895 = vector.extract_strided_slice %1872 {offsets = [0, 96], sizes = [8, 32], strides = [1, 1]} : vector<8x128xf32> to vector<8x32xf32>
    %1896 = math.tanh %1895 : vector<8x32xf32>
    %1897 = vector.extract_strided_slice %1894 {offsets = [0, 32], sizes = [8, 32], strides = [1, 1]} : vector<8x96xf32> to vector<8x32xf32>
    %1898 = arith.mulf %1897, %1859 : vector<8x32xf32>
    %1899 = vector.extract_strided_slice %1894 {offsets = [0, 0], sizes = [8, 32], strides = [1, 1]} : vector<8x96xf32> to vector<8x32xf32>
    %1900 = arith.mulf %1899, %1896 : vector<8x32xf32>
    %1901 = arith.addf %1898, %1900 : vector<8x32xf32>
    %1902 = vector.extract_strided_slice %1894 {offsets = [0, 64], sizes = [8, 32], strides = [1, 1]} : vector<8x96xf32> to vector<8x32xf32>
    %1903 = math.tanh %1901 : vector<8x32xf32>
    %1904 = arith.mulf %1902, %1903 : vector<8x32xf32>
    %1905 = tpu.concatenate %1888, %1904 in 1 : vector<8x32xf32>, vector<8x32xf32> -> vector<8x64xf32>
    %cst_177 = arith.constant dense<0.000000e+00> : vector<8x256xf32>
    %1906 = tpu.matmul %1905, %1769, %cst_177 {dimension_numbers = #tpu.dot_dimension_numbers<[1], [0], [0], [1], [0, 0, 1, 1], [], []>} : vector<8x64xf32>, vector<64x256xf32>, vector<8x256xf32> -> vector<8x256xf32>
    %1907 = vector.extract_strided_slice %1906 {offsets = [0, 0], sizes = [8, 128], strides = [1, 1]} : vector<8x256xf32> to vector<8x128xf32>
    %1908 = vector.extract_strided_slice %1777 {offsets = [3, 0, 0], sizes = [1, 8, 128], strides = [1, 1, 1]} : vector<13x8x256xf32> to vector<1x8x128xf32>
    %1909 = vector.shape_cast %1908 : vector<1x8x128xf32> to vector<8x128xf32>
    %1910 = arith.addf %1907, %1909 : vector<8x128xf32>
    %1911 = vector.extract_strided_slice %1906 {offsets = [0, 128], sizes = [8, 128], strides = [1, 1]} : vector<8x256xf32> to vector<8x128xf32>
    %1912 = vector.extract_strided_slice %1777 {offsets = [9, 0, 128], sizes = [1, 8, 128], strides = [1, 1, 1]} : vector<13x8x256xf32> to vector<1x8x128xf32>
    %1913 = vector.shape_cast %1912 : vector<1x8x128xf32> to vector<8x128xf32>
    %1914 = arith.addf %1911, %1913 : vector<8x128xf32>
    %1915 = vector.extract_strided_slice %1910 {offsets = [0, 0], sizes = [8, 96], strides = [1, 1]} : vector<8x128xf32> to vector<8x96xf32>
    %1916 = arith.negf %1915 : vector<8x96xf32>
    %1917 = math.exp %1916 : vector<8x96xf32>
    %cst_178 = arith.constant 1.000000e+00 : f32
    %1918 = vector.broadcast %cst_178 : f32 to vector<8x96xf32>
    %1919 = arith.addf %1918, %1917 : vector<8x96xf32>
    %1920 = arith.divf %1918, %1919 : vector<8x96xf32>
    %1921 = vector.extract_strided_slice %1910 {offsets = [0, 96], sizes = [8, 32], strides = [1, 1]} : vector<8x128xf32> to vector<8x32xf32>
    %1922 = math.tanh %1921 : vector<8x32xf32>
    %1923 = vector.extract_strided_slice %1920 {offsets = [0, 32], sizes = [8, 32], strides = [1, 1]} : vector<8x96xf32> to vector<8x32xf32>
    %1924 = arith.mulf %1923, %1885 : vector<8x32xf32>
    %1925 = vector.extract_strided_slice %1920 {offsets = [0, 0], sizes = [8, 32], strides = [1, 1]} : vector<8x96xf32> to vector<8x32xf32>
    %1926 = arith.mulf %1925, %1922 : vector<8x32xf32>
    %1927 = arith.addf %1924, %1926 : vector<8x32xf32>
    %1928 = vector.extract_strided_slice %1920 {offsets = [0, 64], sizes = [8, 32], strides = [1, 1]} : vector<8x96xf32> to vector<8x32xf32>
    %1929 = math.tanh %1927 : vector<8x32xf32>
    %1930 = arith.mulf %1928, %1929 : vector<8x32xf32>
    %1931 = vector.extract_strided_slice %1914 {offsets = [0, 0], sizes = [8, 96], strides = [1, 1]} : vector<8x128xf32> to vector<8x96xf32>
    %1932 = arith.negf %1931 : vector<8x96xf32>
    %1933 = math.exp %1932 : vector<8x96xf32>
    %cst_179 = arith.constant 1.000000e+00 : f32
    %1934 = vector.broadcast %cst_179 : f32 to vector<8x96xf32>
    %1935 = arith.addf %1934, %1933 : vector<8x96xf32>
    %1936 = arith.divf %1934, %1935 : vector<8x96xf32>
    %1937 = vector.extract_strided_slice %1914 {offsets = [0, 96], sizes = [8, 32], strides = [1, 1]} : vector<8x128xf32> to vector<8x32xf32>
    %1938 = math.tanh %1937 : vector<8x32xf32>
    %1939 = vector.extract_strided_slice %1936 {offsets = [0, 32], sizes = [8, 32], strides = [1, 1]} : vector<8x96xf32> to vector<8x32xf32>
    %1940 = arith.mulf %1939, %1901 : vector<8x32xf32>
    %1941 = vector.extract_strided_slice %1936 {offsets = [0, 0], sizes = [8, 32], strides = [1, 1]} : vector<8x96xf32> to vector<8x32xf32>
    %1942 = arith.mulf %1941, %1938 : vector<8x32xf32>
    %1943 = arith.addf %1940, %1942 : vector<8x32xf32>
    %1944 = vector.extract_strided_slice %1936 {offsets = [0, 64], sizes = [8, 32], strides = [1, 1]} : vector<8x96xf32> to vector<8x32xf32>
    %1945 = math.tanh %1943 : vector<8x32xf32>
    %1946 = arith.mulf %1944, %1945 : vector<8x32xf32>
    %1947 = tpu.concatenate %1930, %1946 in 1 : vector<8x32xf32>, vector<8x32xf32> -> vector<8x64xf32>
    %cst_180 = arith.constant dense<0.000000e+00> : vector<8x256xf32>
    %1948 = tpu.matmul %1947, %1769, %cst_180 {dimension_numbers = #tpu.dot_dimension_numbers<[1], [0], [0], [1], [0, 0, 1, 1], [], []>} : vector<8x64xf32>, vector<64x256xf32>, vector<8x256xf32> -> vector<8x256xf32>
    %1949 = vector.extract_strided_slice %1948 {offsets = [0, 0], sizes = [8, 128], strides = [1, 1]} : vector<8x256xf32> to vector<8x128xf32>
    %1950 = vector.extract_strided_slice %1777 {offsets = [4, 0, 0], sizes = [1, 8, 128], strides = [1, 1, 1]} : vector<13x8x256xf32> to vector<1x8x128xf32>
    %1951 = vector.shape_cast %1950 : vector<1x8x128xf32> to vector<8x128xf32>
    %1952 = arith.addf %1949, %1951 : vector<8x128xf32>
    %1953 = vector.extract_strided_slice %1948 {offsets = [0, 128], sizes = [8, 128], strides = [1, 1]} : vector<8x256xf32> to vector<8x128xf32>
    %1954 = vector.extract_strided_slice %1777 {offsets = [8, 0, 128], sizes = [1, 8, 128], strides = [1, 1, 1]} : vector<13x8x256xf32> to vector<1x8x128xf32>
    %1955 = vector.shape_cast %1954 : vector<1x8x128xf32> to vector<8x128xf32>
    %1956 = arith.addf %1953, %1955 : vector<8x128xf32>
    %1957 = vector.extract_strided_slice %1952 {offsets = [0, 0], sizes = [8, 96], strides = [1, 1]} : vector<8x128xf32> to vector<8x96xf32>
    %1958 = arith.negf %1957 : vector<8x96xf32>
    %1959 = math.exp %1958 : vector<8x96xf32>
    %cst_181 = arith.constant 1.000000e+00 : f32
    %1960 = vector.broadcast %cst_181 : f32 to vector<8x96xf32>
    %1961 = arith.addf %1960, %1959 : vector<8x96xf32>
    %1962 = arith.divf %1960, %1961 : vector<8x96xf32>
    %1963 = vector.extract_strided_slice %1952 {offsets = [0, 96], sizes = [8, 32], strides = [1, 1]} : vector<8x128xf32> to vector<8x32xf32>
    %1964 = math.tanh %1963 : vector<8x32xf32>
    %1965 = vector.extract_strided_slice %1962 {offsets = [0, 32], sizes = [8, 32], strides = [1, 1]} : vector<8x96xf32> to vector<8x32xf32>
    %1966 = arith.mulf %1965, %1927 : vector<8x32xf32>
    %1967 = vector.extract_strided_slice %1962 {offsets = [0, 0], sizes = [8, 32], strides = [1, 1]} : vector<8x96xf32> to vector<8x32xf32>
    %1968 = arith.mulf %1967, %1964 : vector<8x32xf32>
    %1969 = arith.addf %1966, %1968 : vector<8x32xf32>
    %1970 = vector.extract_strided_slice %1962 {offsets = [0, 64], sizes = [8, 32], strides = [1, 1]} : vector<8x96xf32> to vector<8x32xf32>
    %1971 = math.tanh %1969 : vector<8x32xf32>
    %1972 = arith.mulf %1970, %1971 : vector<8x32xf32>
    %1973 = vector.extract_strided_slice %1956 {offsets = [0, 0], sizes = [8, 96], strides = [1, 1]} : vector<8x128xf32> to vector<8x96xf32>
    %1974 = arith.negf %1973 : vector<8x96xf32>
    %1975 = math.exp %1974 : vector<8x96xf32>
    %cst_182 = arith.constant 1.000000e+00 : f32
    %1976 = vector.broadcast %cst_182 : f32 to vector<8x96xf32>
    %1977 = arith.addf %1976, %1975 : vector<8x96xf32>
    %1978 = arith.divf %1976, %1977 : vector<8x96xf32>
    %1979 = vector.extract_strided_slice %1956 {offsets = [0, 96], sizes = [8, 32], strides = [1, 1]} : vector<8x128xf32> to vector<8x32xf32>
    %1980 = math.tanh %1979 : vector<8x32xf32>
    %1981 = vector.extract_strided_slice %1978 {offsets = [0, 32], sizes = [8, 32], strides = [1, 1]} : vector<8x96xf32> to vector<8x32xf32>
    %1982 = arith.mulf %1981, %1943 : vector<8x32xf32>
    %1983 = vector.extract_strided_slice %1978 {offsets = [0, 0], sizes = [8, 32], strides = [1, 1]} : vector<8x96xf32> to vector<8x32xf32>
    %1984 = arith.mulf %1983, %1980 : vector<8x32xf32>
    %1985 = arith.addf %1982, %1984 : vector<8x32xf32>
    %1986 = vector.extract_strided_slice %1978 {offsets = [0, 64], sizes = [8, 32], strides = [1, 1]} : vector<8x96xf32> to vector<8x32xf32>
    %1987 = math.tanh %1985 : vector<8x32xf32>
    %1988 = arith.mulf %1986, %1987 : vector<8x32xf32>
    %1989 = tpu.concatenate %1972, %1988 in 1 : vector<8x32xf32>, vector<8x32xf32> -> vector<8x64xf32>
    %cst_183 = arith.constant dense<0.000000e+00> : vector<8x256xf32>
    %1990 = tpu.matmul %1989, %1769, %cst_183 {dimension_numbers = #tpu.dot_dimension_numbers<[1], [0], [0], [1], [0, 0, 1, 1], [], []>} : vector<8x64xf32>, vector<64x256xf32>, vector<8x256xf32> -> vector<8x256xf32>
    %1991 = vector.extract_strided_slice %1990 {offsets = [0, 0], sizes = [8, 128], strides = [1, 1]} : vector<8x256xf32> to vector<8x128xf32>
    %1992 = vector.extract_strided_slice %1777 {offsets = [5, 0, 0], sizes = [1, 8, 128], strides = [1, 1, 1]} : vector<13x8x256xf32> to vector<1x8x128xf32>
    %1993 = vector.shape_cast %1992 : vector<1x8x128xf32> to vector<8x128xf32>
    %1994 = arith.addf %1991, %1993 : vector<8x128xf32>
    %1995 = vector.extract_strided_slice %1990 {offsets = [0, 128], sizes = [8, 128], strides = [1, 1]} : vector<8x256xf32> to vector<8x128xf32>
    %1996 = vector.extract_strided_slice %1777 {offsets = [7, 0, 128], sizes = [1, 8, 128], strides = [1, 1, 1]} : vector<13x8x256xf32> to vector<1x8x128xf32>
    %1997 = vector.shape_cast %1996 : vector<1x8x128xf32> to vector<8x128xf32>
    %1998 = arith.addf %1995, %1997 : vector<8x128xf32>
    %1999 = vector.extract_strided_slice %1994 {offsets = [0, 0], sizes = [8, 96], strides = [1, 1]} : vector<8x128xf32> to vector<8x96xf32>
    %2000 = arith.negf %1999 : vector<8x96xf32>
    %2001 = math.exp %2000 : vector<8x96xf32>
    %cst_184 = arith.constant 1.000000e+00 : f32
    %2002 = vector.broadcast %cst_184 : f32 to vector<8x96xf32>
    %2003 = arith.addf %2002, %2001 : vector<8x96xf32>
    %2004 = arith.divf %2002, %2003 : vector<8x96xf32>
    %2005 = vector.extract_strided_slice %1994 {offsets = [0, 96], sizes = [8, 32], strides = [1, 1]} : vector<8x128xf32> to vector<8x32xf32>
    %2006 = math.tanh %2005 : vector<8x32xf32>
    %2007 = vector.extract_strided_slice %2004 {offsets = [0, 32], sizes = [8, 32], strides = [1, 1]} : vector<8x96xf32> to vector<8x32xf32>
    %2008 = arith.mulf %2007, %1969 : vector<8x32xf32>
    %2009 = vector.extract_strided_slice %2004 {offsets = [0, 0], sizes = [8, 32], strides = [1, 1]} : vector<8x96xf32> to vector<8x32xf32>
    %2010 = arith.mulf %2009, %2006 : vector<8x32xf32>
    %2011 = arith.addf %2008, %2010 : vector<8x32xf32>
    %2012 = vector.extract_strided_slice %2004 {offsets = [0, 64], sizes = [8, 32], strides = [1, 1]} : vector<8x96xf32> to vector<8x32xf32>
    %2013 = math.tanh %2011 : vector<8x32xf32>
    %2014 = arith.mulf %2012, %2013 : vector<8x32xf32>
    %2015 = vector.extract_strided_slice %1998 {offsets = [0, 0], sizes = [8, 96], strides = [1, 1]} : vector<8x128xf32> to vector<8x96xf32>
    %2016 = arith.negf %2015 : vector<8x96xf32>
    %2017 = math.exp %2016 : vector<8x96xf32>
    %cst_185 = arith.constant 1.000000e+00 : f32
    %2018 = vector.broadcast %cst_185 : f32 to vector<8x96xf32>
    %2019 = arith.addf %2018, %2017 : vector<8x96xf32>
    %2020 = arith.divf %2018, %2019 : vector<8x96xf32>
    %2021 = vector.extract_strided_slice %1998 {offsets = [0, 96], sizes = [8, 32], strides = [1, 1]} : vector<8x128xf32> to vector<8x32xf32>
    %2022 = math.tanh %2021 : vector<8x32xf32>
    %2023 = vector.extract_strided_slice %2020 {offsets = [0, 32], sizes = [8, 32], strides = [1, 1]} : vector<8x96xf32> to vector<8x32xf32>
    %2024 = arith.mulf %2023, %1985 : vector<8x32xf32>
    %2025 = vector.extract_strided_slice %2020 {offsets = [0, 0], sizes = [8, 32], strides = [1, 1]} : vector<8x96xf32> to vector<8x32xf32>
    %2026 = arith.mulf %2025, %2022 : vector<8x32xf32>
    %2027 = arith.addf %2024, %2026 : vector<8x32xf32>
    %2028 = vector.extract_strided_slice %2020 {offsets = [0, 64], sizes = [8, 32], strides = [1, 1]} : vector<8x96xf32> to vector<8x32xf32>
    %2029 = math.tanh %2027 : vector<8x32xf32>
    %2030 = arith.mulf %2028, %2029 : vector<8x32xf32>
    %2031 = tpu.concatenate %2014, %2030 in 1 : vector<8x32xf32>, vector<8x32xf32> -> vector<8x64xf32>
    %cst_186 = arith.constant dense<0.000000e+00> : vector<8x256xf32>
    %2032 = tpu.matmul %2031, %1769, %cst_186 {dimension_numbers = #tpu.dot_dimension_numbers<[1], [0], [0], [1], [0, 0, 1, 1], [], []>} : vector<8x64xf32>, vector<64x256xf32>, vector<8x256xf32> -> vector<8x256xf32>
    %2033 = vector.extract_strided_slice %2032 {offsets = [0, 0], sizes = [8, 128], strides = [1, 1]} : vector<8x256xf32> to vector<8x128xf32>
    %2034 = vector.extract_strided_slice %1777 {offsets = [6, 0, 0], sizes = [1, 8, 128], strides = [1, 1, 1]} : vector<13x8x256xf32> to vector<1x8x128xf32>
    %2035 = vector.shape_cast %2034 : vector<1x8x128xf32> to vector<8x128xf32>
    %2036 = arith.addf %2033, %2035 : vector<8x128xf32>
    %2037 = vector.extract_strided_slice %2032 {offsets = [0, 128], sizes = [8, 128], strides = [1, 1]} : vector<8x256xf32> to vector<8x128xf32>
    %2038 = vector.extract_strided_slice %1777 {offsets = [6, 0, 128], sizes = [1, 8, 128], strides = [1, 1, 1]} : vector<13x8x256xf32> to vector<1x8x128xf32>
    %2039 = vector.shape_cast %2038 : vector<1x8x128xf32> to vector<8x128xf32>
    %2040 = arith.addf %2037, %2039 : vector<8x128xf32>
    %2041 = vector.extract_strided_slice %2036 {offsets = [0, 0], sizes = [8, 96], strides = [1, 1]} : vector<8x128xf32> to vector<8x96xf32>
    %2042 = arith.negf %2041 : vector<8x96xf32>
    %2043 = math.exp %2042 : vector<8x96xf32>
    %cst_187 = arith.constant 1.000000e+00 : f32
    %2044 = vector.broadcast %cst_187 : f32 to vector<8x96xf32>
    %2045 = arith.addf %2044, %2043 : vector<8x96xf32>
    %2046 = arith.divf %2044, %2045 : vector<8x96xf32>
    %2047 = vector.extract_strided_slice %2036 {offsets = [0, 96], sizes = [8, 32], strides = [1, 1]} : vector<8x128xf32> to vector<8x32xf32>
    %2048 = math.tanh %2047 : vector<8x32xf32>
    %2049 = vector.extract_strided_slice %2046 {offsets = [0, 32], sizes = [8, 32], strides = [1, 1]} : vector<8x96xf32> to vector<8x32xf32>
    %2050 = arith.mulf %2049, %2011 : vector<8x32xf32>
    %2051 = vector.extract_strided_slice %2046 {offsets = [0, 0], sizes = [8, 32], strides = [1, 1]} : vector<8x96xf32> to vector<8x32xf32>
    %2052 = arith.mulf %2051, %2048 : vector<8x32xf32>
    %2053 = arith.addf %2050, %2052 : vector<8x32xf32>
    %2054 = vector.extract_strided_slice %2046 {offsets = [0, 64], sizes = [8, 32], strides = [1, 1]} : vector<8x96xf32> to vector<8x32xf32>
    %2055 = math.tanh %2053 : vector<8x32xf32>
    %2056 = arith.mulf %2054, %2055 : vector<8x32xf32>
    %2057 = vector.extract_strided_slice %2040 {offsets = [0, 0], sizes = [8, 96], strides = [1, 1]} : vector<8x128xf32> to vector<8x96xf32>
    %2058 = arith.negf %2057 : vector<8x96xf32>
    %2059 = math.exp %2058 : vector<8x96xf32>
    %cst_188 = arith.constant 1.000000e+00 : f32
    %2060 = vector.broadcast %cst_188 : f32 to vector<8x96xf32>
    %2061 = arith.addf %2060, %2059 : vector<8x96xf32>
    %2062 = arith.divf %2060, %2061 : vector<8x96xf32>
    %2063 = vector.extract_strided_slice %2040 {offsets = [0, 96], sizes = [8, 32], strides = [1, 1]} : vector<8x128xf32> to vector<8x32xf32>
    %2064 = math.tanh %2063 : vector<8x32xf32>
    %2065 = vector.extract_strided_slice %2062 {offsets = [0, 32], sizes = [8, 32], strides = [1, 1]} : vector<8x96xf32> to vector<8x32xf32>
    %2066 = arith.mulf %2065, %2027 : vector<8x32xf32>
    %2067 = vector.extract_strided_slice %2062 {offsets = [0, 0], sizes = [8, 32], strides = [1, 1]} : vector<8x96xf32> to vector<8x32xf32>
    %2068 = arith.mulf %2067, %2064 : vector<8x32xf32>
    %2069 = arith.addf %2066, %2068 : vector<8x32xf32>
    %2070 = vector.extract_strided_slice %2062 {offsets = [0, 64], sizes = [8, 32], strides = [1, 1]} : vector<8x96xf32> to vector<8x32xf32>
    %2071 = math.tanh %2069 : vector<8x32xf32>
    %2072 = arith.mulf %2070, %2071 : vector<8x32xf32>
    %2073 = tpu.concatenate %2056, %2072 in 1 : vector<8x32xf32>, vector<8x32xf32> -> vector<8x64xf32>
    %cst_189 = arith.constant dense<0.000000e+00> : vector<8x256xf32>
    %2074 = tpu.matmul %2073, %1769, %cst_189 {dimension_numbers = #tpu.dot_dimension_numbers<[1], [0], [0], [1], [0, 0, 1, 1], [], []>} : vector<8x64xf32>, vector<64x256xf32>, vector<8x256xf32> -> vector<8x256xf32>
    %2075 = vector.extract_strided_slice %2074 {offsets = [0, 0], sizes = [8, 128], strides = [1, 1]} : vector<8x256xf32> to vector<8x128xf32>
    %2076 = vector.extract_strided_slice %1777 {offsets = [7, 0, 0], sizes = [1, 8, 128], strides = [1, 1, 1]} : vector<13x8x256xf32> to vector<1x8x128xf32>
    %2077 = vector.shape_cast %2076 : vector<1x8x128xf32> to vector<8x128xf32>
    %2078 = arith.addf %2075, %2077 : vector<8x128xf32>
    %2079 = vector.extract_strided_slice %2074 {offsets = [0, 128], sizes = [8, 128], strides = [1, 1]} : vector<8x256xf32> to vector<8x128xf32>
    %2080 = vector.extract_strided_slice %1777 {offsets = [5, 0, 128], sizes = [1, 8, 128], strides = [1, 1, 1]} : vector<13x8x256xf32> to vector<1x8x128xf32>
    %2081 = vector.shape_cast %2080 : vector<1x8x128xf32> to vector<8x128xf32>
    %2082 = arith.addf %2079, %2081 : vector<8x128xf32>
    %2083 = vector.extract_strided_slice %2078 {offsets = [0, 0], sizes = [8, 96], strides = [1, 1]} : vector<8x128xf32> to vector<8x96xf32>
    %2084 = arith.negf %2083 : vector<8x96xf32>
    %2085 = math.exp %2084 : vector<8x96xf32>
    %cst_190 = arith.constant 1.000000e+00 : f32
    %2086 = vector.broadcast %cst_190 : f32 to vector<8x96xf32>
    %2087 = arith.addf %2086, %2085 : vector<8x96xf32>
    %2088 = arith.divf %2086, %2087 : vector<8x96xf32>
    %2089 = vector.extract_strided_slice %2078 {offsets = [0, 96], sizes = [8, 32], strides = [1, 1]} : vector<8x128xf32> to vector<8x32xf32>
    %2090 = math.tanh %2089 : vector<8x32xf32>
    %2091 = vector.extract_strided_slice %2088 {offsets = [0, 32], sizes = [8, 32], strides = [1, 1]} : vector<8x96xf32> to vector<8x32xf32>
    %2092 = arith.mulf %2091, %2053 : vector<8x32xf32>
    %2093 = vector.extract_strided_slice %2088 {offsets = [0, 0], sizes = [8, 32], strides = [1, 1]} : vector<8x96xf32> to vector<8x32xf32>
    %2094 = arith.mulf %2093, %2090 : vector<8x32xf32>
    %2095 = arith.addf %2092, %2094 : vector<8x32xf32>
    %2096 = vector.extract_strided_slice %2088 {offsets = [0, 64], sizes = [8, 32], strides = [1, 1]} : vector<8x96xf32> to vector<8x32xf32>
    %2097 = math.tanh %2095 : vector<8x32xf32>
    %2098 = arith.mulf %2096, %2097 : vector<8x32xf32>
    %2099 = vector.extract_strided_slice %2082 {offsets = [0, 0], sizes = [8, 96], strides = [1, 1]} : vector<8x128xf32> to vector<8x96xf32>
    %2100 = arith.negf %2099 : vector<8x96xf32>
    %2101 = math.exp %2100 : vector<8x96xf32>
    %cst_191 = arith.constant 1.000000e+00 : f32
    %2102 = vector.broadcast %cst_191 : f32 to vector<8x96xf32>
    %2103 = arith.addf %2102, %2101 : vector<8x96xf32>
    %2104 = arith.divf %2102, %2103 : vector<8x96xf32>
    %2105 = vector.extract_strided_slice %2082 {offsets = [0, 96], sizes = [8, 32], strides = [1, 1]} : vector<8x128xf32> to vector<8x32xf32>
    %2106 = math.tanh %2105 : vector<8x32xf32>
    %2107 = vector.extract_strided_slice %2104 {offsets = [0, 32], sizes = [8, 32], strides = [1, 1]} : vector<8x96xf32> to vector<8x32xf32>
    %2108 = arith.mulf %2107, %2069 : vector<8x32xf32>
    %2109 = vector.extract_strided_slice %2104 {offsets = [0, 0], sizes = [8, 32], strides = [1, 1]} : vector<8x96xf32> to vector<8x32xf32>
    %2110 = arith.mulf %2109, %2106 : vector<8x32xf32>
    %2111 = arith.addf %2108, %2110 : vector<8x32xf32>
    %2112 = vector.extract_strided_slice %2104 {offsets = [0, 64], sizes = [8, 32], strides = [1, 1]} : vector<8x96xf32> to vector<8x32xf32>
    %2113 = math.tanh %2111 : vector<8x32xf32>
    %2114 = arith.mulf %2112, %2113 : vector<8x32xf32>
    %2115 = tpu.concatenate %2098, %2114 in 1 : vector<8x32xf32>, vector<8x32xf32> -> vector<8x64xf32>
    %cst_192 = arith.constant dense<0.000000e+00> : vector<8x256xf32>
    %2116 = tpu.matmul %2115, %1769, %cst_192 {dimension_numbers = #tpu.dot_dimension_numbers<[1], [0], [0], [1], [0, 0, 1, 1], [], []>} : vector<8x64xf32>, vector<64x256xf32>, vector<8x256xf32> -> vector<8x256xf32>
    %2117 = vector.extract_strided_slice %2116 {offsets = [0, 0], sizes = [8, 128], strides = [1, 1]} : vector<8x256xf32> to vector<8x128xf32>
    %2118 = vector.extract_strided_slice %1777 {offsets = [8, 0, 0], sizes = [1, 8, 128], strides = [1, 1, 1]} : vector<13x8x256xf32> to vector<1x8x128xf32>
    %2119 = vector.shape_cast %2118 : vector<1x8x128xf32> to vector<8x128xf32>
    %2120 = arith.addf %2117, %2119 : vector<8x128xf32>
    %2121 = vector.extract_strided_slice %2116 {offsets = [0, 128], sizes = [8, 128], strides = [1, 1]} : vector<8x256xf32> to vector<8x128xf32>
    %2122 = vector.extract_strided_slice %1777 {offsets = [4, 0, 128], sizes = [1, 8, 128], strides = [1, 1, 1]} : vector<13x8x256xf32> to vector<1x8x128xf32>
    %2123 = vector.shape_cast %2122 : vector<1x8x128xf32> to vector<8x128xf32>
    %2124 = arith.addf %2121, %2123 : vector<8x128xf32>
    %2125 = vector.extract_strided_slice %2120 {offsets = [0, 0], sizes = [8, 96], strides = [1, 1]} : vector<8x128xf32> to vector<8x96xf32>
    %2126 = arith.negf %2125 : vector<8x96xf32>
    %2127 = math.exp %2126 : vector<8x96xf32>
    %cst_193 = arith.constant 1.000000e+00 : f32
    %2128 = vector.broadcast %cst_193 : f32 to vector<8x96xf32>
    %2129 = arith.addf %2128, %2127 : vector<8x96xf32>
    %2130 = arith.divf %2128, %2129 : vector<8x96xf32>
    %2131 = vector.extract_strided_slice %2120 {offsets = [0, 96], sizes = [8, 32], strides = [1, 1]} : vector<8x128xf32> to vector<8x32xf32>
    %2132 = math.tanh %2131 : vector<8x32xf32>
    %2133 = vector.extract_strided_slice %2130 {offsets = [0, 32], sizes = [8, 32], strides = [1, 1]} : vector<8x96xf32> to vector<8x32xf32>
    %2134 = arith.mulf %2133, %2095 : vector<8x32xf32>
    %2135 = vector.extract_strided_slice %2130 {offsets = [0, 0], sizes = [8, 32], strides = [1, 1]} : vector<8x96xf32> to vector<8x32xf32>
    %2136 = arith.mulf %2135, %2132 : vector<8x32xf32>
    %2137 = arith.addf %2134, %2136 : vector<8x32xf32>
    %2138 = vector.extract_strided_slice %2130 {offsets = [0, 64], sizes = [8, 32], strides = [1, 1]} : vector<8x96xf32> to vector<8x32xf32>
    %2139 = math.tanh %2137 : vector<8x32xf32>
    %2140 = arith.mulf %2138, %2139 : vector<8x32xf32>
    %2141 = vector.extract_strided_slice %2124 {offsets = [0, 0], sizes = [8, 96], strides = [1, 1]} : vector<8x128xf32> to vector<8x96xf32>
    %2142 = arith.negf %2141 : vector<8x96xf32>
    %2143 = math.exp %2142 : vector<8x96xf32>
    %cst_194 = arith.constant 1.000000e+00 : f32
    %2144 = vector.broadcast %cst_194 : f32 to vector<8x96xf32>
    %2145 = arith.addf %2144, %2143 : vector<8x96xf32>
    %2146 = arith.divf %2144, %2145 : vector<8x96xf32>
    %2147 = vector.extract_strided_slice %2124 {offsets = [0, 96], sizes = [8, 32], strides = [1, 1]} : vector<8x128xf32> to vector<8x32xf32>
    %2148 = math.tanh %2147 : vector<8x32xf32>
    %2149 = vector.extract_strided_slice %2146 {offsets = [0, 32], sizes = [8, 32], strides = [1, 1]} : vector<8x96xf32> to vector<8x32xf32>
    %2150 = arith.mulf %2149, %2111 : vector<8x32xf32>
    %2151 = vector.extract_strided_slice %2146 {offsets = [0, 0], sizes = [8, 32], strides = [1, 1]} : vector<8x96xf32> to vector<8x32xf32>
    %2152 = arith.mulf %2151, %2148 : vector<8x32xf32>
    %2153 = arith.addf %2150, %2152 : vector<8x32xf32>
    %2154 = vector.extract_strided_slice %2146 {offsets = [0, 64], sizes = [8, 32], strides = [1, 1]} : vector<8x96xf32> to vector<8x32xf32>
    %2155 = math.tanh %2153 : vector<8x32xf32>
    %2156 = arith.mulf %2154, %2155 : vector<8x32xf32>
    %2157 = tpu.concatenate %2140, %2156 in 1 : vector<8x32xf32>, vector<8x32xf32> -> vector<8x64xf32>
    %cst_195 = arith.constant dense<0.000000e+00> : vector<8x256xf32>
    %2158 = tpu.matmul %2157, %1769, %cst_195 {dimension_numbers = #tpu.dot_dimension_numbers<[1], [0], [0], [1], [0, 0, 1, 1], [], []>} : vector<8x64xf32>, vector<64x256xf32>, vector<8x256xf32> -> vector<8x256xf32>
    %2159 = vector.extract_strided_slice %2158 {offsets = [0, 0], sizes = [8, 128], strides = [1, 1]} : vector<8x256xf32> to vector<8x128xf32>
    %2160 = vector.extract_strided_slice %1777 {offsets = [9, 0, 0], sizes = [1, 8, 128], strides = [1, 1, 1]} : vector<13x8x256xf32> to vector<1x8x128xf32>
    %2161 = vector.shape_cast %2160 : vector<1x8x128xf32> to vector<8x128xf32>
    %2162 = arith.addf %2159, %2161 : vector<8x128xf32>
    %2163 = vector.extract_strided_slice %2158 {offsets = [0, 128], sizes = [8, 128], strides = [1, 1]} : vector<8x256xf32> to vector<8x128xf32>
    %2164 = vector.extract_strided_slice %1777 {offsets = [3, 0, 128], sizes = [1, 8, 128], strides = [1, 1, 1]} : vector<13x8x256xf32> to vector<1x8x128xf32>
    %2165 = vector.shape_cast %2164 : vector<1x8x128xf32> to vector<8x128xf32>
    %2166 = arith.addf %2163, %2165 : vector<8x128xf32>
    %2167 = vector.extract_strided_slice %2162 {offsets = [0, 0], sizes = [8, 96], strides = [1, 1]} : vector<8x128xf32> to vector<8x96xf32>
    %2168 = arith.negf %2167 : vector<8x96xf32>
    %2169 = math.exp %2168 : vector<8x96xf32>
    %cst_196 = arith.constant 1.000000e+00 : f32
    %2170 = vector.broadcast %cst_196 : f32 to vector<8x96xf32>
    %2171 = arith.addf %2170, %2169 : vector<8x96xf32>
    %2172 = arith.divf %2170, %2171 : vector<8x96xf32>
    %2173 = vector.extract_strided_slice %2162 {offsets = [0, 96], sizes = [8, 32], strides = [1, 1]} : vector<8x128xf32> to vector<8x32xf32>
    %2174 = math.tanh %2173 : vector<8x32xf32>
    %2175 = vector.extract_strided_slice %2172 {offsets = [0, 32], sizes = [8, 32], strides = [1, 1]} : vector<8x96xf32> to vector<8x32xf32>
    %2176 = arith.mulf %2175, %2137 : vector<8x32xf32>
    %2177 = vector.extract_strided_slice %2172 {offsets = [0, 0], sizes = [8, 32], strides = [1, 1]} : vector<8x96xf32> to vector<8x32xf32>
    %2178 = arith.mulf %2177, %2174 : vector<8x32xf32>
    %2179 = arith.addf %2176, %2178 : vector<8x32xf32>
    %2180 = vector.extract_strided_slice %2172 {offsets = [0, 64], sizes = [8, 32], strides = [1, 1]} : vector<8x96xf32> to vector<8x32xf32>
    %2181 = math.tanh %2179 : vector<8x32xf32>
    %2182 = arith.mulf %2180, %2181 : vector<8x32xf32>
    %2183 = vector.extract_strided_slice %2166 {offsets = [0, 0], sizes = [8, 96], strides = [1, 1]} : vector<8x128xf32> to vector<8x96xf32>
    %2184 = arith.negf %2183 : vector<8x96xf32>
    %2185 = math.exp %2184 : vector<8x96xf32>
    %cst_197 = arith.constant 1.000000e+00 : f32
    %2186 = vector.broadcast %cst_197 : f32 to vector<8x96xf32>
    %2187 = arith.addf %2186, %2185 : vector<8x96xf32>
    %2188 = arith.divf %2186, %2187 : vector<8x96xf32>
    %2189 = vector.extract_strided_slice %2166 {offsets = [0, 96], sizes = [8, 32], strides = [1, 1]} : vector<8x128xf32> to vector<8x32xf32>
    %2190 = math.tanh %2189 : vector<8x32xf32>
    %2191 = vector.extract_strided_slice %2188 {offsets = [0, 32], sizes = [8, 32], strides = [1, 1]} : vector<8x96xf32> to vector<8x32xf32>
    %2192 = arith.mulf %2191, %2153 : vector<8x32xf32>
    %2193 = vector.extract_strided_slice %2188 {offsets = [0, 0], sizes = [8, 32], strides = [1, 1]} : vector<8x96xf32> to vector<8x32xf32>
    %2194 = arith.mulf %2193, %2190 : vector<8x32xf32>
    %2195 = arith.addf %2192, %2194 : vector<8x32xf32>
    %2196 = vector.extract_strided_slice %2188 {offsets = [0, 64], sizes = [8, 32], strides = [1, 1]} : vector<8x96xf32> to vector<8x32xf32>
    %2197 = math.tanh %2195 : vector<8x32xf32>
    %2198 = arith.mulf %2196, %2197 : vector<8x32xf32>
    %2199 = tpu.concatenate %2182, %2198 in 1 : vector<8x32xf32>, vector<8x32xf32> -> vector<8x64xf32>
    %cst_198 = arith.constant dense<0.000000e+00> : vector<8x256xf32>
    %2200 = tpu.matmul %2199, %1769, %cst_198 {dimension_numbers = #tpu.dot_dimension_numbers<[1], [0], [0], [1], [0, 0, 1, 1], [], []>} : vector<8x64xf32>, vector<64x256xf32>, vector<8x256xf32> -> vector<8x256xf32>
    %2201 = vector.extract_strided_slice %2200 {offsets = [0, 0], sizes = [8, 128], strides = [1, 1]} : vector<8x256xf32> to vector<8x128xf32>
    %2202 = vector.extract_strided_slice %1777 {offsets = [10, 0, 0], sizes = [1, 8, 128], strides = [1, 1, 1]} : vector<13x8x256xf32> to vector<1x8x128xf32>
    %2203 = vector.shape_cast %2202 : vector<1x8x128xf32> to vector<8x128xf32>
    %2204 = arith.addf %2201, %2203 : vector<8x128xf32>
    %2205 = vector.extract_strided_slice %2200 {offsets = [0, 128], sizes = [8, 128], strides = [1, 1]} : vector<8x256xf32> to vector<8x128xf32>
    %2206 = vector.extract_strided_slice %1777 {offsets = [2, 0, 128], sizes = [1, 8, 128], strides = [1, 1, 1]} : vector<13x8x256xf32> to vector<1x8x128xf32>
    %2207 = vector.shape_cast %2206 : vector<1x8x128xf32> to vector<8x128xf32>
    %2208 = arith.addf %2205, %2207 : vector<8x128xf32>
    %2209 = vector.extract_strided_slice %2204 {offsets = [0, 0], sizes = [8, 96], strides = [1, 1]} : vector<8x128xf32> to vector<8x96xf32>
    %2210 = arith.negf %2209 : vector<8x96xf32>
    %2211 = math.exp %2210 : vector<8x96xf32>
    %cst_199 = arith.constant 1.000000e+00 : f32
    %2212 = vector.broadcast %cst_199 : f32 to vector<8x96xf32>
    %2213 = arith.addf %2212, %2211 : vector<8x96xf32>
    %2214 = arith.divf %2212, %2213 : vector<8x96xf32>
    %2215 = vector.extract_strided_slice %2204 {offsets = [0, 96], sizes = [8, 32], strides = [1, 1]} : vector<8x128xf32> to vector<8x32xf32>
    %2216 = math.tanh %2215 : vector<8x32xf32>
    %2217 = vector.extract_strided_slice %2214 {offsets = [0, 32], sizes = [8, 32], strides = [1, 1]} : vector<8x96xf32> to vector<8x32xf32>
    %2218 = arith.mulf %2217, %2179 : vector<8x32xf32>
    %2219 = vector.extract_strided_slice %2214 {offsets = [0, 0], sizes = [8, 32], strides = [1, 1]} : vector<8x96xf32> to vector<8x32xf32>
    %2220 = arith.mulf %2219, %2216 : vector<8x32xf32>
    %2221 = arith.addf %2218, %2220 : vector<8x32xf32>
    %2222 = vector.extract_strided_slice %2214 {offsets = [0, 64], sizes = [8, 32], strides = [1, 1]} : vector<8x96xf32> to vector<8x32xf32>
    %2223 = math.tanh %2221 : vector<8x32xf32>
    %2224 = arith.mulf %2222, %2223 : vector<8x32xf32>
    %2225 = vector.extract_strided_slice %2208 {offsets = [0, 0], sizes = [8, 96], strides = [1, 1]} : vector<8x128xf32> to vector<8x96xf32>
    %2226 = arith.negf %2225 : vector<8x96xf32>
    %2227 = math.exp %2226 : vector<8x96xf32>
    %cst_200 = arith.constant 1.000000e+00 : f32
    %2228 = vector.broadcast %cst_200 : f32 to vector<8x96xf32>
    %2229 = arith.addf %2228, %2227 : vector<8x96xf32>
    %2230 = arith.divf %2228, %2229 : vector<8x96xf32>
    %2231 = vector.extract_strided_slice %2208 {offsets = [0, 96], sizes = [8, 32], strides = [1, 1]} : vector<8x128xf32> to vector<8x32xf32>
    %2232 = math.tanh %2231 : vector<8x32xf32>
    %2233 = vector.extract_strided_slice %2230 {offsets = [0, 32], sizes = [8, 32], strides = [1, 1]} : vector<8x96xf32> to vector<8x32xf32>
    %2234 = arith.mulf %2233, %2195 : vector<8x32xf32>
    %2235 = vector.extract_strided_slice %2230 {offsets = [0, 0], sizes = [8, 32], strides = [1, 1]} : vector<8x96xf32> to vector<8x32xf32>
    %2236 = arith.mulf %2235, %2232 : vector<8x32xf32>
    %2237 = arith.addf %2234, %2236 : vector<8x32xf32>
    %2238 = vector.extract_strided_slice %2230 {offsets = [0, 64], sizes = [8, 32], strides = [1, 1]} : vector<8x96xf32> to vector<8x32xf32>
    %2239 = math.tanh %2237 : vector<8x32xf32>
    %2240 = arith.mulf %2238, %2239 : vector<8x32xf32>
    %2241 = tpu.concatenate %2224, %2240 in 1 : vector<8x32xf32>, vector<8x32xf32> -> vector<8x64xf32>
    %cst_201 = arith.constant dense<0.000000e+00> : vector<8x256xf32>
    %2242 = tpu.matmul %2241, %1769, %cst_201 {dimension_numbers = #tpu.dot_dimension_numbers<[1], [0], [0], [1], [0, 0, 1, 1], [], []>} : vector<8x64xf32>, vector<64x256xf32>, vector<8x256xf32> -> vector<8x256xf32>
    %2243 = vector.extract_strided_slice %2242 {offsets = [0, 0], sizes = [8, 128], strides = [1, 1]} : vector<8x256xf32> to vector<8x128xf32>
    %2244 = vector.extract_strided_slice %1777 {offsets = [11, 0, 0], sizes = [1, 8, 128], strides = [1, 1, 1]} : vector<13x8x256xf32> to vector<1x8x128xf32>
    %2245 = vector.shape_cast %2244 : vector<1x8x128xf32> to vector<8x128xf32>
    %2246 = arith.addf %2243, %2245 : vector<8x128xf32>
    %2247 = vector.extract_strided_slice %2242 {offsets = [0, 128], sizes = [8, 128], strides = [1, 1]} : vector<8x256xf32> to vector<8x128xf32>
    %2248 = vector.extract_strided_slice %1777 {offsets = [1, 0, 128], sizes = [1, 8, 128], strides = [1, 1, 1]} : vector<13x8x256xf32> to vector<1x8x128xf32>
    %2249 = vector.shape_cast %2248 : vector<1x8x128xf32> to vector<8x128xf32>
    %2250 = arith.addf %2247, %2249 : vector<8x128xf32>
    %2251 = vector.extract_strided_slice %2246 {offsets = [0, 0], sizes = [8, 96], strides = [1, 1]} : vector<8x128xf32> to vector<8x96xf32>
    %2252 = arith.negf %2251 : vector<8x96xf32>
    %2253 = math.exp %2252 : vector<8x96xf32>
    %cst_202 = arith.constant 1.000000e+00 : f32
    %2254 = vector.broadcast %cst_202 : f32 to vector<8x96xf32>
    %2255 = arith.addf %2254, %2253 : vector<8x96xf32>
    %2256 = arith.divf %2254, %2255 : vector<8x96xf32>
    %2257 = vector.extract_strided_slice %2246 {offsets = [0, 96], sizes = [8, 32], strides = [1, 1]} : vector<8x128xf32> to vector<8x32xf32>
    %2258 = math.tanh %2257 : vector<8x32xf32>
    %2259 = vector.extract_strided_slice %2256 {offsets = [0, 32], sizes = [8, 32], strides = [1, 1]} : vector<8x96xf32> to vector<8x32xf32>
    %2260 = arith.mulf %2259, %2221 : vector<8x32xf32>
    %2261 = vector.extract_strided_slice %2256 {offsets = [0, 0], sizes = [8, 32], strides = [1, 1]} : vector<8x96xf32> to vector<8x32xf32>
    %2262 = arith.mulf %2261, %2258 : vector<8x32xf32>
    %2263 = arith.addf %2260, %2262 : vector<8x32xf32>
    %2264 = vector.extract_strided_slice %2256 {offsets = [0, 64], sizes = [8, 32], strides = [1, 1]} : vector<8x96xf32> to vector<8x32xf32>
    %2265 = math.tanh %2263 : vector<8x32xf32>
    %2266 = arith.mulf %2264, %2265 : vector<8x32xf32>
    %2267 = vector.extract_strided_slice %2250 {offsets = [0, 0], sizes = [8, 96], strides = [1, 1]} : vector<8x128xf32> to vector<8x96xf32>
    %2268 = arith.negf %2267 : vector<8x96xf32>
    %2269 = math.exp %2268 : vector<8x96xf32>
    %cst_203 = arith.constant 1.000000e+00 : f32
    %2270 = vector.broadcast %cst_203 : f32 to vector<8x96xf32>
    %2271 = arith.addf %2270, %2269 : vector<8x96xf32>
    %2272 = arith.divf %2270, %2271 : vector<8x96xf32>
    %2273 = vector.extract_strided_slice %2250 {offsets = [0, 96], sizes = [8, 32], strides = [1, 1]} : vector<8x128xf32> to vector<8x32xf32>
    %2274 = math.tanh %2273 : vector<8x32xf32>
    %2275 = vector.extract_strided_slice %2272 {offsets = [0, 32], sizes = [8, 32], strides = [1, 1]} : vector<8x96xf32> to vector<8x32xf32>
    %2276 = arith.mulf %2275, %2237 : vector<8x32xf32>
    %2277 = vector.extract_strided_slice %2272 {offsets = [0, 0], sizes = [8, 32], strides = [1, 1]} : vector<8x96xf32> to vector<8x32xf32>
    %2278 = arith.mulf %2277, %2274 : vector<8x32xf32>
    %2279 = arith.addf %2276, %2278 : vector<8x32xf32>
    %2280 = vector.extract_strided_slice %2272 {offsets = [0, 64], sizes = [8, 32], strides = [1, 1]} : vector<8x96xf32> to vector<8x32xf32>
    %2281 = math.tanh %2279 : vector<8x32xf32>
    %2282 = arith.mulf %2280, %2281 : vector<8x32xf32>
    %2283 = tpu.concatenate %2266, %2282 in 1 : vector<8x32xf32>, vector<8x32xf32> -> vector<8x64xf32>
    %cst_204 = arith.constant dense<0.000000e+00> : vector<8x256xf32>
    %2284 = tpu.matmul %2283, %1769, %cst_204 {dimension_numbers = #tpu.dot_dimension_numbers<[1], [0], [0], [1], [0, 0, 1, 1], [], []>} : vector<8x64xf32>, vector<64x256xf32>, vector<8x256xf32> -> vector<8x256xf32>
    %2285 = vector.extract_strided_slice %2284 {offsets = [0, 0], sizes = [8, 128], strides = [1, 1]} : vector<8x256xf32> to vector<8x128xf32>
    %2286 = vector.extract_strided_slice %1777 {offsets = [12, 0, 0], sizes = [1, 8, 128], strides = [1, 1, 1]} : vector<13x8x256xf32> to vector<1x8x128xf32>
    %2287 = vector.shape_cast %2286 : vector<1x8x128xf32> to vector<8x128xf32>
    %2288 = arith.addf %2285, %2287 : vector<8x128xf32>
    %2289 = vector.extract_strided_slice %2284 {offsets = [0, 128], sizes = [8, 128], strides = [1, 1]} : vector<8x256xf32> to vector<8x128xf32>
    %2290 = vector.extract_strided_slice %1777 {offsets = [0, 0, 128], sizes = [1, 8, 128], strides = [1, 1, 1]} : vector<13x8x256xf32> to vector<1x8x128xf32>
    %2291 = vector.shape_cast %2290 : vector<1x8x128xf32> to vector<8x128xf32>
    %2292 = arith.addf %2289, %2291 : vector<8x128xf32>
    %2293 = vector.extract_strided_slice %2288 {offsets = [0, 0], sizes = [8, 96], strides = [1, 1]} : vector<8x128xf32> to vector<8x96xf32>
    %2294 = arith.negf %2293 : vector<8x96xf32>
    %2295 = math.exp %2294 : vector<8x96xf32>
    %cst_205 = arith.constant 1.000000e+00 : f32
    %2296 = vector.broadcast %cst_205 : f32 to vector<8x96xf32>
    %2297 = arith.addf %2296, %2295 : vector<8x96xf32>
    %2298 = arith.divf %2296, %2297 : vector<8x96xf32>
    %2299 = vector.extract_strided_slice %2288 {offsets = [0, 96], sizes = [8, 32], strides = [1, 1]} : vector<8x128xf32> to vector<8x32xf32>
    %2300 = math.tanh %2299 : vector<8x32xf32>
    %2301 = vector.extract_strided_slice %2298 {offsets = [0, 32], sizes = [8, 32], strides = [1, 1]} : vector<8x96xf32> to vector<8x32xf32>
    %2302 = arith.mulf %2301, %2263 : vector<8x32xf32>
    %2303 = vector.extract_strided_slice %2298 {offsets = [0, 0], sizes = [8, 32], strides = [1, 1]} : vector<8x96xf32> to vector<8x32xf32>
    %2304 = arith.mulf %2303, %2300 : vector<8x32xf32>
    %2305 = arith.addf %2302, %2304 : vector<8x32xf32>
    %2306 = vector.extract_strided_slice %2298 {offsets = [0, 64], sizes = [8, 32], strides = [1, 1]} : vector<8x96xf32> to vector<8x32xf32>
    %2307 = math.tanh %2305 : vector<8x32xf32>
    %2308 = arith.mulf %2306, %2307 : vector<8x32xf32>
    %2309 = vector.extract_strided_slice %2292 {offsets = [0, 0], sizes = [8, 96], strides = [1, 1]} : vector<8x128xf32> to vector<8x96xf32>
    %2310 = arith.negf %2309 : vector<8x96xf32>
    %2311 = math.exp %2310 : vector<8x96xf32>
    %cst_206 = arith.constant 1.000000e+00 : f32
    %2312 = vector.broadcast %cst_206 : f32 to vector<8x96xf32>
    %2313 = arith.addf %2312, %2311 : vector<8x96xf32>
    %2314 = arith.divf %2312, %2313 : vector<8x96xf32>
    %2315 = vector.extract_strided_slice %2292 {offsets = [0, 96], sizes = [8, 32], strides = [1, 1]} : vector<8x128xf32> to vector<8x32xf32>
    %2316 = math.tanh %2315 : vector<8x32xf32>
    %2317 = vector.extract_strided_slice %2314 {offsets = [0, 32], sizes = [8, 32], strides = [1, 1]} : vector<8x96xf32> to vector<8x32xf32>
    %2318 = arith.mulf %2317, %2279 : vector<8x32xf32>
    %2319 = vector.extract_strided_slice %2314 {offsets = [0, 0], sizes = [8, 32], strides = [1, 1]} : vector<8x96xf32> to vector<8x32xf32>
    %2320 = arith.mulf %2319, %2316 : vector<8x32xf32>
    %2321 = arith.addf %2318, %2320 : vector<8x32xf32>
    %2322 = vector.extract_strided_slice %2314 {offsets = [0, 64], sizes = [8, 32], strides = [1, 1]} : vector<8x96xf32> to vector<8x32xf32>
    %2323 = math.tanh %2321 : vector<8x32xf32>
    %2324 = arith.mulf %2322, %2323 : vector<8x32xf32>
    %2325 = tpu.concatenate %2308, %2324 in 1 : vector<8x32xf32>, vector<8x32xf32> -> vector<8x64xf32>
    %c0_207 = arith.constant 0 : index
    %c0_208 = arith.constant 0 : index
    %2326 = vector.load %arg23[%c0_207, %c0_208] : memref<8x64xf32, #tpu.memory_space<vmem>>, vector<8x64xf32>
    tpu.vector_store %arg23[%c0_207, %c0_208], %2325 {strides = array<i32>} : memref<8x64xf32, #tpu.memory_space<vmem>>, vector<8x64xf32>,
    return
  }
}

</mosaic_0001>

<bundles_post_ra>
// kernel: _lambda_.1
= control target key start
LH: loop header
LB: loop body
LE: loop exit
PB: predicated region body
PF: predicated region fallthrough
CT: control target
= control target key end

     0   :  { %v10182_v3 = vmov 0.0   ;;  %vm123_vm0 = vcmask 195584   ;;  %vm306_vm1 = vcmask 523264   ;;  %v113_v48 = vlaneseq  ;;  %s10185_s30 = smov 96   ;;  %s12681_s1 = inlined_call_operand.vmem [shape: f32[24,256], index: 1, kind: input, shape index: {}]   ;;  %s12682_s2 = inlined_call_operand.vmem [shape: f32[64,256], index: 2, kind: input, shape index: {}]   ;;  %s12683_s0 = inlined_call_operand.vmem [shape: f32[13,8,24], index: 0, kind: input, shape index: {}]   ;;  %s12684_s5 = inlined_call_operand.vmem [shape: f32[8,64], index: 5, kind: input, shape index: {}]   ;;  %s12685_s4 = inlined_call_operand.vmem [shape: f32[8,64], index: 4, kind: input, shape index: {}]   ;;  %s12686_s3 = inlined_call_operand.vmem [shape: f32[1,256], index: 3, kind: input, shape index: {}]   ;;  %s12687_s6 = inlined_call_operand.vmem [shape: f32[64,32], index: 6, kind: input, shape index: {}]   ;;  %s12688_s8 = inlined_call_operand.vmem [shape: f32[32,256], index: 8, kind: input, shape index: {}]   ;;  %s12689_s9 = inlined_call_operand.vmem [shape: f32[64,256], index: 9, kind: input, shape index: {}]   ;;  %s12690_s7 = inlined_call_operand.vmem [shape: f32[1,32], index: 7, kind: input, shape index: {}]   ;;  %s12691_s11 = inlined_call_operand.vmem [shape: f32[8,64], index: 11, kind: input, shape index: {}]   ;;  %s12692_s10 = inlined_call_operand.vmem [shape: f32[1,256], index: 10, kind: input, shape index: {}]   ;;  %s12693_s12 = inlined_call_operand.vmem [shape: f32[8,64], index: 12, kind: input, shape index: {}]   ;;  %s12694_s13 = inlined_call_operand.vmem [shape: f32[64,256], index: 13, kind: input, shape index: {}]   ;;  %s12695_s14 = inlined_call_operand.vmem [shape: f32[64,256], index: 14, kind: input, shape index: {}]   ;;  %s12696_s16 = inlined_call_operand.vmem [shape: f32[8,64], index: 16, kind: input, shape index: {}]   ;;  %s12697_s15 = inlined_call_operand.vmem [shape: f32[1,256], index: 15, kind: input, shape index: {}]   ;;  %s12698_s17 = inlined_call_operand.vmem [shape: f32[8,64], index: 17, kind: input, shape index: {}]   ;;  %s12699_s18 = inlined_call_operand.vmem [shape: f32[64,256], index: 18, kind: input, shape index: {}]   ;;  %s12700_s19 = inlined_call_operand.vmem [shape: f32[64,256], index: 19, kind: input, shape index: {}]   ;;  %s12701_s21 = inlined_call_operand.vmem [shape: f32[8,64], index: 21, kind: input, shape index: {}]   ;;  %s12702_s20 = inlined_call_operand.vmem [shape: f32[1,256], index: 20, kind: input, shape index: {}]   ;;  %s12703_s22 = inlined_call_operand.vmem [shape: f32[8,64], index: 22, kind: input, shape index: {}]   ;;  %s12704_s23 = inlined_call_operand.vmem [shape: f32[8,64], index: 23, kind: output, shape index: {}]  }
   0x1   :  { %12710 = sst [smem:[#allocation2_spill]] %s12681_s1  ;;  %227 = vmatprep.mubr.f32.mxu0 %v10182_v3  ;;  %374 = vmatprep.mubr.f32.mxu1 %v10182_v3  ;;  %vm443_vm2 = vcmask 261120   ;;  %vm10187_vm3 = vmmov 0  }
   0x2   :  { %12711 = sst [smem:[#allocation3_spill]] %s12682_s2  ;;  %s12718_s24 = sld [smem:[#allocation2_spill]]  ;;  %v114_v49 = vshrl.u32 %v113_v48, 7 }
   0x3   :  { %12712 = sst [smem:[#allocation4_spill]] %s12683_s0  ;;  %s12719_s0 = sld [smem:[#allocation3_spill]] }
   0x4   :  { %12713 = sst [smem:[#allocation5_spill]] %s12684_s5  ;;  %v10497_v52 = vsub.s32 0, %v114_v49 }
   0x5   :  { %12714 = sst [smem:[#allocation6_spill]] %s12685_s4  ;;  %s12721_s5 = sld [smem:[#allocation5_spill]] }
   0x6   :  { %12715 = sst [smem:[#allocation7_spill]] %s12686_s3  ;;  %s10183_s4 = smov 32  }
   0x7   :  { %12716 = sst [smem:[#allocation8_spill]] %s12687_s6  ;;  %s12722_s3 = sld [smem:[#allocation6_spill]] }
   0x8   :  { %12717 = sst [smem:[#allocation9_spill]] %s12688_s8  ;;  %v88_v0 = vld [vmem:[%s12718_s24 + $0x8] sm:$0xff]  ;;  %v90_v1 = vld [vmem:[%s12718_s24 + $0x18] sm:$0xff]  ;;  %v87_v6 = vld [vmem:[%s12718_s24] sm:$0xff]  ;;  %s12720_s8 = sld [smem:[#allocation4_spill]] }
   0x9   :  { %v94_v2 = vld [vmem:[%s12719_s0 + $0x8] sm:$0xff]  ;;  %v8440_v4 = vpack.c.bf16 %v90_v1, %v88_v0  ;;  %v96_v5 = vld [vmem:[%s12719_s0 + $0x18] sm:$0xff]  ;;  %v89_v7 = vld [vmem:[%s12718_s24 + $0x10] sm:$0xff]  ;;  %s12723_s1 = sld [smem:[#allocation7_spill]]  ;;  %s12724_s2 = sld [smem:[#allocation8_spill]] }
   0xa   :  { %v10328_v8 = vpack.c.bf16 %v96_v5, %v94_v2  ;;  %v8442_v9 = vpack.c.bf16 %v89_v7, %v87_v6  ;;  %v93_v10 = vld [vmem:[%s12719_s0] sm:$0xff]  ;;  %v95_v11 = vld [vmem:[%s12719_s0 + $0x10] sm:$0xff]  ;;  %v92_v12 = vld [vmem:[%s12718_s24 + $0x28] sm:$0xff]  ;;  %s12725_s28 = sld [smem:[#allocation9_spill]] }
   0xb   :  { %8441 = vmatprep.subr.bf16.mxu0 %v8440_v4  ;;  %v10339_v13 = vpack.c.bf16 %v95_v11, %v93_v10  ;;  %v98_v14 = vld [vmem:[%s12719_s0 + $0x28] sm:$0xff]  ;;  %v100_v15 = vld [vmem:[%s12719_s0 + $0x38] sm:$0xff]  ;;  %v97_v17 = vld [vmem:[%s12719_s0 + $0x20] sm:$0xff] }
   0xc   :  { %8445 = vmatprep.subr.bf16.mxu1 %v10328_v8  ;;  %8443 = vmatpush1.bf16.msra.mxu0 %v8442_v9  ;;  %v10348_v16 = vpack.c.bf16 %v100_v15, %v98_v14  ;;  %v99_v18 = vld [vmem:[%s12719_s0 + $0x30] sm:$0xff]  ;;  %v91_v19 = vld [vmem:[%s12718_s24 + $0x20] sm:$0xff]  ;;  %v102_v21 = vld [vmem:[%s12719_s0 + $0x48] sm:$0xff] }
   0xd   :  { %8447 = vmatpush1.bf16.msra.mxu1 %v10339_v13  ;;  %167 = vmatprep.subr.mxu0 %v92_v12  ;;  %v10360_v20 = vpack.c.bf16 %v99_v18, %v97_v17  ;;  %v104_v22 = vld [vmem:[%s12719_s0 + $0x58] sm:$0xff]  ;;  %v101_v25 = vld [vmem:[%s12719_s0 + $0x40] sm:$0xff]  ;;  %v103_v26 = vld [vmem:[%s12719_s0 + $0x50] sm:$0xff]  ;;  %v10543_v18 = vsub.s32 1, %v114_v49 }
   0xe   :  { %8449 = vmatprep.subr.bf16.mxu1 %v10348_v16  ;;  %v74_v23 = vld [vmem:[%s12720_s8] sm:$0xff]  ;;  %v10372_v24 = vpack.c.bf16 %v104_v22, %v102_v21  ;;  %v106_v27 = vld [vmem:[%s12719_s0 + $0x68] sm:$0xff]  ;;  %v108_v28 = vld [vmem:[%s12719_s0 + $0x78] sm:$0xff]  ;;  %v10388_v29 = vpack.c.bf16 %v103_v26, %v101_v25 }
   0xf   :  { %v75_v30 = vld [vmem:[%s12720_s8 + $0x8] sm:$0xff]  ;;  %v10395_v31 = vpack.c.bf16 %v108_v28, %v106_v27  ;;  %v105_v32 = vld [vmem:[%s12719_s0 + $0x60] sm:$0xff]  ;;  %v107_v33 = vld [vmem:[%s12719_s0 + $0x70] sm:$0xff] }
  0x10   :  { %168 = vmatpush1.msra.mxu0 %v91_v19  ;;  %v10407_v34 = vld [vmem:[%s12721_s5] sm:$0xff]  ;;  %v10412_v35 = vpack.c.bf16 %v107_v33, %v105_v32  ;;  %v76_v36 = vld [vmem:[%s12720_s8 + $0x10] sm:$0xff]  ;;  %v77_v38 = vld [vmem:[%s12720_s8 + $0x18] sm:$0xff] }
  0x11   :  { %8451 = vmatpush1.bf16.msra.mxu1 %v10360_v20  ;;  %8142 = vmatmul.mubr.msk.f32.vlgmr.msra.gmra.mrb[0].mxu0 %vm123_vm0, %v74_v23  ;;  %v110_v37 = vld [vmem:[%s12722_s3] sm:$0xff]  ;;  %v79_v40 = vld [vmem:[%s12720_s8 + $0x28] sm:$0xff]  ;;  %v80_v41 = vld [vmem:[%s12720_s8 + $0x30] sm:$0xff] }
  0x12   :  { %8453 = vmatprep.subr.bf16.mxu1 %v10372_v24  ;;  %233 = vmatprep.mubr.f32.mxu0 %v10182_v3  ;;  %v78_v39 = vld [vmem:[%s12720_s8 + $0x20] sm:$0xff]  ;;  %v81_v42 = vld [vmem:[%s12720_s8 + $0x38] sm:$0xff]  ;;  %v83_v44 = vld [vmem:[%s12720_s8 + $0x48] sm:$0xff] }
  0x13   :  { %8493 = vmatprep.subr.bf16.mxu0 %v10328_v8  ;;  %391 = vrot.lane.b32.xlu1 %v10407_v34, %s10183_s4  ;;  %v82_v43 = vld [vmem:[%s12720_s8 + $0x40] sm:$0xff]  ;;  %v84_v45 = vld [vmem:[%s12720_s8 + $0x50] sm:$0xff]  ;;  %v85_v46 = vld [vmem:[%s12720_s8 + $0x58] sm:$0xff] }
  0x14   :  { %8495 = vmatpush1.bf16.msra.mxu0 %v10339_v13  ;;  %v86_v47 = vld [vmem:[%s12720_s8 + $0x60] sm:$0xff]  ;;  %s10184_s8 = smov 64  }
  0x15   :  { %8455 = vmatpush1.bf16.msra.mxu1 %v10388_v29  ;;  %8143 = vmatmul.mubr.msk.f32.gmra.mrb[2].mxu0 %vm123_vm0, %v75_v30  ;;  %v109_v53 = vld [vmem:[%s12723_s1] sm:$0x3] }
  0x16   :  { %8457 = vmatprep.subr.bf16.mxu1 %v10395_v31  ;;  %239 = vmatprep.mubr.f32.mxu0 %v10182_v3  ;;  %v10507_v56 = vrot.slane %v109_v53, %v10497_v52  ;;  %v10550_v22 = vrot.slane %v109_v53, %v10543_v18 }
  0x17   :  { %8497 = vmatprep.subr.bf16.mxu0 %v10348_v16 }
  0x18   :  { %8499 = vmatpush1.bf16.msra.mxu0 %v10360_v20 }
  0x19   :  { %8459 = vmatpush1.bf16.msra.mxu1 %v10412_v35  ;;  %8144 = vmatmul.mubr.msk.f32.gmra.mrb[4].mxu0 %vm123_vm0, %v76_v36 }
  0x1a   :  { %245 = vmatprep.mubr.f32.mxu0 %v10182_v3  ;;  %8461 = vmatprep.subr.bf16.mxu1 %v10328_v8 }
  0x1b   :  { %8501 = vmatprep.subr.bf16.mxu0 %v10372_v24 }
  0x1c   :  { %8155 = vmatmul.mubr.msk.f32.vlgmr.msra.gmra.mrb[0].mxu1 %vm306_vm1, %v110_v37  ;;  %8503 = vmatpush1.bf16.msra.mxu0 %v10388_v29 }
  0x1d   :  { %8145 = vmatmul.mubr.msk.f32.gmra.mrb[6].mxu0 %vm123_vm0, %v77_v38  ;;  %8463 = vmatpush1.bf16.msra.mxu1 %v10339_v13 }
  0x1e   :  { %251 = vmatprep.mubr.f32.mxu0 %v10182_v3  ;;  %8465 = vmatprep.subr.bf16.mxu1 %v10348_v16 }
  0x1f   :  { %512 = vmatprep.mubr.f32.mxu1 %v10182_v3  ;;  %8505 = vmatprep.subr.bf16.mxu0 %v10395_v31 }
  0x20   :  { %8507 = vmatpush1.bf16.msra.mxu0 %v10412_v35 }
  0x21   :  { %8146 = vmatmul.mubr.msk.f32.gmra.mrb[8].mxu0 %vm123_vm0, %v78_v39  ;;  %8467 = vmatpush1.bf16.msra.mxu1 %v10360_v20 }
  0x22   :  { %257 = vmatprep.mubr.f32.mxu0 %v10182_v3  ;;  %8469 = vmatprep.subr.bf16.mxu1 %v10372_v24 }
  0x23   :  { %8525 = vmatprep.subr.bf16.mxu0 %v10328_v8 }
  0x25   :  { %8147 = vmatmul.mubr.msk.f32.gmra.mrb[10].mxu0 %vm123_vm0, %v79_v40  ;;  %8471 = vmatpush1.bf16.msra.mxu1 %v10388_v29 }
  0x26   :  { %263 = vmatprep.mubr.f32.mxu0 %v10182_v3  ;;  %8473 = vmatprep.subr.bf16.mxu1 %v10395_v31 }
  0x29   :  { %8148 = vmatmul.mubr.msk.f32.gmra.mrb[12].mxu0 %vm123_vm0, %v80_v41  ;;  %8475 = vmatpush1.bf16.msra.mxu1 %v10412_v35 }
  0x2a   :  { %269 = vmatprep.mubr.f32.mxu0 %v10182_v3  ;;  %8477 = vmatprep.subr.bf16.mxu1 %v10328_v8 }
  0x2d   :  { %8149 = vmatmul.mubr.msk.f32.gmra.mrb[14].mxu0 %vm123_vm0, %v81_v42 }
  0x2e   :  { %275 = vmatprep.mubr.f32.mxu0 %v10182_v3 }
  0x31   :  { %8150 = vmatmul.mubr.msk.f32.gmra.mrb[16].mxu0 %vm123_vm0, %v82_v43 }
  0x32   :  { %281 = vmatprep.mubr.f32.mxu0 %v10182_v3 }
  0x35   :  { %8151 = vmatmul.mubr.msk.f32.gmra.mrb[18].mxu0 %vm123_vm0, %v83_v44 }
  0x36   :  { %287 = vmatprep.mubr.f32.mxu0 %v10182_v3 }
  0x39   :  { %8152 = vmatmul.mubr.msk.f32.gmra.mrb[20].mxu0 %vm123_vm0, %v84_v45 }
  0x3a   :  { %293 = vmatprep.mubr.f32.mxu0 %v10182_v3 }
  0x3d   :  { %8153 = vmatmul.mubr.msk.f32.gmra.mrb[22].mxu0 %vm123_vm0, %v85_v46 }
  0x3e   :  { %299 = vmatprep.mubr.f32.mxu0 %v10182_v3 }
  0x41   :  { %8154 = vmatmul.mubr.msk.f32.gmra.mrb[24].mxu0 %vm123_vm0, %v86_v47 }
  0x42   :  { %778 = vmatprep.mubr.f32.mxu0 %v10182_v3 }
  0x85   :  { %v392_v45 = vpop.permute.xlu1 %391 }
  0xe4   :  { %v229_v50 = vpop.f32.mrb[0].mxu0 }
  0xe5   :  { %v10495_v51 = vpop.f32.mrb[1].mxu0  ;;  %v230_v59 = vadd.f32 %v229_v50, %v10507_v56 }
  0xe8   :  { %v10502_v54 = vpop.f32.mrb[2].mxu0 }
  0xe9   :  { %v10504_v55 = vpop.f32.mrb[3].mxu0 }
  0xec   :  { %v10509_v57 = vpop.f32.mrb[4].mxu0 }
  0xed   :  { %v10511_v58 = vpop.f32.mrb[5].mxu0 }
  0xef   :  { %v376_v60 = vpop.f32.mrb[0].mxu1 }
  0xf0   :  { %v381_v61 = vadd.f32 %v376_v60, %v230_v59  ;;  %v10514_v62 = vpop.f32.mrb[6].mxu0  ;;  %v378_v63 = vpop.f32.mrb[1].mxu1 }
  0xf1   :  { %v10516_v0 = vpop.f32.mrb[7].mxu0 }
  0xf2   :  { %9350 = vtanh.f32 %v381_v61  ;;  %v8156_v30 = vmul.f32 -1.442695, %v381_v61 }
  0xf4   :  { %v10518_v1 = vpop.f32.mrb[8].mxu0 }
  0xf5   :  { %v10520_v2 = vpop.f32.mrb[9].mxu0 }
  0xf8   :  { %v10522_v4 = vpop.f32.mrb[10].mxu0 }
  0xf9   :  { %v10524_v5 = vpop.f32.mrb[11].mxu0 }
  0xfc   :  { %v9351_v6 = vpop.eup %9350 }
  0xfd   :  { %396 = vrot.lane.b32.xlu0 %v9351_v6, %s10183_s4 }
 0x100   :  { %v10527_v7 = vpop.f32.mrb[14].mxu0 }
 0x101   :  { %v10529_v9 = vpop.f32.mrb[15].mxu0 }
 0x104   :  { %v10531_v10 = vpop.f32.mrb[16].mxu0 }
 0x105   :  { %v10533_v11 = vpop.f32.mrb[17].mxu0 }
 0x108   :  { %v10535_v12 = vpop.f32.mrb[18].mxu0 }
 0x109   :  { %v10537_v14 = vpop.f32.mrb[19].mxu0 }
 0x10c   :  { %v10539_v15 = vpop.f32.mrb[20].mxu0 }
 0x10d   :  { %v10541_v17 = vpop.f32.mrb[21].mxu0 }
 0x110   :  { %v10545_v19 = vpop.f32.mrb[22].mxu0 }
 0x111   :  { %v10547_v21 = vpop.f32.mrb[23].mxu0 }
 0x114   :  { %v10552_v23 = vpop.f32.mrb[24].mxu0 }
 0x115   :  { %v303_v25 = vpop.f32.mrb[25].mxu0 }
 0x116   :  { %v304_v26 = vadd.f32 %v303_v25, %v10550_v22 }
 0x118   :  { %v382_v27 = vadd.f32 %v378_v63, %v304_v26 }
 0x11a   :  { %9352 = vtanh.f32 %v382_v27  ;;  %v8157_v39 = vmul.f32 -1.442695, %v382_v27 }
 0x11b   :  { %9354 = vpow2.f32 %v8156_v30  ;;  %v298_v30 = vadd.f32 %v10547_v21, %v10550_v22 }
 0x124   :  { %v9353_v28 = vpop.eup %9352 }
 0x125   :  { %420 = vrot.lane.b32.xlu0 %v9353_v28, %s10183_s4  ;;  %v9355_v32 = vpop.eup %9354  ;;  %v236_v28 = vadd.f32 %v10502_v54, %v10507_v56 }
 0x126   :  { %v386_v33 = vadd.f32 1.0, %v9355_v32 }
 0x128   :  { %9356 = vrcp.f32 %v386_v33 }
 0x129   :  { %9358 = vpow2.f32 %v8157_v39 }
 0x132   :  { %v9357_v36 = vpop.eup %9356 }
 0x133   :  { %v9359_v40 = vpop.eup %9358  ;;  %v394_v46 = vmul.f32 %v9357_v36, %v392_v45 }
 0x134   :  { %v414_v41 = vadd.f32 1.0, %v9359_v40 }
 0x136   :  { %9360 = vrcp.f32 %v414_v41 }
 0x140   :  { %v9361_v42 = vpop.eup %9360 }
 0x141   :  { %v418_v50 = vmul.f32 %v9361_v42, %v10407_v34 }
 0x16f   :  { %v397_v37 = vpop.permute.xlu0 %396 }
 0x170   :  { %v399_v38 = vmul.f32 %v9357_v36, %v397_v37 }
 0x172   :  { %401 = vrot.lane.b32.xlu1 %v399_v38, %s10183_s4 }
 0x197   :  { %v421_v43 = vpop.permute.xlu0 %420 }
 0x198   :  { %v423_v44 = vmul.f32 %v9361_v42, %v421_v43 }
 0x19a   :  { %425 = vrot.lane.b32.xlu0 %v423_v44, %s10183_s4 }
 0x1e4   :  { %v402_v47 = vpop.permute.xlu1 %401 }
 0x1e5   :  { %v404_v48 = vadd.f32 %v402_v47, %v394_v46 }
 0x1e7   :  { %9362 = vtanh.f32 %v404_v48 }
 0x1f1   :  { %v9363_v49 = vpop.eup %9362 }
 0x1f2   :  { %407 = vrot.lane.b32.xlu1 %v9363_v49, %s10183_s4 }
 0x20c   :  { %v426_v53 = vpop.permute.xlu0 %425 }
 0x20d   :  { %v428_v59 = vadd.f32 %v426_v53, %v418_v50 }
 0x20f   :  { %9364 = vtanh.f32 %v428_v59 }
 0x219   :  { %v9365_v60 = vpop.eup %9364 }
 0x21a   :  { %431 = vrot.lane.b32.xlu0 %v9365_v60, %s10183_s4 }
 0x264   :  { %v408_v61 = vpop.permute.xlu1 %407 }
 0x265   :  { %v410_v63 = vmul.f32 %v9357_v36, %v408_v61 }
 0x267   :  { %436 = vrot.lane.b32.xlu1 %v410_v63, %s10184_s8 }
 0x28c   :  { %v432_v6 = vpop.permute.xlu0 %431 }
 0x28d   :  { %v434_v25 = vmul.f32 %v9361_v42, %v432_v6 }
 0x28f   :  { %440 = vrot.lane.b32.xlu0 %v434_v25, %s10185_s30 }
 0x2d9   :  { %v10563_v26 = vpop.permute.xlu1 %436 }
 0x301   :  { %v10565_v34 = vpop.permute.xlu0 %440 }
 0x302   :  { %v444_v27 = vsel %vm443_vm2, %v10563_v26, %v10565_v34 }
 0x303   :  { %8158 = vmatmul.mubr.msk.f32.vlgmr.msra.gmra.mrb[2].mxu1 %vm306_vm1, %v444_v27 }
 0x304   :  { %8479 = vmatpush1.bf16.msra.mxu1 %v10339_v13  ;;  %645 = vmatprep.mubr.f32.mxu1 %v10182_v3 }
 0x305   :  { %8481 = vmatprep.subr.bf16.mxu1 %v10348_v16 }
 0x308   :  { %8483 = vmatpush1.bf16.msra.mxu1 %v10360_v20 }
 0x309   :  { %8485 = vmatprep.subr.bf16.mxu1 %v10372_v24 }
 0x30c   :  { %8487 = vmatpush1.bf16.msra.mxu1 %v10388_v29 }
 0x30d   :  { %8489 = vmatprep.subr.bf16.mxu1 %v10395_v31 }
 0x310   :  { %8491 = vmatpush1.bf16.msra.mxu1 %v10412_v35 }
 0x311   :  { %8509 = vmatprep.subr.bf16.mxu1 %v10328_v8 }
 0x3d6   :  { %v514_v32 = vpop.f32.mrb[2].mxu1 }
 0x3d7   :  { %v519_v33 = vadd.f32 %v514_v32, %v236_v28  ;;  %v516_v36 = vpop.f32.mrb[3].mxu1 }
 0x3d8   :  { %v520_v37 = vadd.f32 %v516_v36, %v298_v30 }
 0x3d9   :  { %9366 = vtanh.f32 %v519_v33  ;;  %v8159_v40 = vmul.f32 -1.442695, %v519_v33 }
 0x3da   :  { %9368 = vtanh.f32 %v520_v37  ;;  %v8160_v41 = vmul.f32 -1.442695, %v520_v37 }
 0x3db   :  { %9370 = vpow2.f32 %v8159_v40 }
 0x3dc   :  { %9372 = vpow2.f32 %v8160_v41 }
 0x3e3   :  { %v9367_v38 = vpop.eup %9366 }
 0x3e4   :  { %v9369_v39 = vpop.eup %9368  ;;  %530 = vrot.lane.b32.xlu1 %v9367_v38, %s10183_s4  ;;  %v242_v38 = vadd.f32 %v10509_v57, %v10507_v56 }
 0x3e5   :  { %554 = vrot.lane.b32.xlu0 %v9369_v39, %s10183_s4  ;;  %v9371_v54 = vpop.eup %9370  ;;  %v292_v39 = vadd.f32 %v10541_v17, %v10550_v22 }
 0x3e6   :  { %v9373_v42 = vpop.eup %9372  ;;  %v524_v43 = vadd.f32 1.0, %v9371_v54 }
 0x3e7   :  { %v548_v21 = vadd.f32 1.0, %v9373_v42 }
 0x3e8   :  { %9374 = vrcp.f32 %v524_v43 }
 0x3e9   :  { %9376 = vrcp.f32 %v548_v21 }
 0x3f2   :  { %v9375_v44 = vpop.eup %9374 }
 0x3f3   :  { %v9377_v46 = vpop.eup %9376  ;;  %v528_v53 = vmul.f32 %v9375_v44, %v404_v48 }
 0x3f4   :  { %v552_v61 = vmul.f32 %v9377_v46, %v428_v59 }
 0x456   :  { %v531_v45 = vpop.permute.xlu1 %530 }
 0x457   :  { %v533_v47 = vmul.f32 %v9375_v44, %v531_v45  ;;  %v555_v49 = vpop.permute.xlu0 %554 }
 0x458   :  { %v557_v50 = vmul.f32 %v9377_v46, %v555_v49 }
 0x459   :  { %535 = vrot.lane.b32.xlu1 %v533_v47, %s10183_s4 }
 0x45a   :  { %559 = vrot.lane.b32.xlu0 %v557_v50, %s10183_s4 }
 0x4cb   :  { %v536_v60 = vpop.permute.xlu1 %535 }
 0x4cc   :  { %v538_v63 = vadd.f32 %v536_v60, %v528_v53  ;;  %v560_v6 = vpop.permute.xlu0 %559 }
 0x4cd   :  { %v562_v25 = vadd.f32 %v560_v6, %v552_v61 }
 0x4ce   :  { %9378 = vtanh.f32 %v538_v63 }
 0x4cf   :  { %9380 = vtanh.f32 %v562_v25 }
 0x4d8   :  { %v9379_v27 = vpop.eup %9378 }
 0x4d9   :  { %v9381_v28 = vpop.eup %9380  ;;  %541 = vrot.lane.b32.xlu1 %v9379_v27, %s10183_s4 }
 0x4da   :  { %565 = vrot.lane.b32.xlu0 %v9381_v28, %s10183_s4 }
 0x54b   :  { %v542_v30 = vpop.permute.xlu1 %541 }
 0x54c   :  { %v544_v32 = vmul.f32 %v9375_v44, %v542_v30  ;;  %v566_v33 = vpop.permute.xlu0 %565 }
 0x54d   :  { %v568_v36 = vmul.f32 %v9377_v46, %v566_v33 }
 0x54e   :  { %570 = vrot.lane.b32.xlu1 %v544_v32, %s10184_s8 }
 0x54f   :  { %574 = vrot.lane.b32.xlu0 %v568_v36, %s10185_s30 }
 0x5c0   :  { %v10592_v48 = vpop.permute.xlu1 %570 }
 0x5c1   :  { %v10594_v59 = vpop.permute.xlu0 %574 }
 0x5c2   :  { %v577_v37 = vsel %vm443_vm2, %v10592_v48, %v10594_v59 }
 0x5c3   :  { %8161 = vmatmul.mubr.msk.f32.vlgmr.msra.gmra.mrb[4].mxu1 %vm306_vm1, %v577_v37 }
 0x5c4   :  { %8511 = vmatpush1.bf16.msra.mxu1 %v10339_v13  ;;  %911 = vmatprep.mubr.f32.mxu1 %v10182_v3 }
 0x5c5   :  { %8513 = vmatprep.subr.bf16.mxu1 %v10348_v16 }
 0x5c8   :  { %8515 = vmatpush1.bf16.msra.mxu1 %v10360_v20 }
 0x5c9   :  { %8517 = vmatprep.subr.bf16.mxu1 %v10372_v24 }
 0x5cc   :  { %8519 = vmatpush1.bf16.msra.mxu1 %v10388_v29 }
 0x5cd   :  { %8521 = vmatprep.subr.bf16.mxu1 %v10395_v31 }
 0x5d0   :  { %8523 = vmatpush1.bf16.msra.mxu1 %v10412_v35 }
 0x5d1   :  { %8557 = vmatprep.subr.bf16.mxu1 %v10328_v8 }
 0x696   :  { %v647_v40 = vpop.f32.mrb[4].mxu1 }
 0x697   :  { %v652_v41 = vadd.f32 %v647_v40, %v242_v38  ;;  %v649_v54 = vpop.f32.mrb[5].mxu1 }
 0x698   :  { %v653_v42 = vadd.f32 %v649_v54, %v292_v39 }
 0x699   :  { %9382 = vtanh.f32 %v652_v41  ;;  %v8162_v44 = vmul.f32 -1.442695, %v652_v41 }
 0x69a   :  { %9384 = vtanh.f32 %v653_v42  ;;  %v8163_v45 = vmul.f32 -1.442695, %v653_v42 }
 0x69b   :  { %9386 = vpow2.f32 %v8162_v44 }
 0x69c   :  { %9388 = vpow2.f32 %v8163_v45 }
 0x6a3   :  { %v9383_v43 = vpop.eup %9382 }
 0x6a4   :  { %v9385_v21 = vpop.eup %9384  ;;  %663 = vrot.lane.b32.xlu1 %v9383_v43, %s10183_s4  ;;  %v248_v43 = vadd.f32 %v10514_v62, %v10507_v56 }
 0x6a5   :  { %687 = vrot.lane.b32.xlu0 %v9385_v21, %s10183_s4  ;;  %v9387_v57 = vpop.eup %9386  ;;  %v286_v21 = vadd.f32 %v10537_v14, %v10550_v22 }
 0x6a6   :  { %v9389_v46 = vpop.eup %9388  ;;  %v657_v47 = vadd.f32 1.0, %v9387_v57 }
 0x6a7   :  { %v681_v17 = vadd.f32 1.0, %v9389_v46 }
 0x6a8   :  { %9390 = vrcp.f32 %v657_v47 }
 0x6a9   :  { %9392 = vrcp.f32 %v681_v17 }
 0x6b2   :  { %v9391_v49 = vpop.eup %9390 }
 0x6b3   :  { %v9393_v53 = vpop.eup %9392  ;;  %v661_v27 = vmul.f32 %v9391_v49, %v538_v63 }
 0x6b4   :  { %v685_v30 = vmul.f32 %v9393_v53, %v562_v25 }
 0x716   :  { %v664_v50 = vpop.permute.xlu1 %663 }
 0x717   :  { %v666_v60 = vmul.f32 %v9391_v49, %v664_v50  ;;  %v688_v61 = vpop.permute.xlu0 %687 }
 0x718   :  { %v690_v6 = vmul.f32 %v9393_v53, %v688_v61 }
 0x719   :  { %668 = vrot.lane.b32.xlu1 %v666_v60, %s10183_s4 }
 0x71a   :  { %692 = vrot.lane.b32.xlu0 %v690_v6, %s10183_s4 }
 0x78b   :  { %v669_v28 = vpop.permute.xlu1 %668 }
 0x78c   :  { %v671_v32 = vadd.f32 %v669_v28, %v661_v27  ;;  %v693_v33 = vpop.permute.xlu0 %692 }
 0x78d   :  { %v695_v36 = vadd.f32 %v693_v33, %v685_v30 }
 0x78e   :  { %9394 = vtanh.f32 %v671_v32 }
 0x78f   :  { %9396 = vtanh.f32 %v695_v36 }
 0x798   :  { %v9395_v37 = vpop.eup %9394 }
 0x799   :  { %v9397_v38 = vpop.eup %9396  ;;  %674 = vrot.lane.b32.xlu1 %v9395_v37, %s10183_s4 }
 0x79a   :  { %698 = vrot.lane.b32.xlu0 %v9397_v38, %s10183_s4 }
 0x80b   :  { %v675_v39 = vpop.permute.xlu1 %674 }
 0x80c   :  { %v677_v40 = vmul.f32 %v9391_v49, %v675_v39  ;;  %v699_v41 = vpop.permute.xlu0 %698 }
 0x80d   :  { %v701_v54 = vmul.f32 %v9393_v53, %v699_v41 }
 0x80e   :  { %703 = vrot.lane.b32.xlu1 %v677_v40, %s10184_s8 }
 0x80f   :  { %707 = vrot.lane.b32.xlu0 %v701_v54, %s10185_s30 }
 0x880   :  { %v10621_v63 = vpop.permute.xlu1 %703 }
 0x881   :  { %v10623_v25 = vpop.permute.xlu0 %707 }
 0x882   :  { %v710_v42 = vsel %vm443_vm2, %v10621_v63, %v10623_v25 }
 0x883   :  { %8164 = vmatmul.mubr.msk.f32.vlgmr.msra.gmra.mrb[26].mxu0 %vm306_vm1, %v710_v42 }
 0x884   :  { %8527 = vmatpush1.bf16.msra.mxu0 %v10339_v13  ;;  %1044 = vmatprep.mubr.f32.mxu0 %v10182_v3 }
 0x885   :  { %8529 = vmatprep.subr.bf16.mxu0 %v10348_v16 }
 0x888   :  { %8531 = vmatpush1.bf16.msra.mxu0 %v10360_v20 }
 0x889   :  { %8533 = vmatprep.subr.bf16.mxu0 %v10372_v24 }
 0x88c   :  { %8535 = vmatpush1.bf16.msra.mxu0 %v10388_v29 }
 0x88d   :  { %8537 = vmatprep.subr.bf16.mxu0 %v10395_v31 }
 0x890   :  { %8539 = vmatpush1.bf16.msra.mxu0 %v10412_v35 }
 0x891   :  { %8541 = vmatprep.subr.bf16.mxu0 %v10328_v8 }
 0x956   :  { %v780_v44 = vpop.f32.mrb[26].mxu0 }
 0x957   :  { %v785_v45 = vadd.f32 %v780_v44, %v248_v43  ;;  %v782_v57 = vpop.f32.mrb[27].mxu0 }
 0x958   :  { %v786_v46 = vadd.f32 %v782_v57, %v286_v21 }
 0x959   :  { %9398 = vtanh.f32 %v785_v45  ;;  %v8165_v49 = vmul.f32 -1.442695, %v785_v45 }
 0x95a   :  { %9400 = vtanh.f32 %v786_v46  ;;  %v8166_v50 = vmul.f32 -1.442695, %v786_v46 }
 0x95b   :  { %9402 = vpow2.f32 %v8165_v49 }
 0x95c   :  { %9404 = vpow2.f32 %v8166_v50 }
 0x963   :  { %v9399_v47 = vpop.eup %9398 }
 0x964   :  { %v9401_v17 = vpop.eup %9400  ;;  %796 = vrot.lane.b32.xlu1 %v9399_v47, %s10183_s4  ;;  %v254_v47 = vadd.f32 %v10518_v1, %v10507_v56 }
 0x965   :  { %820 = vrot.lane.b32.xlu0 %v9401_v17, %s10183_s4  ;;  %v9403_v62 = vpop.eup %9402  ;;  %v280_v17 = vadd.f32 %v10533_v11, %v10550_v22 }
 0x966   :  { %v9405_v53 = vpop.eup %9404  ;;  %v790_v60 = vadd.f32 1.0, %v9403_v62 }
 0x967   :  { %v814_v14 = vadd.f32 1.0, %v9405_v53 }
 0x968   :  { %9406 = vrcp.f32 %v790_v60 }
 0x969   :  { %9408 = vrcp.f32 %v814_v14 }
 0x972   :  { %v9407_v61 = vpop.eup %9406 }
 0x973   :  { %v9409_v27 = vpop.eup %9408  ;;  %v794_v37 = vmul.f32 %v9407_v61, %v671_v32 }
 0x974   :  { %v818_v39 = vmul.f32 %v9409_v27, %v695_v36 }
 0x9d6   :  { %v797_v6 = vpop.permute.xlu1 %796 }
 0x9d7   :  { %v799_v28 = vmul.f32 %v9407_v61, %v797_v6  ;;  %v821_v30 = vpop.permute.xlu0 %820 }
 0x9d8   :  { %v823_v33 = vmul.f32 %v9409_v27, %v821_v30 }
 0x9d9   :  { %801 = vrot.lane.b32.xlu1 %v799_v28, %s10183_s4 }
 0x9da   :  { %825 = vrot.lane.b32.xlu0 %v823_v33, %s10183_s4 }
 0xa4b   :  { %v802_v38 = vpop.permute.xlu1 %801 }
 0xa4c   :  { %v804_v40 = vadd.f32 %v802_v38, %v794_v37  ;;  %v826_v41 = vpop.permute.xlu0 %825 }
 0xa4d   :  { %v828_v54 = vadd.f32 %v826_v41, %v818_v39 }
 0xa4e   :  { %9410 = vtanh.f32 %v804_v40 }
 0xa4f   :  { %9412 = vtanh.f32 %v828_v54 }
 0xa58   :  { %v9411_v42 = vpop.eup %9410 }
 0xa59   :  { %v9413_v43 = vpop.eup %9412  ;;  %807 = vrot.lane.b32.xlu1 %v9411_v42, %s10183_s4 }
 0xa5a   :  { %831 = vrot.lane.b32.xlu0 %v9413_v43, %s10183_s4 }
 0xacb   :  { %v808_v21 = vpop.permute.xlu1 %807 }
 0xacc   :  { %v810_v44 = vmul.f32 %v9407_v61, %v808_v21  ;;  %v832_v45 = vpop.permute.xlu0 %831 }
 0xacd   :  { %v834_v57 = vmul.f32 %v9409_v27, %v832_v45 }
 0xace   :  { %836 = vrot.lane.b32.xlu1 %v810_v44, %s10184_s8 }
 0xacf   :  { %840 = vrot.lane.b32.xlu0 %v834_v57, %s10185_s30 }
 0xb40   :  { %v10650_v32 = vpop.permute.xlu1 %836 }
 0xb41   :  { %v10652_v36 = vpop.permute.xlu0 %840 }
 0xb42   :  { %v843_v46 = vsel %vm443_vm2, %v10650_v32, %v10652_v36 }
 0xb43   :  { %8167 = vmatmul.mubr.msk.f32.vlgmr.msra.gmra.mrb[6].mxu1 %vm306_vm1, %v843_v46 }
 0xb44   :  { %8559 = vmatpush1.bf16.msra.mxu1 %v10339_v13  ;;  %1310 = vmatprep.mubr.f32.mxu1 %v10182_v3 }
 0xb45   :  { %8561 = vmatprep.subr.bf16.mxu1 %v10348_v16 }
 0xb48   :  { %8563 = vmatpush1.bf16.msra.mxu1 %v10360_v20 }
 0xb49   :  { %8565 = vmatprep.subr.bf16.mxu1 %v10372_v24 }
 0xb4c   :  { %8567 = vmatpush1.bf16.msra.mxu1 %v10388_v29 }
 0xb4d   :  { %8569 = vmatprep.subr.bf16.mxu1 %v10395_v31 }
 0xb50   :  { %8571 = vmatpush1.bf16.msra.mxu1 %v10412_v35 }
 0xb51   :  { %8573 = vmatprep.subr.bf16.mxu1 %v10328_v8 }
 0xc16   :  { %v913_v49 = vpop.f32.mrb[6].mxu1 }
 0xc17   :  { %v918_v50 = vadd.f32 %v913_v49, %v254_v47  ;;  %v915_v62 = vpop.f32.mrb[7].mxu1 }
 0xc18   :  { %v919_v53 = vadd.f32 %v915_v62, %v280_v17 }
 0xc19   :  { %9414 = vtanh.f32 %v918_v50  ;;  %v8168_v61 = vmul.f32 -1.442695, %v918_v50 }
 0xc1a   :  { %9416 = vtanh.f32 %v919_v53  ;;  %v8169_v6 = vmul.f32 -1.442695, %v919_v53 }
 0xc1b   :  { %9418 = vpow2.f32 %v8168_v61 }
 0xc1c   :  { %9420 = vpow2.f32 %v8169_v6 }
 0xc23   :  { %v9415_v60 = vpop.eup %9414 }
 0xc24   :  { %v9417_v14 = vpop.eup %9416  ;;  %929 = vrot.lane.b32.xlu1 %v9415_v60, %s10183_s4  ;;  %v260_v60 = vadd.f32 %v10522_v4, %v10507_v56 }
 0xc25   :  { %953 = vrot.lane.b32.xlu0 %v9417_v14, %s10183_s4  ;;  %v9419_v1 = vpop.eup %9418  ;;  %v274_v14 = vadd.f32 %v10529_v9, %v10550_v22 }
 0xc26   :  { %v9421_v27 = vpop.eup %9420  ;;  %v923_v28 = vadd.f32 1.0, %v9419_v1 }
 0xc27   :  { %v947_v11 = vadd.f32 1.0, %v9421_v27 }
 0xc28   :  { %9422 = vrcp.f32 %v923_v28 }
 0xc29   :  { %9424 = vrcp.f32 %v947_v11 }
 0xc32   :  { %v9423_v30 = vpop.eup %9422 }
 0xc33   :  { %v9425_v37 = vpop.eup %9424  ;;  %v927_v42 = vmul.f32 %v9423_v30, %v804_v40 }
 0xc34   :  { %v951_v21 = vmul.f32 %v9425_v37, %v828_v54 }
 0xc96   :  { %v930_v33 = vpop.permute.xlu1 %929 }
 0xc97   :  { %v932_v38 = vmul.f32 %v9423_v30, %v930_v33  ;;  %v954_v39 = vpop.permute.xlu0 %953 }
 0xc98   :  { %v956_v41 = vmul.f32 %v9425_v37, %v954_v39 }
 0xc99   :  { %934 = vrot.lane.b32.xlu1 %v932_v38, %s10183_s4 }
 0xc9a   :  { %958 = vrot.lane.b32.xlu0 %v956_v41, %s10183_s4 }
 0xd0b   :  { %v935_v43 = vpop.permute.xlu1 %934 }
 0xd0c   :  { %v937_v44 = vadd.f32 %v935_v43, %v927_v42  ;;  %v959_v45 = vpop.permute.xlu0 %958 }
 0xd0d   :  { %v961_v57 = vadd.f32 %v959_v45, %v951_v21 }
 0xd0e   :  { %9426 = vtanh.f32 %v937_v44 }
 0xd0f   :  { %9428 = vtanh.f32 %v961_v57 }
 0xd18   :  { %v9427_v46 = vpop.eup %9426 }
 0xd19   :  { %v9429_v47 = vpop.eup %9428  ;;  %940 = vrot.lane.b32.xlu1 %v9427_v46, %s10183_s4 }
 0xd1a   :  { %964 = vrot.lane.b32.xlu0 %v9429_v47, %s10183_s4 }
 0xd8b   :  { %v941_v17 = vpop.permute.xlu1 %940 }
 0xd8c   :  { %v943_v49 = vmul.f32 %v9423_v30, %v941_v17  ;;  %v965_v50 = vpop.permute.xlu0 %964 }
 0xd8d   :  { %v967_v62 = vmul.f32 %v9425_v37, %v965_v50 }
 0xd8e   :  { %969 = vrot.lane.b32.xlu1 %v943_v49, %s10184_s8 }
 0xd8f   :  { %973 = vrot.lane.b32.xlu0 %v967_v62, %s10185_s30 }
 0xe00   :  { %v10679_v40 = vpop.permute.xlu1 %969 }
 0xe01   :  { %v10681_v54 = vpop.permute.xlu0 %973 }
 0xe02   :  { %v976_v53 = vsel %vm443_vm2, %v10679_v40, %v10681_v54 }
 0xe03   :  { %8170 = vmatmul.mubr.msk.f32.vlgmr.msra.gmra.mrb[28].mxu0 %vm306_vm1, %v976_v53 }
 0xe04   :  { %8543 = vmatpush1.bf16.msra.mxu0 %v10339_v13  ;;  %1177 = vmatprep.mubr.f32.mxu0 %v10182_v3 }
 0xe05   :  { %8545 = vmatprep.subr.bf16.mxu0 %v10348_v16 }
 0xe08   :  { %8547 = vmatpush1.bf16.msra.mxu0 %v10360_v20 }
 0xe09   :  { %8549 = vmatprep.subr.bf16.mxu0 %v10372_v24 }
 0xe0c   :  { %8551 = vmatpush1.bf16.msra.mxu0 %v10388_v29 }
 0xe0d   :  { %8553 = vmatprep.subr.bf16.mxu0 %v10395_v31 }
 0xe10   :  { %8555 = vmatpush1.bf16.msra.mxu0 %v10412_v35 }
 0xe11   :  { %8589 = vmatprep.subr.bf16.mxu0 %v10328_v8 }
 0xed6   :  { %v1046_v61 = vpop.f32.mrb[28].mxu0 }
 0xed7   :  { %v1051_v6 = vadd.f32 %v1046_v61, %v260_v60  ;;  %v1048_v1 = vpop.f32.mrb[29].mxu0 }
 0xed8   :  { %v1052_v27 = vadd.f32 %v1048_v1, %v274_v14 }
 0xed9   :  { %9430 = vtanh.f32 %v1051_v6  ;;  %v8171_v30 = vmul.f32 -1.442695, %v1051_v6 }
 0xeda   :  { %9432 = vtanh.f32 %v1052_v27  ;;  %v8172_v33 = vmul.f32 -1.442695, %v1052_v27 }
 0xedb   :  { %9434 = vpow2.f32 %v8171_v30 }
 0xedc   :  { %9436 = vpow2.f32 %v8172_v33 }
 0xee3   :  { %v9431_v28 = vpop.eup %9430 }
 0xee4   :  { %v9433_v11 = vpop.eup %9432  ;;  %1062 = vrot.lane.b32.xlu1 %v9431_v28, %s10183_s4 }
 0xee5   :  { %1086 = vrot.lane.b32.xlu0 %v9433_v11, %s10183_s4  ;;  %v9435_v4 = vpop.eup %9434 }
 0xee6   :  { %v9437_v37 = vpop.eup %9436  ;;  %v1056_v38 = vadd.f32 1.0, %v9435_v4 }
 0xee7   :  { %v1080_v9 = vadd.f32 1.0, %v9437_v37 }
 0xee8   :  { %9438 = vrcp.f32 %v1056_v38 }
 0xee9   :  { %9440 = vrcp.f32 %v1080_v9 }
 0xef2   :  { %v9439_v39 = vpop.eup %9438 }
 0xef3   :  { %v9441_v42 = vpop.eup %9440  ;;  %v1060_v46 = vmul.f32 %v9439_v39, %v937_v44 }
 0xef4   :  { %v1084_v17 = vmul.f32 %v9441_v42, %v961_v57 }
 0xf56   :  { %v1063_v41 = vpop.permute.xlu1 %1062 }
 0xf57   :  { %v1065_v43 = vmul.f32 %v9439_v39, %v1063_v41  ;;  %v1087_v21 = vpop.permute.xlu0 %1086 }
 0xf58   :  { %v1089_v45 = vmul.f32 %v9441_v42, %v1087_v21 }
 0xf59   :  { %1067 = vrot.lane.b32.xlu1 %v1065_v43, %s10183_s4 }
 0xf5a   :  { %1091 = vrot.lane.b32.xlu0 %v1089_v45, %s10183_s4 }
 0xfcb   :  { %v1068_v47 = vpop.permute.xlu1 %1067 }
 0xfcc   :  { %v1070_v49 = vadd.f32 %v1068_v47, %v1060_v46  ;;  %v1092_v50 = vpop.permute.xlu0 %1091 }
 0xfcd   :  { %v1094_v62 = vadd.f32 %v1092_v50, %v1084_v17 }
 0xfce   :  { %9442 = vtanh.f32 %v1070_v49 }
 0xfcf   :  { %9444 = vtanh.f32 %v1094_v62 }
 0xfd8   :  { %v9443_v53 = vpop.eup %9442 }
 0xfd9   :  { %v9445_v60 = vpop.eup %9444  ;;  %1073 = vrot.lane.b32.xlu1 %v9443_v53, %s10183_s4 }
 0xfda   :  { %1097 = vrot.lane.b32.xlu0 %v9445_v60, %s10183_s4 }
0x104b   :  { %v1074_v14 = vpop.permute.xlu1 %1073 }
0x104c   :  { %v1076_v61 = vmul.f32 %v9439_v39, %v1074_v14  ;;  %v1098_v6 = vpop.permute.xlu0 %1097 }
0x104d   :  { %v1100_v1 = vmul.f32 %v9441_v42, %v1098_v6 }
0x104e   :  { %1102 = vrot.lane.b32.xlu1 %v1076_v61, %s10184_s8 }
0x104f   :  { %1106 = vrot.lane.b32.xlu0 %v1100_v1, %s10185_s30 }
0x10c0   :  { %v10708_v44 = vpop.permute.xlu1 %1102 }
0x10c1   :  { %v10710_v57 = vpop.permute.xlu0 %1106 }
0x10c2   :  { %v1109_v27 = vsel %vm443_vm2, %v10708_v44, %v10710_v57 }
0x10c3   :  { %8173 = vmatmul.mubr.msk.f32.vlgmr.msra.gmra.mrb[12].mxu0 %vm306_vm1, %v1109_v27 }
0x10c4   :  { %8591 = vmatpush1.bf16.msra.mxu0 %v10339_v13  ;;  %1576 = vmatprep.mubr.f32.mxu0 %v10182_v3 }
0x10c5   :  { %8593 = vmatprep.subr.bf16.mxu0 %v10348_v16 }
0x10c8   :  { %8595 = vmatpush1.bf16.msra.mxu0 %v10360_v20 }
0x10c9   :  { %8597 = vmatprep.subr.bf16.mxu0 %v10372_v24 }
0x10cc   :  { %8599 = vmatpush1.bf16.msra.mxu0 %v10388_v29 }
0x10cd   :  { %8601 = vmatprep.subr.bf16.mxu0 %v10395_v31 }
0x10d0   :  { %8603 = vmatpush1.bf16.msra.mxu0 %v10412_v35 }
0x10d1   :  { %8621 = vmatprep.subr.bf16.mxu0 %v10328_v8 }
0x1196   :  { %v1179_v28 = vpop.f32.mrb[12].mxu0 }
0x1197   :  { %v9328_v11 = vadd.f32 %v1179_v28, %v10507_v56  ;;  %v1181_v30 = vpop.f32.mrb[13].mxu0 }
0x1198   :  { %v9329_v33 = vadd.f32 %v1181_v30, %v10550_v22 }
0x1199   :  { %9446 = vtanh.f32 %v9328_v11  ;;  %v8174_v38 = vmul.f32 -1.442695, %v9328_v11 }
0x119a   :  { %9448 = vtanh.f32 %v9329_v33  ;;  %v8175_v9 = vmul.f32 -1.442695, %v9329_v33 }
0x119b   :  { %9450 = vpow2.f32 %v8174_v38  ;;  %v272_v38 = vadd.f32 %v10527_v7, %v10507_v56 }
0x119c   :  { %9452 = vpow2.f32 %v8175_v9  ;;  %v262_v9 = vadd.f32 %v10524_v5, %v10550_v22 }
0x11a3   :  { %v9447_v4 = vpop.eup %9446 }
0x11a4   :  { %v9449_v37 = vpop.eup %9448  ;;  %1195 = vrot.lane.b32.xlu1 %v9447_v4, %s10183_s4 }
0x11a5   :  { %1219 = vrot.lane.b32.xlu0 %v9449_v37, %s10183_s4  ;;  %v9451_v39 = vpop.eup %9450 }
0x11a6   :  { %v9453_v41 = vpop.eup %9452  ;;  %v1189_v42 = vadd.f32 1.0, %v9451_v39 }
0x11a7   :  { %v1213_v43 = vadd.f32 1.0, %v9453_v41 }
0x11a8   :  { %9454 = vrcp.f32 %v1189_v42 }
0x11a9   :  { %9456 = vrcp.f32 %v1213_v43 }
0x11b2   :  { %v9455_v21 = vpop.eup %9454 }
0x11b3   :  { %v9457_v46 = vpop.eup %9456  ;;  %v1193_v53 = vmul.f32 %v9455_v21, %v1070_v49 }
0x11b4   :  { %v1217_v14 = vmul.f32 %v9457_v46, %v1094_v62 }
0x1216   :  { %v1196_v45 = vpop.permute.xlu1 %1195 }
0x1217   :  { %v1198_v47 = vmul.f32 %v9455_v21, %v1196_v45  ;;  %v1220_v17 = vpop.permute.xlu0 %1219 }
0x1218   :  { %v1222_v50 = vmul.f32 %v9457_v46, %v1220_v17 }
0x1219   :  { %1200 = vrot.lane.b32.xlu1 %v1198_v47, %s10183_s4 }
0x121a   :  { %1224 = vrot.lane.b32.xlu0 %v1222_v50, %s10183_s4 }
0x128b   :  { %v1201_v60 = vpop.permute.xlu1 %1200 }
0x128c   :  { %v1203_v61 = vadd.f32 %v1201_v60, %v1193_v53  ;;  %v1225_v6 = vpop.permute.xlu0 %1224 }
0x128d   :  { %v1227_v1 = vadd.f32 %v1225_v6, %v1217_v14 }
0x128e   :  { %9458 = vtanh.f32 %v1203_v61 }
0x128f   :  { %9460 = vtanh.f32 %v1227_v1 }
0x1298   :  { %v9459_v27 = vpop.eup %9458 }
0x1299   :  { %v9461_v28 = vpop.eup %9460  ;;  %1206 = vrot.lane.b32.xlu1 %v9459_v27, %s10183_s4 }
0x129a   :  { %1230 = vrot.lane.b32.xlu0 %v9461_v28, %s10183_s4 }
0x130b   :  { %v1207_v11 = vpop.permute.xlu1 %1206 }
0x130c   :  { %v1209_v30 = vmul.f32 %v9455_v21, %v1207_v11  ;;  %v1231_v33 = vpop.permute.xlu0 %1230 }
0x130d   :  { %v1233_v4 = vmul.f32 %v9457_v46, %v1231_v33 }
0x130e   :  { %1235 = vrot.lane.b32.xlu1 %v1209_v30, %s10184_s8 }
0x130f   :  { %1239 = vrot.lane.b32.xlu0 %v1233_v4, %s10185_s30 }
0x1380   :  { %v1236_v49 = vpop.permute.xlu1 %1235 }
0x1381   :  { %v1240_v62 = vpop.permute.xlu0 %1239 }
0x1382   :  { %v10736_v37 = vsel %vm443_vm2, %v1236_v49, %v1240_v62 }
0x1383   :  { %8176 = vmatmul.mubr.msk.f32.vlgmr.msra.gmra.mrb[8].mxu1 %vm306_vm1, %v10736_v37 }
0x1384   :  { %8575 = vmatpush1.bf16.msra.mxu1 %v10339_v13  ;;  %1443 = vmatprep.mubr.f32.mxu1 %v10182_v3 }
0x1385   :  { %8577 = vmatprep.subr.bf16.mxu1 %v10348_v16 }
0x1388   :  { %8579 = vmatpush1.bf16.msra.mxu1 %v10360_v20 }
0x1389   :  { %8581 = vmatprep.subr.bf16.mxu1 %v10372_v24 }
0x138c   :  { %8583 = vmatpush1.bf16.msra.mxu1 %v10388_v29 }
0x138d   :  { %8585 = vmatprep.subr.bf16.mxu1 %v10395_v31 }
0x1390   :  { %8587 = vmatpush1.bf16.msra.mxu1 %v10412_v35 }
0x1391   :  { %8605 = vmatprep.subr.bf16.mxu1 %v10328_v8 }
0x1456   :  { %v1312_v39 = vpop.f32.mrb[8].mxu1 }
0x1457   :  { %v1317_v41 = vadd.f32 %v1312_v39, %v272_v38  ;;  %v1314_v42 = vpop.f32.mrb[9].mxu1 }
0x1458   :  { %v1318_v43 = vadd.f32 %v1314_v42, %v262_v9 }
0x1459   :  { %9462 = vtanh.f32 %v1317_v41  ;;  %v8177_v46 = vmul.f32 -1.442695, %v1317_v41 }
0x145a   :  { %9464 = vtanh.f32 %v1318_v43  ;;  %v8178_v47 = vmul.f32 -1.442695, %v1318_v43 }
0x145b   :  { %9466 = vpow2.f32 %v8177_v46  ;;  %v256_v46 = vadd.f32 %v10520_v2, %v10550_v22 }
0x145c   :  { %9468 = vpow2.f32 %v8178_v47 }
0x1463   :  { %v9463_v21 = vpop.eup %9462 }
0x1464   :  { %v9465_v45 = vpop.eup %9464  ;;  %1328 = vrot.lane.b32.xlu1 %v9463_v21, %s10183_s4 }
0x1465   :  { %1352 = vrot.lane.b32.xlu0 %v9465_v45, %s10183_s4  ;;  %v9467_v7 = vpop.eup %9466  ;;  %v278_v45 = vadd.f32 %v10531_v10, %v10507_v56 }
0x1466   :  { %v9469_v17 = vpop.eup %9468  ;;  %v1322_v50 = vadd.f32 1.0, %v9467_v7 }
0x1467   :  { %v1346_v5 = vadd.f32 1.0, %v9469_v17 }
0x1468   :  { %9470 = vrcp.f32 %v1322_v50 }
0x1469   :  { %9472 = vrcp.f32 %v1346_v5 }
0x1472   :  { %v9471_v53 = vpop.eup %9470 }
0x1473   :  { %v9473_v14 = vpop.eup %9472  ;;  %v1326_v11 = vmul.f32 %v9471_v53, %v1203_v61 }
0x1474   :  { %v1350_v33 = vmul.f32 %v9473_v14, %v1227_v1 }
0x14d6   :  { %v1329_v60 = vpop.permute.xlu1 %1328 }
0x14d7   :  { %v1331_v6 = vmul.f32 %v9471_v53, %v1329_v60  ;;  %v1353_v27 = vpop.permute.xlu0 %1352 }
0x14d8   :  { %v1355_v28 = vmul.f32 %v9473_v14, %v1353_v27 }
0x14d9   :  { %1333 = vrot.lane.b32.xlu1 %v1331_v6, %s10183_s4 }
0x14da   :  { %1357 = vrot.lane.b32.xlu0 %v1355_v28, %s10183_s4 }
0x154b   :  { %v1334_v30 = vpop.permute.xlu1 %1333 }
0x154c   :  { %v1336_v4 = vadd.f32 %v1334_v30, %v1326_v11  ;;  %v1358_v49 = vpop.permute.xlu0 %1357 }
0x154d   :  { %v1360_v62 = vadd.f32 %v1358_v49, %v1350_v33 }
0x154e   :  { %9474 = vtanh.f32 %v1336_v4 }
0x154f   :  { %9476 = vtanh.f32 %v1360_v62 }
0x1558   :  { %v9475_v38 = vpop.eup %9474 }
0x1559   :  { %v9477_v9 = vpop.eup %9476  ;;  %1339 = vrot.lane.b32.xlu1 %v9475_v38, %s10183_s4 }
0x155a   :  { %1363 = vrot.lane.b32.xlu0 %v9477_v9, %s10183_s4 }
0x15cb   :  { %v1340_v39 = vpop.permute.xlu1 %1339 }
0x15cc   :  { %v1342_v41 = vmul.f32 %v9471_v53, %v1340_v39  ;;  %v1364_v42 = vpop.permute.xlu0 %1363 }
0x15cd   :  { %v1366_v43 = vmul.f32 %v9473_v14, %v1364_v42 }
0x15ce   :  { %1368 = vrot.lane.b32.xlu1 %v1342_v41, %s10184_s8 }
0x15cf   :  { %1372 = vrot.lane.b32.xlu0 %v1366_v43, %s10185_s30 }
0x1640   :  { %v10761_v61 = vpop.permute.xlu1 %1368 }
0x1641   :  { %v10763_v1 = vpop.permute.xlu0 %1372 }
0x1642   :  { %v1375_v21 = vsel %vm443_vm2, %v10761_v61, %v10763_v1 }
0x1643   :  { %8179 = vmatmul.mubr.msk.f32.vlgmr.msra.gmra.mrb[10].mxu1 %vm306_vm1, %v1375_v21 }
0x1644   :  { %8607 = vmatpush1.bf16.msra.mxu1 %v10339_v13  ;;  %1709 = vmatprep.mubr.f32.mxu1 %v10182_v3 }
0x1645   :  { %8609 = vmatprep.subr.bf16.mxu1 %v10348_v16 }
0x1648   :  { %8611 = vmatpush1.bf16.msra.mxu1 %v10360_v20 }
0x1649   :  { %8613 = vmatprep.subr.bf16.mxu1 %v10372_v24 }
0x164c   :  { %8615 = vmatpush1.bf16.msra.mxu1 %v10388_v29 }
0x164d   :  { %8617 = vmatprep.subr.bf16.mxu1 %v10395_v31 }
0x1650   :  { %8619 = vmatpush1.bf16.msra.mxu1 %v10412_v35 }
0x1651   :  { %8637 = vmatprep.subr.bf16.mxu1 %v10328_v8 }
0x1716   :  { %v1445_v47 = vpop.f32.mrb[10].mxu1 }
0x1717   :  { %v1450_v7 = vadd.f32 %v1445_v47, %v278_v45  ;;  %v1447_v17 = vpop.f32.mrb[11].mxu1 }
0x1718   :  { %v1451_v50 = vadd.f32 %v1447_v17, %v256_v46 }
0x1719   :  { %9478 = vtanh.f32 %v1450_v7  ;;  %v8180_v60 = vmul.f32 -1.442695, %v1450_v7 }
0x171a   :  { %9480 = vtanh.f32 %v1451_v50  ;;  %v8181_v8 = vmul.f32 -1.442695, %v1451_v50 }
0x171b   :  { %9482 = vpow2.f32 %v8180_v60 }
0x171c   :  { %9484 = vpow2.f32 %v8181_v8 }
0x1723   :  { %v9479_v5 = vpop.eup %9478 }
0x1724   :  { %v9481_v53 = vpop.eup %9480  ;;  %1461 = vrot.lane.b32.xlu1 %v9479_v5, %s10183_s4  ;;  %v284_v5 = vadd.f32 %v10535_v12, %v10507_v56 }
0x1725   :  { %1485 = vrot.lane.b32.xlu0 %v9481_v53, %s10183_s4  ;;  %v9483_v10 = vpop.eup %9482  ;;  %v250_v53 = vadd.f32 %v10516_v0, %v10550_v22 }
0x1726   :  { %v9485_v14 = vpop.eup %9484  ;;  %v1455_v6 = vadd.f32 1.0, %v9483_v10 }
0x1727   :  { %v1479_v2 = vadd.f32 1.0, %v9485_v14 }
0x1728   :  { %9486 = vrcp.f32 %v1455_v6 }
0x1729   :  { %9488 = vrcp.f32 %v1479_v2 }
0x1732   :  { %v9487_v27 = vpop.eup %9486 }
0x1733   :  { %v9489_v11 = vpop.eup %9488  ;;  %v1459_v38 = vmul.f32 %v9487_v27, %v1336_v4 }
0x1734   :  { %v1483_v39 = vmul.f32 %v9489_v11, %v1360_v62 }
0x1796   :  { %v1462_v28 = vpop.permute.xlu1 %1461 }
0x1797   :  { %v1464_v30 = vmul.f32 %v9487_v27, %v1462_v28  ;;  %v1486_v33 = vpop.permute.xlu0 %1485 }
0x1798   :  { %v1488_v49 = vmul.f32 %v9489_v11, %v1486_v33 }
0x1799   :  { %1466 = vrot.lane.b32.xlu1 %v1464_v30, %s10183_s4 }
0x179a   :  { %1490 = vrot.lane.b32.xlu0 %v1488_v49, %s10183_s4 }
0x180b   :  { %v1467_v9 = vpop.permute.xlu1 %1466 }
0x180c   :  { %v1469_v41 = vadd.f32 %v1467_v9, %v1459_v38  ;;  %v1491_v42 = vpop.permute.xlu0 %1490 }
0x180d   :  { %v1493_v43 = vadd.f32 %v1491_v42, %v1483_v39 }
0x180e   :  { %9490 = vtanh.f32 %v1469_v41 }
0x180f   :  { %9492 = vtanh.f32 %v1493_v43 }
0x1818   :  { %v9491_v21 = vpop.eup %9490 }
0x1819   :  { %v9493_v45 = vpop.eup %9492  ;;  %1472 = vrot.lane.b32.xlu1 %v9491_v21, %s10183_s4 }
0x181a   :  { %1496 = vrot.lane.b32.xlu0 %v9493_v45, %s10183_s4 }
0x188b   :  { %v1473_v46 = vpop.permute.xlu1 %1472 }
0x188c   :  { %v1475_v47 = vmul.f32 %v9487_v27, %v1473_v46  ;;  %v1497_v7 = vpop.permute.xlu0 %1496 }
0x188d   :  { %v1499_v17 = vmul.f32 %v9489_v11, %v1497_v7 }
0x188e   :  { %1501 = vrot.lane.b32.xlu1 %v1475_v47, %s10184_s8 }
0x188f   :  { %1505 = vrot.lane.b32.xlu0 %v1499_v17, %s10185_s30 }
0x1900   :  { %v10790_v4 = vpop.permute.xlu1 %1501 }
0x1901   :  { %v10792_v62 = vpop.permute.xlu0 %1505 }
0x1902   :  { %v1508_v50 = vsel %vm443_vm2, %v10790_v4, %v10792_v62 }
0x1903   :  { %8182 = vmatmul.mubr.msk.f32.vlgmr.msra.gmra.mrb[30].mxu0 %vm306_vm1, %v1508_v50 }
0x1904   :  { %8623 = vmatpush1.bf16.msra.mxu0 %v10339_v13  ;;  %1842 = vmatprep.mubr.f32.mxu0 %v10182_v3 }
0x1905   :  { %8625 = vmatprep.subr.bf16.mxu0 %v10348_v16 }
0x1908   :  { %8627 = vmatpush1.bf16.msra.mxu0 %v10360_v20 }
0x1909   :  { %8629 = vmatprep.subr.bf16.mxu0 %v10372_v24 }
0x190c   :  { %8631 = vmatpush1.bf16.msra.mxu0 %v10388_v29 }
0x190d   :  { %8633 = vmatprep.subr.bf16.mxu0 %v10395_v31 }
0x1910   :  { %8635 = vmatpush1.bf16.msra.mxu0 %v10412_v35 }
0x19d6   :  { %v1578_v60 = vpop.f32.mrb[30].mxu0 }
0x19d7   :  { %v1583_v8 = vadd.f32 %v1578_v60, %v284_v5  ;;  %v1580_v10 = vpop.f32.mrb[31].mxu0 }
0x19d8   :  { %v1584_v14 = vadd.f32 %v1580_v10, %v250_v53 }
0x19d9   :  { %9494 = vtanh.f32 %v1583_v8  ;;  %v8183_v27 = vmul.f32 -1.442695, %v1583_v8 }
0x19da   :  { %9496 = vtanh.f32 %v1584_v14  ;;  %v8184_v28 = vmul.f32 -1.442695, %v1584_v14 }
0x19db   :  { %9498 = vpow2.f32 %v8183_v27 }
0x19dc   :  { %9500 = vpow2.f32 %v8184_v28 }
0x19e3   :  { %v9495_v6 = vpop.eup %9494 }
0x19e4   :  { %v9497_v2 = vpop.eup %9496  ;;  %1594 = vrot.lane.b32.xlu1 %v9495_v6, %s10183_s4  ;;  %v290_v6 = vadd.f32 %v10539_v15, %v10507_v56 }
0x19e5   :  { %1618 = vrot.lane.b32.xlu0 %v9497_v2, %s10183_s4  ;;  %v9499_v12 = vpop.eup %9498 }
0x19e6   :  { %v9501_v11 = vpop.eup %9500  ;;  %v1588_v30 = vadd.f32 1.0, %v9499_v12 }
0x19e7   :  { %v1612_v0 = vadd.f32 1.0, %v9501_v11 }
0x19e8   :  { %9502 = vrcp.f32 %v1588_v30 }
0x19e9   :  { %9504 = vrcp.f32 %v1612_v0 }
0x19f2   :  { %v9503_v33 = vpop.eup %9502 }
0x19f3   :  { %v9505_v38 = vpop.eup %9504  ;;  %v1592_v21 = vmul.f32 %v9503_v33, %v1469_v41 }
0x19f4   :  { %v1616_v46 = vmul.f32 %v9505_v38, %v1493_v43 }
0x1a56   :  { %v1595_v49 = vpop.permute.xlu1 %1594 }
0x1a57   :  { %v1597_v9 = vmul.f32 %v9503_v33, %v1595_v49  ;;  %v1619_v39 = vpop.permute.xlu0 %1618 }
0x1a58   :  { %v1621_v42 = vmul.f32 %v9505_v38, %v1619_v39 }
0x1a59   :  { %1599 = vrot.lane.b32.xlu1 %v1597_v9, %s10183_s4 }
0x1a5a   :  { %1623 = vrot.lane.b32.xlu0 %v1621_v42, %s10183_s4 }
0x1acb   :  { %v1600_v45 = vpop.permute.xlu1 %1599 }
0x1acc   :  { %v1602_v47 = vadd.f32 %v1600_v45, %v1592_v21  ;;  %v1624_v7 = vpop.permute.xlu0 %1623 }
0x1acd   :  { %v1626_v17 = vadd.f32 %v1624_v7, %v1616_v46 }
0x1ace   :  { %9506 = vtanh.f32 %v1602_v47 }
0x1acf   :  { %9508 = vtanh.f32 %v1626_v17 }
0x1ad8   :  { %v9507_v50 = vpop.eup %9506 }
0x1ad9   :  { %v9509_v5 = vpop.eup %9508  ;;  %1605 = vrot.lane.b32.xlu1 %v9507_v50, %s10183_s4 }
0x1ada   :  { %1629 = vrot.lane.b32.xlu0 %v9509_v5, %s10183_s4 }
0x1b4b   :  { %v1606_v53 = vpop.permute.xlu1 %1605 }
0x1b4c   :  { %v1608_v60 = vmul.f32 %v9503_v33, %v1606_v53  ;;  %v1630_v8 = vpop.permute.xlu0 %1629 }
0x1b4d   :  { %v1632_v10 = vmul.f32 %v9505_v38, %v1630_v8 }
0x1b4e   :  { %1634 = vrot.lane.b32.xlu1 %v1608_v60, %s10184_s8 }
0x1b4f   :  { %1638 = vrot.lane.b32.xlu0 %v1632_v10, %s10185_s30 }
0x1bc0   :  { %v10818_v41 = vpop.permute.xlu1 %1634 }
0x1bc1   :  { %v10820_v43 = vpop.permute.xlu0 %1638 }
0x1bc2   :  { %v1641_v14 = vsel %vm443_vm2, %v10818_v41, %v10820_v43 }
0x1bc3   :  { %8185 = vmatmul.mubr.msk.f32.vlgmr.msra.gmra.mrb[12].mxu1 %vm306_vm1, %v1641_v14  ;;  %v296_v14 = vadd.f32 %v10545_v19, %v10507_v56 }
0x1bc4   :  { %8639 = vmatpush1.bf16.msra.mxu1 %v10339_v13  ;;  %1975 = vmatprep.mubr.f32.mxu1 %v10182_v3  ;;  %v244_v13 = vadd.f32 %v10511_v58, %v10550_v22 }
0x1bc5   :  { %8641 = vmatprep.subr.bf16.mxu1 %v10348_v16 }
0x1bc8   :  { %8643 = vmatpush1.bf16.msra.mxu1 %v10360_v20 }
0x1bc9   :  { %8645 = vmatprep.subr.bf16.mxu1 %v10372_v24 }
0x1bcc   :  { %8647 = vmatpush1.bf16.msra.mxu1 %v10388_v29 }
0x1bcd   :  { %8649 = vmatprep.subr.bf16.mxu1 %v10395_v31 }
0x1bd0   :  { %8651 = vmatpush1.bf16.msra.mxu1 %v10412_v35 }
0x1c96   :  { %v1711_v2 = vpop.f32.mrb[12].mxu1 }
0x1c97   :  { %v1716_v27 = vadd.f32 %v1711_v2, %v290_v6  ;;  %v1713_v28 = vpop.f32.mrb[13].mxu1  ;;  %v238_v6 = vadd.f32 %v10504_v55, %v10550_v22 }
0x1c98   :  { %v1717_v16 = vadd.f32 %v1713_v28, %v244_v13 }
0x1c99   :  { %9510 = vtanh.f32 %v1716_v27  ;;  %v8186_v29 = vmul.f32 -1.442695, %v1716_v27 }
0x1c9a   :  { %9512 = vtanh.f32 %v1717_v16  ;;  %v8187_v31 = vmul.f32 -1.442695, %v1717_v16 }
0x1c9b   :  { %9514 = vpow2.f32 %v8186_v29 }
0x1c9c   :  { %9516 = vpow2.f32 %v8187_v31 }
0x1ca3   :  { %v9511_v20 = vpop.eup %9510 }
0x1ca4   :  { %v9513_v24 = vpop.eup %9512  ;;  %1727 = vrot.lane.b32.xlu1 %v9511_v20, %s10183_s4 }
0x1ca5   :  { %1751 = vrot.lane.b32.xlu0 %v9513_v24, %s10183_s4  ;;  %v9515_v35 = vpop.eup %9514 }
0x1ca6   :  { %v9517_v15 = vpop.eup %9516  ;;  %v1721_v12 = vadd.f32 1.0, %v9515_v35 }
0x1ca7   :  { %v1745_v58 = vadd.f32 1.0, %v9517_v15 }
0x1ca8   :  { %9518 = vrcp.f32 %v1721_v12 }
0x1ca9   :  { %9520 = vrcp.f32 %v1745_v58 }
0x1cb2   :  { %v9519_v11 = vpop.eup %9518 }
0x1cb3   :  { %v9521_v0 = vpop.eup %9520  ;;  %v1725_v9 = vmul.f32 %v9519_v11, %v1602_v47 }
0x1cb4   :  { %v1749_v42 = vmul.f32 %v9521_v0, %v1626_v17 }
0x1d16   :  { %v1728_v30 = vpop.permute.xlu1 %1727 }
0x1d17   :  { %v1730_v33 = vmul.f32 %v9519_v11, %v1728_v30  ;;  %v1752_v49 = vpop.permute.xlu0 %1751 }
0x1d18   :  { %v1754_v38 = vmul.f32 %v9521_v0, %v1752_v49 }
0x1d19   :  { %1732 = vrot.lane.b32.xlu1 %v1730_v33, %s10183_s4 }
0x1d1a   :  { %1756 = vrot.lane.b32.xlu0 %v1754_v38, %s10183_s4 }
0x1d8b   :  { %v1733_v39 = vpop.permute.xlu1 %1732 }
0x1d8c   :  { %v1735_v21 = vadd.f32 %v1733_v39, %v1725_v9  ;;  %v1757_v45 = vpop.permute.xlu0 %1756 }
0x1d8d   :  { %v1759_v46 = vadd.f32 %v1757_v45, %v1749_v42 }
0x1d8e   :  { %9522 = vtanh.f32 %v1735_v21 }
0x1d8f   :  { %9524 = vtanh.f32 %v1759_v46 }
0x1d98   :  { %v9523_v7 = vpop.eup %9522 }
0x1d99   :  { %v9525_v50 = vpop.eup %9524  ;;  %1738 = vrot.lane.b32.xlu1 %v9523_v7, %s10183_s4 }
0x1d9a   :  { %1762 = vrot.lane.b32.xlu0 %v9525_v50, %s10183_s4 }
0x1e0b   :  { %v1739_v5 = vpop.permute.xlu1 %1738 }
0x1e0c   :  { %v1741_v53 = vmul.f32 %v9519_v11, %v1739_v5  ;;  %v1763_v60 = vpop.permute.xlu0 %1762 }
0x1e0d   :  { %v1765_v8 = vmul.f32 %v9521_v0, %v1763_v60 }
0x1e0e   :  { %1767 = vrot.lane.b32.xlu1 %v1741_v53, %s10184_s8 }
0x1e0f   :  { %1771 = vrot.lane.b32.xlu0 %v1765_v8, %s10185_s30 }
0x1e80   :  { %v10846_v47 = vpop.permute.xlu1 %1767 }
0x1e81   :  { %v10848_v17 = vpop.permute.xlu0 %1771 }
0x1e82   :  { %v1774_v10 = vsel %vm443_vm2, %v10846_v47, %v10848_v17 }
0x1e83   :  { %8188 = vmatmul.mubr.msk.f32.vlgmr.msra.gmra.mrb[32].mxu0 %vm306_vm1, %v1774_v10  ;;  %v302_v10 = vadd.f32 %v10552_v23, %v10507_v56 }
0x1e84   :  { %8401 = vmatprep.mubr.msk.f32.mxu0 %vm10187_vm3, %v10182_v3 }
0x1f56   :  { %v1844_v13 = vpop.f32.mrb[32].mxu0 }
0x1f57   :  { %v1849_v2 = vadd.f32 %v1844_v13, %v296_v14  ;;  %v1846_v27 = vpop.f32.mrb[33].mxu0  ;;  %v232_v14 = vadd.f32 %v10495_v51, %v10550_v22 }
0x1f58   :  { %v1850_v28 = vadd.f32 %v1846_v27, %v238_v6 }
0x1f59   :  { %9526 = vtanh.f32 %v1849_v2  ;;  %v8189_v24 = vmul.f32 -1.442695, %v1849_v2 }
0x1f5a   :  { %9528 = vtanh.f32 %v1850_v28  ;;  %v8190_v29 = vmul.f32 -1.442695, %v1850_v28 }
0x1f5b   :  { %9530 = vpow2.f32 %v8189_v24 }
0x1f5c   :  { %9532 = vpow2.f32 %v8190_v29 }
0x1f63   :  { %v9527_v16 = vpop.eup %9526 }
0x1f64   :  { %v9529_v20 = vpop.eup %9528  ;;  %1860 = vrot.lane.b32.xlu1 %v9527_v16, %s10183_s4 }
0x1f65   :  { %1884 = vrot.lane.b32.xlu0 %v9529_v20, %s10183_s4  ;;  %v9531_v19 = vpop.eup %9530 }
0x1f66   :  { %v9533_v31 = vpop.eup %9532  ;;  %v1854_v35 = vadd.f32 1.0, %v9531_v19 }
0x1f67   :  { %v1878_v55 = vadd.f32 1.0, %v9533_v31 }
0x1f68   :  { %9534 = vrcp.f32 %v1854_v35 }
0x1f69   :  { %9536 = vrcp.f32 %v1878_v55 }
0x1f72   :  { %v9535_v15 = vpop.eup %9534 }
0x1f73   :  { %v9537_v58 = vpop.eup %9536  ;;  %v1858_v33 = vmul.f32 %v9535_v15, %v1735_v21 }
0x1f74   :  { %v1882_v38 = vmul.f32 %v9537_v58, %v1759_v46 }
0x1fd6   :  { %v1861_v12 = vpop.permute.xlu1 %1860 }
0x1fd7   :  { %v1863_v11 = vmul.f32 %v9535_v15, %v1861_v12  ;;  %v1885_v30 = vpop.permute.xlu0 %1884 }
0x1fd8   :  { %v1887_v0 = vmul.f32 %v9537_v58, %v1885_v30 }
0x1fd9   :  { %1865 = vrot.lane.b32.xlu1 %v1863_v11, %s10183_s4 }
0x1fda   :  { %1889 = vrot.lane.b32.xlu0 %v1887_v0, %s10183_s4 }
0x204b   :  { %v1866_v49 = vpop.permute.xlu1 %1865 }
0x204c   :  { %v1868_v9 = vadd.f32 %v1866_v49, %v1858_v33  ;;  %v1890_v39 = vpop.permute.xlu0 %1889  ;;  %v10186_v49 = vmov 0.0|0.0  }
0x204d   :  { %v1892_v42 = vadd.f32 %v1890_v39, %v1882_v38  ;;  %8652 = vmatprep.subr.bf16.mxu0 %v10186_v49  ;;  %v2052_v38 = vld [vmem:[%s12724_s2] sm:$0xff]  ;;  %v2053_v39 = vld [vmem:[%s12724_s2 + $0x8] sm:$0xff] }
0x204e   :  { %9538 = vtanh.f32 %v1868_v9 }
0x204f   :  { %9540 = vtanh.f32 %v1892_v42 }
0x2058   :  { %v9539_v45 = vpop.eup %9538 }
0x2059   :  { %v9541_v7 = vpop.eup %9540  ;;  %1871 = vrot.lane.b32.xlu1 %v9539_v45, %s10183_s4  ;;  %v2055_v45 = vld [vmem:[%s12724_s2 + $0x18] sm:$0xff] }
0x205a   :  { %1895 = vrot.lane.b32.xlu0 %v9541_v7, %s10183_s4 }
0x20cb   :  { %v1872_v50 = vpop.permute.xlu1 %1871 }
0x20cc   :  { %v1874_v5 = vmul.f32 %v9535_v15, %v1872_v50  ;;  %v1896_v53 = vpop.permute.xlu0 %1895  ;;  %v2056_v50 = vld [vmem:[%s12724_s2 + $0x20] sm:$0xff] }
0x20cd   :  { %v1898_v60 = vmul.f32 %v9537_v58, %v1896_v53 }
0x20ce   :  { %1900 = vrot.lane.b32.xlu1 %v1874_v5, %s10184_s8  ;;  %v2057_v5 = vld [vmem:[%s12724_s2 + $0x28] sm:$0xff] }
0x20cf   :  { %1904 = vrot.lane.b32.xlu0 %v1898_v60, %s10185_s30  ;;  %v8659_v53 = vpack.c.bf16 %v2057_v5, %v2056_v50  ;;  %v11087_v5 = vld [vmem:[%s12690_s7] ss:$0 sm:$0xff] }
0x2140   :  { %v10866_v21 = vpop.permute.xlu1 %1900 }
0x2141   :  { %v10868_v46 = vpop.permute.xlu0 %1904 }
0x2142   :  { %v1907_v8 = vsel %vm443_vm2, %v10866_v21, %v10868_v46 }
0x2143   :  { %8191 = vmatmul.mubr.msk.f32.vlgmr.msra.gmra.mrb[14].mxu1 %vm306_vm1, %v1907_v8  ;;  %v2058_v8 = vld [vmem:[%s12724_s2 + $0x30] sm:$0xff] }
0x2144   :  { %2387 = vmatprep.mubr.f32.mxu1 %v10182_v3 }
0x2216   :  { %v1977_v6 = vpop.f32.mrb[14].mxu1 }
0x2217   :  { %v1982_v13 = vadd.f32 %v1977_v6, %v302_v10  ;;  %v1979_v2 = vpop.f32.mrb[15].mxu1  ;;  %v2059_v10 = vld [vmem:[%s12724_s2 + $0x38] sm:$0xff] }
0x2218   :  { %v1983_v27 = vadd.f32 %v1979_v2, %v232_v14  ;;  %v8662_v6 = vpack.c.bf16 %v2059_v10, %v2058_v8 }
0x2219   :  { %9542 = vtanh.f32 %v1982_v13  ;;  %v8192_v20 = vmul.f32 -1.442695, %v1982_v13 }
0x221a   :  { %9544 = vtanh.f32 %v1983_v27  ;;  %v8193_v24 = vmul.f32 -1.442695, %v1983_v27 }
0x221b   :  { %9546 = vpow2.f32 %v8192_v20  ;;  %v2249_v20 = vld [vmem:[%s12725_s28 + $0x18] sm:$0xff] }
0x221c   :  { %9548 = vpow2.f32 %v8193_v24  ;;  %v2246_v24 = vld [vmem:[%s12725_s28] sm:$0xff] }
0x2223   :  { %v9543_v28 = vpop.eup %9542 }
0x2224   :  { %v9545_v16 = vpop.eup %9544  ;;  %1993 = vrot.lane.b32.xlu0 %v9543_v28, %s10183_s4 }
0x2225   :  { %2017 = vrot.lane.b32.xlu1 %v9545_v16, %s10183_s4  ;;  %v9547_v56 = vpop.eup %9546  ;;  %v2247_v16 = vld [vmem:[%s12725_s28 + $0x8] sm:$0xff] }
0x2226   :  { %v9549_v23 = vpop.eup %9548  ;;  %v1987_v29 = vadd.f32 1.0, %v9547_v56  ;;  %v8664_v56 = vpack.c.bf16 %v2249_v20, %v2247_v16 }
0x2227   :  { %v2011_v51 = vadd.f32 1.0, %v9549_v23  ;;  %v2248_v23 = vld [vmem:[%s12725_s28 + $0x10] sm:$0xff] }
0x2228   :  { %9550 = vrcp.f32 %v1987_v29  ;;  %v8666_v29 = vpack.c.bf16 %v2248_v23, %v2246_v24  ;;  %8665 = vmatprep.subr.bf16.mxu1 %v8664_v56 }
0x2229   :  { %9552 = vrcp.f32 %v2011_v51 }
0x222a   :  { %8667 = vmatpush1.bf16.msra.mxu1 %v8666_v29 }
0x2232   :  { %v9551_v22 = vpop.eup %9550 }
0x2233   :  { %v9553_v31 = vpop.eup %9552  ;;  %v1991_v12 = vmul.f32 %v9551_v22, %v1868_v9  ;;  %v2054_v9 = vld [vmem:[%s12724_s2 + $0x10] sm:$0xff] }
0x2234   :  { %v2015_v11 = vmul.f32 %v9553_v31, %v1892_v42  ;;  %v8653_v42 = vpack.c.bf16 %v2053_v39, %v2052_v38  ;;  %v8656_v7 = vpack.c.bf16 %v2055_v45, %v2054_v9  ;;  %v2267_v39 = vld [vmem:[%s12689_s9 + $0x68] sm:$0xff]  ;;  %v2269_v9 = vld [vmem:[%s12689_s9 + $0x78] sm:$0xff]  ;;  %v2266_v45 = vld [vmem:[%s12689_s9 + $0x60] sm:$0xff] }
0x2236   :  { %8654 = vmatpush3.bf16.msra.mxu0 %v8653_v42  ;;  %v11071_v42 = vpack.c.bf16 %v2269_v9, %v2267_v39 }
0x2237   :  { %8655 = vmatprep.subr.bf16.mxu0 %v10186_v49 }
0x223a   :  { %8657 = vmatpush3.bf16.msra.mxu0 %v8656_v7  ;;  %v2268_v7 = vld [vmem:[%s12689_s9 + $0x70] sm:$0xff] }
0x223b   :  { %8658 = vmatprep.subr.bf16.mxu0 %v10186_v49  ;;  %v11080_v50 = vpack.c.bf16 %v2268_v7, %v2266_v45 }
0x223e   :  { %8660 = vmatpush3.bf16.msra.mxu0 %v8659_v53 }
0x223f   :  { %8661 = vmatprep.subr.bf16.mxu0 %v10186_v49  ;;  %v2264_v49 = vld [vmem:[%s12689_s9 + $0x50] sm:$0xff] }
0x2242   :  { %8663 = vmatpush3.bf16.msra.mxu0 %v8662_v6 }
0x2296   :  { %v1994_v19 = vpop.permute.xlu0 %1993 }
0x2297   :  { %v1996_v35 = vmul.f32 %v9551_v22, %v1994_v19  ;;  %v2018_v55 = vpop.permute.xlu1 %2017  ;;  %v2041_v19 = vsel %vm443_vm2, %v10592_v48, %v10868_v46  ;;  %v2044_v48 = vsel %vm443_vm2, %v10679_v40, %v10792_v62  ;;  %v2047_v40 = vsel %vm443_vm2, %v10790_v4, %v10681_v54  ;;  %v2255_v62 = vld [vmem:[%s12689_s9 + $0x8] sm:$0xff] }
0x2298   :  { %v2020_v15 = vmul.f32 %v9553_v31, %v2018_v55  ;;  %v2050_v54 = vsel %vm443_vm2, %v10866_v21, %v10594_v59  ;;  %v2253_v59 = vld [vmem:[%s12725_s28 + $0x38] sm:$0xff]  ;;  %v2259_v46 = vld [vmem:[%s12689_s9 + $0x28] sm:$0xff]  ;;  %v2258_v55 = vld [vmem:[%s12689_s9 + $0x20] sm:$0xff] }
0x2299   :  { %1998 = vrot.lane.b32.xlu0 %v1996_v35, %s10183_s4  ;;  %v2261_v35 = vld [vmem:[%s12689_s9 + $0x38] sm:$0xff] }
0x229a   :  { %2022 = vrot.lane.b32.xlu1 %v2020_v15, %s10183_s4  ;;  %v11038_v15 = vpack.c.bf16 %v2261_v35, %v2259_v46 }
0x230b   :  { %v1999_v58 = vpop.permute.xlu0 %1998 }
0x230c   :  { %v2001_v30 = vadd.f32 %v1999_v58, %v1991_v12  ;;  %v2023_v0 = vpop.permute.xlu1 %2022  ;;  %v2260_v12 = vld [vmem:[%s12689_s9 + $0x30] sm:$0xff] }
0x230d   :  { %v2025_v33 = vadd.f32 %v2023_v0, %v2015_v11  ;;  %v11043_v58 = vpack.c.bf16 %v2260_v12, %v2258_v55  ;;  %v2263_v11 = vld [vmem:[%s12689_s9 + $0x48] sm:$0xff]  ;;  %v2262_v0 = vld [vmem:[%s12689_s9 + $0x40] sm:$0xff] }
0x230e   :  { %9554 = vtanh.f32 %v2001_v30  ;;  %v2265_v30 = vld [vmem:[%s12689_s9 + $0x58] sm:$0xff]  ;;  %v11061_v38 = vpack.c.bf16 %v2264_v49, %v2262_v0 }
0x230f   :  { %9556 = vtanh.f32 %v2025_v33  ;;  %v11056_v33 = vpack.c.bf16 %v2265_v30, %v2263_v11 }
0x2318   :  { %v9555_v60 = vpop.eup %9554 }
0x2319   :  { %v9557_v14 = vpop.eup %9556  ;;  %2004 = vrot.lane.b32.xlu0 %v9555_v60, %s10183_s4 }
0x231a   :  { %2028 = vrot.lane.b32.xlu1 %v9557_v14, %s10183_s4 }
0x238b   :  { %v2005_v13 = vpop.permute.xlu0 %2004 }
0x238c   :  { %v2007_v2 = vmul.f32 %v9551_v22, %v2005_v13  ;;  %v2029_v27 = vpop.permute.xlu1 %2028 }
0x238d   :  { %v2031_v28 = vmul.f32 %v9553_v31, %v2029_v27  ;;  %v2042_v31 = vsel %vm443_vm2, %v10621_v63, %v10848_v17  ;;  %v2045_v63 = vsel %vm443_vm2, %v10708_v44, %v10763_v1  ;;  %v2048_v44 = vsel %vm443_vm2, %v10818_v41, %v10652_v36  ;;  %v2250_v1 = vld [vmem:[%s12725_s28 + $0x20] sm:$0xff]  ;;  %v2257_v41 = vld [vmem:[%s12689_s9 + $0x18] sm:$0xff]  ;;  %v2256_v17 = vld [vmem:[%s12689_s9 + $0x10] sm:$0xff] }
0x238e   :  { %2033 = vrot.lane.b32.xlu0 %v2007_v2, %s10184_s8 }
0x238f   :  { %2037 = vrot.lane.b32.xlu1 %v2031_v28, %s10185_s30 }
0x2401   :  { %v2038_v51 = vpop.permute.xlu1 %2037 }
0x2402   :  { %v2040_v22 = vsel %vm443_vm2, %v10563_v26, %v2038_v51  ;;  %v2043_v26 = vsel %vm443_vm2, %v10650_v32, %v10820_v43  ;;  %v2046_v32 = vsel %vm443_vm2, %v10761_v61, %v10710_v57  ;;  %v2049_v57 = vsel %vm443_vm2, %v10846_v47, %v10623_v25  ;;  %v2251_v25 = vld [vmem:[%s12725_s28 + $0x28] sm:$0xff]  ;;  %v2254_v43 = vld [vmem:[%s12689_s9] sm:$0xff] }
0x2403   :  { %8402 = vmatmul.mubr.msk.f32.vlgmr.msra.gmra.mrb[34].mxu0 %vm306_vm1, %v2040_v22  ;;  %v8668_v61 = vpack.c.bf16 %v2253_v59, %v2251_v25  ;;  %v11019_v47 = vpack.c.bf16 %v2257_v41, %v2255_v62  ;;  %v11024_v21 = vpack.c.bf16 %v2256_v17, %v2254_v43 }
0x2404   :  { %8404 = vmatprep.mubr.msk.f32.mxu0 %vm10187_vm3, %v10182_v3 }
0x2405   :  { %8669 = vmatprep.subr.bf16.mxu1 %v8668_v61  ;;  %8689 = vmatprep.subr.bf16.mxu0 %v11019_v47 }
0x2406   :  { %8691 = vmatpush1.bf16.msra.mxu0 %v11024_v21 }
0x2407   :  { %8405 = vmatmul.mubr.msk.f32.gmra.mrb[36].mxu0 %vm306_vm1, %v2041_v19  ;;  %8693 = vmatprep.subr.bf16.mxu0 %v11038_v15 }
0x2408   :  { %8407 = vmatprep.mubr.msk.f32.mxu0 %vm10187_vm3, %v10182_v3 }
0x240a   :  { %8695 = vmatpush1.bf16.msra.mxu0 %v11043_v58 }
0x240b   :  { %8408 = vmatmul.mubr.msk.f32.gmra.mrb[38].mxu0 %vm306_vm1, %v2042_v31  ;;  %8697 = vmatprep.subr.bf16.mxu0 %v11056_v33 }
0x240c   :  { %8410 = vmatprep.mubr.msk.f32.mxu0 %vm10187_vm3, %v10182_v3 }
0x240e   :  { %8699 = vmatpush1.bf16.msra.mxu0 %v11061_v38 }
0x240f   :  { %8411 = vmatmul.mubr.msk.f32.gmra.mrb[40].mxu0 %vm306_vm1, %v2043_v26  ;;  %8701 = vmatprep.subr.bf16.mxu0 %v11071_v42 }
0x2410   :  { %8413 = vmatprep.mubr.msk.f32.mxu0 %vm10187_vm3, %v10182_v3 }
0x2412   :  { %8703 = vmatpush1.bf16.msra.mxu0 %v11080_v50 }
0x2413   :  { %8414 = vmatmul.mubr.msk.f32.gmra.mrb[42].mxu0 %vm306_vm1, %v2044_v48  ;;  %8721 = vmatprep.subr.bf16.mxu0 %v11019_v47 }
0x2414   :  { %8416 = vmatprep.mubr.msk.f32.mxu0 %vm10187_vm3, %v10182_v3 }
0x2417   :  { %8417 = vmatmul.mubr.msk.f32.gmra.mrb[44].mxu0 %vm306_vm1, %v2045_v63 }
0x2418   :  { %8419 = vmatprep.mubr.msk.f32.mxu0 %vm10187_vm3, %v10182_v3 }
0x241b   :  { %8420 = vmatmul.mubr.msk.f32.gmra.mrb[46].mxu0 %vm306_vm1, %v10736_v37  ;;  %v2034_v37 = vpop.permute.xlu0 %2033 }
0x241c   :  { %8422 = vmatprep.mubr.msk.f32.mxu0 %vm10187_vm3, %v10182_v3  ;;  %v2051_v36 = vsel %vm443_vm2, %v2034_v37, %v10565_v34  ;;  %v2252_v34 = vld [vmem:[%s12725_s28 + $0x30] sm:$0xff] }
0x241d   :  { %v8670_v4 = vpack.c.bf16 %v2252_v34, %v2250_v1 }
0x241f   :  { %8423 = vmatmul.mubr.msk.f32.gmra.mrb[48].mxu0 %vm306_vm1, %v2046_v32  ;;  %8671 = vmatpush1.bf16.msra.mxu1 %v8670_v4 }
0x2420   :  { %8425 = vmatprep.mubr.msk.f32.mxu0 %vm10187_vm3, %v10182_v3  ;;  %8673 = vmatprep.subr.bf16.mxu1 %v11019_v47 }
0x2423   :  { %8426 = vmatmul.mubr.msk.f32.gmra.mrb[50].mxu0 %vm306_vm1, %v2047_v40 }
0x2424   :  { %8428 = vmatprep.mubr.msk.f32.mxu0 %vm10187_vm3, %v10182_v3 }
0x2427   :  { %8429 = vmatmul.mubr.msk.f32.gmra.mrb[52].mxu0 %vm306_vm1, %v2048_v44 }
0x2428   :  { %8431 = vmatprep.mubr.msk.f32.mxu0 %vm10187_vm3, %v10182_v3 }
0x242b   :  { %8432 = vmatmul.mubr.msk.f32.gmra.mrb[54].mxu0 %vm306_vm1, %v2049_v57 }
0x242c   :  { %8434 = vmatprep.mubr.msk.f32.mxu0 %vm10187_vm3, %v10182_v3 }
0x242f   :  { %8435 = vmatmul.mubr.msk.f32.gmra.mrb[56].mxu0 %vm306_vm1, %v2050_v54 }
0x2430   :  { %8437 = vmatprep.mubr.msk.f32.mxu0 %vm10187_vm3, %v10182_v3 }
0x2433   :  { %8438 = vmatmul.mubr.msk.f32.gmra.mrb[58].mxu0 %vm306_vm1, %v2051_v36 }
0x2434   :  { %2670 = vmatprep.mubr.f32.mxu0 %v10182_v3 }
0x24d6   :  { %v2169_v53 = vpop.f32.mrb[34].mxu0 }
0x24d7   :  { %v2170_v60 = vadd.f32 %v11087_v5, %v2169_v53  ;;  %v8403_v8 = vpop.f32.mrb[35].mxu0  ;;  %v2271_v53 = vld [vmem:[%s12691_s11] sm:$0xff] }
0x24d9   :  { %v2233_v10 = vmax.f32 %v2170_v60, 0.0 }
0x24da   :  { %v2174_v14 = vpop.f32.mrb[36].mxu0 }
0x24db   :  { %v2175_v6 = vadd.f32 %v11087_v5, %v2174_v14  ;;  %v8406_v13 = vpop.f32.mrb[37].mxu0  ;;  %8208 = vmatmul.mubr.msk.f32.vlgmr.msra.gmra.mrb[16].mxu1 %vm443_vm2, %v2233_v10 }
0x24dc   :  { %8675 = vmatpush1.bf16.msra.mxu1 %v11024_v21  ;;  %2393 = vmatprep.mubr.f32.mxu1 %v10182_v3 }
0x24dd   :  { %v2234_v2 = vmax.f32 %v2175_v6, 0.0  ;;  %8677 = vmatprep.subr.bf16.mxu1 %v11038_v15 }
0x24de   :  { %v2179_v27 = vpop.f32.mrb[38].mxu0 }
0x24df   :  { %v2180_v28 = vadd.f32 %v11087_v5, %v2179_v27  ;;  %v8409_v16 = vpop.f32.mrb[39].mxu0  ;;  %8209 = vmatmul.mubr.msk.f32.gmra.mrb[18].mxu1 %vm443_vm2, %v2234_v2 }
0x24e0   :  { %2399 = vmatprep.mubr.f32.mxu1 %v10182_v3  ;;  %8679 = vmatpush1.bf16.msra.mxu1 %v11043_v58 }
0x24e1   :  { %v2235_v20 = vmax.f32 %v2180_v28, 0.0  ;;  %8681 = vmatprep.subr.bf16.mxu1 %v11056_v33 }
0x24e2   :  { %v2184_v24 = vpop.f32.mrb[40].mxu0 }
0x24e3   :  { %v2185_v56 = vadd.f32 %v11087_v5, %v2184_v24  ;;  %v8412_v23 = vpop.f32.mrb[41].mxu0  ;;  %8210 = vmatmul.mubr.msk.f32.gmra.mrb[20].mxu1 %vm443_vm2, %v2235_v20 }
0x24e4   :  { %2405 = vmatprep.mubr.f32.mxu1 %v10182_v3  ;;  %8683 = vmatpush1.bf16.msra.mxu1 %v11061_v38 }
0x24e5   :  { %v2236_v29 = vmax.f32 %v2185_v56, 0.0  ;;  %8685 = vmatprep.subr.bf16.mxu1 %v11071_v42 }
0x24e6   :  { %v2189_v51 = vpop.f32.mrb[42].mxu0 }
0x24e7   :  { %v2190_v22 = vadd.f32 %v11087_v5, %v2189_v51  ;;  %v8415_v19 = vpop.f32.mrb[43].mxu0  ;;  %8211 = vmatmul.mubr.msk.f32.gmra.mrb[22].mxu1 %vm443_vm2, %v2236_v29 }
0x24e8   :  { %2411 = vmatprep.mubr.f32.mxu1 %v10182_v3  ;;  %8687 = vmatpush1.bf16.msra.mxu1 %v11080_v50 }
0x24e9   :  { %v2237_v31 = vmax.f32 %v2190_v22, 0.0  ;;  %8705 = vmatprep.subr.bf16.mxu1 %v11019_v47 }
0x24ea   :  { %v2194_v26 = vpop.f32.mrb[44].mxu0 }
0x24eb   :  { %v2195_v48 = vadd.f32 %v11087_v5, %v2194_v26  ;;  %v8418_v63 = vpop.f32.mrb[45].mxu0  ;;  %8212 = vmatmul.mubr.msk.f32.gmra.mrb[24].mxu1 %vm443_vm2, %v2237_v31  ;;  %v2270_v26 = vld [vmem:[%s12692_s10] sm:$0x3] }
0x24ec   :  { %2417 = vmatprep.mubr.f32.mxu1 %v10182_v3 }
0x24ed   :  { %v2238_v32 = vmax.f32 %v2195_v48, 0.0 }
0x24ee   :  { %v2199_v40 = vpop.f32.mrb[46].mxu0 }
0x24ef   :  { %v2200_v44 = vadd.f32 %v11087_v5, %v2199_v40  ;;  %v8421_v57 = vpop.f32.mrb[47].mxu0  ;;  %8213 = vmatmul.mubr.msk.f32.gmra.mrb[26].mxu1 %vm443_vm2, %v2238_v32  ;;  %v11195_v32 = vrot.slane %v2270_v26, %v10497_v52 }
0x24f0   :  { %2423 = vmatprep.mubr.f32.mxu1 %v10182_v3  ;;  %v11200_v57 = vrot.slane %v2270_v26, %v10543_v18 }
0x24f1   :  { %v2239_v54 = vmax.f32 %v2200_v44, 0.0 }
0x24f2   :  { %v2204_v37 = vpop.f32.mrb[48].mxu0 }
0x24f3   :  { %v2205_v36 = vadd.f32 %v11087_v5, %v2204_v37  ;;  %v8424_v25 = vpop.f32.mrb[49].mxu0  ;;  %8214 = vmatmul.mubr.msk.f32.gmra.mrb[28].mxu1 %vm443_vm2, %v2239_v54 }
0x24f4   :  { %2429 = vmatprep.mubr.f32.mxu1 %v10182_v3 }
0x24f5   :  { %v2240_v59 = vmax.f32 %v2205_v36, 0.0 }
0x24f6   :  { %v2209_v61 = vpop.f32.mrb[50].mxu0 }
0x24f7   :  { %v2210_v1 = vadd.f32 %v11087_v5, %v2209_v61  ;;  %v8427_v34 = vpop.f32.mrb[51].mxu0  ;;  %8215 = vmatmul.mubr.msk.f32.gmra.mrb[30].mxu1 %vm443_vm2, %v2240_v59 }
0x24f8   :  { %2435 = vmatprep.mubr.f32.mxu1 %v10182_v3 }
0x24f9   :  { %v2241_v4 = vmax.f32 %v2210_v1, 0.0 }
0x24fa   :  { %v2214_v62 = vpop.f32.mrb[52].mxu0 }
0x24fb   :  { %v2215_v41 = vadd.f32 %v11087_v5, %v2214_v62  ;;  %v8430_v43 = vpop.f32.mrb[53].mxu0  ;;  %8216 = vmatmul.mubr.msk.f32.gmra.mrb[32].mxu1 %vm443_vm2, %v2241_v4  ;;  %v2272_v4 = vld [vmem:[%s12693_s12] sm:$0xff] }
0x24fc   :  { %2441 = vmatprep.mubr.f32.mxu1 %v10182_v3 }
0x24fd   :  { %v2242_v17 = vmax.f32 %v2215_v41, 0.0 }
0x24fe   :  { %v2219_v46 = vpop.f32.mrb[54].mxu0 }
0x24ff   :  { %v2220_v35 = vadd.f32 %v11087_v5, %v2219_v46  ;;  %v8433_v55 = vpop.f32.mrb[55].mxu0  ;;  %8217 = vmatmul.mubr.msk.f32.gmra.mrb[34].mxu1 %vm443_vm2, %v2242_v17 }
0x2500   :  { %2447 = vmatprep.mubr.f32.mxu1 %v10182_v3 }
0x2501   :  { %v2243_v12 = vmax.f32 %v2220_v35, 0.0 }
0x2502   :  { %v2224_v11 = vpop.f32.mrb[56].mxu0 }
0x2503   :  { %v2225_v30 = vadd.f32 %v11087_v5, %v2224_v11  ;;  %v8436_v0 = vpop.f32.mrb[57].mxu0  ;;  %8218 = vmatmul.mubr.msk.f32.gmra.mrb[36].mxu1 %vm443_vm2, %v2243_v12 }
0x2504   :  { %2453 = vmatprep.mubr.f32.mxu1 %v10182_v3 }
0x2505   :  { %v2244_v49 = vmax.f32 %v2225_v30, 0.0 }
0x2506   :  { %v2229_v39 = vpop.f32.mrb[58].mxu0 }
0x2507   :  { %v2230_v9 = vadd.f32 %v11087_v5, %v2229_v39  ;;  %v8439_v45 = vpop.f32.mrb[59].mxu0  ;;  %8219 = vmatmul.mubr.msk.f32.gmra.mrb[38].mxu1 %vm443_vm2, %v2244_v49 }
0x2508   :  { %2459 = vmatprep.mubr.f32.mxu1 %v10182_v3 }
0x2509   :  { %v2245_v7 = vmax.f32 %v2230_v9, 0.0 }
0x250b   :  { %8220 = vmatmul.mubr.msk.f32.gmra.mrb[40].mxu1 %vm443_vm2, %v2245_v7 }
0x250c   :  { %2533 = vmatprep.mubr.f32.mxu1 %v10182_v3 }
0x250f   :  { %8221 = vmatmul.mubr.msk.f32.vlgmr.msra.gmra.mrb[42].mxu1 %vm306_vm1, %v2271_v53 }
0x2510   :  { %8707 = vmatpush1.bf16.msra.mxu1 %v11024_v21  ;;  %2803 = vmatprep.mubr.f32.mxu1 %v10182_v3 }
0x2511   :  { %8709 = vmatprep.subr.bf16.mxu1 %v11038_v15 }
0x2514   :  { %8711 = vmatpush1.bf16.msra.mxu1 %v11043_v58 }
0x2515   :  { %8713 = vmatprep.subr.bf16.mxu1 %v11056_v33 }
0x2518   :  { %8715 = vmatpush1.bf16.msra.mxu1 %v11061_v38 }
0x2519   :  { %8717 = vmatprep.subr.bf16.mxu1 %v11071_v42 }
0x251c   :  { %8719 = vmatpush1.bf16.msra.mxu1 %v11080_v50 }
0x251d   :  { %8737 = vmatprep.subr.bf16.mxu1 %v11019_v47 }
0x25ae   :  { %v2389_v5 = vpop.f32.mrb[16].mxu1 }
0x25af   :  { %v11149_v60 = vpop.f32.mrb[17].mxu1  ;;  %v2390_v54 = vadd.f32 %v2389_v5, %v11195_v32 }
0x25b2   :  { %v11151_v8 = vpop.f32.mrb[18].mxu1 }
0x25b3   :  { %v11153_v10 = vpop.f32.mrb[19].mxu1 }
0x25b6   :  { %v11155_v14 = vpop.f32.mrb[20].mxu1 }
0x25b7   :  { %v11157_v6 = vpop.f32.mrb[21].mxu1 }
0x25ba   :  { %v11159_v13 = vpop.f32.mrb[22].mxu1 }
0x25bb   :  { %v11161_v2 = vpop.f32.mrb[23].mxu1 }
0x25be   :  { %v11163_v27 = vpop.f32.mrb[24].mxu1 }
0x25bf   :  { %v11165_v28 = vpop.f32.mrb[25].mxu1 }
0x25c2   :  { %v11167_v16 = vpop.f32.mrb[26].mxu1 }
0x25c3   :  { %v11169_v20 = vpop.f32.mrb[27].mxu1 }
0x25ca   :  { %v11171_v24 = vpop.f32.mrb[30].mxu1 }
0x25cb   :  { %v11173_v56 = vpop.f32.mrb[31].mxu1 }
0x25ce   :  { %v11175_v23 = vpop.f32.mrb[32].mxu1 }
0x25cf   :  { %v11177_v29 = vpop.f32.mrb[33].mxu1 }
0x25d2   :  { %v11179_v51 = vpop.f32.mrb[34].mxu1 }
0x25d3   :  { %v11181_v22 = vpop.f32.mrb[35].mxu1 }
0x25d6   :  { %v11183_v19 = vpop.f32.mrb[36].mxu1 }
0x25d7   :  { %v11185_v31 = vpop.f32.mrb[37].mxu1 }
0x25da   :  { %v11190_v48 = vpop.f32.mrb[38].mxu1 }
0x25db   :  { %v11192_v63 = vpop.f32.mrb[39].mxu1 }
0x25de   :  { %v11197_v40 = vpop.f32.mrb[40].mxu1 }
0x25df   :  { %v2463_v44 = vpop.f32.mrb[41].mxu1 }
0x25e0   :  { %v2464_v37 = vadd.f32 %v2463_v44, %v11200_v57 }
0x25e2   :  { %v2535_v36 = vpop.f32.mrb[42].mxu1 }
0x25e3   :  { %v2540_v25 = vadd.f32 %v2535_v36, %v2390_v54  ;;  %v2537_v59 = vpop.f32.mrb[43].mxu1 }
0x25e4   :  { %v2541_v61 = vadd.f32 %v2537_v59, %v2464_v37 }
0x25e5   :  { %9558 = vtanh.f32 %v2540_v25  ;;  %v8222_v62 = vmul.f32 -1.442695, %v2540_v25 }
0x25e6   :  { %9560 = vtanh.f32 %v2541_v61  ;;  %v8223_v41 = vmul.f32 -1.442695, %v2541_v61 }
0x25e7   :  { %9562 = vpow2.f32 %v8222_v62  ;;  %v2458_v62 = vadd.f32 %v11192_v63, %v11200_v57 }
0x25e8   :  { %9564 = vpow2.f32 %v8223_v41 }
0x25ef   :  { %v9559_v1 = vpop.eup %9558 }
0x25f0   :  { %v9561_v34 = vpop.eup %9560  ;;  %2555 = vrot.lane.b32.xlu1 %v9559_v1, %s10183_s4 }
0x25f1   :  { %2579 = vrot.lane.b32.xlu0 %v9561_v34, %s10183_s4  ;;  %v9563_v43 = vpop.eup %9562 }
0x25f2   :  { %v9565_v17 = vpop.eup %9564  ;;  %v2545_v46 = vadd.f32 1.0, %v9563_v43 }
0x25f3   :  { %v2573_v35 = vadd.f32 1.0, %v9565_v17 }
0x25f4   :  { %2550 = vrot.lane.b32.xlu1 %v2272_v4, %s10183_s4  ;;  %9566 = vrcp.f32 %v2545_v46 }
0x25f5   :  { %9568 = vrcp.f32 %v2573_v35 }
0x25fe   :  { %v9567_v55 = vpop.eup %9566 }
0x25ff   :  { %v9569_v11 = vpop.eup %9568 }
0x2600   :  { %v2577_v7 = vmul.f32 %v9569_v11, %v2272_v4  ;;  %v2396_v4 = vadd.f32 %v11151_v8, %v11195_v32 }
0x2662   :  { %v2556_v12 = vpop.permute.xlu1 %2555 }
0x2663   :  { %v2558_v30 = vmul.f32 %v9567_v55, %v2556_v12  ;;  %v2580_v0 = vpop.permute.xlu0 %2579 }
0x2664   :  { %v2582_v49 = vmul.f32 %v9569_v11, %v2580_v0 }
0x2665   :  { %2560 = vrot.lane.b32.xlu0 %v2558_v30, %s10183_s4 }
0x2666   :  { %2584 = vrot.lane.b32.xlu1 %v2582_v49, %s10183_s4  ;;  %v2551_v39 = vpop.permute.xlu1 %2550 }
0x2667   :  { %v2553_v9 = vmul.f32 %v9567_v55, %v2551_v39 }
0x26d7   :  { %v2561_v45 = vpop.permute.xlu0 %2560 }
0x26d8   :  { %v2563_v53 = vadd.f32 %v2561_v45, %v2553_v9  ;;  %v2585_v5 = vpop.permute.xlu1 %2584 }
0x26d9   :  { %v2587_v26 = vadd.f32 %v2585_v5, %v2577_v7 }
0x26da   :  { %9570 = vtanh.f32 %v2563_v53 }
0x26db   :  { %9572 = vtanh.f32 %v2587_v26 }
0x26e4   :  { %v9571_v44 = vpop.eup %9570 }
0x26e5   :  { %v9573_v54 = vpop.eup %9572  ;;  %2566 = vrot.lane.b32.xlu0 %v9571_v44, %s10183_s4 }
0x26e6   :  { %2590 = vrot.lane.b32.xlu1 %v9573_v54, %s10183_s4 }
0x2757   :  { %v2567_v37 = vpop.permute.xlu0 %2566 }
0x2758   :  { %v2569_v36 = vmul.f32 %v9567_v55, %v2567_v37  ;;  %v2591_v25 = vpop.permute.xlu1 %2590 }
0x2759   :  { %v2593_v59 = vmul.f32 %v9569_v11, %v2591_v25 }
0x275a   :  { %2595 = vrot.lane.b32.xlu0 %v2569_v36, %s10184_s8 }
0x275b   :  { %2599 = vrot.lane.b32.xlu1 %v2593_v59, %s10185_s30 }
0x27cc   :  { %v11216_v61 = vpop.permute.xlu0 %2595 }
0x27cd   :  { %v11218_v1 = vpop.permute.xlu1 %2599 }
0x27ce   :  { %v2602_v34 = vsel %vm443_vm2, %v11216_v61, %v11218_v1 }
0x27cf   :  { %8224 = vmatmul.mubr.msk.f32.vlgmr.msra.gmra.mrb[60].mxu0 %vm306_vm1, %v2602_v34 }
0x27d0   :  { %8723 = vmatpush1.bf16.msra.mxu0 %v11024_v21  ;;  %2936 = vmatprep.mubr.f32.mxu0 %v10182_v3 }
0x27d1   :  { %8725 = vmatprep.subr.bf16.mxu0 %v11038_v15 }
0x27d4   :  { %8727 = vmatpush1.bf16.msra.mxu0 %v11043_v58 }
0x27d5   :  { %8729 = vmatprep.subr.bf16.mxu0 %v11056_v33 }
0x27d8   :  { %8731 = vmatpush1.bf16.msra.mxu0 %v11061_v38 }
0x27d9   :  { %8733 = vmatprep.subr.bf16.mxu0 %v11071_v42 }
0x27dc   :  { %8735 = vmatpush1.bf16.msra.mxu0 %v11080_v50 }
0x27dd   :  { %8753 = vmatprep.subr.bf16.mxu0 %v11019_v47 }
0x28a2   :  { %v2672_v41 = vpop.f32.mrb[60].mxu0 }
0x28a3   :  { %v2677_v43 = vadd.f32 %v2672_v41, %v2396_v4  ;;  %v2674_v17 = vpop.f32.mrb[61].mxu0 }
0x28a4   :  { %v2678_v46 = vadd.f32 %v2674_v17, %v2458_v62 }
0x28a5   :  { %9574 = vtanh.f32 %v2677_v43  ;;  %v8225_v12 = vmul.f32 -1.442695, %v2677_v43 }
0x28a6   :  { %9576 = vtanh.f32 %v2678_v46  ;;  %v8226_v11 = vmul.f32 -1.442695, %v2678_v46 }
0x28a7   :  { %9578 = vpow2.f32 %v8225_v12 }
0x28a8   :  { %9580 = vpow2.f32 %v8226_v11 }
0x28af   :  { %v9575_v35 = vpop.eup %9574 }
0x28b0   :  { %v9577_v55 = vpop.eup %9576  ;;  %2688 = vrot.lane.b32.xlu0 %v9575_v35, %s10183_s4  ;;  %v2402_v35 = vadd.f32 %v11155_v14, %v11195_v32 }
0x28b1   :  { %2712 = vrot.lane.b32.xlu1 %v9577_v55, %s10183_s4  ;;  %v9579_v8 = vpop.eup %9578  ;;  %v2452_v55 = vadd.f32 %v11185_v31, %v11200_v57 }
0x28b2   :  { %v9581_v30 = vpop.eup %9580  ;;  %v2682_v0 = vadd.f32 1.0, %v9579_v8 }
0x28b3   :  { %v2706_v63 = vadd.f32 1.0, %v9581_v30 }
0x28b4   :  { %9582 = vrcp.f32 %v2682_v0 }
0x28b5   :  { %9584 = vrcp.f32 %v2706_v63 }
0x28be   :  { %v9583_v49 = vpop.eup %9582 }
0x28bf   :  { %v9585_v9 = vpop.eup %9584  ;;  %v2686_v44 = vmul.f32 %v9583_v49, %v2563_v53 }
0x28c0   :  { %v2710_v37 = vmul.f32 %v9585_v9, %v2587_v26 }
0x2922   :  { %v2689_v39 = vpop.permute.xlu0 %2688 }
0x2923   :  { %v2691_v45 = vmul.f32 %v9583_v49, %v2689_v39  ;;  %v2713_v7 = vpop.permute.xlu1 %2712 }
0x2924   :  { %v2715_v5 = vmul.f32 %v9585_v9, %v2713_v7 }
0x2925   :  { %2693 = vrot.lane.b32.xlu0 %v2691_v45, %s10183_s4 }
0x2926   :  { %2717 = vrot.lane.b32.xlu1 %v2715_v5, %s10183_s4 }
0x2997   :  { %v2694_v54 = vpop.permute.xlu0 %2693 }
0x2998   :  { %v2696_v36 = vadd.f32 %v2694_v54, %v2686_v44  ;;  %v2718_v25 = vpop.permute.xlu1 %2717 }
0x2999   :  { %v2720_v59 = vadd.f32 %v2718_v25, %v2710_v37 }
0x299a   :  { %9586 = vtanh.f32 %v2696_v36 }
0x299b   :  { %9588 = vtanh.f32 %v2720_v59 }
0x29a4   :  { %v9587_v34 = vpop.eup %9586 }
0x29a5   :  { %v9589_v4 = vpop.eup %9588  ;;  %2699 = vrot.lane.b32.xlu0 %v9587_v34, %s10183_s4 }
0x29a6   :  { %2723 = vrot.lane.b32.xlu1 %v9589_v4, %s10183_s4 }
0x2a17   :  { %v2700_v62 = vpop.permute.xlu0 %2699 }
0x2a18   :  { %v2702_v41 = vmul.f32 %v9583_v49, %v2700_v62  ;;  %v2724_v43 = vpop.permute.xlu1 %2723 }
0x2a19   :  { %v2726_v17 = vmul.f32 %v9585_v9, %v2724_v43 }
0x2a1a   :  { %2728 = vrot.lane.b32.xlu0 %v2702_v41, %s10184_s8 }
0x2a1b   :  { %2732 = vrot.lane.b32.xlu1 %v2726_v17, %s10185_s30 }
0x2a8c   :  { %v11245_v53 = vpop.permute.xlu0 %2728 }
0x2a8d   :  { %v11247_v26 = vpop.permute.xlu1 %2732 }
0x2a8e   :  { %v2735_v46 = vsel %vm443_vm2, %v11245_v53, %v11247_v26 }
0x2a8f   :  { %8227 = vmatmul.mubr.msk.f32.vlgmr.msra.gmra.mrb[44].mxu1 %vm306_vm1, %v2735_v46 }
0x2a90   :  { %8739 = vmatpush1.bf16.msra.mxu1 %v11024_v21  ;;  %3069 = vmatprep.mubr.f32.mxu1 %v10182_v3 }
0x2a91   :  { %8741 = vmatprep.subr.bf16.mxu1 %v11038_v15 }
0x2a94   :  { %8743 = vmatpush1.bf16.msra.mxu1 %v11043_v58 }
0x2a95   :  { %8745 = vmatprep.subr.bf16.mxu1 %v11056_v33 }
0x2a98   :  { %8747 = vmatpush1.bf16.msra.mxu1 %v11061_v38 }
0x2a99   :  { %8749 = vmatprep.subr.bf16.mxu1 %v11071_v42 }
0x2a9c   :  { %8751 = vmatpush1.bf16.msra.mxu1 %v11080_v50 }
0x2a9d   :  { %8769 = vmatprep.subr.bf16.mxu1 %v11019_v47 }
0x2b62   :  { %v2805_v12 = vpop.f32.mrb[44].mxu1 }
0x2b63   :  { %v2810_v11 = vadd.f32 %v2805_v12, %v2402_v35  ;;  %v2807_v8 = vpop.f32.mrb[45].mxu1 }
0x2b64   :  { %v2811_v30 = vadd.f32 %v2807_v8, %v2452_v55 }
0x2b65   :  { %9590 = vtanh.f32 %v2810_v11  ;;  %v8228_v49 = vmul.f32 -1.442695, %v2810_v11 }
0x2b66   :  { %9592 = vtanh.f32 %v2811_v30  ;;  %v8229_v39 = vmul.f32 -1.442695, %v2811_v30 }
0x2b67   :  { %9594 = vpow2.f32 %v8228_v49 }
0x2b68   :  { %9596 = vpow2.f32 %v8229_v39 }
0x2b6f   :  { %v9591_v0 = vpop.eup %9590 }
0x2b70   :  { %v9593_v63 = vpop.eup %9592  ;;  %2821 = vrot.lane.b32.xlu0 %v9591_v0, %s10183_s4  ;;  %v2408_v0 = vadd.f32 %v11159_v13, %v11195_v32 }
0x2b71   :  { %2845 = vrot.lane.b32.xlu1 %v9593_v63, %s10183_s4  ;;  %v9595_v14 = vpop.eup %9594  ;;  %v2446_v63 = vadd.f32 %v11181_v22, %v11200_v57 }
0x2b72   :  { %v9597_v9 = vpop.eup %9596  ;;  %v2815_v45 = vadd.f32 1.0, %v9595_v14 }
0x2b73   :  { %v2839_v31 = vadd.f32 1.0, %v9597_v9 }
0x2b74   :  { %9598 = vrcp.f32 %v2815_v45 }
0x2b75   :  { %9600 = vrcp.f32 %v2839_v31 }
0x2b7e   :  { %v9599_v7 = vpop.eup %9598 }
0x2b7f   :  { %v9601_v44 = vpop.eup %9600  ;;  %v2819_v34 = vmul.f32 %v9599_v7, %v2696_v36 }
0x2b80   :  { %v2843_v62 = vmul.f32 %v9601_v44, %v2720_v59 }
0x2be2   :  { %v2822_v5 = vpop.permute.xlu0 %2821 }
0x2be3   :  { %v2824_v54 = vmul.f32 %v9599_v7, %v2822_v5  ;;  %v2846_v37 = vpop.permute.xlu1 %2845 }
0x2be4   :  { %v2848_v25 = vmul.f32 %v9601_v44, %v2846_v37 }
0x2be5   :  { %2826 = vrot.lane.b32.xlu0 %v2824_v54, %s10183_s4 }
0x2be6   :  { %2850 = vrot.lane.b32.xlu1 %v2848_v25, %s10183_s4 }
0x2c57   :  { %v2827_v4 = vpop.permute.xlu0 %2826 }
0x2c58   :  { %v2829_v41 = vadd.f32 %v2827_v4, %v2819_v34  ;;  %v2851_v43 = vpop.permute.xlu1 %2850 }
0x2c59   :  { %v2853_v17 = vadd.f32 %v2851_v43, %v2843_v62 }
0x2c5a   :  { %9602 = vtanh.f32 %v2829_v41 }
0x2c5b   :  { %9604 = vtanh.f32 %v2853_v17 }
0x2c64   :  { %v9603_v46 = vpop.eup %9602 }
0x2c65   :  { %v9605_v35 = vpop.eup %9604  ;;  %2832 = vrot.lane.b32.xlu0 %v9603_v46, %s10183_s4 }
0x2c66   :  { %2856 = vrot.lane.b32.xlu1 %v9605_v35, %s10183_s4 }
0x2cd7   :  { %v2833_v55 = vpop.permute.xlu0 %2832 }
0x2cd8   :  { %v2835_v12 = vmul.f32 %v9599_v7, %v2833_v55  ;;  %v2857_v11 = vpop.permute.xlu1 %2856 }
0x2cd9   :  { %v2859_v8 = vmul.f32 %v9601_v44, %v2857_v11 }
0x2cda   :  { %2861 = vrot.lane.b32.xlu0 %v2835_v12, %s10184_s8 }
0x2cdb   :  { %2865 = vrot.lane.b32.xlu1 %v2859_v8, %s10185_s30 }
0x2d4c   :  { %v11274_v36 = vpop.permute.xlu0 %2861 }
0x2d4d   :  { %v11276_v59 = vpop.permute.xlu1 %2865 }
0x2d4e   :  { %v2868_v30 = vsel %vm443_vm2, %v11274_v36, %v11276_v59 }
0x2d4f   :  { %8230 = vmatmul.mubr.msk.f32.vlgmr.msra.gmra.mrb[62].mxu0 %vm306_vm1, %v2868_v30 }
0x2d50   :  { %8755 = vmatpush1.bf16.msra.mxu0 %v11024_v21  ;;  %3202 = vmatprep.mubr.f32.mxu0 %v10182_v3 }
0x2d51   :  { %8757 = vmatprep.subr.bf16.mxu0 %v11038_v15 }
0x2d54   :  { %8759 = vmatpush1.bf16.msra.mxu0 %v11043_v58 }
0x2d55   :  { %8761 = vmatprep.subr.bf16.mxu0 %v11056_v33 }
0x2d58   :  { %8763 = vmatpush1.bf16.msra.mxu0 %v11061_v38 }
0x2d59   :  { %8765 = vmatprep.subr.bf16.mxu0 %v11071_v42 }
0x2d5c   :  { %8767 = vmatpush1.bf16.msra.mxu0 %v11080_v50 }
0x2d5d   :  { %8785 = vmatprep.subr.bf16.mxu0 %v11019_v47 }
0x2e22   :  { %v2938_v49 = vpop.f32.mrb[62].mxu0 }
0x2e23   :  { %v2943_v39 = vadd.f32 %v2938_v49, %v2408_v0  ;;  %v2940_v14 = vpop.f32.mrb[63].mxu0 }
0x2e24   :  { %v2944_v9 = vadd.f32 %v2940_v14, %v2446_v63 }
0x2e25   :  { %9606 = vtanh.f32 %v2943_v39  ;;  %v8231_v7 = vmul.f32 -1.442695, %v2943_v39 }
0x2e26   :  { %9608 = vtanh.f32 %v2944_v9  ;;  %v8232_v5 = vmul.f32 -1.442695, %v2944_v9 }
0x2e27   :  { %9610 = vpow2.f32 %v8231_v7 }
0x2e28   :  { %9612 = vpow2.f32 %v8232_v5 }
0x2e2f   :  { %v9607_v45 = vpop.eup %9606 }
0x2e30   :  { %v9609_v31 = vpop.eup %9608  ;;  %2954 = vrot.lane.b32.xlu0 %v9607_v45, %s10183_s4  ;;  %v2414_v45 = vadd.f32 %v11163_v27, %v11195_v32 }
0x2e31   :  { %2978 = vrot.lane.b32.xlu1 %v9609_v31, %s10183_s4  ;;  %v9611_v13 = vpop.eup %9610  ;;  %v2440_v31 = vadd.f32 %v11177_v29, %v11200_v57 }
0x2e32   :  { %v9613_v44 = vpop.eup %9612  ;;  %v2948_v54 = vadd.f32 1.0, %v9611_v13 }
0x2e33   :  { %v2972_v22 = vadd.f32 1.0, %v9613_v44 }
0x2e34   :  { %9614 = vrcp.f32 %v2948_v54 }
0x2e35   :  { %9616 = vrcp.f32 %v2972_v22 }
0x2e3e   :  { %v9615_v37 = vpop.eup %9614 }
0x2e3f   :  { %v9617_v34 = vpop.eup %9616  ;;  %v2952_v46 = vmul.f32 %v9615_v37, %v2829_v41 }
0x2e40   :  { %v2976_v55 = vmul.f32 %v9617_v34, %v2853_v17 }
0x2ea2   :  { %v2955_v25 = vpop.permute.xlu0 %2954 }
0x2ea3   :  { %v2957_v4 = vmul.f32 %v9615_v37, %v2955_v25  ;;  %v2979_v62 = vpop.permute.xlu1 %2978 }
0x2ea4   :  { %v2981_v43 = vmul.f32 %v9617_v34, %v2979_v62 }
0x2ea5   :  { %2959 = vrot.lane.b32.xlu0 %v2957_v4, %s10183_s4 }
0x2ea6   :  { %2983 = vrot.lane.b32.xlu1 %v2981_v43, %s10183_s4 }
0x2f17   :  { %v2960_v35 = vpop.permute.xlu0 %2959 }
0x2f18   :  { %v2962_v12 = vadd.f32 %v2960_v35, %v2952_v46  ;;  %v2984_v11 = vpop.permute.xlu1 %2983 }
0x2f19   :  { %v2986_v8 = vadd.f32 %v2984_v11, %v2976_v55 }
0x2f1a   :  { %9618 = vtanh.f32 %v2962_v12 }
0x2f1b   :  { %9620 = vtanh.f32 %v2986_v8 }
0x2f24   :  { %v9619_v30 = vpop.eup %9618 }
0x2f25   :  { %v9621_v0 = vpop.eup %9620  ;;  %2965 = vrot.lane.b32.xlu0 %v9619_v30, %s10183_s4 }
0x2f26   :  { %2989 = vrot.lane.b32.xlu1 %v9621_v0, %s10183_s4 }
0x2f97   :  { %v2966_v63 = vpop.permute.xlu0 %2965 }
0x2f98   :  { %v2968_v49 = vmul.f32 %v9615_v37, %v2966_v63  ;;  %v2990_v39 = vpop.permute.xlu1 %2989 }
0x2f99   :  { %v2992_v14 = vmul.f32 %v9617_v34, %v2990_v39 }
0x2f9a   :  { %2994 = vrot.lane.b32.xlu0 %v2968_v49, %s10184_s8 }
0x2f9b   :  { %2998 = vrot.lane.b32.xlu1 %v2992_v14, %s10185_s30 }
0x300c   :  { %v11303_v41 = vpop.permute.xlu0 %2994 }
0x300d   :  { %v11305_v17 = vpop.permute.xlu1 %2998 }
0x300e   :  { %v3001_v9 = vsel %vm443_vm2, %v11303_v41, %v11305_v17 }
0x300f   :  { %8233 = vmatmul.mubr.msk.f32.vlgmr.msra.gmra.mrb[46].mxu1 %vm306_vm1, %v3001_v9 }
0x3010   :  { %8771 = vmatpush1.bf16.msra.mxu1 %v11024_v21  ;;  %3335 = vmatprep.mubr.f32.mxu1 %v10182_v3 }
0x3011   :  { %8773 = vmatprep.subr.bf16.mxu1 %v11038_v15 }
0x3014   :  { %8775 = vmatpush1.bf16.msra.mxu1 %v11043_v58 }
0x3015   :  { %8777 = vmatprep.subr.bf16.mxu1 %v11056_v33 }
0x3018   :  { %8779 = vmatpush1.bf16.msra.mxu1 %v11061_v38 }
0x3019   :  { %8781 = vmatprep.subr.bf16.mxu1 %v11071_v42 }
0x301c   :  { %8783 = vmatpush1.bf16.msra.mxu1 %v11080_v50 }
0x301d   :  { %8801 = vmatprep.subr.bf16.mxu1 %v11019_v47 }
0x30e2   :  { %v3071_v7 = vpop.f32.mrb[46].mxu1 }
0x30e3   :  { %v3076_v5 = vadd.f32 %v3071_v7, %v2414_v45  ;;  %v3073_v13 = vpop.f32.mrb[47].mxu1 }
0x30e4   :  { %v3077_v44 = vadd.f32 %v3073_v13, %v2440_v31 }
0x30e5   :  { %9622 = vtanh.f32 %v3076_v5  ;;  %v8234_v37 = vmul.f32 -1.442695, %v3076_v5 }
0x30e6   :  { %9624 = vtanh.f32 %v3077_v44  ;;  %v8235_v25 = vmul.f32 -1.442695, %v3077_v44 }
0x30e7   :  { %9626 = vpow2.f32 %v8234_v37 }
0x30e8   :  { %9628 = vpow2.f32 %v8235_v25 }
0x30ef   :  { %v9623_v54 = vpop.eup %9622 }
0x30f0   :  { %v9625_v22 = vpop.eup %9624  ;;  %3087 = vrot.lane.b32.xlu0 %v9623_v54, %s10183_s4  ;;  %v2420_v54 = vadd.f32 %v11167_v16, %v11195_v32 }
0x30f1   :  { %3111 = vrot.lane.b32.xlu1 %v9625_v22, %s10183_s4  ;;  %v9627_v27 = vpop.eup %9626  ;;  %v2434_v22 = vadd.f32 %v11173_v56, %v11200_v57 }
0x30f2   :  { %v9629_v34 = vpop.eup %9628  ;;  %v3081_v4 = vadd.f32 1.0, %v9627_v27 }
0x30f3   :  { %v3105_v29 = vadd.f32 1.0, %v9629_v34 }
0x30f4   :  { %9630 = vrcp.f32 %v3081_v4 }
0x30f5   :  { %9632 = vrcp.f32 %v3105_v29 }
0x30fe   :  { %v9631_v62 = vpop.eup %9630 }
0x30ff   :  { %v9633_v46 = vpop.eup %9632  ;;  %v3085_v30 = vmul.f32 %v9631_v62, %v2962_v12 }
0x3100   :  { %v3109_v63 = vmul.f32 %v9633_v46, %v2986_v8 }
0x3162   :  { %v3088_v43 = vpop.permute.xlu0 %3087 }
0x3163   :  { %v3090_v35 = vmul.f32 %v9631_v62, %v3088_v43  ;;  %v3112_v55 = vpop.permute.xlu1 %3111 }
0x3164   :  { %v3114_v11 = vmul.f32 %v9633_v46, %v3112_v55 }
0x3165   :  { %3092 = vrot.lane.b32.xlu0 %v3090_v35, %s10183_s4 }
0x3166   :  { %3116 = vrot.lane.b32.xlu1 %v3114_v11, %s10183_s4 }
0x31d7   :  { %v3093_v0 = vpop.permute.xlu0 %3092 }
0x31d8   :  { %v3095_v49 = vadd.f32 %v3093_v0, %v3085_v30  ;;  %v3117_v39 = vpop.permute.xlu1 %3116 }
0x31d9   :  { %v3119_v14 = vadd.f32 %v3117_v39, %v3109_v63 }
0x31da   :  { %9634 = vtanh.f32 %v3095_v49 }
0x31db   :  { %9636 = vtanh.f32 %v3119_v14 }
0x31e4   :  { %v9635_v9 = vpop.eup %9634 }
0x31e5   :  { %v9637_v45 = vpop.eup %9636  ;;  %3098 = vrot.lane.b32.xlu0 %v9635_v9, %s10183_s4 }
0x31e6   :  { %3122 = vrot.lane.b32.xlu1 %v9637_v45, %s10183_s4 }
0x3257   :  { %v3099_v31 = vpop.permute.xlu0 %3098 }
0x3258   :  { %v3101_v7 = vmul.f32 %v9631_v62, %v3099_v31  ;;  %v3123_v5 = vpop.permute.xlu1 %3122 }
0x3259   :  { %v3125_v13 = vmul.f32 %v9633_v46, %v3123_v5 }
0x325a   :  { %3127 = vrot.lane.b32.xlu0 %v3101_v7, %s10184_s8 }
0x325b   :  { %3131 = vrot.lane.b32.xlu1 %v3125_v13, %s10185_s30 }
0x32cc   :  { %v11332_v12 = vpop.permute.xlu0 %3127 }
0x32cd   :  { %v11334_v8 = vpop.permute.xlu1 %3131 }
0x32ce   :  { %v3134_v44 = vsel %vm443_vm2, %v11332_v12, %v11334_v8 }
0x32cf   :  { %8236 = vmatmul.mubr.msk.f32.vlgmr.msra.gmra.mrb[64].mxu0 %vm306_vm1, %v3134_v44 }
0x32d0   :  { %8787 = vmatpush1.bf16.msra.mxu0 %v11024_v21  ;;  %3468 = vmatprep.mubr.f32.mxu0 %v10182_v3 }
0x32d1   :  { %8789 = vmatprep.subr.bf16.mxu0 %v11038_v15 }
0x32d4   :  { %8791 = vmatpush1.bf16.msra.mxu0 %v11043_v58 }
0x32d5   :  { %8793 = vmatprep.subr.bf16.mxu0 %v11056_v33 }
0x32d8   :  { %8795 = vmatpush1.bf16.msra.mxu0 %v11061_v38 }
0x32d9   :  { %8797 = vmatprep.subr.bf16.mxu0 %v11071_v42 }
0x32dc   :  { %8799 = vmatpush1.bf16.msra.mxu0 %v11080_v50 }
0x32dd   :  { %8817 = vmatprep.subr.bf16.mxu0 %v11019_v47 }
0x33a2   :  { %v3204_v37 = vpop.f32.mrb[64].mxu0 }
0x33a3   :  { %v3209_v25 = vadd.f32 %v3204_v37, %v2420_v54  ;;  %v3206_v27 = vpop.f32.mrb[65].mxu0 }
0x33a4   :  { %v3210_v34 = vadd.f32 %v3206_v27, %v2434_v22 }
0x33a5   :  { %9638 = vtanh.f32 %v3209_v25  ;;  %v8237_v62 = vmul.f32 -1.442695, %v3209_v25 }
0x33a6   :  { %9640 = vtanh.f32 %v3210_v34  ;;  %v8238_v43 = vmul.f32 -1.442695, %v3210_v34 }
0x33a7   :  { %9642 = vpow2.f32 %v8237_v62 }
0x33a8   :  { %9644 = vpow2.f32 %v8238_v43 }
0x33af   :  { %v9639_v4 = vpop.eup %9638 }
0x33b0   :  { %v9641_v29 = vpop.eup %9640  ;;  %3220 = vrot.lane.b32.xlu0 %v9639_v4, %s10183_s4 }
0x33b1   :  { %3244 = vrot.lane.b32.xlu1 %v9641_v29, %s10183_s4  ;;  %v9643_v16 = vpop.eup %9642 }
0x33b2   :  { %v9645_v46 = vpop.eup %9644  ;;  %v3214_v35 = vadd.f32 1.0, %v9643_v16 }
0x33b3   :  { %v3238_v56 = vadd.f32 1.0, %v9645_v46 }
0x33b4   :  { %9646 = vrcp.f32 %v3214_v35 }
0x33b5   :  { %9648 = vrcp.f32 %v3238_v56 }
0x33be   :  { %v9647_v55 = vpop.eup %9646 }
0x33bf   :  { %v9649_v30 = vpop.eup %9648  ;;  %v3218_v9 = vmul.f32 %v9647_v55, %v3095_v49 }
0x33c0   :  { %v3242_v31 = vmul.f32 %v9649_v30, %v3119_v14 }
0x3422   :  { %v3221_v11 = vpop.permute.xlu0 %3220 }
0x3423   :  { %v3223_v0 = vmul.f32 %v9647_v55, %v3221_v11  ;;  %v3245_v63 = vpop.permute.xlu1 %3244 }
0x3424   :  { %v3247_v39 = vmul.f32 %v9649_v30, %v3245_v63 }
0x3425   :  { %3225 = vrot.lane.b32.xlu0 %v3223_v0, %s10183_s4 }
0x3426   :  { %3249 = vrot.lane.b32.xlu1 %v3247_v39, %s10183_s4 }
0x3497   :  { %v3226_v45 = vpop.permute.xlu0 %3225 }
0x3498   :  { %v3228_v7 = vadd.f32 %v3226_v45, %v3218_v9  ;;  %v3250_v5 = vpop.permute.xlu1 %3249 }
0x3499   :  { %v3252_v13 = vadd.f32 %v3250_v5, %v3242_v31 }
0x349a   :  { %9650 = vtanh.f32 %v3228_v7 }
0x349b   :  { %9652 = vtanh.f32 %v3252_v13 }
0x34a4   :  { %v9651_v44 = vpop.eup %9650 }
0x34a5   :  { %v9653_v54 = vpop.eup %9652  ;;  %3231 = vrot.lane.b32.xlu0 %v9651_v44, %s10183_s4 }
0x34a6   :  { %3255 = vrot.lane.b32.xlu1 %v9653_v54, %s10183_s4 }
0x3517   :  { %v3232_v22 = vpop.permute.xlu0 %3231 }
0x3518   :  { %v3234_v37 = vmul.f32 %v9647_v55, %v3232_v22  ;;  %v3256_v25 = vpop.permute.xlu1 %3255 }
0x3519   :  { %v3258_v27 = vmul.f32 %v9649_v30, %v3256_v25 }
0x351a   :  { %3260 = vrot.lane.b32.xlu0 %v3234_v37, %s10184_s8 }
0x351b   :  { %3264 = vrot.lane.b32.xlu1 %v3258_v27, %s10185_s30 }
0x358c   :  { %v11361_v49 = vpop.permute.xlu0 %3260 }
0x358d   :  { %v11363_v14 = vpop.permute.xlu1 %3264 }
0x358e   :  { %v3267_v34 = vsel %vm443_vm2, %v11361_v49, %v11363_v14 }
0x358f   :  { %8239 = vmatmul.mubr.msk.f32.vlgmr.msra.gmra.mrb[28].mxu1 %vm306_vm1, %v3267_v34 }
0x3590   :  { %8803 = vmatpush1.bf16.msra.mxu1 %v11024_v21  ;;  %3601 = vmatprep.mubr.f32.mxu1 %v10182_v3 }
0x3591   :  { %8805 = vmatprep.subr.bf16.mxu1 %v11038_v15 }
0x3594   :  { %8807 = vmatpush1.bf16.msra.mxu1 %v11043_v58 }
0x3595   :  { %8809 = vmatprep.subr.bf16.mxu1 %v11056_v33 }
0x3598   :  { %8811 = vmatpush1.bf16.msra.mxu1 %v11061_v38 }
0x3599   :  { %8813 = vmatprep.subr.bf16.mxu1 %v11071_v42 }
0x359c   :  { %8815 = vmatpush1.bf16.msra.mxu1 %v11080_v50 }
0x359d   :  { %8833 = vmatprep.subr.bf16.mxu1 %v11019_v47 }
0x3662   :  { %v3337_v4 = vpop.f32.mrb[28].mxu1 }
0x3663   :  { %v9330_v29 = vadd.f32 %v3337_v4, %v11195_v32  ;;  %v3339_v62 = vpop.f32.mrb[29].mxu1 }
0x3664   :  { %v9331_v43 = vadd.f32 %v3339_v62, %v11200_v57 }
0x3665   :  { %9654 = vtanh.f32 %v9330_v29  ;;  %v8240_v35 = vmul.f32 -1.442695, %v9330_v29 }
0x3666   :  { %9656 = vtanh.f32 %v9331_v43  ;;  %v8241_v56 = vmul.f32 -1.442695, %v9331_v43 }
0x3667   :  { %9658 = vpow2.f32 %v8240_v35  ;;  %v2432_v35 = vadd.f32 %v11171_v24, %v11195_v32 }
0x3668   :  { %9660 = vpow2.f32 %v8241_v56  ;;  %v2422_v56 = vadd.f32 %v11169_v20, %v11200_v57 }
0x366f   :  { %v9655_v16 = vpop.eup %9654 }
0x3670   :  { %v9657_v46 = vpop.eup %9656  ;;  %3353 = vrot.lane.b32.xlu0 %v9655_v16, %s10183_s4 }
0x3671   :  { %3377 = vrot.lane.b32.xlu1 %v9657_v46, %s10183_s4  ;;  %v9659_v55 = vpop.eup %9658 }
0x3672   :  { %v9661_v11 = vpop.eup %9660  ;;  %v3347_v30 = vadd.f32 1.0, %v9659_v55 }
0x3673   :  { %v3371_v0 = vadd.f32 1.0, %v9661_v11 }
0x3674   :  { %9662 = vrcp.f32 %v3347_v30 }
0x3675   :  { %9664 = vrcp.f32 %v3371_v0 }
0x367e   :  { %v9663_v63 = vpop.eup %9662 }
0x367f   :  { %v9665_v9 = vpop.eup %9664  ;;  %v3351_v44 = vmul.f32 %v9663_v63, %v3228_v7 }
0x3680   :  { %v3375_v22 = vmul.f32 %v9665_v9, %v3252_v13 }
0x36e2   :  { %v3354_v39 = vpop.permute.xlu0 %3353 }
0x36e3   :  { %v3356_v45 = vmul.f32 %v9663_v63, %v3354_v39  ;;  %v3378_v31 = vpop.permute.xlu1 %3377 }
0x36e4   :  { %v3380_v5 = vmul.f32 %v9665_v9, %v3378_v31 }
0x36e5   :  { %3358 = vrot.lane.b32.xlu0 %v3356_v45, %s10183_s4 }
0x36e6   :  { %3382 = vrot.lane.b32.xlu1 %v3380_v5, %s10183_s4 }
0x3757   :  { %v3359_v54 = vpop.permute.xlu0 %3358 }
0x3758   :  { %v3361_v37 = vadd.f32 %v3359_v54, %v3351_v44  ;;  %v3383_v25 = vpop.permute.xlu1 %3382 }
0x3759   :  { %v3385_v27 = vadd.f32 %v3383_v25, %v3375_v22 }
0x375a   :  { %9666 = vtanh.f32 %v3361_v37 }
0x375b   :  { %9668 = vtanh.f32 %v3385_v27 }
0x3764   :  { %v9667_v34 = vpop.eup %9666 }
0x3765   :  { %v9669_v4 = vpop.eup %9668  ;;  %3364 = vrot.lane.b32.xlu0 %v9667_v34, %s10183_s4 }
0x3766   :  { %3388 = vrot.lane.b32.xlu1 %v9669_v4, %s10183_s4 }
0x37d7   :  { %v3365_v29 = vpop.permute.xlu0 %3364 }
0x37d8   :  { %v3367_v62 = vmul.f32 %v9663_v63, %v3365_v29  ;;  %v3389_v43 = vpop.permute.xlu1 %3388 }
0x37d9   :  { %v3391_v16 = vmul.f32 %v9665_v9, %v3389_v43 }
0x37da   :  { %3393 = vrot.lane.b32.xlu0 %v3367_v62, %s10184_s8 }
0x37db   :  { %3397 = vrot.lane.b32.xlu1 %v3391_v16, %s10185_s30 }
0x384c   :  { %v3394_v7 = vpop.permute.xlu0 %3393 }
0x384d   :  { %v3398_v13 = vpop.permute.xlu1 %3397 }
0x384e   :  { %v11389_v46 = vsel %vm443_vm2, %v3394_v7, %v3398_v13 }
0x384f   :  { %8242 = vmatmul.mubr.msk.f32.vlgmr.msra.gmra.mrb[66].mxu0 %vm306_vm1, %v11389_v46 }
0x3850   :  { %8819 = vmatpush1.bf16.msra.mxu0 %v11024_v21  ;;  %3734 = vmatprep.mubr.f32.mxu0 %v10182_v3 }
0x3851   :  { %8821 = vmatprep.subr.bf16.mxu0 %v11038_v15 }
0x3854   :  { %8823 = vmatpush1.bf16.msra.mxu0 %v11043_v58 }
0x3855   :  { %8825 = vmatprep.subr.bf16.mxu0 %v11056_v33 }
0x3858   :  { %8827 = vmatpush1.bf16.msra.mxu0 %v11061_v38 }
0x3859   :  { %8829 = vmatprep.subr.bf16.mxu0 %v11071_v42 }
0x385c   :  { %8831 = vmatpush1.bf16.msra.mxu0 %v11080_v50 }
0x385d   :  { %8849 = vmatprep.subr.bf16.mxu0 %v11019_v47 }
0x3922   :  { %v3470_v55 = vpop.f32.mrb[66].mxu0 }
0x3923   :  { %v3475_v11 = vadd.f32 %v3470_v55, %v2432_v35  ;;  %v3472_v30 = vpop.f32.mrb[67].mxu0 }
0x3924   :  { %v3476_v0 = vadd.f32 %v3472_v30, %v2422_v56 }
0x3925   :  { %9670 = vtanh.f32 %v3475_v11  ;;  %v8243_v9 = vmul.f32 -1.442695, %v3475_v11 }
0x3926   :  { %9672 = vtanh.f32 %v3476_v0  ;;  %v8244_v45 = vmul.f32 -1.442695, %v3476_v0 }
0x3927   :  { %9674 = vpow2.f32 %v8243_v9  ;;  %v2416_v9 = vadd.f32 %v11165_v28, %v11200_v57 }
0x3928   :  { %9676 = vpow2.f32 %v8244_v45 }
0x392f   :  { %v9671_v63 = vpop.eup %9670 }
0x3930   :  { %v9673_v39 = vpop.eup %9672  ;;  %3486 = vrot.lane.b32.xlu0 %v9671_v63, %s10183_s4 }
0x3931   :  { %3510 = vrot.lane.b32.xlu1 %v9673_v39, %s10183_s4  ;;  %v9675_v24 = vpop.eup %9674  ;;  %v2438_v39 = vadd.f32 %v11175_v23, %v11195_v32 }
0x3932   :  { %v9677_v31 = vpop.eup %9676  ;;  %v3480_v5 = vadd.f32 1.0, %v9675_v24 }
0x3933   :  { %v3504_v20 = vadd.f32 1.0, %v9677_v31 }
0x3934   :  { %9678 = vrcp.f32 %v3480_v5 }
0x3935   :  { %9680 = vrcp.f32 %v3504_v20 }
0x393e   :  { %v9679_v44 = vpop.eup %9678 }
0x393f   :  { %v9681_v22 = vpop.eup %9680  ;;  %v3484_v29 = vmul.f32 %v9679_v44, %v3361_v37 }
0x3940   :  { %v3508_v43 = vmul.f32 %v9681_v22, %v3385_v27 }
0x39a2   :  { %v3487_v54 = vpop.permute.xlu0 %3486 }
0x39a3   :  { %v3489_v25 = vmul.f32 %v9679_v44, %v3487_v54  ;;  %v3511_v34 = vpop.permute.xlu1 %3510 }
0x39a4   :  { %v3513_v4 = vmul.f32 %v9681_v22, %v3511_v34 }
0x39a5   :  { %3491 = vrot.lane.b32.xlu0 %v3489_v25, %s10183_s4 }
0x39a6   :  { %3515 = vrot.lane.b32.xlu1 %v3513_v4, %s10183_s4 }
0x3a17   :  { %v3492_v62 = vpop.permute.xlu0 %3491 }
0x3a18   :  { %v3494_v16 = vadd.f32 %v3492_v62, %v3484_v29  ;;  %v3516_v7 = vpop.permute.xlu1 %3515 }
0x3a19   :  { %v3518_v13 = vadd.f32 %v3516_v7, %v3508_v43 }
0x3a1a   :  { %9682 = vtanh.f32 %v3494_v16 }
0x3a1b   :  { %9684 = vtanh.f32 %v3518_v13 }
0x3a24   :  { %v9683_v35 = vpop.eup %9682 }
0x3a25   :  { %v9685_v56 = vpop.eup %9684  ;;  %3497 = vrot.lane.b32.xlu0 %v9683_v35, %s10183_s4 }
0x3a26   :  { %3521 = vrot.lane.b32.xlu1 %v9685_v56, %s10183_s4 }
0x3a97   :  { %v3498_v55 = vpop.permute.xlu0 %3497 }
0x3a98   :  { %v3500_v11 = vmul.f32 %v9679_v44, %v3498_v55  ;;  %v3522_v30 = vpop.permute.xlu1 %3521 }
0x3a99   :  { %v3524_v0 = vmul.f32 %v9681_v22, %v3522_v30 }
0x3a9a   :  { %3526 = vrot.lane.b32.xlu0 %v3500_v11, %s10184_s8 }
0x3a9b   :  { %3530 = vrot.lane.b32.xlu1 %v3524_v0, %s10185_s30 }
0x3b0c   :  { %v11414_v37 = vpop.permute.xlu0 %3526 }
0x3b0d   :  { %v11416_v27 = vpop.permute.xlu1 %3530 }
0x3b0e   :  { %v3533_v63 = vsel %vm443_vm2, %v11414_v37, %v11416_v27 }
0x3b0f   :  { %8245 = vmatmul.mubr.msk.f32.vlgmr.msra.gmra.mrb[48].mxu1 %vm306_vm1, %v3533_v63 }
0x3b10   :  { %8835 = vmatpush1.bf16.msra.mxu1 %v11024_v21  ;;  %3867 = vmatprep.mubr.f32.mxu1 %v10182_v3 }
0x3b11   :  { %8837 = vmatprep.subr.bf16.mxu1 %v11038_v15 }
0x3b14   :  { %8839 = vmatpush1.bf16.msra.mxu1 %v11043_v58 }
0x3b15   :  { %8841 = vmatprep.subr.bf16.mxu1 %v11056_v33 }
0x3b18   :  { %8843 = vmatpush1.bf16.msra.mxu1 %v11061_v38 }
0x3b19   :  { %8845 = vmatprep.subr.bf16.mxu1 %v11071_v42 }
0x3b1c   :  { %8847 = vmatpush1.bf16.msra.mxu1 %v11080_v50 }
0x3b1d   :  { %8865 = vmatprep.subr.bf16.mxu1 %v11019_v47 }
0x3be2   :  { %v3603_v45 = vpop.f32.mrb[48].mxu1 }
0x3be3   :  { %v3608_v24 = vadd.f32 %v3603_v45, %v2438_v39  ;;  %v3605_v31 = vpop.f32.mrb[49].mxu1 }
0x3be4   :  { %v3609_v5 = vadd.f32 %v3605_v31, %v2416_v9 }
0x3be5   :  { %9686 = vtanh.f32 %v3608_v24  ;;  %v8246_v54 = vmul.f32 -1.442695, %v3608_v24 }
0x3be6   :  { %9688 = vtanh.f32 %v3609_v5  ;;  %v8247_v47 = vmul.f32 -1.442695, %v3609_v5 }
0x3be7   :  { %9690 = vpow2.f32 %v8246_v54 }
0x3be8   :  { %9692 = vpow2.f32 %v8247_v47 }
0x3bef   :  { %v9687_v20 = vpop.eup %9686 }
0x3bf0   :  { %v9689_v44 = vpop.eup %9688  ;;  %3619 = vrot.lane.b32.xlu0 %v9687_v20, %s10183_s4  ;;  %v2444_v20 = vadd.f32 %v11179_v51, %v11195_v32 }
0x3bf1   :  { %3643 = vrot.lane.b32.xlu1 %v9689_v44, %s10183_s4  ;;  %v9691_v23 = vpop.eup %9690  ;;  %v2410_v44 = vadd.f32 %v11161_v2, %v11200_v57 }
0x3bf2   :  { %v9693_v22 = vpop.eup %9692  ;;  %v3613_v25 = vadd.f32 1.0, %v9691_v23 }
0x3bf3   :  { %v3637_v28 = vadd.f32 1.0, %v9693_v22 }
0x3bf4   :  { %9694 = vrcp.f32 %v3613_v25 }
0x3bf5   :  { %9696 = vrcp.f32 %v3637_v28 }
0x3bfe   :  { %v9695_v34 = vpop.eup %9694 }
0x3bff   :  { %v9697_v29 = vpop.eup %9696  ;;  %v3617_v35 = vmul.f32 %v9695_v34, %v3494_v16 }
0x3c00   :  { %v3641_v55 = vmul.f32 %v9697_v29, %v3518_v13 }
0x3c62   :  { %v3620_v4 = vpop.permute.xlu0 %3619 }
0x3c63   :  { %v3622_v62 = vmul.f32 %v9695_v34, %v3620_v4  ;;  %v3644_v43 = vpop.permute.xlu1 %3643 }
0x3c64   :  { %v3646_v7 = vmul.f32 %v9697_v29, %v3644_v43 }
0x3c65   :  { %3624 = vrot.lane.b32.xlu0 %v3622_v62, %s10183_s4 }
0x3c66   :  { %3648 = vrot.lane.b32.xlu1 %v3646_v7, %s10183_s4 }
0x3cd7   :  { %v3625_v56 = vpop.permute.xlu0 %3624 }
0x3cd8   :  { %v3627_v11 = vadd.f32 %v3625_v56, %v3617_v35  ;;  %v3649_v30 = vpop.permute.xlu1 %3648 }
0x3cd9   :  { %v3651_v0 = vadd.f32 %v3649_v30, %v3641_v55 }
0x3cda   :  { %9698 = vtanh.f32 %v3627_v11 }
0x3cdb   :  { %9700 = vtanh.f32 %v3651_v0 }
0x3ce4   :  { %v9699_v63 = vpop.eup %9698 }
0x3ce5   :  { %v9701_v39 = vpop.eup %9700  ;;  %3630 = vrot.lane.b32.xlu0 %v9699_v63, %s10183_s4 }
0x3ce6   :  { %3654 = vrot.lane.b32.xlu1 %v9701_v39, %s10183_s4 }
0x3d57   :  { %v3631_v9 = vpop.permute.xlu0 %3630 }
0x3d58   :  { %v3633_v45 = vmul.f32 %v9695_v34, %v3631_v9  ;;  %v3655_v24 = vpop.permute.xlu1 %3654 }
0x3d59   :  { %v3657_v31 = vmul.f32 %v9697_v29, %v3655_v24 }
0x3d5a   :  { %3659 = vrot.lane.b32.xlu0 %v3633_v45, %s10184_s8 }
0x3d5b   :  { %3663 = vrot.lane.b32.xlu1 %v3657_v31, %s10185_s30 }
0x3dcc   :  { %v11443_v16 = vpop.permute.xlu0 %3659 }
0x3dcd   :  { %v11445_v13 = vpop.permute.xlu1 %3663 }
0x3dce   :  { %v3666_v5 = vsel %vm443_vm2, %v11443_v16, %v11445_v13 }
0x3dcf   :  { %8248 = vmatmul.mubr.msk.f32.vlgmr.msra.gmra.mrb[68].mxu0 %vm306_vm1, %v3666_v5 }
0x3dd0   :  { %8851 = vmatpush1.bf16.msra.mxu0 %v11024_v21  ;;  %4000 = vmatprep.mubr.f32.mxu0 %v10182_v3 }
0x3dd1   :  { %8853 = vmatprep.subr.bf16.mxu0 %v11038_v15 }
0x3dd4   :  { %8855 = vmatpush1.bf16.msra.mxu0 %v11043_v58 }
0x3dd5   :  { %8857 = vmatprep.subr.bf16.mxu0 %v11056_v33 }
0x3dd8   :  { %8859 = vmatpush1.bf16.msra.mxu0 %v11061_v38 }
0x3dd9   :  { %8861 = vmatprep.subr.bf16.mxu0 %v11071_v42 }
0x3ddc   :  { %8863 = vmatpush1.bf16.msra.mxu0 %v11080_v50 }
0x3ea2   :  { %v3736_v54 = vpop.f32.mrb[68].mxu0 }
0x3ea3   :  { %v3741_v47 = vadd.f32 %v3736_v54, %v2444_v20  ;;  %v3738_v23 = vpop.f32.mrb[69].mxu0 }
0x3ea4   :  { %v3742_v22 = vadd.f32 %v3738_v23, %v2410_v44 }
0x3ea5   :  { %9702 = vtanh.f32 %v3741_v47  ;;  %v8249_v34 = vmul.f32 -1.442695, %v3741_v47 }
0x3ea6   :  { %9704 = vtanh.f32 %v3742_v22  ;;  %v8250_v4 = vmul.f32 -1.442695, %v3742_v22 }
0x3ea7   :  { %9706 = vpow2.f32 %v8249_v34 }
0x3ea8   :  { %9708 = vpow2.f32 %v8250_v4 }
0x3eaf   :  { %v9703_v25 = vpop.eup %9702 }
0x3eb0   :  { %v9705_v28 = vpop.eup %9704  ;;  %3752 = vrot.lane.b32.xlu0 %v9703_v25, %s10183_s4  ;;  %v2450_v25 = vadd.f32 %v11183_v19, %v11195_v32 }
0x3eb1   :  { %3776 = vrot.lane.b32.xlu1 %v9705_v28, %s10183_s4  ;;  %v9707_v51 = vpop.eup %9706 }
0x3eb2   :  { %v9709_v29 = vpop.eup %9708  ;;  %v3746_v62 = vadd.f32 1.0, %v9707_v51 }
0x3eb3   :  { %v3770_v2 = vadd.f32 1.0, %v9709_v29 }
0x3eb4   :  { %9710 = vrcp.f32 %v3746_v62 }
0x3eb5   :  { %9712 = vrcp.f32 %v3770_v2 }
0x3ebe   :  { %v9711_v43 = vpop.eup %9710 }
0x3ebf   :  { %v9713_v35 = vpop.eup %9712  ;;  %v3750_v63 = vmul.f32 %v9711_v43, %v3627_v11 }
0x3ec0   :  { %v3774_v9 = vmul.f32 %v9713_v35, %v3651_v0 }
0x3f22   :  { %v3753_v7 = vpop.permute.xlu0 %3752 }
0x3f23   :  { %v3755_v56 = vmul.f32 %v9711_v43, %v3753_v7  ;;  %v3777_v55 = vpop.permute.xlu1 %3776 }
0x3f24   :  { %v3779_v30 = vmul.f32 %v9713_v35, %v3777_v55 }
0x3f25   :  { %3757 = vrot.lane.b32.xlu0 %v3755_v56, %s10183_s4 }
0x3f26   :  { %3781 = vrot.lane.b32.xlu1 %v3779_v30, %s10183_s4 }
0x3f97   :  { %v3758_v39 = vpop.permute.xlu0 %3757 }
0x3f98   :  { %v3760_v45 = vadd.f32 %v3758_v39, %v3750_v63  ;;  %v3782_v24 = vpop.permute.xlu1 %3781 }
0x3f99   :  { %v3784_v31 = vadd.f32 %v3782_v24, %v3774_v9 }
0x3f9a   :  { %9714 = vtanh.f32 %v3760_v45 }
0x3f9b   :  { %9716 = vtanh.f32 %v3784_v31 }
0x3fa4   :  { %v9715_v5 = vpop.eup %9714 }
0x3fa5   :  { %v9717_v20 = vpop.eup %9716  ;;  %3763 = vrot.lane.b32.xlu0 %v9715_v5, %s10183_s4 }
0x3fa6   :  { %3787 = vrot.lane.b32.xlu1 %v9717_v20, %s10183_s4 }
0x4017   :  { %v3764_v44 = vpop.permute.xlu0 %3763 }
0x4018   :  { %v3766_v54 = vmul.f32 %v9711_v43, %v3764_v44  ;;  %v3788_v47 = vpop.permute.xlu1 %3787 }
0x4019   :  { %v3790_v23 = vmul.f32 %v9713_v35, %v3788_v47 }
0x401a   :  { %3792 = vrot.lane.b32.xlu0 %v3766_v54, %s10184_s8 }
0x401b   :  { %3796 = vrot.lane.b32.xlu1 %v3790_v23, %s10185_s30 }
0x408c   :  { %v11471_v11 = vpop.permute.xlu0 %3792 }
0x408d   :  { %v11473_v0 = vpop.permute.xlu1 %3796 }
0x408e   :  { %v3799_v22 = vsel %vm443_vm2, %v11471_v11, %v11473_v0 }
0x408f   :  { %8251 = vmatmul.mubr.msk.f32.vlgmr.msra.gmra.mrb[50].mxu1 %vm306_vm1, %v3799_v22  ;;  %v2456_v22 = vadd.f32 %v11190_v48, %v11195_v32 }
0x4090   :  { %8867 = vmatpush1.bf16.msra.mxu1 %v11024_v21  ;;  %4133 = vmatprep.mubr.f32.mxu1 %v10182_v3  ;;  %v2404_v21 = vadd.f32 %v11157_v6, %v11200_v57 }
0x4091   :  { %8869 = vmatprep.subr.bf16.mxu1 %v11038_v15 }
0x4094   :  { %8871 = vmatpush1.bf16.msra.mxu1 %v11043_v58 }
0x4095   :  { %8873 = vmatprep.subr.bf16.mxu1 %v11056_v33 }
0x4098   :  { %8875 = vmatpush1.bf16.msra.mxu1 %v11061_v38 }
0x4099   :  { %8877 = vmatprep.subr.bf16.mxu1 %v11071_v42 }
0x409c   :  { %8879 = vmatpush1.bf16.msra.mxu1 %v11080_v50 }
0x4162   :  { %v3869_v28 = vpop.f32.mrb[50].mxu1 }
0x4163   :  { %v3874_v34 = vadd.f32 %v3869_v28, %v2450_v25  ;;  %v3871_v4 = vpop.f32.mrb[51].mxu1  ;;  %v2398_v25 = vadd.f32 %v11153_v10, %v11200_v57 }
0x4164   :  { %v3875_v15 = vadd.f32 %v3871_v4, %v2404_v21 }
0x4165   :  { %9718 = vtanh.f32 %v3874_v34  ;;  %v8252_v38 = vmul.f32 -1.442695, %v3874_v34 }
0x4166   :  { %9720 = vtanh.f32 %v3875_v15  ;;  %v8253_v42 = vmul.f32 -1.442695, %v3875_v15 }
0x4167   :  { %9722 = vpow2.f32 %v8252_v38 }
0x4168   :  { %9724 = vpow2.f32 %v8253_v42 }
0x416f   :  { %v9719_v58 = vpop.eup %9718 }
0x4170   :  { %v9721_v33 = vpop.eup %9720  ;;  %3885 = vrot.lane.b32.xlu0 %v9719_v58, %s10183_s4 }
0x4171   :  { %3909 = vrot.lane.b32.xlu1 %v9721_v33, %s10183_s4  ;;  %v9723_v50 = vpop.eup %9722 }
0x4172   :  { %v9725_v19 = vpop.eup %9724  ;;  %v3879_v51 = vadd.f32 1.0, %v9723_v50 }
0x4173   :  { %v3903_v6 = vadd.f32 1.0, %v9725_v19 }
0x4174   :  { %9726 = vrcp.f32 %v3879_v51 }
0x4175   :  { %9728 = vrcp.f32 %v3903_v6 }
0x417e   :  { %v9727_v29 = vpop.eup %9726 }
0x417f   :  { %v9729_v2 = vpop.eup %9728  ;;  %v3883_v56 = vmul.f32 %v9727_v29, %v3760_v45 }
0x4180   :  { %v3907_v30 = vmul.f32 %v9729_v2, %v3784_v31 }
0x41e2   :  { %v3886_v62 = vpop.permute.xlu0 %3885 }
0x41e3   :  { %v3888_v43 = vmul.f32 %v9727_v29, %v3886_v62  ;;  %v3910_v7 = vpop.permute.xlu1 %3909 }
0x41e4   :  { %v3912_v35 = vmul.f32 %v9729_v2, %v3910_v7 }
0x41e5   :  { %3890 = vrot.lane.b32.xlu0 %v3888_v43, %s10183_s4 }
0x41e6   :  { %3914 = vrot.lane.b32.xlu1 %v3912_v35, %s10183_s4 }
0x4257   :  { %v3891_v55 = vpop.permute.xlu0 %3890 }
0x4258   :  { %v3893_v63 = vadd.f32 %v3891_v55, %v3883_v56  ;;  %v3915_v39 = vpop.permute.xlu1 %3914 }
0x4259   :  { %v3917_v9 = vadd.f32 %v3915_v39, %v3907_v30 }
0x425a   :  { %9730 = vtanh.f32 %v3893_v63 }
0x425b   :  { %9732 = vtanh.f32 %v3917_v9 }
0x4264   :  { %v9731_v24 = vpop.eup %9730 }
0x4265   :  { %v9733_v5 = vpop.eup %9732  ;;  %3896 = vrot.lane.b32.xlu0 %v9731_v24, %s10183_s4 }
0x4266   :  { %3920 = vrot.lane.b32.xlu1 %v9733_v5, %s10183_s4 }
0x42d7   :  { %v3897_v20 = vpop.permute.xlu0 %3896 }
0x42d8   :  { %v3899_v44 = vmul.f32 %v9727_v29, %v3897_v20  ;;  %v3921_v54 = vpop.permute.xlu1 %3920 }
0x42d9   :  { %v3923_v47 = vmul.f32 %v9729_v2, %v3921_v54 }
0x42da   :  { %3925 = vrot.lane.b32.xlu0 %v3899_v44, %s10184_s8 }
0x42db   :  { %3929 = vrot.lane.b32.xlu1 %v3923_v47, %s10185_s30 }
0x434c   :  { %v11499_v45 = vpop.permute.xlu0 %3925 }
0x434d   :  { %v11501_v31 = vpop.permute.xlu1 %3929 }
0x434e   :  { %v3932_v23 = vsel %vm443_vm2, %v11499_v45, %v11501_v31 }
0x434f   :  { %8254 = vmatmul.mubr.msk.f32.vlgmr.msra.gmra.mrb[70].mxu0 %vm306_vm1, %v3932_v23  ;;  %v2462_v23 = vadd.f32 %v11197_v40, %v11195_v32 }
0x4350   :  { %4356 = vmatprep.mubr.f32.mxu0 %v10182_v3 }
0x4422   :  { %v4002_v21 = vpop.f32.mrb[70].mxu0 }
0x4423   :  { %v4007_v28 = vadd.f32 %v4002_v21, %v2456_v22  ;;  %v4004_v34 = vpop.f32.mrb[71].mxu0  ;;  %v2392_v22 = vadd.f32 %v11149_v60, %v11200_v57 }
0x4424   :  { %v4008_v4 = vadd.f32 %v4004_v34, %v2398_v25 }
0x4425   :  { %9734 = vtanh.f32 %v4007_v28  ;;  %v8255_v33 = vmul.f32 -1.442695, %v4007_v28 }
0x4426   :  { %9736 = vtanh.f32 %v4008_v4  ;;  %v8256_v38 = vmul.f32 -1.442695, %v4008_v4 }
0x4427   :  { %9738 = vpow2.f32 %v8255_v33 }
0x4428   :  { %9740 = vpow2.f32 %v8256_v38 }
0x442f   :  { %v9735_v15 = vpop.eup %9734 }
0x4430   :  { %v9737_v58 = vpop.eup %9736  ;;  %4018 = vrot.lane.b32.xlu0 %v9735_v15, %s10183_s4 }
0x4431   :  { %4042 = vrot.lane.b32.xlu1 %v9737_v58, %s10183_s4  ;;  %v9739_v48 = vpop.eup %9738 }
0x4432   :  { %v9741_v42 = vpop.eup %9740  ;;  %v4012_v50 = vadd.f32 1.0, %v9739_v48 }
0x4433   :  { %v4036_v10 = vadd.f32 1.0, %v9741_v42 }
0x4434   :  { %9742 = vrcp.f32 %v4012_v50 }
0x4435   :  { %9744 = vrcp.f32 %v4036_v10 }
0x443e   :  { %v9743_v19 = vpop.eup %9742 }
0x443f   :  { %v9745_v6 = vpop.eup %9744  ;;  %v4016_v43 = vmul.f32 %v9743_v19, %v3893_v63 }
0x4440   :  { %v4040_v35 = vmul.f32 %v9745_v6, %v3917_v9 }
0x44a2   :  { %v4019_v51 = vpop.permute.xlu0 %4018 }
0x44a3   :  { %v4021_v29 = vmul.f32 %v9743_v19, %v4019_v51  ;;  %v4043_v62 = vpop.permute.xlu1 %4042 }
0x44a4   :  { %v4045_v2 = vmul.f32 %v9745_v6, %v4043_v62 }
0x44a5   :  { %4023 = vrot.lane.b32.xlu0 %v4021_v29, %s10183_s4 }
0x44a6   :  { %4047 = vrot.lane.b32.xlu1 %v4045_v2, %s10183_s4 }
0x4517   :  { %v4024_v7 = vpop.permute.xlu0 %4023 }
0x4518   :  { %v4026_v56 = vadd.f32 %v4024_v7, %v4016_v43  ;;  %v4048_v55 = vpop.permute.xlu1 %4047  ;;  %v4211_v7 = vld [vmem:[%s12694_s13 + $0x8] sm:$0xff] }
0x4519   :  { %v4050_v30 = vadd.f32 %v4048_v55, %v4040_v35  ;;  %v4213_v35 = vld [vmem:[%s12694_s13 + $0x18] sm:$0xff] }
0x451a   :  { %9746 = vtanh.f32 %v4026_v56  ;;  %v8880_v55 = vpack.c.bf16 %v4213_v35, %v4211_v7  ;;  %v4223_v7 = vld [vmem:[%s12694_s13 + $0x68] sm:$0xff]  ;;  %v4225_v35 = vld [vmem:[%s12694_s13 + $0x78] sm:$0xff] }
0x451b   :  { %9748 = vtanh.f32 %v4050_v30 }
0x451c   :  { %8881 = vmatprep.subr.bf16.mxu0 %v8880_v55 }
0x4524   :  { %v9747_v39 = vpop.eup %9746 }
0x4525   :  { %v9749_v24 = vpop.eup %9748  ;;  %4029 = vrot.lane.b32.xlu0 %v9747_v39, %s10183_s4  ;;  %v4227_v39 = vld [vmem:[%s12695_s14 + $0x8] sm:$0xff] }
0x4526   :  { %4053 = vrot.lane.b32.xlu1 %v9749_v24, %s10183_s4  ;;  %v4229_v24 = vld [vmem:[%s12695_s14 + $0x18] sm:$0xff] }
0x4597   :  { %v4030_v5 = vpop.permute.xlu0 %4029 }
0x4598   :  { %v4032_v20 = vmul.f32 %v9743_v19, %v4030_v5  ;;  %v4054_v44 = vpop.permute.xlu1 %4053 }
0x4599   :  { %v4056_v54 = vmul.f32 %v9745_v6, %v4054_v44  ;;  %v4226_v44 = vld [vmem:[%s12695_s14] sm:$0xff] }
0x459a   :  { %4058 = vrot.lane.b32.xlu0 %v4032_v20, %s10184_s8  ;;  %v11563_v20 = vpack.c.bf16 %v4229_v24, %v4227_v39  ;;  %v4222_v39 = vld [vmem:[%s12694_s13 + $0x60] sm:$0xff]  ;;  %v4224_v24 = vld [vmem:[%s12694_s13 + $0x70] sm:$0xff] }
0x459b   :  { %4062 = vrot.lane.b32.xlu1 %v4056_v54, %s10185_s30  ;;  %v4228_v54 = vld [vmem:[%s12695_s14 + $0x10] sm:$0xff] }
0x459c   :  { %8897 = vmatprep.subr.bf16.mxu1 %v11563_v20 }
0x460c   :  { %v11520_v63 = vpop.permute.xlu0 %4058 }
0x460d   :  { %v11522_v9 = vpop.permute.xlu1 %4062 }
0x460e   :  { %v4065_v47 = vsel %vm443_vm2, %v11520_v63, %v11522_v9 }
0x460f   :  { %8257 = vmatmul.mubr.msk.f32.vlgmr.msra.gmra.mrb[52].mxu1 %vm306_vm1, %v4065_v47  ;;  %v4215_v47 = vld [vmem:[%s12694_s13 + $0x28] sm:$0xff] }
0x4610   :  { %4502 = vmatprep.mubr.f32.mxu1 %v10182_v3 }
0x46e2   :  { %v4135_v25 = vpop.f32.mrb[52].mxu1 }
0x46e3   :  { %v4140_v21 = vadd.f32 %v4135_v25, %v2462_v23  ;;  %v4137_v28 = vpop.f32.mrb[53].mxu1  ;;  %v11574_v23 = vpack.c.bf16 %v4228_v54, %v4226_v44  ;;  %v4214_v25 = vld [vmem:[%s12694_s13 + $0x20] sm:$0xff]  ;;  %v4239_v44 = vld [vmem:[%s12695_s14 + $0x68] sm:$0xff]  ;;  %v4241_v54 = vld [vmem:[%s12695_s14 + $0x78] sm:$0xff] }
0x46e4   :  { %v4141_v34 = vadd.f32 %v4137_v28, %v2392_v22  ;;  %v4217_v22 = vld [vmem:[%s12694_s13 + $0x38] sm:$0xff] }
0x46e5   :  { %9750 = vtanh.f32 %v4140_v21  ;;  %v8258_v58 = vmul.f32 -1.442695, %v4140_v21  ;;  %v4216_v21 = vld [vmem:[%s12694_s13 + $0x30] sm:$0xff]  ;;  %v8884_v28 = vpack.c.bf16 %v4217_v22, %v4215_v47  ;;  %8899 = vmatpush1.bf16.msra.mxu1 %v11574_v23  ;;  %v11656_v47 = vpack.c.bf16 %v4241_v54, %v4239_v44  ;;  %v4238_v22 = vld [vmem:[%s12695_s14 + $0x60] sm:$0xff] }
0x46e6   :  { %9752 = vtanh.f32 %v4141_v34  ;;  %v8259_v33 = vmul.f32 -1.442695, %v4141_v34  ;;  %v8886_v34 = vpack.c.bf16 %v4216_v21, %v4214_v25  ;;  %v4240_v25 = vld [vmem:[%s12695_s14 + $0x70] sm:$0xff] }
0x46e7   :  { %9754 = vpow2.f32 %v8258_v58  ;;  %v4230_v58 = vld [vmem:[%s12695_s14 + $0x20] sm:$0xff]  ;;  %v11664_v21 = vpack.c.bf16 %v4240_v25, %v4238_v22 }
0x46e8   :  { %9756 = vpow2.f32 %v8259_v33 }
0x46ef   :  { %v9751_v4 = vpop.eup %9750 }
0x46f0   :  { %v9753_v15 = vpop.eup %9752  ;;  %4151 = vrot.lane.b32.xlu1 %v9751_v4, %s10183_s4  ;;  %v4231_v4 = vld [vmem:[%s12695_s14 + $0x28] sm:$0xff] }
0x46f1   :  { %4175 = vrot.lane.b32.xlu0 %v9753_v15, %s10183_s4  ;;  %v9755_v32 = vpop.eup %9754  ;;  %v4233_v15 = vld [vmem:[%s12695_s14 + $0x38] sm:$0xff] }
0x46f2   :  { %v9757_v40 = vpop.eup %9756  ;;  %v4145_v38 = vadd.f32 1.0, %v9755_v32  ;;  %v11596_v33 = vpack.c.bf16 %v4233_v15, %v4231_v4  ;;  %v4232_v32 = vld [vmem:[%s12695_s14 + $0x30] sm:$0xff] }
0x46f3   :  { %v4169_v60 = vadd.f32 1.0, %v9757_v40  ;;  %v4219_v40 = vld [vmem:[%s12694_s13 + $0x48] sm:$0xff] }
0x46f4   :  { %9758 = vrcp.f32 %v4145_v38  ;;  %v4221_v38 = vld [vmem:[%s12694_s13 + $0x58] sm:$0xff]  ;;  %8901 = vmatprep.subr.bf16.mxu1 %v11596_v33 }
0x46f5   :  { %9760 = vrcp.f32 %v4169_v60  ;;  %v11607_v60 = vpack.c.bf16 %v4232_v32, %v4230_v58 }
0x46f7   :  { %8903 = vmatpush1.bf16.msra.mxu1 %v11607_v60 }
0x46fe   :  { %v11535_v57 = vpop.eup %9758 }
0x46ff   :  { %v11537_v42 = vpop.eup %9760  ;;  %v4149_v51 = vmul.f32 %v11535_v57, %v4026_v56  ;;  %v4210_v56 = vld [vmem:[%s12694_s13] sm:$0xff] }
0x4700   :  { %v4173_v29 = vmul.f32 %v11537_v42, %v4050_v30  ;;  %v4212_v30 = vld [vmem:[%s12694_s13 + $0x10] sm:$0xff] }
0x4701   :  { %v8882_v5 = vpack.c.bf16 %v4212_v30, %v4210_v56  ;;  %v8892_v30 = vpack.c.bf16 %v4225_v35, %v4223_v7 }
0x4703   :  { %8883 = vmatpush1.bf16.msra.mxu0 %v8882_v5  ;;  %v8894_v5 = vpack.c.bf16 %v4224_v24, %v4222_v39 }
0x4704   :  { %8885 = vmatprep.subr.bf16.mxu0 %v8884_v28  ;;  %v4243_v28 = vld [vmem:[%s12696_s16] sm:$0xff] }
0x4707   :  { %8887 = vmatpush1.bf16.msra.mxu0 %v8886_v34 }
0x4762   :  { %v4152_v48 = vpop.permute.xlu1 %4151 }
0x4763   :  { %v4154_v50 = vmul.f32 %v11535_v57, %v4152_v48  ;;  %v4176_v10 = vpop.permute.xlu0 %4175  ;;  %v8888_v48 = vpack.c.bf16 %v4221_v38, %v4219_v40 }
0x4764   :  { %v4178_v19 = vmul.f32 %v11537_v42, %v4176_v10  ;;  %v4220_v10 = vld [vmem:[%s12694_s13 + $0x50] sm:$0xff] }
0x4765   :  { %4156 = vrot.lane.b32.xlu1 %v4154_v50, %s10183_s4  ;;  %v4218_v50 = vld [vmem:[%s12694_s13 + $0x40] sm:$0xff]  ;;  %8889 = vmatprep.subr.bf16.mxu0 %v8888_v48 }
0x4766   :  { %4180 = vrot.lane.b32.xlu0 %v4178_v19, %s10183_s4  ;;  %v4235_v19 = vld [vmem:[%s12695_s14 + $0x48] sm:$0xff] }
0x47d7   :  { %v4157_v6 = vpop.permute.xlu1 %4156 }
0x47d8   :  { %v4159_v62 = vadd.f32 %v4157_v6, %v4149_v51  ;;  %v4181_v2 = vpop.permute.xlu0 %4180  ;;  %v4237_v51 = vld [vmem:[%s12695_s14 + $0x58] sm:$0xff]  ;;  %v4234_v6 = vld [vmem:[%s12695_s14 + $0x40] sm:$0xff] }
0x47d9   :  { %v4183_v43 = vadd.f32 %v4181_v2, %v4173_v29  ;;  %v4236_v29 = vld [vmem:[%s12695_s14 + $0x50] sm:$0xff]  ;;  %v8890_v2 = vpack.c.bf16 %v4220_v10, %v4218_v50 }
0x47da   :  { %9762 = vtanh.f32 %v4159_v62  ;;  %v11638_v55 = vpack.c.bf16 %v4236_v29, %v4234_v6 }
0x47db   :  { %9764 = vtanh.f32 %v4183_v43  ;;  %v11628_v43 = vpack.c.bf16 %v4237_v51, %v4235_v19  ;;  %8891 = vmatpush1.bf16.msra.mxu0 %v8890_v2  ;;  %v4244_v19 = vld [vmem:[%s12698_s17] sm:$0xff] }
0x47dc   :  { %8893 = vmatprep.subr.bf16.mxu0 %v8892_v30 }
0x47dd   :  { %8905 = vmatprep.subr.bf16.mxu1 %v11628_v43 }
0x47de   :  { %8907 = vmatpush1.bf16.msra.mxu1 %v11638_v55 }
0x47df   :  { %8895 = vmatpush1.bf16.msra.mxu0 %v8894_v5  ;;  %8909 = vmatprep.subr.bf16.mxu1 %v11656_v47 }
0x47e0   :  { %8945 = vmatprep.subr.bf16.mxu0 %v11563_v20 }
0x47e2   :  { %8911 = vmatpush1.bf16.msra.mxu1 %v11664_v21 }
0x47e3   :  { %8913 = vmatprep.subr.bf16.mxu1 %v11563_v20 }
0x47e4   :  { %v9763_v62 = vpop.eup %9762 }
0x47e5   :  { %v9765_v56 = vpop.eup %9764  ;;  %4162 = vrot.lane.b32.xlu1 %v9763_v62, %s10183_s4  ;;  %8273 = vmatmul.mubr.msk.f32.vlgmr.msra.gmra.mrb[54].mxu1 %vm306_vm1, %v4243_v28 }
0x47e6   :  { %4186 = vrot.lane.b32.xlu0 %v9765_v56, %s10183_s4  ;;  %8915 = vmatpush1.bf16.msra.mxu1 %v11574_v23 }
0x47e7   :  { %4639 = vmatprep.mubr.f32.mxu1 %v10182_v3  ;;  %8917 = vmatprep.subr.bf16.mxu1 %v11596_v33 }
0x47ea   :  { %8919 = vmatpush1.bf16.msra.mxu1 %v11607_v60 }
0x47eb   :  { %8921 = vmatprep.subr.bf16.mxu1 %v11628_v43 }
0x47ee   :  { %8923 = vmatpush1.bf16.msra.mxu1 %v11638_v55 }
0x47ef   :  { %8925 = vmatprep.subr.bf16.mxu1 %v11656_v47 }
0x47f2   :  { %8927 = vmatpush1.bf16.msra.mxu1 %v11664_v21 }
0x47f3   :  { %8929 = vmatprep.subr.bf16.mxu1 %v11563_v20 }
0x4857   :  { %v4163_v34 = vpop.permute.xlu1 %4162 }
0x4858   :  { %v4165_v4 = vmul.f32 %v11535_v57, %v4163_v34  ;;  %v4187_v15 = vpop.permute.xlu0 %4186 }
0x4859   :  { %v4189_v58 = vmul.f32 %v11537_v42, %v4187_v15  ;;  %v4199_v42 = vsel %vm443_vm2, %v11245_v53, %v11522_v9  ;;  %v4201_v53 = vsel %vm443_vm2, %v11303_v41, %v11473_v0  ;;  %v4203_v41 = vsel %vm443_vm2, %v11361_v49, %v11416_v27 }
0x485a   :  { %4191 = vrot.lane.b32.xlu1 %v4165_v4, %s10184_s8  ;;  %v4205_v49 = vsel %vm443_vm2, %v11443_v16, %v11334_v8  ;;  %v4208_v8 = vsel %vm443_vm2, %v11520_v63, %v11247_v26  ;;  %v4242_v16 = vld [vmem:[%s12697_s15] sm:$0x3] }
0x485b   :  { %4195 = vrot.lane.b32.xlu0 %v4189_v58, %s10185_s30  ;;  %v11759_v26 = vrot.slane %v4242_v16, %v10497_v52  ;;  %v11808_v44 = vrot.slane %v4242_v16, %v10543_v18 }
0x48cd   :  { %v4196_v32 = vpop.permute.xlu0 %4195 }
0x48ce   :  { %v4198_v57 = vsel %vm443_vm2, %v11216_v61, %v4196_v32  ;;  %v4200_v61 = vsel %vm443_vm2, %v11274_v36, %v11501_v31  ;;  %v4202_v36 = vsel %vm443_vm2, %v11332_v12, %v11445_v13  ;;  %v4204_v12 = vsel %vm443_vm2, %v11414_v37, %v11363_v14  ;;  %v4192_v37 = vpop.permute.xlu1 %4191 }
0x48cf   :  { %8260 = vmatmul.mubr.msk.f32.vlgmr.msra.gmra.mrb[72].mxu0 %vm306_vm1, %v4198_v57  ;;  %v4207_v14 = vsel %vm443_vm2, %v11499_v45, %v11276_v59  ;;  %v4504_v59 = vpop.f32.mrb[54].mxu1 }
0x48d0   :  { %4362 = vmatprep.mubr.f32.mxu0 %v10182_v3  ;;  %8947 = vmatpush1.bf16.msra.mxu0 %v11574_v23  ;;  %v4506_v27 = vpop.f32.mrb[55].mxu1 }
0x48d1   :  { %8949 = vmatprep.subr.bf16.mxu0 %v11596_v33 }
0x48d3   :  { %8261 = vmatmul.mubr.msk.f32.gmra.mrb[74].mxu0 %vm306_vm1, %v4199_v42 }
0x48d4   :  { %4368 = vmatprep.mubr.f32.mxu0 %v10182_v3  ;;  %8951 = vmatpush1.bf16.msra.mxu0 %v11607_v60 }
0x48d5   :  { %8953 = vmatprep.subr.bf16.mxu0 %v11628_v43 }
0x48d7   :  { %8262 = vmatmul.mubr.msk.f32.gmra.mrb[76].mxu0 %vm306_vm1, %v4200_v61 }
0x48d8   :  { %4374 = vmatprep.mubr.f32.mxu0 %v10182_v3  ;;  %8955 = vmatpush1.bf16.msra.mxu0 %v11638_v55 }
0x48d9   :  { %8957 = vmatprep.subr.bf16.mxu0 %v11656_v47 }
0x48db   :  { %8263 = vmatmul.mubr.msk.f32.gmra.mrb[78].mxu0 %vm306_vm1, %v4201_v53 }
0x48dc   :  { %4380 = vmatprep.mubr.f32.mxu0 %v10182_v3  ;;  %8959 = vmatpush1.bf16.msra.mxu0 %v11664_v21 }
0x48dd   :  { %8977 = vmatprep.subr.bf16.mxu0 %v11563_v20 }
0x48df   :  { %8264 = vmatmul.mubr.msk.f32.gmra.mrb[80].mxu0 %vm306_vm1, %v4202_v36 }
0x48e0   :  { %4386 = vmatprep.mubr.f32.mxu0 %v10182_v3 }
0x48e3   :  { %8265 = vmatmul.mubr.msk.f32.gmra.mrb[82].mxu0 %vm306_vm1, %v4203_v41 }
0x48e4   :  { %4392 = vmatprep.mubr.f32.mxu0 %v10182_v3 }
0x48e7   :  { %8266 = vmatmul.mubr.msk.f32.gmra.mrb[84].mxu0 %vm306_vm1, %v11389_v46  ;;  %v4206_v46 = vsel %vm443_vm2, %v11471_v11, %v11305_v17  ;;  %v4209_v17 = vsel %vm443_vm2, %v4192_v37, %v11218_v1 }
0x48e8   :  { %4398 = vmatprep.mubr.f32.mxu0 %v10182_v3 }
0x48eb   :  { %8267 = vmatmul.mubr.msk.f32.gmra.mrb[86].mxu0 %vm306_vm1, %v4204_v12 }
0x48ec   :  { %4404 = vmatprep.mubr.f32.mxu0 %v10182_v3 }
0x48ef   :  { %8268 = vmatmul.mubr.msk.f32.gmra.mrb[88].mxu0 %vm306_vm1, %v4205_v49 }
0x48f0   :  { %4410 = vmatprep.mubr.f32.mxu0 %v10182_v3 }
0x48f3   :  { %8269 = vmatmul.mubr.msk.f32.gmra.mrb[90].mxu0 %vm306_vm1, %v4206_v46 }
0x48f4   :  { %4416 = vmatprep.mubr.f32.mxu0 %v10182_v3 }
0x48f7   :  { %8270 = vmatmul.mubr.msk.f32.gmra.mrb[92].mxu0 %vm306_vm1, %v4207_v14 }
0x48f8   :  { %4422 = vmatprep.mubr.f32.mxu0 %v10182_v3 }
0x48fb   :  { %8271 = vmatmul.mubr.msk.f32.gmra.mrb[94].mxu0 %vm306_vm1, %v4208_v8 }
0x48fc   :  { %4428 = vmatprep.mubr.f32.mxu0 %v10182_v3 }
0x48ff   :  { %8272 = vmatmul.mubr.msk.f32.gmra.mrb[96].mxu0 %vm306_vm1, %v4209_v17 }
0x4900   :  { %4905 = vmatprep.mubr.f32.mxu0 %v10182_v3 }
0x49a2   :  { %v4358_v13 = vpop.f32.mrb[72].mxu0 }
0x49a3   :  { %v4359_v11 = vadd.f32 %v4358_v13, %v11759_v26  ;;  %v11762_v0 = vpop.f32.mrb[73].mxu0 }
0x49a5   :  { %v4509_v45 = vadd.f32 %v4504_v59, %v4359_v11 }
0x49a6   :  { %v11764_v1 = vpop.f32.mrb[74].mxu0 }
0x49a7   :  { %9766 = vtanh.f32 %v4509_v45  ;;  %v11766_v31 = vpop.f32.mrb[75].mxu0  ;;  %v8274_v4 = vmul.f32 -1.442695, %v4509_v45 }
0x49aa   :  { %v11768_v63 = vpop.f32.mrb[76].mxu0 }
0x49ab   :  { %v11770_v9 = vpop.f32.mrb[77].mxu0 }
0x49ae   :  { %v11772_v40 = vpop.f32.mrb[78].mxu0 }
0x49af   :  { %v11774_v38 = vpop.f32.mrb[79].mxu0 }
0x49b1   :  { %v9767_v48 = vpop.eup %9766 }
0x49b2   :  { %v11776_v50 = vpop.f32.mrb[80].mxu0  ;;  %4524 = vrot.lane.b32.xlu0 %v9767_v48, %s10183_s4 }
0x49b3   :  { %v11779_v10 = vpop.f32.mrb[81].mxu0 }
0x49b6   :  { %v11784_v51 = vpop.f32.mrb[82].mxu0  ;;  %4519 = vrot.lane.b32.xlu0 %v4244_v19, %s10183_s4 }
0x49b7   :  { %v11787_v6 = vpop.f32.mrb[83].mxu0 }
0x49be   :  { %v11789_v29 = vpop.f32.mrb[86].mxu0 }
0x49bf   :  { %v11791_v62 = vpop.f32.mrb[87].mxu0 }
0x49c2   :  { %v11793_v2 = vpop.f32.mrb[88].mxu0 }
0x49c3   :  { %v11795_v7 = vpop.f32.mrb[89].mxu0 }
0x49c6   :  { %v11797_v35 = vpop.f32.mrb[90].mxu0 }
0x49c7   :  { %v11799_v56 = vpop.f32.mrb[91].mxu0 }
0x49ca   :  { %v11801_v30 = vpop.f32.mrb[92].mxu0 }
0x49cb   :  { %v11803_v39 = vpop.f32.mrb[93].mxu0 }
0x49ce   :  { %v11805_v24 = vpop.f32.mrb[94].mxu0 }
0x49cf   :  { %v4426_v5 = vpop.f32.mrb[95].mxu0 }
0x49d2   :  { %v11810_v54 = vpop.f32.mrb[96].mxu0 }
0x49d3   :  { %v4432_v22 = vpop.f32.mrb[97].mxu0 }
0x49d4   :  { %v4433_v25 = vadd.f32 %v4432_v22, %v11808_v44 }
0x49d6   :  { %v4510_v28 = vadd.f32 %v4506_v27, %v4433_v25 }
0x49d8   :  { %9768 = vtanh.f32 %v4510_v28  ;;  %v8275_v61 = vmul.f32 -1.442695, %v4510_v28 }
0x49d9   :  { %9770 = vpow2.f32 %v8274_v4  ;;  %v4427_v4 = vadd.f32 %v4426_v5, %v11808_v44 }
0x49e2   :  { %v9769_v34 = vpop.eup %9768 }
0x49e3   :  { %4548 = vrot.lane.b32.xlu1 %v9769_v34, %s10183_s4  ;;  %v9771_v15 = vpop.eup %9770  ;;  %v4365_v34 = vadd.f32 %v11764_v1, %v11759_v26 }
0x49e4   :  { %v4514_v58 = vadd.f32 1.0, %v9771_v15 }
0x49e6   :  { %9772 = vrcp.f32 %v4514_v58 }
0x49e7   :  { %9774 = vpow2.f32 %v8275_v61 }
0x49f0   :  { %v9773_v32 = vpop.eup %9772 }
0x49f1   :  { %v9775_v53 = vpop.eup %9774 }
0x49f2   :  { %v4542_v36 = vadd.f32 1.0, %v9775_v53 }
0x49f4   :  { %9776 = vrcp.f32 %v4542_v36 }
0x49fe   :  { %v9777_v41 = vpop.eup %9776 }
0x49ff   :  { %v4546_v59 = vmul.f32 %v9777_v41, %v4244_v19 }
0x4a24   :  { %v4525_v57 = vpop.permute.xlu0 %4524 }
0x4a25   :  { %v4527_v42 = vmul.f32 %v9773_v32, %v4525_v57 }
0x4a27   :  { %4529 = vrot.lane.b32.xlu1 %v4527_v42, %s10183_s4 }
0x4a28   :  { %v4520_v46 = vpop.permute.xlu0 %4519 }
0x4a29   :  { %v4522_v14 = vmul.f32 %v9773_v32, %v4520_v46 }
0x4a55   :  { %v4549_v12 = vpop.permute.xlu1 %4548 }
0x4a56   :  { %v4551_v49 = vmul.f32 %v9777_v41, %v4549_v12 }
0x4a58   :  { %4553 = vrot.lane.b32.xlu0 %v4551_v49, %s10183_s4 }
0x4a99   :  { %v4530_v8 = vpop.permute.xlu1 %4529 }
0x4a9a   :  { %v4532_v37 = vadd.f32 %v4530_v8, %v4522_v14 }
0x4a9c   :  { %9778 = vtanh.f32 %v4532_v37 }
0x4aa6   :  { %v9779_v17 = vpop.eup %9778 }
0x4aa7   :  { %4535 = vrot.lane.b32.xlu1 %v9779_v17, %s10183_s4 }
0x4aca   :  { %v4554_v27 = vpop.permute.xlu0 %4553 }
0x4acb   :  { %v4556_v16 = vadd.f32 %v4554_v27, %v4546_v59 }
0x4acd   :  { %9780 = vtanh.f32 %v4556_v16 }
0x4ad7   :  { %v9781_v13 = vpop.eup %9780 }
0x4ad8   :  { %4559 = vrot.lane.b32.xlu0 %v9781_v13, %s10183_s4 }
0x4b19   :  { %v4536_v11 = vpop.permute.xlu1 %4535 }
0x4b1a   :  { %v4538_v45 = vmul.f32 %v9773_v32, %v4536_v11 }
0x4b1c   :  { %4564 = vrot.lane.b32.xlu1 %v4538_v45, %s10184_s8 }
0x4b4a   :  { %v4560_v48 = vpop.permute.xlu0 %4559 }
0x4b4b   :  { %v4562_v22 = vmul.f32 %v9777_v41, %v4560_v48 }
0x4b4d   :  { %4568 = vrot.lane.b32.xlu0 %v4562_v22, %s10185_s30 }
0x4b8e   :  { %v11820_v25 = vpop.permute.xlu1 %4564 }
0x4bbf   :  { %v11822_v28 = vpop.permute.xlu0 %4568 }
0x4bc0   :  { %v4571_v19 = vsel %vm443_vm2, %v11820_v25, %v11822_v28 }
0x4bc1   :  { %8276 = vmatmul.mubr.msk.f32.vlgmr.msra.gmra.mrb[56].mxu1 %vm306_vm1, %v4571_v19 }
0x4bc2   :  { %8931 = vmatpush1.bf16.msra.mxu1 %v11574_v23  ;;  %4772 = vmatprep.mubr.f32.mxu1 %v10182_v3 }
0x4bc3   :  { %8933 = vmatprep.subr.bf16.mxu1 %v11596_v33 }
0x4bc6   :  { %8935 = vmatpush1.bf16.msra.mxu1 %v11607_v60 }
0x4bc7   :  { %8937 = vmatprep.subr.bf16.mxu1 %v11628_v43 }
0x4bca   :  { %8939 = vmatpush1.bf16.msra.mxu1 %v11638_v55 }
0x4bcb   :  { %8941 = vmatprep.subr.bf16.mxu1 %v11656_v47 }
0x4bce   :  { %8943 = vmatpush1.bf16.msra.mxu1 %v11664_v21 }
0x4bcf   :  { %8961 = vmatprep.subr.bf16.mxu1 %v11563_v20 }
0x4c94   :  { %v4641_v15 = vpop.f32.mrb[56].mxu1 }
0x4c95   :  { %v4646_v58 = vadd.f32 %v4641_v15, %v4365_v34  ;;  %v4643_v32 = vpop.f32.mrb[57].mxu1 }
0x4c96   :  { %v4647_v57 = vadd.f32 %v4643_v32, %v4427_v4 }
0x4c97   :  { %9782 = vtanh.f32 %v4646_v58  ;;  %v8277_v53 = vmul.f32 -1.442695, %v4646_v58 }
0x4c98   :  { %9784 = vtanh.f32 %v4647_v57  ;;  %v8278_v36 = vmul.f32 -1.442695, %v4647_v57 }
0x4c99   :  { %9786 = vpow2.f32 %v8277_v53 }
0x4c9a   :  { %9788 = vpow2.f32 %v8278_v36 }
0x4ca1   :  { %v9783_v42 = vpop.eup %9782 }
0x4ca2   :  { %v9785_v61 = vpop.eup %9784  ;;  %4657 = vrot.lane.b32.xlu1 %v9783_v42, %s10183_s4  ;;  %v4371_v42 = vadd.f32 %v11768_v63, %v11759_v26 }
0x4ca3   :  { %4681 = vrot.lane.b32.xlu0 %v9785_v61, %s10183_s4  ;;  %v9787_v41 = vpop.eup %9786  ;;  %v4421_v61 = vadd.f32 %v11803_v39, %v11808_v44 }
0x4ca4   :  { %v9789_v1 = vpop.eup %9788  ;;  %v4651_v12 = vadd.f32 1.0, %v9787_v41 }
0x4ca5   :  { %v4675_v5 = vadd.f32 1.0, %v9789_v1 }
0x4ca6   :  { %9790 = vrcp.f32 %v4651_v12 }
0x4ca7   :  { %9792 = vrcp.f32 %v4675_v5 }
0x4cb0   :  { %v9791_v49 = vpop.eup %9790 }
0x4cb1   :  { %v9793_v14 = vpop.eup %9792  ;;  %v4655_v27 = vmul.f32 %v9791_v49, %v4532_v37 }
0x4cb2   :  { %v4679_v11 = vmul.f32 %v9793_v14, %v4556_v16 }
0x4d14   :  { %v4658_v46 = vpop.permute.xlu1 %4657 }
0x4d15   :  { %v4660_v8 = vmul.f32 %v9791_v49, %v4658_v46  ;;  %v4682_v17 = vpop.permute.xlu0 %4681 }
0x4d16   :  { %v4684_v59 = vmul.f32 %v9793_v14, %v4682_v17 }
0x4d17   :  { %4662 = vrot.lane.b32.xlu1 %v4660_v8, %s10183_s4 }
0x4d18   :  { %4686 = vrot.lane.b32.xlu0 %v4684_v59, %s10183_s4 }
0x4d89   :  { %v4663_v13 = vpop.permute.xlu1 %4662 }
0x4d8a   :  { %v4665_v45 = vadd.f32 %v4663_v13, %v4655_v27  ;;  %v4687_v48 = vpop.permute.xlu0 %4686 }
0x4d8b   :  { %v4689_v22 = vadd.f32 %v4687_v48, %v4679_v11 }
0x4d8c   :  { %9794 = vtanh.f32 %v4665_v45 }
0x4d8d   :  { %9796 = vtanh.f32 %v4689_v22 }
0x4d96   :  { %v9795_v19 = vpop.eup %9794 }
0x4d97   :  { %v9797_v34 = vpop.eup %9796  ;;  %4668 = vrot.lane.b32.xlu1 %v9795_v19, %s10183_s4 }
0x4d98   :  { %4692 = vrot.lane.b32.xlu0 %v9797_v34, %s10183_s4 }
0x4e09   :  { %v4669_v4 = vpop.permute.xlu1 %4668 }
0x4e0a   :  { %v4671_v15 = vmul.f32 %v9791_v49, %v4669_v4  ;;  %v4693_v58 = vpop.permute.xlu0 %4692 }
0x4e0b   :  { %v4695_v32 = vmul.f32 %v9793_v14, %v4693_v58 }
0x4e0c   :  { %4697 = vrot.lane.b32.xlu1 %v4671_v15, %s10184_s8 }
0x4e0d   :  { %4701 = vrot.lane.b32.xlu0 %v4695_v32, %s10185_s30 }
0x4e7e   :  { %v11848_v37 = vpop.permute.xlu1 %4697 }
0x4e7f   :  { %v11850_v16 = vpop.permute.xlu0 %4701 }
0x4e80   :  { %v4704_v57 = vsel %vm443_vm2, %v11848_v37, %v11850_v16 }
0x4e81   :  { %8279 = vmatmul.mubr.msk.f32.vlgmr.msra.gmra.mrb[58].mxu1 %vm306_vm1, %v4704_v57 }
0x4e82   :  { %8963 = vmatpush1.bf16.msra.mxu1 %v11574_v23  ;;  %5038 = vmatprep.mubr.f32.mxu1 %v10182_v3 }
0x4e83   :  { %8965 = vmatprep.subr.bf16.mxu1 %v11596_v33 }
0x4e86   :  { %8967 = vmatpush1.bf16.msra.mxu1 %v11607_v60 }
0x4e87   :  { %8969 = vmatprep.subr.bf16.mxu1 %v11628_v43 }
0x4e8a   :  { %8971 = vmatpush1.bf16.msra.mxu1 %v11638_v55 }
0x4e8b   :  { %8973 = vmatprep.subr.bf16.mxu1 %v11656_v47 }
0x4e8e   :  { %8975 = vmatpush1.bf16.msra.mxu1 %v11664_v21 }
0x4e8f   :  { %9009 = vmatprep.subr.bf16.mxu1 %v11563_v20 }
0x4f54   :  { %v4774_v53 = vpop.f32.mrb[58].mxu1 }
0x4f55   :  { %v4779_v36 = vadd.f32 %v4774_v53, %v4371_v42  ;;  %v4776_v41 = vpop.f32.mrb[59].mxu1 }
0x4f56   :  { %v4780_v1 = vadd.f32 %v4776_v41, %v4421_v61 }
0x4f57   :  { %9798 = vtanh.f32 %v4779_v36  ;;  %v8280_v49 = vmul.f32 -1.442695, %v4779_v36 }
0x4f58   :  { %9800 = vtanh.f32 %v4780_v1  ;;  %v8281_v46 = vmul.f32 -1.442695, %v4780_v1 }
0x4f59   :  { %9802 = vpow2.f32 %v8280_v49 }
0x4f5a   :  { %9804 = vpow2.f32 %v8281_v46 }
0x4f61   :  { %v9799_v12 = vpop.eup %9798 }
0x4f62   :  { %v9801_v5 = vpop.eup %9800  ;;  %4790 = vrot.lane.b32.xlu1 %v9799_v12, %s10183_s4  ;;  %v4377_v12 = vadd.f32 %v11772_v40, %v11759_v26 }
0x4f63   :  { %4814 = vrot.lane.b32.xlu0 %v9801_v5, %s10183_s4  ;;  %v9803_v63 = vpop.eup %9802  ;;  %v4415_v5 = vadd.f32 %v11799_v56, %v11808_v44 }
0x4f64   :  { %v9805_v14 = vpop.eup %9804  ;;  %v4784_v8 = vadd.f32 1.0, %v9803_v63 }
0x4f65   :  { %v4808_v39 = vadd.f32 1.0, %v9805_v14 }
0x4f66   :  { %9806 = vrcp.f32 %v4784_v8 }
0x4f67   :  { %9808 = vrcp.f32 %v4808_v39 }
0x4f70   :  { %v9807_v17 = vpop.eup %9806 }
0x4f71   :  { %v9809_v27 = vpop.eup %9808  ;;  %v4788_v19 = vmul.f32 %v9807_v17, %v4665_v45 }
0x4f72   :  { %v4812_v4 = vmul.f32 %v9809_v27, %v4689_v22 }
0x4fd4   :  { %v4791_v59 = vpop.permute.xlu1 %4790 }
0x4fd5   :  { %v4793_v13 = vmul.f32 %v9807_v17, %v4791_v59  ;;  %v4815_v11 = vpop.permute.xlu0 %4814 }
0x4fd6   :  { %v4817_v48 = vmul.f32 %v9809_v27, %v4815_v11 }
0x4fd7   :  { %4795 = vrot.lane.b32.xlu1 %v4793_v13, %s10183_s4 }
0x4fd8   :  { %4819 = vrot.lane.b32.xlu0 %v4817_v48, %s10183_s4 }
0x5049   :  { %v4796_v34 = vpop.permute.xlu1 %4795 }
0x504a   :  { %v4798_v15 = vadd.f32 %v4796_v34, %v4788_v19  ;;  %v4820_v58 = vpop.permute.xlu0 %4819 }
0x504b   :  { %v4822_v32 = vadd.f32 %v4820_v58, %v4812_v4 }
0x504c   :  { %9810 = vtanh.f32 %v4798_v15 }
0x504d   :  { %9812 = vtanh.f32 %v4822_v32 }
0x5056   :  { %v9811_v57 = vpop.eup %9810 }
0x5057   :  { %v9813_v42 = vpop.eup %9812  ;;  %4801 = vrot.lane.b32.xlu1 %v9811_v57, %s10183_s4 }
0x5058   :  { %4825 = vrot.lane.b32.xlu0 %v9813_v42, %s10183_s4 }
0x50c9   :  { %v4802_v61 = vpop.permute.xlu1 %4801 }
0x50ca   :  { %v4804_v53 = vmul.f32 %v9807_v17, %v4802_v61  ;;  %v4826_v36 = vpop.permute.xlu0 %4825 }
0x50cb   :  { %v4828_v41 = vmul.f32 %v9809_v27, %v4826_v36 }
0x50cc   :  { %4830 = vrot.lane.b32.xlu1 %v4804_v53, %s10184_s8 }
0x50cd   :  { %4834 = vrot.lane.b32.xlu0 %v4828_v41, %s10185_s30 }
0x513e   :  { %v11877_v45 = vpop.permute.xlu1 %4830 }
0x513f   :  { %v11879_v22 = vpop.permute.xlu0 %4834 }
0x5140   :  { %v4837_v1 = vsel %vm443_vm2, %v11877_v45, %v11879_v22 }
0x5141   :  { %8282 = vmatmul.mubr.msk.f32.vlgmr.msra.gmra.mrb[98].mxu0 %vm306_vm1, %v4837_v1 }
0x5142   :  { %8979 = vmatpush1.bf16.msra.mxu0 %v11574_v23  ;;  %5171 = vmatprep.mubr.f32.mxu0 %v10182_v3 }
0x5143   :  { %8981 = vmatprep.subr.bf16.mxu0 %v11596_v33 }
0x5146   :  { %8983 = vmatpush1.bf16.msra.mxu0 %v11607_v60 }
0x5147   :  { %8985 = vmatprep.subr.bf16.mxu0 %v11628_v43 }
0x514a   :  { %8987 = vmatpush1.bf16.msra.mxu0 %v11638_v55 }
0x514b   :  { %8989 = vmatprep.subr.bf16.mxu0 %v11656_v47 }
0x514e   :  { %8991 = vmatpush1.bf16.msra.mxu0 %v11664_v21 }
0x514f   :  { %8993 = vmatprep.subr.bf16.mxu0 %v11563_v20 }
0x5214   :  { %v4907_v49 = vpop.f32.mrb[98].mxu0 }
0x5215   :  { %v4912_v46 = vadd.f32 %v4907_v49, %v4377_v12  ;;  %v4909_v63 = vpop.f32.mrb[99].mxu0 }
0x5216   :  { %v4913_v14 = vadd.f32 %v4909_v63, %v4415_v5 }
0x5217   :  { %9814 = vtanh.f32 %v4912_v46  ;;  %v8283_v17 = vmul.f32 -1.442695, %v4912_v46 }
0x5218   :  { %9816 = vtanh.f32 %v4913_v14  ;;  %v8284_v59 = vmul.f32 -1.442695, %v4913_v14 }
0x5219   :  { %9818 = vpow2.f32 %v8283_v17 }
0x521a   :  { %9820 = vpow2.f32 %v8284_v59 }
0x5221   :  { %v9815_v8 = vpop.eup %9814 }
0x5222   :  { %v9817_v39 = vpop.eup %9816  ;;  %4923 = vrot.lane.b32.xlu1 %v9815_v8, %s10183_s4  ;;  %v4383_v8 = vadd.f32 %v11776_v50, %v11759_v26 }
0x5223   :  { %4947 = vrot.lane.b32.xlu0 %v9817_v39, %s10183_s4  ;;  %v9819_v40 = vpop.eup %9818  ;;  %v4409_v39 = vadd.f32 %v11795_v7, %v11808_v44 }
0x5224   :  { %v9821_v27 = vpop.eup %9820  ;;  %v4917_v13 = vadd.f32 1.0, %v9819_v40 }
0x5225   :  { %v4941_v56 = vadd.f32 1.0, %v9821_v27 }
0x5226   :  { %9822 = vrcp.f32 %v4917_v13 }
0x5227   :  { %9824 = vrcp.f32 %v4941_v56 }
0x5230   :  { %v9823_v11 = vpop.eup %9822 }
0x5231   :  { %v9825_v19 = vpop.eup %9824  ;;  %v4921_v57 = vmul.f32 %v9823_v11, %v4798_v15 }
0x5232   :  { %v4945_v61 = vmul.f32 %v9825_v19, %v4822_v32 }
0x5294   :  { %v4924_v48 = vpop.permute.xlu1 %4923 }
0x5295   :  { %v4926_v34 = vmul.f32 %v9823_v11, %v4924_v48  ;;  %v4948_v4 = vpop.permute.xlu0 %4947 }
0x5296   :  { %v4950_v58 = vmul.f32 %v9825_v19, %v4948_v4 }
0x5297   :  { %4928 = vrot.lane.b32.xlu1 %v4926_v34, %s10183_s4 }
0x5298   :  { %4952 = vrot.lane.b32.xlu0 %v4950_v58, %s10183_s4 }
0x5309   :  { %v4929_v42 = vpop.permute.xlu1 %4928 }
0x530a   :  { %v4931_v53 = vadd.f32 %v4929_v42, %v4921_v57  ;;  %v4953_v36 = vpop.permute.xlu0 %4952 }
0x530b   :  { %v4955_v41 = vadd.f32 %v4953_v36, %v4945_v61 }
0x530c   :  { %9826 = vtanh.f32 %v4931_v53 }
0x530d   :  { %9828 = vtanh.f32 %v4955_v41 }
0x5316   :  { %v9827_v1 = vpop.eup %9826 }
0x5317   :  { %v9829_v12 = vpop.eup %9828  ;;  %4934 = vrot.lane.b32.xlu1 %v9827_v1, %s10183_s4 }
0x5318   :  { %4958 = vrot.lane.b32.xlu0 %v9829_v12, %s10183_s4 }
0x5389   :  { %v4935_v5 = vpop.permute.xlu1 %4934 }
0x538a   :  { %v4937_v49 = vmul.f32 %v9823_v11, %v4935_v5  ;;  %v4959_v46 = vpop.permute.xlu0 %4958 }
0x538b   :  { %v4961_v63 = vmul.f32 %v9825_v19, %v4959_v46 }
0x538c   :  { %4963 = vrot.lane.b32.xlu1 %v4937_v49, %s10184_s8 }
0x538d   :  { %4967 = vrot.lane.b32.xlu0 %v4961_v63, %s10185_s30 }
0x53fe   :  { %v11906_v15 = vpop.permute.xlu1 %4963 }
0x53ff   :  { %v11908_v32 = vpop.permute.xlu0 %4967 }
0x5400   :  { %v4970_v14 = vsel %vm443_vm2, %v11906_v15, %v11908_v32 }
0x5401   :  { %8285 = vmatmul.mubr.msk.f32.vlgmr.msra.gmra.mrb[60].mxu1 %vm306_vm1, %v4970_v14 }
0x5402   :  { %9011 = vmatpush1.bf16.msra.mxu1 %v11574_v23  ;;  %5437 = vmatprep.mubr.f32.mxu1 %v10182_v3 }
0x5403   :  { %9013 = vmatprep.subr.bf16.mxu1 %v11596_v33 }
0x5406   :  { %9015 = vmatpush1.bf16.msra.mxu1 %v11607_v60 }
0x5407   :  { %9017 = vmatprep.subr.bf16.mxu1 %v11628_v43 }
0x540a   :  { %9019 = vmatpush1.bf16.msra.mxu1 %v11638_v55 }
0x540b   :  { %9021 = vmatprep.subr.bf16.mxu1 %v11656_v47 }
0x540e   :  { %9023 = vmatpush1.bf16.msra.mxu1 %v11664_v21 }
0x540f   :  { %9025 = vmatprep.subr.bf16.mxu1 %v11563_v20 }
0x54d4   :  { %v5040_v17 = vpop.f32.mrb[60].mxu1 }
0x54d5   :  { %v5045_v59 = vadd.f32 %v5040_v17, %v4383_v8  ;;  %v5042_v40 = vpop.f32.mrb[61].mxu1 }
0x54d6   :  { %v5046_v27 = vadd.f32 %v5042_v40, %v4409_v39 }
0x54d7   :  { %9830 = vtanh.f32 %v5045_v59  ;;  %v8286_v11 = vmul.f32 -1.442695, %v5045_v59 }
0x54d8   :  { %9832 = vtanh.f32 %v5046_v27  ;;  %v8287_v48 = vmul.f32 -1.442695, %v5046_v27 }
0x54d9   :  { %9834 = vpow2.f32 %v8286_v11 }
0x54da   :  { %9836 = vpow2.f32 %v8287_v48 }
0x54e1   :  { %v9831_v13 = vpop.eup %9830 }
0x54e2   :  { %v9833_v56 = vpop.eup %9832  ;;  %5056 = vrot.lane.b32.xlu1 %v9831_v13, %s10183_s4  ;;  %v4389_v13 = vadd.f32 %v11784_v51, %v11759_v26 }
0x54e3   :  { %5080 = vrot.lane.b32.xlu0 %v9833_v56, %s10183_s4  ;;  %v9835_v50 = vpop.eup %9834  ;;  %v4403_v56 = vadd.f32 %v11791_v62, %v11808_v44 }
0x54e4   :  { %v9837_v19 = vpop.eup %9836  ;;  %v5050_v34 = vadd.f32 1.0, %v9835_v50 }
0x54e5   :  { %v5074_v7 = vadd.f32 1.0, %v9837_v19 }
0x54e6   :  { %9838 = vrcp.f32 %v5050_v34 }
0x54e7   :  { %9840 = vrcp.f32 %v5074_v7 }
0x54f0   :  { %v9839_v4 = vpop.eup %9838 }
0x54f1   :  { %v9841_v57 = vpop.eup %9840  ;;  %v5054_v1 = vmul.f32 %v9839_v4, %v4931_v53 }
0x54f2   :  { %v5078_v5 = vmul.f32 %v9841_v57, %v4955_v41 }
0x5554   :  { %v5057_v58 = vpop.permute.xlu1 %5056 }
0x5555   :  { %v5059_v42 = vmul.f32 %v9839_v4, %v5057_v58  ;;  %v5081_v61 = vpop.permute.xlu0 %5080 }
0x5556   :  { %v5083_v36 = vmul.f32 %v9841_v57, %v5081_v61 }
0x5557   :  { %5061 = vrot.lane.b32.xlu1 %v5059_v42, %s10183_s4 }
0x5558   :  { %5085 = vrot.lane.b32.xlu0 %v5083_v36, %s10183_s4 }
0x55c9   :  { %v5062_v12 = vpop.permute.xlu1 %5061 }
0x55ca   :  { %v5064_v49 = vadd.f32 %v5062_v12, %v5054_v1  ;;  %v5086_v46 = vpop.permute.xlu0 %5085 }
0x55cb   :  { %v5088_v63 = vadd.f32 %v5086_v46, %v5078_v5 }
0x55cc   :  { %9842 = vtanh.f32 %v5064_v49 }
0x55cd   :  { %9844 = vtanh.f32 %v5088_v63 }
0x55d6   :  { %v9843_v14 = vpop.eup %9842 }
0x55d7   :  { %v9845_v8 = vpop.eup %9844  ;;  %5067 = vrot.lane.b32.xlu1 %v9843_v14, %s10183_s4 }
0x55d8   :  { %5091 = vrot.lane.b32.xlu0 %v9845_v8, %s10183_s4 }
0x5649   :  { %v5068_v39 = vpop.permute.xlu1 %5067 }
0x564a   :  { %v5070_v17 = vmul.f32 %v9839_v4, %v5068_v39  ;;  %v5092_v59 = vpop.permute.xlu0 %5091 }
0x564b   :  { %v5094_v40 = vmul.f32 %v9841_v57, %v5092_v59 }
0x564c   :  { %5096 = vrot.lane.b32.xlu1 %v5070_v17, %s10184_s8 }
0x564d   :  { %5100 = vrot.lane.b32.xlu0 %v5094_v40, %s10185_s30 }
0x56be   :  { %v11935_v53 = vpop.permute.xlu1 %5096 }
0x56bf   :  { %v11937_v41 = vpop.permute.xlu0 %5100 }
0x56c0   :  { %v5103_v27 = vsel %vm443_vm2, %v11935_v53, %v11937_v41 }
0x56c1   :  { %8288 = vmatmul.mubr.msk.f32.vlgmr.msra.gmra.mrb[100].mxu0 %vm306_vm1, %v5103_v27 }
0x56c2   :  { %8995 = vmatpush1.bf16.msra.mxu0 %v11574_v23  ;;  %5304 = vmatprep.mubr.f32.mxu0 %v10182_v3 }
0x56c3   :  { %8997 = vmatprep.subr.bf16.mxu0 %v11596_v33 }
0x56c6   :  { %8999 = vmatpush1.bf16.msra.mxu0 %v11607_v60 }
0x56c7   :  { %9001 = vmatprep.subr.bf16.mxu0 %v11628_v43 }
0x56ca   :  { %9003 = vmatpush1.bf16.msra.mxu0 %v11638_v55 }
0x56cb   :  { %9005 = vmatprep.subr.bf16.mxu0 %v11656_v47 }
0x56ce   :  { %9007 = vmatpush1.bf16.msra.mxu0 %v11664_v21 }
0x56cf   :  { %9041 = vmatprep.subr.bf16.mxu0 %v11563_v20 }
0x5794   :  { %v5173_v11 = vpop.f32.mrb[100].mxu0 }
0x5795   :  { %v5178_v48 = vadd.f32 %v5173_v11, %v4389_v13  ;;  %v5175_v50 = vpop.f32.mrb[101].mxu0 }
0x5796   :  { %v5179_v19 = vadd.f32 %v5175_v50, %v4403_v56 }
0x5797   :  { %9846 = vtanh.f32 %v5178_v48  ;;  %v8289_v4 = vmul.f32 -1.442695, %v5178_v48 }
0x5798   :  { %9848 = vtanh.f32 %v5179_v19  ;;  %v8290_v58 = vmul.f32 -1.442695, %v5179_v19 }
0x5799   :  { %9850 = vpow2.f32 %v8289_v4 }
0x579a   :  { %9852 = vpow2.f32 %v8290_v58 }
0x57a1   :  { %v9847_v34 = vpop.eup %9846 }
0x57a2   :  { %v9849_v7 = vpop.eup %9848  ;;  %5189 = vrot.lane.b32.xlu1 %v9847_v34, %s10183_s4 }
0x57a3   :  { %5213 = vrot.lane.b32.xlu0 %v9849_v7, %s10183_s4  ;;  %v9851_v51 = vpop.eup %9850 }
0x57a4   :  { %v9853_v57 = vpop.eup %9852  ;;  %v5183_v42 = vadd.f32 1.0, %v9851_v51 }
0x57a5   :  { %v5207_v62 = vadd.f32 1.0, %v9853_v57 }
0x57a6   :  { %9854 = vrcp.f32 %v5183_v42 }
0x57a7   :  { %9856 = vrcp.f32 %v5207_v62 }
0x57b0   :  { %v9855_v61 = vpop.eup %9854 }
0x57b1   :  { %v9857_v1 = vpop.eup %9856  ;;  %v5187_v14 = vmul.f32 %v9855_v61, %v5064_v49 }
0x57b2   :  { %v5211_v39 = vmul.f32 %v9857_v1, %v5088_v63 }
0x5814   :  { %v5190_v36 = vpop.permute.xlu1 %5189 }
0x5815   :  { %v5192_v12 = vmul.f32 %v9855_v61, %v5190_v36  ;;  %v5214_v5 = vpop.permute.xlu0 %5213 }
0x5816   :  { %v5216_v46 = vmul.f32 %v9857_v1, %v5214_v5 }
0x5817   :  { %5194 = vrot.lane.b32.xlu1 %v5192_v12, %s10183_s4 }
0x5818   :  { %5218 = vrot.lane.b32.xlu0 %v5216_v46, %s10183_s4 }
0x5889   :  { %v5195_v8 = vpop.permute.xlu1 %5194 }
0x588a   :  { %v5197_v17 = vadd.f32 %v5195_v8, %v5187_v14  ;;  %v5219_v59 = vpop.permute.xlu0 %5218 }
0x588b   :  { %v5221_v40 = vadd.f32 %v5219_v59, %v5211_v39 }
0x588c   :  { %9858 = vtanh.f32 %v5197_v17 }
0x588d   :  { %9860 = vtanh.f32 %v5221_v40 }
0x5896   :  { %v9859_v27 = vpop.eup %9858 }
0x5897   :  { %v9861_v13 = vpop.eup %9860  ;;  %5200 = vrot.lane.b32.xlu1 %v9859_v27, %s10183_s4 }
0x5898   :  { %5224 = vrot.lane.b32.xlu0 %v9861_v13, %s10183_s4 }
0x5909   :  { %v5201_v56 = vpop.permute.xlu1 %5200 }
0x590a   :  { %v5203_v11 = vmul.f32 %v9855_v61, %v5201_v56  ;;  %v5225_v48 = vpop.permute.xlu0 %5224 }
0x590b   :  { %v5227_v50 = vmul.f32 %v9857_v1, %v5225_v48 }
0x590c   :  { %5229 = vrot.lane.b32.xlu1 %v5203_v11, %s10184_s8 }
0x590d   :  { %5233 = vrot.lane.b32.xlu0 %v5227_v50, %s10185_s30 }
0x597e   :  { %v11964_v49 = vpop.permute.xlu1 %5229 }
0x597f   :  { %v11966_v63 = vpop.permute.xlu0 %5233 }
0x5980   :  { %v5236_v19 = vsel %vm443_vm2, %v11964_v49, %v11966_v63 }
0x5981   :  { %8291 = vmatmul.mubr.msk.f32.vlgmr.msra.gmra.mrb[84].mxu0 %vm306_vm1, %v5236_v19 }
0x5982   :  { %9043 = vmatpush1.bf16.msra.mxu0 %v11574_v23  ;;  %5703 = vmatprep.mubr.f32.mxu0 %v10182_v3 }
0x5983   :  { %9045 = vmatprep.subr.bf16.mxu0 %v11596_v33 }
0x5986   :  { %9047 = vmatpush1.bf16.msra.mxu0 %v11607_v60 }
0x5987   :  { %9049 = vmatprep.subr.bf16.mxu0 %v11628_v43 }
0x598a   :  { %9051 = vmatpush1.bf16.msra.mxu0 %v11638_v55 }
0x598b   :  { %9053 = vmatprep.subr.bf16.mxu0 %v11656_v47 }
0x598e   :  { %9055 = vmatpush1.bf16.msra.mxu0 %v11664_v21 }
0x598f   :  { %9073 = vmatprep.subr.bf16.mxu0 %v11563_v20 }
0x5a54   :  { %v5306_v34 = vpop.f32.mrb[84].mxu0 }
0x5a55   :  { %v9332_v7 = vadd.f32 %v5306_v34, %v11759_v26  ;;  %v5308_v4 = vpop.f32.mrb[85].mxu0 }
0x5a56   :  { %v9333_v58 = vadd.f32 %v5308_v4, %v11808_v44 }
0x5a57   :  { %9862 = vtanh.f32 %v9332_v7  ;;  %v8292_v42 = vmul.f32 -1.442695, %v9332_v7 }
0x5a58   :  { %9864 = vtanh.f32 %v9333_v58  ;;  %v8293_v62 = vmul.f32 -1.442695, %v9333_v58 }
0x5a59   :  { %9866 = vpow2.f32 %v8292_v42  ;;  %v4401_v42 = vadd.f32 %v11789_v29, %v11759_v26 }
0x5a5a   :  { %9868 = vpow2.f32 %v8293_v62  ;;  %v4391_v62 = vadd.f32 %v11787_v6, %v11808_v44 }
0x5a61   :  { %v9863_v51 = vpop.eup %9862 }
0x5a62   :  { %v9865_v57 = vpop.eup %9864  ;;  %5322 = vrot.lane.b32.xlu1 %v9863_v51, %s10183_s4 }
0x5a63   :  { %5346 = vrot.lane.b32.xlu0 %v9865_v57, %s10183_s4  ;;  %v9867_v61 = vpop.eup %9866 }
0x5a64   :  { %v9869_v36 = vpop.eup %9868  ;;  %v5316_v1 = vadd.f32 1.0, %v9867_v61 }
0x5a65   :  { %v5340_v12 = vadd.f32 1.0, %v9869_v36 }
0x5a66   :  { %9870 = vrcp.f32 %v5316_v1 }
0x5a67   :  { %9872 = vrcp.f32 %v5340_v12 }
0x5a70   :  { %v9871_v5 = vpop.eup %9870 }
0x5a71   :  { %v9873_v14 = vpop.eup %9872  ;;  %v5320_v27 = vmul.f32 %v9871_v5, %v5197_v17 }
0x5a72   :  { %v5344_v56 = vmul.f32 %v9873_v14, %v5221_v40 }
0x5ad4   :  { %v5323_v46 = vpop.permute.xlu1 %5322 }
0x5ad5   :  { %v5325_v8 = vmul.f32 %v9871_v5, %v5323_v46  ;;  %v5347_v39 = vpop.permute.xlu0 %5346 }
0x5ad6   :  { %v5349_v59 = vmul.f32 %v9873_v14, %v5347_v39 }
0x5ad7   :  { %5327 = vrot.lane.b32.xlu1 %v5325_v8, %s10183_s4 }
0x5ad8   :  { %5351 = vrot.lane.b32.xlu0 %v5349_v59, %s10183_s4 }
0x5b49   :  { %v5328_v13 = vpop.permute.xlu1 %5327 }
0x5b4a   :  { %v5330_v11 = vadd.f32 %v5328_v13, %v5320_v27  ;;  %v5352_v48 = vpop.permute.xlu0 %5351 }
0x5b4b   :  { %v5354_v50 = vadd.f32 %v5352_v48, %v5344_v56 }
0x5b4c   :  { %9874 = vtanh.f32 %v5330_v11 }
0x5b4d   :  { %9876 = vtanh.f32 %v5354_v50 }
0x5b56   :  { %v9875_v19 = vpop.eup %9874 }
0x5b57   :  { %v9877_v34 = vpop.eup %9876  ;;  %5333 = vrot.lane.b32.xlu1 %v9875_v19, %s10183_s4 }
0x5b58   :  { %5357 = vrot.lane.b32.xlu0 %v9877_v34, %s10183_s4 }
0x5bc9   :  { %v5334_v7 = vpop.permute.xlu1 %5333 }
0x5bca   :  { %v5336_v4 = vmul.f32 %v9871_v5, %v5334_v7  ;;  %v5358_v58 = vpop.permute.xlu0 %5357 }
0x5bcb   :  { %v5360_v51 = vmul.f32 %v9873_v14, %v5358_v58 }
0x5bcc   :  { %5362 = vrot.lane.b32.xlu1 %v5336_v4, %s10184_s8 }
0x5bcd   :  { %5366 = vrot.lane.b32.xlu0 %v5360_v51, %s10185_s30 }
0x5c3e   :  { %v5363_v17 = vpop.permute.xlu1 %5362 }
0x5c3f   :  { %v5367_v40 = vpop.permute.xlu0 %5366 }
0x5c40   :  { %v11992_v57 = vsel %vm443_vm2, %v5363_v17, %v5367_v40 }
0x5c41   :  { %8294 = vmatmul.mubr.msk.f32.vlgmr.msra.gmra.mrb[62].mxu1 %vm306_vm1, %v11992_v57 }
0x5c42   :  { %9027 = vmatpush1.bf16.msra.mxu1 %v11574_v23  ;;  %5570 = vmatprep.mubr.f32.mxu1 %v10182_v3 }
0x5c43   :  { %9029 = vmatprep.subr.bf16.mxu1 %v11596_v33 }
0x5c46   :  { %9031 = vmatpush1.bf16.msra.mxu1 %v11607_v60 }
0x5c47   :  { %9033 = vmatprep.subr.bf16.mxu1 %v11628_v43 }
0x5c4a   :  { %9035 = vmatpush1.bf16.msra.mxu1 %v11638_v55 }
0x5c4b   :  { %9037 = vmatprep.subr.bf16.mxu1 %v11656_v47 }
0x5c4e   :  { %9039 = vmatpush1.bf16.msra.mxu1 %v11664_v21 }
0x5c4f   :  { %9057 = vmatprep.subr.bf16.mxu1 %v11563_v20 }
0x5d14   :  { %v5439_v61 = vpop.f32.mrb[62].mxu1 }
0x5d15   :  { %v5444_v36 = vadd.f32 %v5439_v61, %v4401_v42  ;;  %v5441_v1 = vpop.f32.mrb[63].mxu1 }
0x5d16   :  { %v5445_v12 = vadd.f32 %v5441_v1, %v4391_v62 }
0x5d17   :  { %9878 = vtanh.f32 %v5444_v36  ;;  %v8295_v14 = vmul.f32 -1.442695, %v5444_v36 }
0x5d18   :  { %9880 = vtanh.f32 %v5445_v12  ;;  %v8296_v8 = vmul.f32 -1.442695, %v5445_v12 }
0x5d19   :  { %9882 = vpow2.f32 %v8295_v14  ;;  %v4385_v14 = vadd.f32 %v11779_v10, %v11808_v44 }
0x5d1a   :  { %9884 = vpow2.f32 %v8296_v8 }
0x5d21   :  { %v9879_v5 = vpop.eup %9878 }
0x5d22   :  { %v9881_v46 = vpop.eup %9880  ;;  %5455 = vrot.lane.b32.xlu1 %v9879_v5, %s10183_s4 }
0x5d23   :  { %5479 = vrot.lane.b32.xlu0 %v9881_v46, %s10183_s4  ;;  %v9883_v29 = vpop.eup %9882  ;;  %v4407_v46 = vadd.f32 %v11793_v2, %v11759_v26 }
0x5d24   :  { %v9885_v39 = vpop.eup %9884  ;;  %v5449_v59 = vadd.f32 1.0, %v9883_v29 }
0x5d25   :  { %v5473_v6 = vadd.f32 1.0, %v9885_v39 }
0x5d26   :  { %9886 = vrcp.f32 %v5449_v59 }
0x5d27   :  { %9888 = vrcp.f32 %v5473_v6 }
0x5d30   :  { %v9887_v27 = vpop.eup %9886 }
0x5d31   :  { %v9889_v56 = vpop.eup %9888  ;;  %v5453_v7 = vmul.f32 %v9887_v27, %v5330_v11 }
0x5d32   :  { %v5477_v58 = vmul.f32 %v9889_v56, %v5354_v50 }
0x5d94   :  { %v5456_v13 = vpop.permute.xlu1 %5455 }
0x5d95   :  { %v5458_v48 = vmul.f32 %v9887_v27, %v5456_v13  ;;  %v5480_v19 = vpop.permute.xlu0 %5479 }
0x5d96   :  { %v5482_v34 = vmul.f32 %v9889_v56, %v5480_v19 }
0x5d97   :  { %5460 = vrot.lane.b32.xlu1 %v5458_v48, %s10183_s4 }
0x5d98   :  { %5484 = vrot.lane.b32.xlu0 %v5482_v34, %s10183_s4 }
0x5e09   :  { %v5461_v4 = vpop.permute.xlu1 %5460 }
0x5e0a   :  { %v5463_v51 = vadd.f32 %v5461_v4, %v5453_v7  ;;  %v5485_v17 = vpop.permute.xlu0 %5484 }
0x5e0b   :  { %v5487_v40 = vadd.f32 %v5485_v17, %v5477_v58 }
0x5e0c   :  { %9890 = vtanh.f32 %v5463_v51 }
0x5e0d   :  { %9892 = vtanh.f32 %v5487_v40 }
0x5e16   :  { %v9891_v42 = vpop.eup %9890 }
0x5e17   :  { %v9893_v62 = vpop.eup %9892  ;;  %5466 = vrot.lane.b32.xlu1 %v9891_v42, %s10183_s4 }
0x5e18   :  { %5490 = vrot.lane.b32.xlu0 %v9893_v62, %s10183_s4 }
0x5e89   :  { %v5467_v61 = vpop.permute.xlu1 %5466 }
0x5e8a   :  { %v5469_v36 = vmul.f32 %v9887_v27, %v5467_v61  ;;  %v5491_v1 = vpop.permute.xlu0 %5490 }
0x5e8b   :  { %v5493_v12 = vmul.f32 %v9889_v56, %v5491_v1 }
0x5e8c   :  { %5495 = vrot.lane.b32.xlu1 %v5469_v36, %s10184_s8 }
0x5e8d   :  { %5499 = vrot.lane.b32.xlu0 %v5493_v12, %s10185_s30 }
0x5efe   :  { %v12017_v11 = vpop.permute.xlu1 %5495 }
0x5eff   :  { %v12019_v50 = vpop.permute.xlu0 %5499 }
0x5f00   :  { %v5502_v5 = vsel %vm443_vm2, %v12017_v11, %v12019_v50 }
0x5f01   :  { %8297 = vmatmul.mubr.msk.f32.vlgmr.msra.gmra.mrb[64].mxu1 %vm306_vm1, %v5502_v5 }
0x5f02   :  { %9059 = vmatpush1.bf16.msra.mxu1 %v11574_v23  ;;  %5836 = vmatprep.mubr.f32.mxu1 %v10182_v3 }
0x5f03   :  { %9061 = vmatprep.subr.bf16.mxu1 %v11596_v33 }
0x5f06   :  { %9063 = vmatpush1.bf16.msra.mxu1 %v11607_v60 }
0x5f07   :  { %9065 = vmatprep.subr.bf16.mxu1 %v11628_v43 }
0x5f0a   :  { %9067 = vmatpush1.bf16.msra.mxu1 %v11638_v55 }
0x5f0b   :  { %9069 = vmatprep.subr.bf16.mxu1 %v11656_v47 }
0x5f0e   :  { %9071 = vmatpush1.bf16.msra.mxu1 %v11664_v21 }
0x5f0f   :  { %9089 = vmatprep.subr.bf16.mxu1 %v11563_v20 }
0x5fd4   :  { %v5572_v8 = vpop.f32.mrb[64].mxu1 }
0x5fd5   :  { %v5577_v29 = vadd.f32 %v5572_v8, %v4407_v46  ;;  %v5574_v39 = vpop.f32.mrb[65].mxu1 }
0x5fd6   :  { %v5578_v59 = vadd.f32 %v5574_v39, %v4385_v14 }
0x5fd7   :  { %9894 = vtanh.f32 %v5577_v29  ;;  %v8298_v13 = vmul.f32 -1.442695, %v5577_v29 }
0x5fd8   :  { %9896 = vtanh.f32 %v5578_v59  ;;  %v8299_v20 = vmul.f32 -1.442695, %v5578_v59 }
0x5fd9   :  { %9898 = vpow2.f32 %v8298_v13 }
0x5fda   :  { %9900 = vpow2.f32 %v8299_v20 }
0x5fe1   :  { %v9895_v6 = vpop.eup %9894 }
0x5fe2   :  { %v9897_v27 = vpop.eup %9896  ;;  %5588 = vrot.lane.b32.xlu1 %v9895_v6, %s10183_s4  ;;  %v4413_v6 = vadd.f32 %v11797_v35, %v11759_v26 }
0x5fe3   :  { %5612 = vrot.lane.b32.xlu0 %v9897_v27, %s10183_s4  ;;  %v9899_v2 = vpop.eup %9898  ;;  %v4379_v27 = vadd.f32 %v11774_v38, %v11808_v44 }
0x5fe4   :  { %v9901_v56 = vpop.eup %9900  ;;  %v5582_v48 = vadd.f32 1.0, %v9899_v2 }
0x5fe5   :  { %v5606_v10 = vadd.f32 1.0, %v9901_v56 }
0x5fe6   :  { %9902 = vrcp.f32 %v5582_v48 }
0x5fe7   :  { %9904 = vrcp.f32 %v5606_v10 }
0x5ff0   :  { %v9903_v19 = vpop.eup %9902 }
0x5ff1   :  { %v9905_v7 = vpop.eup %9904  ;;  %v5586_v42 = vmul.f32 %v9903_v19, %v5463_v51 }
0x5ff2   :  { %v5610_v61 = vmul.f32 %v9905_v7, %v5487_v40 }
0x6054   :  { %v5589_v34 = vpop.permute.xlu1 %5588 }
0x6055   :  { %v5591_v4 = vmul.f32 %v9903_v19, %v5589_v34  ;;  %v5613_v58 = vpop.permute.xlu0 %5612 }
0x6056   :  { %v5615_v17 = vmul.f32 %v9905_v7, %v5613_v58 }
0x6057   :  { %5593 = vrot.lane.b32.xlu1 %v5591_v4, %s10183_s4 }
0x6058   :  { %5617 = vrot.lane.b32.xlu0 %v5615_v17, %s10183_s4 }
0x60c9   :  { %v5594_v62 = vpop.permute.xlu1 %5593 }
0x60ca   :  { %v5596_v36 = vadd.f32 %v5594_v62, %v5586_v42  ;;  %v5618_v1 = vpop.permute.xlu0 %5617 }
0x60cb   :  { %v5620_v12 = vadd.f32 %v5618_v1, %v5610_v61 }
0x60cc   :  { %9906 = vtanh.f32 %v5596_v36 }
0x60cd   :  { %9908 = vtanh.f32 %v5620_v12 }
0x60d6   :  { %v9907_v5 = vpop.eup %9906 }
0x60d7   :  { %v9909_v46 = vpop.eup %9908  ;;  %5599 = vrot.lane.b32.xlu1 %v9907_v5, %s10183_s4 }
0x60d8   :  { %5623 = vrot.lane.b32.xlu0 %v9909_v46, %s10183_s4 }
0x6149   :  { %v5600_v14 = vpop.permute.xlu1 %5599 }
0x614a   :  { %v5602_v8 = vmul.f32 %v9903_v19, %v5600_v14  ;;  %v5624_v29 = vpop.permute.xlu0 %5623 }
0x614b   :  { %v5626_v39 = vmul.f32 %v9905_v7, %v5624_v29 }
0x614c   :  { %5628 = vrot.lane.b32.xlu1 %v5602_v8, %s10184_s8 }
0x614d   :  { %5632 = vrot.lane.b32.xlu0 %v5626_v39, %s10185_s30 }
0x61be   :  { %v12046_v51 = vpop.permute.xlu1 %5628 }
0x61bf   :  { %v12048_v40 = vpop.permute.xlu0 %5632 }
0x61c0   :  { %v5635_v59 = vsel %vm443_vm2, %v12046_v51, %v12048_v40 }
0x61c1   :  { %8300 = vmatmul.mubr.msk.f32.vlgmr.msra.gmra.mrb[102].mxu0 %vm306_vm1, %v5635_v59 }
0x61c2   :  { %9075 = vmatpush1.bf16.msra.mxu0 %v11574_v23  ;;  %5969 = vmatprep.mubr.f32.mxu0 %v10182_v3 }
0x61c3   :  { %9077 = vmatprep.subr.bf16.mxu0 %v11596_v33 }
0x61c6   :  { %9079 = vmatpush1.bf16.msra.mxu0 %v11607_v60 }
0x61c7   :  { %9081 = vmatprep.subr.bf16.mxu0 %v11628_v43 }
0x61ca   :  { %9083 = vmatpush1.bf16.msra.mxu0 %v11638_v55 }
0x61cb   :  { %9085 = vmatprep.subr.bf16.mxu0 %v11656_v47 }
0x61ce   :  { %9087 = vmatpush1.bf16.msra.mxu0 %v11664_v21 }
0x6294   :  { %v5705_v13 = vpop.f32.mrb[102].mxu0 }
0x6295   :  { %v5710_v20 = vadd.f32 %v5705_v13, %v4413_v6  ;;  %v5707_v2 = vpop.f32.mrb[103].mxu0 }
0x6296   :  { %v5711_v56 = vadd.f32 %v5707_v2, %v4379_v27 }
0x6297   :  { %9910 = vtanh.f32 %v5710_v20  ;;  %v8301_v19 = vmul.f32 -1.442695, %v5710_v20 }
0x6298   :  { %9912 = vtanh.f32 %v5711_v56  ;;  %v8302_v34 = vmul.f32 -1.442695, %v5711_v56 }
0x6299   :  { %9914 = vpow2.f32 %v8301_v19 }
0x629a   :  { %9916 = vpow2.f32 %v8302_v34 }
0x62a1   :  { %v9911_v48 = vpop.eup %9910 }
0x62a2   :  { %v9913_v10 = vpop.eup %9912  ;;  %5721 = vrot.lane.b32.xlu1 %v9911_v48, %s10183_s4  ;;  %v4419_v48 = vadd.f32 %v11801_v30, %v11759_v26 }
0x62a3   :  { %5745 = vrot.lane.b32.xlu0 %v9913_v10, %s10183_s4  ;;  %v9915_v35 = vpop.eup %9914 }
0x62a4   :  { %v9917_v7 = vpop.eup %9916  ;;  %v5715_v4 = vadd.f32 1.0, %v9915_v35 }
0x62a5   :  { %v5739_v38 = vadd.f32 1.0, %v9917_v7 }
0x62a6   :  { %9918 = vrcp.f32 %v5715_v4 }
0x62a7   :  { %9920 = vrcp.f32 %v5739_v38 }
0x62b0   :  { %v9919_v58 = vpop.eup %9918 }
0x62b1   :  { %v9921_v42 = vpop.eup %9920  ;;  %v5719_v5 = vmul.f32 %v9919_v58, %v5596_v36 }
0x62b2   :  { %v5743_v14 = vmul.f32 %v9921_v42, %v5620_v12 }
0x6314   :  { %v5722_v17 = vpop.permute.xlu1 %5721 }
0x6315   :  { %v5724_v62 = vmul.f32 %v9919_v58, %v5722_v17  ;;  %v5746_v61 = vpop.permute.xlu0 %5745 }
0x6316   :  { %v5748_v1 = vmul.f32 %v9921_v42, %v5746_v61 }
0x6317   :  { %5726 = vrot.lane.b32.xlu1 %v5724_v62, %s10183_s4 }
0x6318   :  { %5750 = vrot.lane.b32.xlu0 %v5748_v1, %s10183_s4 }
0x6389   :  { %v5727_v46 = vpop.permute.xlu1 %5726 }
0x638a   :  { %v5729_v8 = vadd.f32 %v5727_v46, %v5719_v5  ;;  %v5751_v29 = vpop.permute.xlu0 %5750 }
0x638b   :  { %v5753_v39 = vadd.f32 %v5751_v29, %v5743_v14 }
0x638c   :  { %9922 = vtanh.f32 %v5729_v8 }
0x638d   :  { %9924 = vtanh.f32 %v5753_v39 }
0x6396   :  { %v9923_v59 = vpop.eup %9922 }
0x6397   :  { %v9925_v6 = vpop.eup %9924  ;;  %5732 = vrot.lane.b32.xlu1 %v9923_v59, %s10183_s4 }
0x6398   :  { %5756 = vrot.lane.b32.xlu0 %v9925_v6, %s10183_s4 }
0x6409   :  { %v5733_v27 = vpop.permute.xlu1 %5732 }
0x640a   :  { %v5735_v13 = vmul.f32 %v9919_v58, %v5733_v27  ;;  %v5757_v20 = vpop.permute.xlu0 %5756 }
0x640b   :  { %v5759_v2 = vmul.f32 %v9921_v42, %v5757_v20 }
0x640c   :  { %5761 = vrot.lane.b32.xlu1 %v5735_v13, %s10184_s8 }
0x640d   :  { %5765 = vrot.lane.b32.xlu0 %v5759_v2, %s10185_s30 }
0x647e   :  { %v12074_v36 = vpop.permute.xlu1 %5761 }
0x647f   :  { %v12076_v12 = vpop.permute.xlu0 %5765 }
0x6480   :  { %v5768_v56 = vsel %vm443_vm2, %v12074_v36, %v12076_v12 }
0x6481   :  { %8303 = vmatmul.mubr.msk.f32.vlgmr.msra.gmra.mrb[66].mxu1 %vm306_vm1, %v5768_v56  ;;  %v4425_v56 = vadd.f32 %v11805_v24, %v11759_v26 }
0x6482   :  { %9091 = vmatpush1.bf16.msra.mxu1 %v11574_v23  ;;  %6102 = vmatprep.mubr.f32.mxu1 %v10182_v3  ;;  %v4373_v23 = vadd.f32 %v11770_v9, %v11808_v44 }
0x6483   :  { %9093 = vmatprep.subr.bf16.mxu1 %v11596_v33 }
0x6486   :  { %9095 = vmatpush1.bf16.msra.mxu1 %v11607_v60 }
0x6487   :  { %9097 = vmatprep.subr.bf16.mxu1 %v11628_v43 }
0x648a   :  { %9099 = vmatpush1.bf16.msra.mxu1 %v11638_v55 }
0x648b   :  { %9101 = vmatprep.subr.bf16.mxu1 %v11656_v47 }
0x648e   :  { %9103 = vmatpush1.bf16.msra.mxu1 %v11664_v21 }
0x6554   :  { %v5838_v10 = vpop.f32.mrb[66].mxu1 }
0x6555   :  { %v5843_v19 = vadd.f32 %v5838_v10, %v4419_v48  ;;  %v5840_v34 = vpop.f32.mrb[67].mxu1  ;;  %v4367_v48 = vadd.f32 %v11766_v31, %v11808_v44 }
0x6556   :  { %v5844_v33 = vadd.f32 %v5840_v34, %v4373_v23 }
0x6557   :  { %9926 = vtanh.f32 %v5843_v19  ;;  %v8304_v55 = vmul.f32 -1.442695, %v5843_v19 }
0x6558   :  { %9928 = vtanh.f32 %v5844_v33  ;;  %v8305_v47 = vmul.f32 -1.442695, %v5844_v33 }
0x6559   :  { %9930 = vpow2.f32 %v8304_v55 }
0x655a   :  { %9932 = vpow2.f32 %v8305_v47 }
0x6561   :  { %v9927_v60 = vpop.eup %9926 }
0x6562   :  { %v9929_v43 = vpop.eup %9928  ;;  %5854 = vrot.lane.b32.xlu1 %v9927_v60, %s10183_s4 }
0x6563   :  { %5878 = vrot.lane.b32.xlu0 %v9929_v43, %s10183_s4  ;;  %v9931_v21 = vpop.eup %9930 }
0x6564   :  { %v9933_v30 = vpop.eup %9932  ;;  %v5848_v35 = vadd.f32 1.0, %v9931_v21 }
0x6565   :  { %v5872_v9 = vadd.f32 1.0, %v9933_v30 }
0x6566   :  { %9934 = vrcp.f32 %v5848_v35 }
0x6567   :  { %9936 = vrcp.f32 %v5872_v9 }
0x6570   :  { %v9935_v7 = vpop.eup %9934 }
0x6571   :  { %v9937_v38 = vpop.eup %9936  ;;  %v5852_v62 = vmul.f32 %v9935_v7, %v5729_v8 }
0x6572   :  { %v5876_v1 = vmul.f32 %v9937_v38, %v5753_v39 }
0x65d4   :  { %v5855_v4 = vpop.permute.xlu1 %5854 }
0x65d5   :  { %v5857_v58 = vmul.f32 %v9935_v7, %v5855_v4  ;;  %v5879_v17 = vpop.permute.xlu0 %5878 }
0x65d6   :  { %v5881_v42 = vmul.f32 %v9937_v38, %v5879_v17 }
0x65d7   :  { %5859 = vrot.lane.b32.xlu1 %v5857_v58, %s10183_s4 }
0x65d8   :  { %5883 = vrot.lane.b32.xlu0 %v5881_v42, %s10183_s4 }
0x6649   :  { %v5860_v61 = vpop.permute.xlu1 %5859 }
0x664a   :  { %v5862_v5 = vadd.f32 %v5860_v61, %v5852_v62  ;;  %v5884_v46 = vpop.permute.xlu0 %5883 }
0x664b   :  { %v5886_v14 = vadd.f32 %v5884_v46, %v5876_v1 }
0x664c   :  { %9938 = vtanh.f32 %v5862_v5 }
0x664d   :  { %9940 = vtanh.f32 %v5886_v14 }
0x6656   :  { %v9939_v29 = vpop.eup %9938 }
0x6657   :  { %v9941_v59 = vpop.eup %9940  ;;  %5865 = vrot.lane.b32.xlu1 %v9939_v29, %s10183_s4 }
0x6658   :  { %5889 = vrot.lane.b32.xlu0 %v9941_v59, %s10183_s4 }
0x66c9   :  { %v5866_v6 = vpop.permute.xlu1 %5865 }
0x66ca   :  { %v5868_v27 = vmul.f32 %v9935_v7, %v5866_v6  ;;  %v5890_v13 = vpop.permute.xlu0 %5889 }
0x66cb   :  { %v5892_v20 = vmul.f32 %v9937_v38, %v5890_v13 }
0x66cc   :  { %5894 = vrot.lane.b32.xlu1 %v5868_v27, %s10184_s8 }
0x66cd   :  { %5898 = vrot.lane.b32.xlu0 %v5892_v20, %s10185_s30 }
0x673e   :  { %v12102_v8 = vpop.permute.xlu1 %5894 }
0x673f   :  { %v12104_v39 = vpop.permute.xlu0 %5898 }
0x6740   :  { %v5901_v2 = vsel %vm443_vm2, %v12102_v8, %v12104_v39 }
0x6741   :  { %8306 = vmatmul.mubr.msk.f32.vlgmr.msra.gmra.mrb[104].mxu0 %vm306_vm1, %v5901_v2  ;;  %v4431_v2 = vadd.f32 %v11810_v54, %v11759_v26 }
0x6742   :  { %6325 = vmatprep.mubr.f32.mxu0 %v10182_v3 }
0x6814   :  { %v5971_v23 = vpop.f32.mrb[104].mxu0 }
0x6815   :  { %v5976_v10 = vadd.f32 %v5971_v23, %v4425_v56  ;;  %v5973_v19 = vpop.f32.mrb[105].mxu0  ;;  %v4361_v56 = vadd.f32 %v11762_v0, %v11808_v44 }
0x6816   :  { %v5977_v34 = vadd.f32 %v5973_v19, %v4367_v48 }
0x6817   :  { %9942 = vtanh.f32 %v5976_v10  ;;  %v8307_v43 = vmul.f32 -1.442695, %v5976_v10 }
0x6818   :  { %9944 = vtanh.f32 %v5977_v34  ;;  %v8308_v55 = vmul.f32 -1.442695, %v5977_v34 }
0x6819   :  { %9946 = vpow2.f32 %v8307_v43 }
0x681a   :  { %9948 = vpow2.f32 %v8308_v55 }
0x6821   :  { %v9943_v33 = vpop.eup %9942 }
0x6822   :  { %v9945_v60 = vpop.eup %9944  ;;  %5987 = vrot.lane.b32.xlu1 %v9943_v33, %s10183_s4 }
0x6823   :  { %6011 = vrot.lane.b32.xlu0 %v9945_v60, %s10183_s4  ;;  %v9947_v24 = vpop.eup %9946 }
0x6824   :  { %v9949_v47 = vpop.eup %9948  ;;  %v5981_v21 = vadd.f32 1.0, %v9947_v24 }
0x6825   :  { %v6005_v31 = vadd.f32 1.0, %v9949_v47 }
0x6826   :  { %9950 = vrcp.f32 %v5981_v21 }
0x6827   :  { %9952 = vrcp.f32 %v6005_v31 }
0x6830   :  { %v9951_v30 = vpop.eup %9950 }
0x6831   :  { %v9953_v9 = vpop.eup %9952  ;;  %v5985_v58 = vmul.f32 %v9951_v30, %v5862_v5 }
0x6832   :  { %v6009_v42 = vmul.f32 %v9953_v9, %v5886_v14 }
0x6894   :  { %v5988_v35 = vpop.permute.xlu1 %5987 }
0x6895   :  { %v5990_v7 = vmul.f32 %v9951_v30, %v5988_v35  ;;  %v6012_v4 = vpop.permute.xlu0 %6011 }
0x6896   :  { %v6014_v38 = vmul.f32 %v9953_v9, %v6012_v4 }
0x6897   :  { %5992 = vrot.lane.b32.xlu1 %v5990_v7, %s10183_s4 }
0x6898   :  { %6016 = vrot.lane.b32.xlu0 %v6014_v38, %s10183_s4 }
0x6909   :  { %v5993_v17 = vpop.permute.xlu1 %5992 }
0x690a   :  { %v5995_v62 = vadd.f32 %v5993_v17, %v5985_v58  ;;  %v6017_v61 = vpop.permute.xlu0 %6016  ;;  %v6180_v17 = vld [vmem:[%s12699_s18 + $0x8] sm:$0xff] }
0x690b   :  { %v6019_v1 = vadd.f32 %v6017_v61, %v6009_v42  ;;  %v6182_v42 = vld [vmem:[%s12699_s18 + $0x18] sm:$0xff] }
0x690c   :  { %9954 = vtanh.f32 %v5995_v62  ;;  %v9104_v61 = vpack.c.bf16 %v6182_v42, %v6180_v17  ;;  %v6192_v17 = vld [vmem:[%s12699_s18 + $0x68] sm:$0xff]  ;;  %v6194_v42 = vld [vmem:[%s12699_s18 + $0x78] sm:$0xff] }
0x690d   :  { %9956 = vtanh.f32 %v6019_v1 }
0x690e   :  { %9105 = vmatprep.subr.bf16.mxu0 %v9104_v61 }
0x6916   :  { %v9955_v46 = vpop.eup %9954 }
0x6917   :  { %v9957_v29 = vpop.eup %9956  ;;  %5998 = vrot.lane.b32.xlu1 %v9955_v46, %s10183_s4  ;;  %v6196_v46 = vld [vmem:[%s12700_s19 + $0x8] sm:$0xff] }
0x6918   :  { %6022 = vrot.lane.b32.xlu0 %v9957_v29, %s10183_s4  ;;  %v6198_v29 = vld [vmem:[%s12700_s19 + $0x18] sm:$0xff] }
0x6989   :  { %v5999_v59 = vpop.permute.xlu1 %5998 }
0x698a   :  { %v6001_v6 = vmul.f32 %v9951_v30, %v5999_v59  ;;  %v6023_v27 = vpop.permute.xlu0 %6022 }
0x698b   :  { %v6025_v13 = vmul.f32 %v9953_v9, %v6023_v27  ;;  %v6195_v27 = vld [vmem:[%s12700_s19] sm:$0xff] }
0x698c   :  { %6027 = vrot.lane.b32.xlu1 %v6001_v6, %s10184_s8  ;;  %v12166_v6 = vpack.c.bf16 %v6198_v29, %v6196_v46  ;;  %v6191_v46 = vld [vmem:[%s12699_s18 + $0x60] sm:$0xff]  ;;  %v6193_v29 = vld [vmem:[%s12699_s18 + $0x70] sm:$0xff] }
0x698d   :  { %6031 = vrot.lane.b32.xlu0 %v6025_v13, %s10185_s30  ;;  %v6197_v13 = vld [vmem:[%s12700_s19 + $0x10] sm:$0xff] }
0x698e   :  { %9121 = vmatprep.subr.bf16.mxu1 %v12166_v6 }
0x69fe   :  { %v12123_v5 = vpop.permute.xlu1 %6027 }
0x69ff   :  { %v12125_v14 = vpop.permute.xlu0 %6031 }
0x6a00   :  { %v6034_v20 = vsel %vm443_vm2, %v12123_v5, %v12125_v14 }
0x6a01   :  { %8309 = vmatmul.mubr.msk.f32.vlgmr.msra.gmra.mrb[68].mxu1 %vm306_vm1, %v6034_v20  ;;  %v6184_v20 = vld [vmem:[%s12699_s18 + $0x28] sm:$0xff] }
0x6a02   :  { %6471 = vmatprep.mubr.f32.mxu1 %v10182_v3 }
0x6ad4   :  { %v6104_v48 = vpop.f32.mrb[68].mxu1 }
0x6ad5   :  { %v6109_v23 = vadd.f32 %v6104_v48, %v4431_v2  ;;  %v6106_v10 = vpop.f32.mrb[69].mxu1  ;;  %v12177_v2 = vpack.c.bf16 %v6197_v13, %v6195_v27  ;;  %v6183_v48 = vld [vmem:[%s12699_s18 + $0x20] sm:$0xff]  ;;  %v6208_v27 = vld [vmem:[%s12700_s19 + $0x68] sm:$0xff]  ;;  %v6210_v13 = vld [vmem:[%s12700_s19 + $0x78] sm:$0xff] }
0x6ad6   :  { %v6110_v19 = vadd.f32 %v6106_v10, %v4361_v56  ;;  %v6186_v56 = vld [vmem:[%s12699_s18 + $0x38] sm:$0xff] }
0x6ad7   :  { %9958 = vtanh.f32 %v6109_v23  ;;  %v8310_v60 = vmul.f32 -1.442695, %v6109_v23  ;;  %v6185_v23 = vld [vmem:[%s12699_s18 + $0x30] sm:$0xff]  ;;  %v9108_v10 = vpack.c.bf16 %v6186_v56, %v6184_v20  ;;  %9123 = vmatpush1.bf16.msra.mxu1 %v12177_v2  ;;  %v12259_v20 = vpack.c.bf16 %v6210_v13, %v6208_v27  ;;  %v6207_v56 = vld [vmem:[%s12700_s19 + $0x60] sm:$0xff] }
0x6ad8   :  { %9960 = vtanh.f32 %v6110_v19  ;;  %v8311_v43 = vmul.f32 -1.442695, %v6110_v19  ;;  %v9110_v19 = vpack.c.bf16 %v6185_v23, %v6183_v48  ;;  %v6209_v48 = vld [vmem:[%s12700_s19 + $0x70] sm:$0xff] }
0x6ad9   :  { %9962 = vpow2.f32 %v8310_v60  ;;  %v6199_v60 = vld [vmem:[%s12700_s19 + $0x20] sm:$0xff]  ;;  %v12267_v23 = vpack.c.bf16 %v6209_v48, %v6207_v56 }
0x6ada   :  { %9964 = vpow2.f32 %v8311_v43 }
0x6ae1   :  { %v9959_v34 = vpop.eup %9958 }
0x6ae2   :  { %v9961_v33 = vpop.eup %9960  ;;  %6120 = vrot.lane.b32.xlu0 %v9959_v34, %s10183_s4  ;;  %v6200_v34 = vld [vmem:[%s12700_s19 + $0x28] sm:$0xff] }
0x6ae3   :  { %6144 = vrot.lane.b32.xlu1 %v9961_v33, %s10183_s4  ;;  %v9963_v26 = vpop.eup %9962  ;;  %v6202_v33 = vld [vmem:[%s12700_s19 + $0x38] sm:$0xff] }
0x6ae4   :  { %v9965_v54 = vpop.eup %9964  ;;  %v6114_v55 = vadd.f32 1.0, %v9963_v26  ;;  %v12199_v43 = vpack.c.bf16 %v6202_v33, %v6200_v34  ;;  %v6201_v26 = vld [vmem:[%s12700_s19 + $0x30] sm:$0xff] }
0x6ae5   :  { %v6138_v0 = vadd.f32 1.0, %v9965_v54  ;;  %v6188_v54 = vld [vmem:[%s12699_s18 + $0x48] sm:$0xff] }
0x6ae6   :  { %9966 = vrcp.f32 %v6114_v55  ;;  %v6190_v55 = vld [vmem:[%s12699_s18 + $0x58] sm:$0xff]  ;;  %9125 = vmatprep.subr.bf16.mxu1 %v12199_v43 }
0x6ae7   :  { %9968 = vrcp.f32 %v6138_v0  ;;  %v12210_v0 = vpack.c.bf16 %v6201_v26, %v6199_v60 }
0x6ae9   :  { %9127 = vmatpush1.bf16.msra.mxu1 %v12210_v0 }
0x6af0   :  { %v12138_v44 = vpop.eup %9966 }
0x6af1   :  { %v12140_v47 = vpop.eup %9968  ;;  %v6118_v35 = vmul.f32 %v12138_v44, %v5995_v62  ;;  %v6179_v62 = vld [vmem:[%s12699_s18] sm:$0xff] }
0x6af2   :  { %v6142_v7 = vmul.f32 %v12140_v47, %v6019_v1  ;;  %v6181_v1 = vld [vmem:[%s12699_s18 + $0x10] sm:$0xff] }
0x6af3   :  { %v9106_v59 = vpack.c.bf16 %v6181_v1, %v6179_v62  ;;  %v9116_v1 = vpack.c.bf16 %v6194_v42, %v6192_v17 }
0x6af5   :  { %9107 = vmatpush1.bf16.msra.mxu0 %v9106_v59  ;;  %v9118_v59 = vpack.c.bf16 %v6193_v29, %v6191_v46 }
0x6af6   :  { %9109 = vmatprep.subr.bf16.mxu0 %v9108_v10  ;;  %v6212_v10 = vld [vmem:[%s12701_s21] sm:$0xff] }
0x6af9   :  { %9111 = vmatpush1.bf16.msra.mxu0 %v9110_v19 }
0x6b54   :  { %v6121_v24 = vpop.permute.xlu0 %6120 }
0x6b55   :  { %v6123_v21 = vmul.f32 %v12138_v44, %v6121_v24  ;;  %v6145_v31 = vpop.permute.xlu1 %6144  ;;  %v9112_v24 = vpack.c.bf16 %v6190_v55, %v6188_v54 }
0x6b56   :  { %v6147_v30 = vmul.f32 %v12140_v47, %v6145_v31  ;;  %v6189_v31 = vld [vmem:[%s12699_s18 + $0x50] sm:$0xff] }
0x6b57   :  { %6125 = vrot.lane.b32.xlu0 %v6123_v21, %s10183_s4  ;;  %v6187_v21 = vld [vmem:[%s12699_s18 + $0x40] sm:$0xff]  ;;  %9113 = vmatprep.subr.bf16.mxu0 %v9112_v24 }
0x6b58   :  { %6149 = vrot.lane.b32.xlu1 %v6147_v30, %s10183_s4  ;;  %v6204_v30 = vld [vmem:[%s12700_s19 + $0x48] sm:$0xff] }
0x6bc9   :  { %v6126_v9 = vpop.permute.xlu0 %6125 }
0x6bca   :  { %v6128_v4 = vadd.f32 %v6126_v9, %v6118_v35  ;;  %v6150_v38 = vpop.permute.xlu1 %6149  ;;  %v6206_v35 = vld [vmem:[%s12700_s19 + $0x58] sm:$0xff]  ;;  %v6203_v9 = vld [vmem:[%s12700_s19 + $0x40] sm:$0xff] }
0x6bcb   :  { %v6152_v58 = vadd.f32 %v6150_v38, %v6142_v7  ;;  %v6205_v7 = vld [vmem:[%s12700_s19 + $0x50] sm:$0xff]  ;;  %v9114_v38 = vpack.c.bf16 %v6189_v31, %v6187_v21  ;;  %v6213_v31 = vld [vmem:[%s12703_s22] sm:$0xff] }
0x6bcc   :  { %9970 = vtanh.f32 %v6128_v4  ;;  %v12241_v61 = vpack.c.bf16 %v6205_v7, %v6203_v9 }
0x6bcd   :  { %9972 = vtanh.f32 %v6152_v58  ;;  %v12231_v58 = vpack.c.bf16 %v6206_v35, %v6204_v30  ;;  %9115 = vmatpush1.bf16.msra.mxu0 %v9114_v38 }
0x6bce   :  { %9117 = vmatprep.subr.bf16.mxu0 %v9116_v1 }
0x6bcf   :  { %9129 = vmatprep.subr.bf16.mxu1 %v12231_v58 }
0x6bd0   :  { %9131 = vmatpush1.bf16.msra.mxu1 %v12241_v61 }
0x6bd1   :  { %9119 = vmatpush1.bf16.msra.mxu0 %v9118_v59  ;;  %9133 = vmatprep.subr.bf16.mxu1 %v12259_v20 }
0x6bd2   :  { %9169 = vmatprep.subr.bf16.mxu0 %v12166_v6 }
0x6bd4   :  { %9135 = vmatpush1.bf16.msra.mxu1 %v12267_v23 }
0x6bd5   :  { %9137 = vmatprep.subr.bf16.mxu1 %v12166_v6 }
0x6bd6   :  { %v9971_v4 = vpop.eup %9970 }
0x6bd7   :  { %v9973_v62 = vpop.eup %9972  ;;  %6131 = vrot.lane.b32.xlu0 %v9971_v4, %s10183_s4  ;;  %8325 = vmatmul.mubr.msk.f32.vlgmr.msra.gmra.mrb[70].mxu1 %vm306_vm1, %v6212_v10 }
0x6bd8   :  { %6155 = vrot.lane.b32.xlu1 %v9973_v62, %s10183_s4  ;;  %9139 = vmatpush1.bf16.msra.mxu1 %v12177_v2 }
0x6bd9   :  { %6608 = vmatprep.mubr.f32.mxu1 %v10182_v3  ;;  %9141 = vmatprep.subr.bf16.mxu1 %v12199_v43 }
0x6bdc   :  { %9143 = vmatpush1.bf16.msra.mxu1 %v12210_v0 }
0x6bdd   :  { %9145 = vmatprep.subr.bf16.mxu1 %v12231_v58 }
0x6be0   :  { %9147 = vmatpush1.bf16.msra.mxu1 %v12241_v61 }
0x6be1   :  { %9149 = vmatprep.subr.bf16.mxu1 %v12259_v20 }
0x6be4   :  { %9151 = vmatpush1.bf16.msra.mxu1 %v12267_v23 }
0x6be5   :  { %9153 = vmatprep.subr.bf16.mxu1 %v12166_v6 }
0x6c49   :  { %v6132_v19 = vpop.permute.xlu0 %6131 }
0x6c4a   :  { %v6134_v34 = vmul.f32 %v12138_v44, %v6132_v19  ;;  %v6156_v33 = vpop.permute.xlu1 %6155 }
0x6c4b   :  { %v6158_v60 = vmul.f32 %v12140_v47, %v6156_v33  ;;  %v6168_v47 = vsel %vm443_vm2, %v11848_v37, %v12125_v14  ;;  %v6170_v37 = vsel %vm443_vm2, %v11906_v15, %v12076_v12  ;;  %v6172_v15 = vsel %vm443_vm2, %v11964_v49, %v12019_v50 }
0x6c4c   :  { %6160 = vrot.lane.b32.xlu0 %v6134_v34, %s10184_s8  ;;  %v6174_v49 = vsel %vm443_vm2, %v12046_v51, %v11937_v41  ;;  %v6177_v41 = vsel %vm443_vm2, %v12123_v5, %v11850_v16  ;;  %v6211_v51 = vld [vmem:[%s12702_s20] sm:$0x3] }
0x6c4d   :  { %6164 = vrot.lane.b32.xlu1 %v6158_v60, %s10185_s30  ;;  %v12362_v16 = vrot.slane %v6211_v51, %v10497_v52  ;;  %v12411_v59 = vrot.slane %v6211_v51, %v10543_v18 }
0x6cbf   :  { %v6165_v26 = vpop.permute.xlu1 %6164 }
0x6cc0   :  { %v6167_v44 = vsel %vm443_vm2, %v11820_v25, %v6165_v26  ;;  %v6169_v25 = vsel %vm443_vm2, %v11877_v45, %v12104_v39  ;;  %v6171_v45 = vsel %vm443_vm2, %v11935_v53, %v12048_v40  ;;  %v6173_v53 = vsel %vm443_vm2, %v12017_v11, %v11966_v63  ;;  %v6161_v11 = vpop.permute.xlu0 %6160 }
0x6cc1   :  { %8312 = vmatmul.mubr.msk.f32.vlgmr.msra.gmra.mrb[106].mxu0 %vm306_vm1, %v6167_v44  ;;  %v6176_v63 = vsel %vm443_vm2, %v12102_v8, %v11879_v22  ;;  %v6473_v22 = vpop.f32.mrb[70].mxu1 }
0x6cc2   :  { %6331 = vmatprep.mubr.f32.mxu0 %v10182_v3  ;;  %9171 = vmatpush1.bf16.msra.mxu0 %v12177_v2  ;;  %v6475_v50 = vpop.f32.mrb[71].mxu1 }
0x6cc3   :  { %9173 = vmatprep.subr.bf16.mxu0 %v12199_v43 }
0x6cc5   :  { %8313 = vmatmul.mubr.msk.f32.gmra.mrb[108].mxu0 %vm306_vm1, %v6168_v47 }
0x6cc6   :  { %6337 = vmatprep.mubr.f32.mxu0 %v10182_v3  ;;  %9175 = vmatpush1.bf16.msra.mxu0 %v12210_v0 }
0x6cc7   :  { %9177 = vmatprep.subr.bf16.mxu0 %v12231_v58 }
0x6cc9   :  { %8314 = vmatmul.mubr.msk.f32.gmra.mrb[110].mxu0 %vm306_vm1, %v6169_v25 }
0x6cca   :  { %6343 = vmatprep.mubr.f32.mxu0 %v10182_v3  ;;  %9179 = vmatpush1.bf16.msra.mxu0 %v12241_v61 }
0x6ccb   :  { %9181 = vmatprep.subr.bf16.mxu0 %v12259_v20 }
0x6ccd   :  { %8315 = vmatmul.mubr.msk.f32.gmra.mrb[112].mxu0 %vm306_vm1, %v6170_v37 }
0x6cce   :  { %6349 = vmatprep.mubr.f32.mxu0 %v10182_v3  ;;  %9183 = vmatpush1.bf16.msra.mxu0 %v12267_v23 }
0x6ccf   :  { %9201 = vmatprep.subr.bf16.mxu0 %v12166_v6 }
0x6cd1   :  { %8316 = vmatmul.mubr.msk.f32.gmra.mrb[114].mxu0 %vm306_vm1, %v6171_v45 }
0x6cd2   :  { %6355 = vmatprep.mubr.f32.mxu0 %v10182_v3 }
0x6cd5   :  { %8317 = vmatmul.mubr.msk.f32.gmra.mrb[116].mxu0 %vm306_vm1, %v6172_v15 }
0x6cd6   :  { %6361 = vmatprep.mubr.f32.mxu0 %v10182_v3 }
0x6cd9   :  { %8318 = vmatmul.mubr.msk.f32.gmra.mrb[118].mxu0 %vm306_vm1, %v11992_v57  ;;  %v6175_v57 = vsel %vm443_vm2, %v12074_v36, %v11908_v32  ;;  %v6178_v32 = vsel %vm443_vm2, %v6161_v11, %v11822_v28 }
0x6cda   :  { %6367 = vmatprep.mubr.f32.mxu0 %v10182_v3 }
0x6cdd   :  { %8319 = vmatmul.mubr.msk.f32.gmra.mrb[120].mxu0 %vm306_vm1, %v6173_v53 }
0x6cde   :  { %6373 = vmatprep.mubr.f32.mxu0 %v10182_v3 }
0x6ce1   :  { %8320 = vmatmul.mubr.msk.f32.gmra.mrb[122].mxu0 %vm306_vm1, %v6174_v49 }
0x6ce2   :  { %6379 = vmatprep.mubr.f32.mxu0 %v10182_v3 }
0x6ce5   :  { %8321 = vmatmul.mubr.msk.f32.gmra.mrb[124].mxu0 %vm306_vm1, %v6175_v57 }
0x6ce6   :  { %6385 = vmatprep.mubr.f32.mxu0 %v10182_v3 }
0x6ce9   :  { %8322 = vmatmul.mubr.msk.f32.gmra.mrb[126].mxu0 %vm306_vm1, %v6176_v63 }
0x6cea   :  { %6391 = vmatprep.mubr.f32.mxu0 %v10182_v3 }
0x6ced   :  { %8323 = vmatmul.mubr.msk.f32.gmra.mrb[128].mxu0 %vm306_vm1, %v6177_v41 }
0x6cee   :  { %6397 = vmatprep.mubr.f32.mxu0 %v10182_v3 }
0x6cf1   :  { %8324 = vmatmul.mubr.msk.f32.gmra.mrb[130].mxu0 %vm306_vm1, %v6178_v32 }
0x6cf2   :  { %6874 = vmatprep.mubr.f32.mxu0 %v10182_v3 }
0x6d94   :  { %v6327_v40 = vpop.f32.mrb[106].mxu0 }
0x6d95   :  { %v6328_v36 = vadd.f32 %v6327_v40, %v12362_v16  ;;  %v12365_v12 = vpop.f32.mrb[107].mxu0 }
0x6d97   :  { %v6478_v8 = vadd.f32 %v6473_v22, %v6328_v36 }
0x6d98   :  { %v12367_v28 = vpop.f32.mrb[108].mxu0 }
0x6d99   :  { %9974 = vtanh.f32 %v6478_v8  ;;  %v12369_v39 = vpop.f32.mrb[109].mxu0  ;;  %v8326_v19 = vmul.f32 -1.442695, %v6478_v8 }
0x6d9c   :  { %v12371_v5 = vpop.f32.mrb[110].mxu0 }
0x6d9d   :  { %v12373_v14 = vpop.f32.mrb[111].mxu0 }
0x6da0   :  { %v12375_v54 = vpop.f32.mrb[112].mxu0 }
0x6da1   :  { %v12377_v55 = vpop.f32.mrb[113].mxu0 }
0x6da3   :  { %v9975_v52 = vpop.eup %9974 }
0x6da4   :  { %v12379_v24 = vpop.f32.mrb[114].mxu0  ;;  %6493 = vrot.lane.b32.xlu1 %v9975_v52, %s10183_s4 }
0x6da5   :  { %v12382_v21 = vpop.f32.mrb[115].mxu0 }
0x6da8   :  { %v12387_v30 = vpop.f32.mrb[116].mxu0  ;;  %6488 = vrot.lane.b32.xlu1 %v6213_v31, %s10183_s4 }
0x6da9   :  { %v12390_v35 = vpop.f32.mrb[117].mxu0 }
0x6db0   :  { %v12392_v9 = vpop.f32.mrb[120].mxu0 }
0x6db1   :  { %v12394_v7 = vpop.f32.mrb[121].mxu0 }
0x6db4   :  { %v12396_v4 = vpop.f32.mrb[122].mxu0 }
0x6db5   :  { %v12398_v38 = vpop.f32.mrb[123].mxu0 }
0x6db8   :  { %v12400_v17 = vpop.f32.mrb[124].mxu0 }
0x6db9   :  { %v12402_v42 = vpop.f32.mrb[125].mxu0 }
0x6dbc   :  { %v12404_v62 = vpop.f32.mrb[126].mxu0 }
0x6dbd   :  { %v12406_v1 = vpop.f32.mrb[127].mxu0 }
0x6dc0   :  { %v12408_v46 = vpop.f32.mrb[128].mxu0 }
0x6dc1   :  { %v6395_v29 = vpop.f32.mrb[129].mxu0 }
0x6dc4   :  { %v12413_v27 = vpop.f32.mrb[130].mxu0 }
0x6dc5   :  { %v6401_v13 = vpop.f32.mrb[131].mxu0 }
0x6dc6   :  { %v6402_v56 = vadd.f32 %v6401_v13, %v12411_v59 }
0x6dc8   :  { %v6479_v48 = vadd.f32 %v6475_v50, %v6402_v56 }
0x6dca   :  { %9976 = vtanh.f32 %v6479_v48  ;;  %v8327_v18 = vmul.f32 -1.442695, %v6479_v48  ;;  %v6396_v48 = vadd.f32 %v6395_v29, %v12411_v59 }
0x6dcb   :  { %9978 = vpow2.f32 %v8326_v19 }
0x6dd4   :  { %v9977_v10 = vpop.eup %9976 }
0x6dd5   :  { %6517 = vrot.lane.b32.xlu0 %v9977_v10, %s10183_s4  ;;  %v9979_v34 = vpop.eup %9978 }
0x6dd6   :  { %v6483_v33 = vadd.f32 1.0, %v9979_v34 }
0x6dd8   :  { %9980 = vrcp.f32 %v6483_v33 }
0x6dd9   :  { %9982 = vpow2.f32 %v8327_v18 }
0x6de2   :  { %v9981_v60 = vpop.eup %9980 }
0x6de3   :  { %v9983_v47 = vpop.eup %9982 }
0x6de4   :  { %v6511_v25 = vadd.f32 1.0, %v9983_v47 }
0x6de6   :  { %9984 = vrcp.f32 %v6511_v25 }
0x6df0   :  { %v9985_v37 = vpop.eup %9984 }
0x6df1   :  { %v6515_v11 = vmul.f32 %v9985_v37, %v6213_v31  ;;  %v6334_v31 = vadd.f32 %v12367_v28, %v12362_v16 }
0x6e16   :  { %v6494_v26 = vpop.permute.xlu1 %6493 }
0x6e17   :  { %v6496_v44 = vmul.f32 %v9981_v60, %v6494_v26 }
0x6e19   :  { %6498 = vrot.lane.b32.xlu0 %v6496_v44, %s10183_s4 }
0x6e1a   :  { %v6489_v53 = vpop.permute.xlu1 %6488 }
0x6e1b   :  { %v6491_v49 = vmul.f32 %v9981_v60, %v6489_v53 }
0x6e47   :  { %v6518_v45 = vpop.permute.xlu0 %6517 }
0x6e48   :  { %v6520_v15 = vmul.f32 %v9985_v37, %v6518_v45 }
0x6e4a   :  { %6522 = vrot.lane.b32.xlu1 %v6520_v15, %s10183_s4 }
0x6e8b   :  { %v6499_v57 = vpop.permute.xlu0 %6498 }
0x6e8c   :  { %v6501_v63 = vadd.f32 %v6499_v57, %v6491_v49 }
0x6e8e   :  { %9986 = vtanh.f32 %v6501_v63 }
0x6e98   :  { %v9987_v41 = vpop.eup %9986 }
0x6e99   :  { %6504 = vrot.lane.b32.xlu0 %v9987_v41, %s10183_s4 }
0x6ebc   :  { %v6523_v32 = vpop.permute.xlu1 %6522 }
0x6ebd   :  { %v6525_v22 = vadd.f32 %v6523_v32, %v6515_v11 }
0x6ebf   :  { %9988 = vtanh.f32 %v6525_v22 }
0x6ec9   :  { %v9989_v50 = vpop.eup %9988 }
0x6eca   :  { %6528 = vrot.lane.b32.xlu1 %v9989_v50, %s10183_s4 }
0x6f0b   :  { %v6505_v51 = vpop.permute.xlu0 %6504 }
0x6f0c   :  { %v6507_v40 = vmul.f32 %v9981_v60, %v6505_v51 }
0x6f0e   :  { %6533 = vrot.lane.b32.xlu0 %v6507_v40, %s10184_s8 }
0x6f3c   :  { %v6529_v36 = vpop.permute.xlu1 %6528 }
0x6f3d   :  { %v6531_v8 = vmul.f32 %v9985_v37, %v6529_v36 }
0x6f3f   :  { %6537 = vrot.lane.b32.xlu1 %v6531_v8, %s10185_s30 }
0x6f80   :  { %v6534_v52 = vpop.permute.xlu0 %6533 }
0x6fb1   :  { %v6538_v13 = vpop.permute.xlu1 %6537 }
0x6fb2   :  { %v6540_v56 = vsel %vm443_vm2, %v6534_v52, %v6538_v13 }
0x6fb3   :  { %8328 = vmatmul.mubr.msk.f32.vlgmr.msra.gmra.mrb[72].mxu1 %vm306_vm1, %v6540_v56 }
0x6fb4   :  { %9155 = vmatpush1.bf16.msra.mxu1 %v12177_v2  ;;  %6741 = vmatprep.mubr.f32.mxu1 %v10182_v3 }
0x6fb5   :  { %9157 = vmatprep.subr.bf16.mxu1 %v12199_v43 }
0x6fb8   :  { %9159 = vmatpush1.bf16.msra.mxu1 %v12210_v0 }
0x6fb9   :  { %9161 = vmatprep.subr.bf16.mxu1 %v12231_v58 }
0x6fbc   :  { %9163 = vmatpush1.bf16.msra.mxu1 %v12241_v61 }
0x6fbd   :  { %9165 = vmatprep.subr.bf16.mxu1 %v12259_v20 }
0x6fc0   :  { %9167 = vmatpush1.bf16.msra.mxu1 %v12267_v23 }
0x6fc1   :  { %9185 = vmatprep.subr.bf16.mxu1 %v12166_v6 }
0x7086   :  { %v6610_v10 = vpop.f32.mrb[72].mxu1 }
0x7087   :  { %v6615_v19 = vadd.f32 %v6610_v10, %v6334_v31  ;;  %v6612_v34 = vpop.f32.mrb[73].mxu1  ;;  %v6340_v10 = vadd.f32 %v12371_v5, %v12362_v16 }
0x7088   :  { %v6616_v33 = vadd.f32 %v6612_v34, %v6396_v48 }
0x7089   :  { %9990 = vtanh.f32 %v6615_v19  ;;  %v8329_v44 = vmul.f32 -1.442695, %v6615_v19  ;;  %v6390_v19 = vadd.f32 %v12406_v1, %v12411_v59 }
0x708a   :  { %9992 = vtanh.f32 %v6616_v33  ;;  %v8330_v18 = vmul.f32 -1.442695, %v6616_v33 }
0x708b   :  { %9994 = vpow2.f32 %v8329_v44 }
0x708c   :  { %9996 = vpow2.f32 %v8330_v18 }
0x7093   :  { %v9991_v60 = vpop.eup %9990 }
0x7094   :  { %v9993_v26 = vpop.eup %9992  ;;  %6626 = vrot.lane.b32.xlu0 %v9991_v60, %s10183_s4 }
0x7095   :  { %6650 = vrot.lane.b32.xlu1 %v9993_v26, %s10183_s4  ;;  %v9995_v47 = vpop.eup %9994 }
0x7096   :  { %v9997_v28 = vpop.eup %9996  ;;  %v6620_v25 = vadd.f32 1.0, %v9995_v47 }
0x7097   :  { %v6644_v29 = vadd.f32 1.0, %v9997_v28 }
0x7098   :  { %9998 = vrcp.f32 %v6620_v25 }
0x7099   :  { %10000 = vrcp.f32 %v6644_v29 }
0x70a2   :  { %v9999_v37 = vpop.eup %9998 }
0x70a3   :  { %v10001_v15 = vpop.eup %10000  ;;  %v6624_v41 = vmul.f32 %v9999_v37, %v6501_v63 }
0x70a4   :  { %v6648_v32 = vmul.f32 %v10001_v15, %v6525_v22 }
0x7106   :  { %v6627_v45 = vpop.permute.xlu0 %6626 }
0x7107   :  { %v6629_v53 = vmul.f32 %v9999_v37, %v6627_v45  ;;  %v6651_v49 = vpop.permute.xlu1 %6650 }
0x7108   :  { %v6653_v57 = vmul.f32 %v10001_v15, %v6651_v49 }
0x7109   :  { %6631 = vrot.lane.b32.xlu0 %v6629_v53, %s10183_s4 }
0x710a   :  { %6655 = vrot.lane.b32.xlu1 %v6653_v57, %s10183_s4 }
0x717b   :  { %v6632_v11 = vpop.permute.xlu0 %6631 }
0x717c   :  { %v6634_v50 = vadd.f32 %v6632_v11, %v6624_v41  ;;  %v6656_v51 = vpop.permute.xlu1 %6655 }
0x717d   :  { %v6658_v40 = vadd.f32 %v6656_v51, %v6648_v32 }
0x717e   :  { %10002 = vtanh.f32 %v6634_v50 }
0x717f   :  { %10004 = vtanh.f32 %v6658_v40 }
0x7188   :  { %v10003_v36 = vpop.eup %10002 }
0x7189   :  { %v10005_v8 = vpop.eup %10004  ;;  %6637 = vrot.lane.b32.xlu0 %v10003_v36, %s10183_s4 }
0x718a   :  { %6661 = vrot.lane.b32.xlu1 %v10005_v8, %s10183_s4 }
0x71fb   :  { %v6638_v52 = vpop.permute.xlu0 %6637 }
0x71fc   :  { %v6640_v13 = vmul.f32 %v9999_v37, %v6638_v52  ;;  %v6662_v56 = vpop.permute.xlu1 %6661 }
0x71fd   :  { %v6664_v31 = vmul.f32 %v10001_v15, %v6662_v56 }
0x71fe   :  { %6666 = vrot.lane.b32.xlu0 %v6640_v13, %s10184_s8 }
0x71ff   :  { %6670 = vrot.lane.b32.xlu1 %v6664_v31, %s10185_s30 }
0x7270   :  { %v6667_v63 = vpop.permute.xlu0 %6666 }
0x7271   :  { %v6671_v22 = vpop.permute.xlu1 %6670 }
0x7272   :  { %v6673_v48 = vsel %vm443_vm2, %v6667_v63, %v6671_v22 }
0x7273   :  { %8331 = vmatmul.mubr.msk.f32.vlgmr.msra.gmra.mrb[74].mxu1 %vm306_vm1, %v6673_v48 }
0x7274   :  { %9187 = vmatpush1.bf16.msra.mxu1 %v12177_v2  ;;  %7007 = vmatprep.mubr.f32.mxu1 %v10182_v3 }
0x7275   :  { %9189 = vmatprep.subr.bf16.mxu1 %v12199_v43 }
0x7278   :  { %9191 = vmatpush1.bf16.msra.mxu1 %v12210_v0 }
0x7279   :  { %9193 = vmatprep.subr.bf16.mxu1 %v12231_v58 }
0x727c   :  { %9195 = vmatpush1.bf16.msra.mxu1 %v12241_v61 }
0x727d   :  { %9197 = vmatprep.subr.bf16.mxu1 %v12259_v20 }
0x7280   :  { %9199 = vmatpush1.bf16.msra.mxu1 %v12267_v23 }
0x7281   :  { %9233 = vmatprep.subr.bf16.mxu1 %v12166_v6 }
0x7346   :  { %v6743_v34 = vpop.f32.mrb[74].mxu1 }
0x7347   :  { %v6748_v33 = vadd.f32 %v6743_v34, %v6340_v10  ;;  %v6745_v60 = vpop.f32.mrb[75].mxu1  ;;  %v6346_v10 = vadd.f32 %v12375_v54, %v12362_v16 }
0x7348   :  { %v6749_v26 = vadd.f32 %v6745_v60, %v6390_v19  ;;  %v6384_v19 = vadd.f32 %v12402_v42, %v12411_v59 }
0x7349   :  { %10006 = vtanh.f32 %v6748_v33  ;;  %v8332_v47 = vmul.f32 -1.442695, %v6748_v33 }
0x734a   :  { %10008 = vtanh.f32 %v6749_v26  ;;  %v8333_v28 = vmul.f32 -1.442695, %v6749_v26 }
0x734b   :  { %10010 = vpow2.f32 %v8332_v47 }
0x734c   :  { %10012 = vpow2.f32 %v8333_v28 }
0x7353   :  { %v10007_v44 = vpop.eup %10006 }
0x7354   :  { %v10009_v18 = vpop.eup %10008  ;;  %6759 = vrot.lane.b32.xlu0 %v10007_v44, %s10183_s4 }
0x7355   :  { %6783 = vrot.lane.b32.xlu1 %v10009_v18, %s10183_s4  ;;  %v10011_v5 = vpop.eup %10010 }
0x7356   :  { %v10013_v25 = vpop.eup %10012  ;;  %v6753_v29 = vadd.f32 1.0, %v10011_v5 }
0x7357   :  { %v6777_v1 = vadd.f32 1.0, %v10013_v25 }
0x7358   :  { %10014 = vrcp.f32 %v6753_v29 }
0x7359   :  { %10016 = vrcp.f32 %v6777_v1 }
0x7362   :  { %v10015_v37 = vpop.eup %10014 }
0x7363   :  { %v10017_v15 = vpop.eup %10016  ;;  %v6757_v41 = vmul.f32 %v10015_v37, %v6634_v50 }
0x7364   :  { %v6781_v32 = vmul.f32 %v10017_v15, %v6658_v40 }
0x73c6   :  { %v6760_v45 = vpop.permute.xlu0 %6759 }
0x73c7   :  { %v6762_v53 = vmul.f32 %v10015_v37, %v6760_v45  ;;  %v6784_v49 = vpop.permute.xlu1 %6783 }
0x73c8   :  { %v6786_v57 = vmul.f32 %v10017_v15, %v6784_v49 }
0x73c9   :  { %6764 = vrot.lane.b32.xlu0 %v6762_v53, %s10183_s4 }
0x73ca   :  { %6788 = vrot.lane.b32.xlu1 %v6786_v57, %s10183_s4 }
0x743b   :  { %v6765_v11 = vpop.permute.xlu0 %6764 }
0x743c   :  { %v6767_v51 = vadd.f32 %v6765_v11, %v6757_v41  ;;  %v6789_v36 = vpop.permute.xlu1 %6788 }
0x743d   :  { %v6791_v8 = vadd.f32 %v6789_v36, %v6781_v32 }
0x743e   :  { %10018 = vtanh.f32 %v6767_v51 }
0x743f   :  { %10020 = vtanh.f32 %v6791_v8 }
0x7448   :  { %v10019_v52 = vpop.eup %10018 }
0x7449   :  { %v10021_v13 = vpop.eup %10020  ;;  %6770 = vrot.lane.b32.xlu0 %v10019_v52, %s10183_s4 }
0x744a   :  { %6794 = vrot.lane.b32.xlu1 %v10021_v13, %s10183_s4 }
0x74bb   :  { %v6771_v56 = vpop.permute.xlu0 %6770 }
0x74bc   :  { %v6773_v31 = vmul.f32 %v10015_v37, %v6771_v56  ;;  %v6795_v63 = vpop.permute.xlu1 %6794 }
0x74bd   :  { %v6797_v22 = vmul.f32 %v10017_v15, %v6795_v63 }
0x74be   :  { %6799 = vrot.lane.b32.xlu0 %v6773_v31, %s10184_s8 }
0x74bf   :  { %6803 = vrot.lane.b32.xlu1 %v6797_v22, %s10185_s30 }
0x7530   :  { %v6800_v50 = vpop.permute.xlu0 %6799 }
0x7531   :  { %v6804_v40 = vpop.permute.xlu1 %6803 }
0x7532   :  { %v6806_v48 = vsel %vm443_vm2, %v6800_v50, %v6804_v40  ;;  %v6352_v40 = vadd.f32 %v12379_v24, %v12362_v16 }
0x7533   :  { %8334 = vmatmul.mubr.msk.f32.vlgmr.msra.gmra.mrb[132].mxu0 %vm306_vm1, %v6806_v48  ;;  %v6378_v48 = vadd.f32 %v12398_v38, %v12411_v59 }
0x7534   :  { %9203 = vmatpush1.bf16.msra.mxu0 %v12177_v2  ;;  %7140 = vmatprep.mubr.f32.mxu0 %v10182_v3 }
0x7535   :  { %9205 = vmatprep.subr.bf16.mxu0 %v12199_v43 }
0x7538   :  { %9207 = vmatpush1.bf16.msra.mxu0 %v12210_v0 }
0x7539   :  { %9209 = vmatprep.subr.bf16.mxu0 %v12231_v58 }
0x753c   :  { %9211 = vmatpush1.bf16.msra.mxu0 %v12241_v61 }
0x753d   :  { %9213 = vmatprep.subr.bf16.mxu0 %v12259_v20 }
0x7540   :  { %9215 = vmatpush1.bf16.msra.mxu0 %v12267_v23 }
0x7541   :  { %9217 = vmatprep.subr.bf16.mxu0 %v12166_v6 }
0x7606   :  { %v6876_v34 = vpop.f32.mrb[132].mxu0 }
0x7607   :  { %v6881_v33 = vadd.f32 %v6876_v34, %v6346_v10  ;;  %v6878_v60 = vpop.f32.mrb[133].mxu0 }
0x7608   :  { %v6882_v26 = vadd.f32 %v6878_v60, %v6384_v19 }
0x7609   :  { %10022 = vtanh.f32 %v6881_v33  ;;  %v8335_v47 = vmul.f32 -1.442695, %v6881_v33 }
0x760a   :  { %10024 = vtanh.f32 %v6882_v26  ;;  %v8336_v28 = vmul.f32 -1.442695, %v6882_v26 }
0x760b   :  { %10026 = vpow2.f32 %v8335_v47 }
0x760c   :  { %10028 = vpow2.f32 %v8336_v28 }
0x7613   :  { %v10023_v44 = vpop.eup %10022 }
0x7614   :  { %v10025_v18 = vpop.eup %10024  ;;  %6892 = vrot.lane.b32.xlu0 %v10023_v44, %s10183_s4 }
0x7615   :  { %6916 = vrot.lane.b32.xlu1 %v10025_v18, %s10183_s4  ;;  %v10027_v54 = vpop.eup %10026 }
0x7616   :  { %v10029_v5 = vpop.eup %10028  ;;  %v6886_v25 = vadd.f32 1.0, %v10027_v54 }
0x7617   :  { %v6910_v42 = vadd.f32 1.0, %v10029_v5 }
0x7618   :  { %10030 = vrcp.f32 %v6886_v25 }
0x7619   :  { %10032 = vrcp.f32 %v6910_v42 }
0x7622   :  { %v10031_v29 = vpop.eup %10030 }
0x7623   :  { %v10033_v37 = vpop.eup %10032  ;;  %v6890_v49 = vmul.f32 %v10031_v29, %v6767_v51 }
0x7624   :  { %v6914_v41 = vmul.f32 %v10033_v37, %v6791_v8 }
0x7686   :  { %v6893_v1 = vpop.permute.xlu0 %6892 }
0x7687   :  { %v6895_v45 = vmul.f32 %v10031_v29, %v6893_v1  ;;  %v6917_v15 = vpop.permute.xlu1 %6916 }
0x7688   :  { %v6919_v53 = vmul.f32 %v10033_v37, %v6917_v15 }
0x7689   :  { %6897 = vrot.lane.b32.xlu0 %v6895_v45, %s10183_s4 }
0x768a   :  { %6921 = vrot.lane.b32.xlu1 %v6919_v53, %s10183_s4 }
0x76fb   :  { %v6898_v57 = vpop.permute.xlu0 %6897 }
0x76fc   :  { %v6900_v11 = vadd.f32 %v6898_v57, %v6890_v49  ;;  %v6922_v32 = vpop.permute.xlu1 %6921 }
0x76fd   :  { %v6924_v36 = vadd.f32 %v6922_v32, %v6914_v41 }
0x76fe   :  { %10034 = vtanh.f32 %v6900_v11 }
0x76ff   :  { %10036 = vtanh.f32 %v6924_v36 }
0x7708   :  { %v10035_v52 = vpop.eup %10034 }
0x7709   :  { %v10037_v13 = vpop.eup %10036  ;;  %6903 = vrot.lane.b32.xlu0 %v10035_v52, %s10183_s4 }
0x770a   :  { %6927 = vrot.lane.b32.xlu1 %v10037_v13, %s10183_s4 }
0x777b   :  { %v6904_v56 = vpop.permute.xlu0 %6903 }
0x777c   :  { %v6906_v31 = vmul.f32 %v10031_v29, %v6904_v56  ;;  %v6928_v63 = vpop.permute.xlu1 %6927 }
0x777d   :  { %v6930_v22 = vmul.f32 %v10033_v37, %v6928_v63 }
0x777e   :  { %6932 = vrot.lane.b32.xlu0 %v6906_v31, %s10184_s8 }
0x777f   :  { %6936 = vrot.lane.b32.xlu1 %v6930_v22, %s10185_s30  ;;  %v6358_v22 = vadd.f32 %v12387_v30, %v12362_v16 }
0x77f0   :  { %v6933_v51 = vpop.permute.xlu0 %6932 }
0x77f1   :  { %v6937_v8 = vpop.permute.xlu1 %6936 }
0x77f2   :  { %v6939_v50 = vsel %vm443_vm2, %v6933_v51, %v6937_v8  ;;  %v6372_v51 = vadd.f32 %v12394_v7, %v12411_v59 }
0x77f3   :  { %8337 = vmatmul.mubr.msk.f32.vlgmr.msra.gmra.mrb[76].mxu1 %vm306_vm1, %v6939_v50 }
0x77f4   :  { %9235 = vmatpush1.bf16.msra.mxu1 %v12177_v2  ;;  %7406 = vmatprep.mubr.f32.mxu1 %v10182_v3 }
0x77f5   :  { %9237 = vmatprep.subr.bf16.mxu1 %v12199_v43 }
0x77f8   :  { %9239 = vmatpush1.bf16.msra.mxu1 %v12210_v0 }
0x77f9   :  { %9241 = vmatprep.subr.bf16.mxu1 %v12231_v58 }
0x77fc   :  { %9243 = vmatpush1.bf16.msra.mxu1 %v12241_v61 }
0x77fd   :  { %9245 = vmatprep.subr.bf16.mxu1 %v12259_v20 }
0x7800   :  { %9247 = vmatpush1.bf16.msra.mxu1 %v12267_v23 }
0x7801   :  { %9249 = vmatprep.subr.bf16.mxu1 %v12166_v6 }
0x78c6   :  { %v7009_v10 = vpop.f32.mrb[76].mxu1 }
0x78c7   :  { %v7014_v19 = vadd.f32 %v7009_v10, %v6352_v40  ;;  %v7011_v34 = vpop.f32.mrb[77].mxu1 }
0x78c8   :  { %v7015_v33 = vadd.f32 %v7011_v34, %v6378_v48 }
0x78c9   :  { %10038 = vtanh.f32 %v7014_v19  ;;  %v8338_v44 = vmul.f32 -1.442695, %v7014_v19 }
0x78ca   :  { %10040 = vtanh.f32 %v7015_v33  ;;  %v8339_v18 = vmul.f32 -1.442695, %v7015_v33 }
0x78cb   :  { %10042 = vpow2.f32 %v8338_v44 }
0x78cc   :  { %10044 = vpow2.f32 %v8339_v18 }
0x78d3   :  { %v10039_v60 = vpop.eup %10038 }
0x78d4   :  { %v10041_v26 = vpop.eup %10040  ;;  %7025 = vrot.lane.b32.xlu0 %v10039_v60, %s10183_s4 }
0x78d5   :  { %7049 = vrot.lane.b32.xlu1 %v10041_v26, %s10183_s4  ;;  %v10043_v24 = vpop.eup %10042 }
0x78d6   :  { %v10045_v47 = vpop.eup %10044  ;;  %v7019_v28 = vadd.f32 1.0, %v10043_v24 }
0x78d7   :  { %v7043_v38 = vadd.f32 1.0, %v10045_v47 }
0x78d8   :  { %10046 = vrcp.f32 %v7019_v28 }
0x78d9   :  { %10048 = vrcp.f32 %v7043_v38 }
0x78e2   :  { %v10047_v54 = vpop.eup %10046 }
0x78e3   :  { %v10049_v25 = vpop.eup %10048  ;;  %v7023_v37 = vmul.f32 %v10047_v54, %v6900_v11 }
0x78e4   :  { %v7047_v15 = vmul.f32 %v10049_v25, %v6924_v36 }
0x7946   :  { %v7026_v5 = vpop.permute.xlu0 %7025 }
0x7947   :  { %v7028_v42 = vmul.f32 %v10047_v54, %v7026_v5  ;;  %v7050_v29 = vpop.permute.xlu1 %7049 }
0x7948   :  { %v7052_v1 = vmul.f32 %v10049_v25, %v7050_v29 }
0x7949   :  { %7030 = vrot.lane.b32.xlu0 %v7028_v42, %s10183_s4 }
0x794a   :  { %7054 = vrot.lane.b32.xlu1 %v7052_v1, %s10183_s4 }
0x79bb   :  { %v7031_v45 = vpop.permute.xlu0 %7030 }
0x79bc   :  { %v7033_v53 = vadd.f32 %v7031_v45, %v7023_v37  ;;  %v7055_v49 = vpop.permute.xlu1 %7054 }
0x79bd   :  { %v7057_v57 = vadd.f32 %v7055_v49, %v7047_v15 }
0x79be   :  { %10050 = vtanh.f32 %v7033_v53 }
0x79bf   :  { %10052 = vtanh.f32 %v7057_v57 }
0x79c8   :  { %v10051_v41 = vpop.eup %10050 }
0x79c9   :  { %v10053_v32 = vpop.eup %10052  ;;  %7036 = vrot.lane.b32.xlu0 %v10051_v41, %s10183_s4 }
0x79ca   :  { %7060 = vrot.lane.b32.xlu1 %v10053_v32, %s10183_s4 }
0x7a3b   :  { %v7037_v52 = vpop.permute.xlu0 %7036 }
0x7a3c   :  { %v7039_v13 = vmul.f32 %v10047_v54, %v7037_v52  ;;  %v7061_v56 = vpop.permute.xlu1 %7060 }
0x7a3d   :  { %v7063_v31 = vmul.f32 %v10049_v25, %v7061_v56 }
0x7a3e   :  { %7065 = vrot.lane.b32.xlu0 %v7039_v13, %s10184_s8 }
0x7a3f   :  { %7069 = vrot.lane.b32.xlu1 %v7063_v31, %s10185_s30 }
0x7ab0   :  { %v7066_v11 = vpop.permute.xlu0 %7065 }
0x7ab1   :  { %v7070_v36 = vpop.permute.xlu1 %7069 }
0x7ab2   :  { %v7072_v63 = vsel %vm443_vm2, %v7066_v11, %v7070_v36 }
0x7ab3   :  { %8340 = vmatmul.mubr.msk.f32.vlgmr.msra.gmra.mrb[134].mxu0 %vm306_vm1, %v7072_v63 }
0x7ab4   :  { %9219 = vmatpush1.bf16.msra.mxu0 %v12177_v2  ;;  %7273 = vmatprep.mubr.f32.mxu0 %v10182_v3 }
0x7ab5   :  { %9221 = vmatprep.subr.bf16.mxu0 %v12199_v43 }
0x7ab8   :  { %9223 = vmatpush1.bf16.msra.mxu0 %v12210_v0 }
0x7ab9   :  { %9225 = vmatprep.subr.bf16.mxu0 %v12231_v58 }
0x7abc   :  { %9227 = vmatpush1.bf16.msra.mxu0 %v12241_v61 }
0x7abd   :  { %9229 = vmatprep.subr.bf16.mxu0 %v12259_v20 }
0x7ac0   :  { %9231 = vmatpush1.bf16.msra.mxu0 %v12267_v23 }
0x7ac1   :  { %9265 = vmatprep.subr.bf16.mxu0 %v12166_v6 }
0x7b86   :  { %v7142_v8 = vpop.f32.mrb[134].mxu0 }
0x7b87   :  { %v7147_v50 = vadd.f32 %v7142_v8, %v6358_v22  ;;  %v7144_v40 = vpop.f32.mrb[135].mxu0 }
0x7b88   :  { %v7148_v48 = vadd.f32 %v7144_v40, %v6372_v51 }
0x7b89   :  { %10054 = vtanh.f32 %v7147_v50  ;;  %v8341_v34 = vmul.f32 -1.442695, %v7147_v50 }
0x7b8a   :  { %10056 = vtanh.f32 %v7148_v48  ;;  %v8342_v33 = vmul.f32 -1.442695, %v7148_v48 }
0x7b8b   :  { %10058 = vpow2.f32 %v8341_v34 }
0x7b8c   :  { %10060 = vpow2.f32 %v8342_v33 }
0x7b93   :  { %v10055_v10 = vpop.eup %10054 }
0x7b94   :  { %v10057_v19 = vpop.eup %10056  ;;  %7158 = vrot.lane.b32.xlu0 %v10055_v10, %s10183_s4 }
0x7b95   :  { %7182 = vrot.lane.b32.xlu1 %v10057_v19, %s10183_s4  ;;  %v10059_v30 = vpop.eup %10058 }
0x7b96   :  { %v10061_v60 = vpop.eup %10060  ;;  %v7152_v26 = vadd.f32 1.0, %v10059_v30 }
0x7b97   :  { %v7176_v7 = vadd.f32 1.0, %v10061_v60 }
0x7b98   :  { %10062 = vrcp.f32 %v7152_v26 }
0x7b99   :  { %10064 = vrcp.f32 %v7176_v7 }
0x7ba2   :  { %v10063_v44 = vpop.eup %10062 }
0x7ba3   :  { %v10065_v24 = vpop.eup %10064  ;;  %v7156_v54 = vmul.f32 %v10063_v44, %v7033_v53 }
0x7ba4   :  { %v7180_v25 = vmul.f32 %v10065_v24, %v7057_v57 }
0x7c06   :  { %v7159_v18 = vpop.permute.xlu0 %7158 }
0x7c07   :  { %v7161_v47 = vmul.f32 %v10063_v44, %v7159_v18  ;;  %v7183_v28 = vpop.permute.xlu1 %7182 }
0x7c08   :  { %v7185_v38 = vmul.f32 %v10065_v24, %v7183_v28 }
0x7c09   :  { %7163 = vrot.lane.b32.xlu0 %v7161_v47, %s10183_s4 }
0x7c0a   :  { %7187 = vrot.lane.b32.xlu1 %v7185_v38, %s10183_s4 }
0x7c7b   :  { %v7164_v5 = vpop.permute.xlu0 %7163 }
0x7c7c   :  { %v7166_v42 = vadd.f32 %v7164_v5, %v7156_v54  ;;  %v7188_v29 = vpop.permute.xlu1 %7187 }
0x7c7d   :  { %v7190_v1 = vadd.f32 %v7188_v29, %v7180_v25 }
0x7c7e   :  { %10066 = vtanh.f32 %v7166_v42 }
0x7c7f   :  { %10068 = vtanh.f32 %v7190_v1 }
0x7c88   :  { %v10067_v37 = vpop.eup %10066 }
0x7c89   :  { %v10069_v45 = vpop.eup %10068  ;;  %7169 = vrot.lane.b32.xlu0 %v10067_v37, %s10183_s4 }
0x7c8a   :  { %7193 = vrot.lane.b32.xlu1 %v10069_v45, %s10183_s4  ;;  %v6370_v45 = vadd.f32 %v12392_v9, %v12362_v16 }
0x7cfb   :  { %v7170_v15 = vpop.permute.xlu0 %7169 }
0x7cfc   :  { %v7172_v49 = vmul.f32 %v10063_v44, %v7170_v15  ;;  %v7194_v41 = vpop.permute.xlu1 %7193  ;;  %v6360_v15 = vadd.f32 %v12390_v35, %v12411_v59 }
0x7cfd   :  { %v7196_v32 = vmul.f32 %v10065_v24, %v7194_v41 }
0x7cfe   :  { %7198 = vrot.lane.b32.xlu0 %v7172_v49, %s10184_s8 }
0x7cff   :  { %7202 = vrot.lane.b32.xlu1 %v7196_v32, %s10185_s30 }
0x7d70   :  { %v7199_v53 = vpop.permute.xlu0 %7198 }
0x7d71   :  { %v7203_v57 = vpop.permute.xlu1 %7202 }
0x7d72   :  { %v7205_v52 = vsel %vm443_vm2, %v7199_v53, %v7203_v57 }
0x7d73   :  { %8343 = vmatmul.mubr.msk.f32.vlgmr.msra.gmra.mrb[118].mxu0 %vm306_vm1, %v7205_v52 }
0x7d74   :  { %9267 = vmatpush1.bf16.msra.mxu0 %v12177_v2  ;;  %7672 = vmatprep.mubr.f32.mxu0 %v10182_v3 }
0x7d75   :  { %9269 = vmatprep.subr.bf16.mxu0 %v12199_v43 }
0x7d78   :  { %9271 = vmatpush1.bf16.msra.mxu0 %v12210_v0 }
0x7d79   :  { %9273 = vmatprep.subr.bf16.mxu0 %v12231_v58 }
0x7d7c   :  { %9275 = vmatpush1.bf16.msra.mxu0 %v12241_v61 }
0x7d7d   :  { %9277 = vmatprep.subr.bf16.mxu0 %v12259_v20 }
0x7d80   :  { %9279 = vmatpush1.bf16.msra.mxu0 %v12267_v23 }
0x7d81   :  { %9297 = vmatprep.subr.bf16.mxu0 %v12166_v6 }
0x7e46   :  { %v7275_v13 = vpop.f32.mrb[118].mxu0 }
0x7e47   :  { %v9334_v56 = vadd.f32 %v7275_v13, %v12362_v16  ;;  %v7277_v31 = vpop.f32.mrb[119].mxu0 }
0x7e48   :  { %v9335_v11 = vadd.f32 %v7277_v31, %v12411_v59 }
0x7e49   :  { %10070 = vtanh.f32 %v9334_v56  ;;  %v8344_v22 = vmul.f32 -1.442695, %v9334_v56 }
0x7e4a   :  { %10072 = vtanh.f32 %v9335_v11  ;;  %v8345_v51 = vmul.f32 -1.442695, %v9335_v11 }
0x7e4b   :  { %10074 = vpow2.f32 %v8344_v22 }
0x7e4c   :  { %10076 = vpow2.f32 %v8345_v51 }
0x7e53   :  { %v10071_v36 = vpop.eup %10070 }
0x7e54   :  { %v10073_v63 = vpop.eup %10072  ;;  %7291 = vrot.lane.b32.xlu0 %v10071_v36, %s10183_s4 }
0x7e55   :  { %7315 = vrot.lane.b32.xlu1 %v10073_v63, %s10183_s4  ;;  %v10075_v8 = vpop.eup %10074 }
0x7e56   :  { %v10077_v50 = vpop.eup %10076  ;;  %v7285_v40 = vadd.f32 1.0, %v10075_v8 }
0x7e57   :  { %v7309_v48 = vadd.f32 1.0, %v10077_v50 }
0x7e58   :  { %10078 = vrcp.f32 %v7285_v40 }
0x7e59   :  { %10080 = vrcp.f32 %v7309_v48 }
0x7e62   :  { %v10079_v10 = vpop.eup %10078 }
0x7e63   :  { %v10081_v34 = vpop.eup %10080  ;;  %v7289_v26 = vmul.f32 %v10079_v10, %v7166_v42 }
0x7e64   :  { %v7313_v44 = vmul.f32 %v10081_v34, %v7190_v1 }
0x7ec6   :  { %v7292_v19 = vpop.permute.xlu0 %7291 }
0x7ec7   :  { %v7294_v33 = vmul.f32 %v10079_v10, %v7292_v19  ;;  %v7316_v30 = vpop.permute.xlu1 %7315 }
0x7ec8   :  { %v7318_v60 = vmul.f32 %v10081_v34, %v7316_v30 }
0x7ec9   :  { %7296 = vrot.lane.b32.xlu0 %v7294_v33, %s10183_s4 }
0x7eca   :  { %7320 = vrot.lane.b32.xlu1 %v7318_v60, %s10183_s4 }
0x7f3b   :  { %v7297_v7 = vpop.permute.xlu0 %7296 }
0x7f3c   :  { %v7299_v18 = vadd.f32 %v7297_v7, %v7289_v26  ;;  %v7321_v24 = vpop.permute.xlu1 %7320 }
0x7f3d   :  { %v7323_v47 = vadd.f32 %v7321_v24, %v7313_v44 }
0x7f3e   :  { %10082 = vtanh.f32 %v7299_v18 }
0x7f3f   :  { %10084 = vtanh.f32 %v7323_v47 }
0x7f48   :  { %v10083_v28 = vpop.eup %10082 }
0x7f49   :  { %v10085_v38 = vpop.eup %10084  ;;  %7302 = vrot.lane.b32.xlu0 %v10083_v28, %s10183_s4 }
0x7f4a   :  { %7326 = vrot.lane.b32.xlu1 %v10085_v38, %s10183_s4  ;;  %v6376_v38 = vadd.f32 %v12396_v4, %v12362_v16 }
0x7fbb   :  { %v7303_v54 = vpop.permute.xlu0 %7302 }
0x7fbc   :  { %v7305_v5 = vmul.f32 %v10079_v10, %v7303_v54  ;;  %v7327_v25 = vpop.permute.xlu1 %7326  ;;  %v6354_v54 = vadd.f32 %v12382_v21, %v12411_v59 }
0x7fbd   :  { %v7329_v29 = vmul.f32 %v10081_v34, %v7327_v25 }
0x7fbe   :  { %7331 = vrot.lane.b32.xlu0 %v7305_v5, %s10184_s8 }
0x7fbf   :  { %7335 = vrot.lane.b32.xlu1 %v7329_v29, %s10185_s30 }
0x8030   :  { %v7332_v42 = vpop.permute.xlu0 %7331 }
0x8031   :  { %v7336_v1 = vpop.permute.xlu1 %7335 }
0x8032   :  { %v7338_v37 = vsel %vm443_vm2, %v7332_v42, %v7336_v1 }
0x8033   :  { %8346 = vmatmul.mubr.msk.f32.vlgmr.msra.gmra.mrb[78].mxu1 %vm306_vm1, %v7338_v37 }
0x8034   :  { %9251 = vmatpush1.bf16.msra.mxu1 %v12177_v2  ;;  %7539 = vmatprep.mubr.f32.mxu1 %v10182_v3 }
0x8035   :  { %9253 = vmatprep.subr.bf16.mxu1 %v12199_v43 }
0x8038   :  { %9255 = vmatpush1.bf16.msra.mxu1 %v12210_v0 }
0x8039   :  { %9257 = vmatprep.subr.bf16.mxu1 %v12231_v58 }
0x803c   :  { %9259 = vmatpush1.bf16.msra.mxu1 %v12241_v61 }
0x803d   :  { %9261 = vmatprep.subr.bf16.mxu1 %v12259_v20 }
0x8040   :  { %9263 = vmatpush1.bf16.msra.mxu1 %v12267_v23 }
0x8041   :  { %9281 = vmatprep.subr.bf16.mxu1 %v12166_v6 }
0x8106   :  { %v7408_v49 = vpop.f32.mrb[78].mxu1 }
0x8107   :  { %v7413_v41 = vadd.f32 %v7408_v49, %v6370_v45  ;;  %v7410_v32 = vpop.f32.mrb[79].mxu1 }
0x8108   :  { %v7414_v53 = vadd.f32 %v7410_v32, %v6360_v15 }
0x8109   :  { %10086 = vtanh.f32 %v7413_v41  ;;  %v8347_v13 = vmul.f32 -1.442695, %v7413_v41 }
0x810a   :  { %10088 = vtanh.f32 %v7414_v53  ;;  %v8348_v56 = vmul.f32 -1.442695, %v7414_v53 }
0x810b   :  { %10090 = vpow2.f32 %v8347_v13 }
0x810c   :  { %10092 = vpow2.f32 %v8348_v56 }
0x8113   :  { %v10087_v57 = vpop.eup %10086 }
0x8114   :  { %v10089_v52 = vpop.eup %10088  ;;  %7424 = vrot.lane.b32.xlu0 %v10087_v57, %s10183_s4 }
0x8115   :  { %7448 = vrot.lane.b32.xlu1 %v10089_v52, %s10183_s4  ;;  %v10091_v9 = vpop.eup %10090 }
0x8116   :  { %v10093_v31 = vpop.eup %10092  ;;  %v7418_v11 = vadd.f32 1.0, %v10091_v9 }
0x8117   :  { %v7442_v35 = vadd.f32 1.0, %v10093_v31 }
0x8118   :  { %10094 = vrcp.f32 %v7418_v11 }
0x8119   :  { %10096 = vrcp.f32 %v7442_v35 }
0x8122   :  { %v10095_v36 = vpop.eup %10094 }
0x8123   :  { %v10097_v22 = vpop.eup %10096  ;;  %v7422_v40 = vmul.f32 %v10095_v36, %v7299_v18 }
0x8124   :  { %v7446_v10 = vmul.f32 %v10097_v22, %v7323_v47 }
0x8186   :  { %v7425_v63 = vpop.permute.xlu0 %7424 }
0x8187   :  { %v7427_v51 = vmul.f32 %v10095_v36, %v7425_v63  ;;  %v7449_v8 = vpop.permute.xlu1 %7448 }
0x8188   :  { %v7451_v50 = vmul.f32 %v10097_v22, %v7449_v8 }
0x8189   :  { %7429 = vrot.lane.b32.xlu0 %v7427_v51, %s10183_s4 }
0x818a   :  { %7453 = vrot.lane.b32.xlu1 %v7451_v50, %s10183_s4 }
0x81fb   :  { %v7430_v48 = vpop.permute.xlu0 %7429 }
0x81fc   :  { %v7432_v19 = vadd.f32 %v7430_v48, %v7422_v40  ;;  %v7454_v34 = vpop.permute.xlu1 %7453 }
0x81fd   :  { %v7456_v33 = vadd.f32 %v7454_v34, %v7446_v10  ;;  %v6382_v34 = vadd.f32 %v12400_v17, %v12362_v16 }
0x81fe   :  { %10098 = vtanh.f32 %v7432_v19 }
0x81ff   :  { %10100 = vtanh.f32 %v7456_v33 }
0x8208   :  { %v10099_v30 = vpop.eup %10098 }
0x8209   :  { %v10101_v60 = vpop.eup %10100  ;;  %7435 = vrot.lane.b32.xlu0 %v10099_v30, %s10183_s4 }
0x820a   :  { %7459 = vrot.lane.b32.xlu1 %v10101_v60, %s10183_s4 }
0x827b   :  { %v7436_v26 = vpop.permute.xlu0 %7435 }
0x827c   :  { %v7438_v7 = vmul.f32 %v10095_v36, %v7436_v26  ;;  %v7460_v44 = vpop.permute.xlu1 %7459 }
0x827d   :  { %v7462_v24 = vmul.f32 %v10097_v22, %v7460_v44 }
0x827e   :  { %7464 = vrot.lane.b32.xlu0 %v7438_v7, %s10184_s8 }
0x827f   :  { %7468 = vrot.lane.b32.xlu1 %v7462_v24, %s10185_s30 }
0x82f0   :  { %v7465_v18 = vpop.permute.xlu0 %7464 }
0x82f1   :  { %v7469_v47 = vpop.permute.xlu1 %7468 }
0x82f2   :  { %v7471_v28 = vsel %vm443_vm2, %v7465_v18, %v7469_v47 }
0x82f3   :  { %8349 = vmatmul.mubr.msk.f32.vlgmr.msra.gmra.mrb[80].mxu1 %vm306_vm1, %v7471_v28 }
0x82f4   :  { %9283 = vmatpush1.bf16.msra.mxu1 %v12177_v2  ;;  %7805 = vmatprep.mubr.f32.mxu1 %v10182_v3 }
0x82f5   :  { %9285 = vmatprep.subr.bf16.mxu1 %v12199_v43 }
0x82f8   :  { %9287 = vmatpush1.bf16.msra.mxu1 %v12210_v0 }
0x82f9   :  { %9289 = vmatprep.subr.bf16.mxu1 %v12231_v58 }
0x82fc   :  { %9291 = vmatpush1.bf16.msra.mxu1 %v12241_v61 }
0x82fd   :  { %9293 = vmatprep.subr.bf16.mxu1 %v12259_v20 }
0x8300   :  { %9295 = vmatpush1.bf16.msra.mxu1 %v12267_v23 }
0x8301   :  { %9313 = vmatprep.subr.bf16.mxu1 %v12166_v6 }
0x83c6   :  { %v7541_v5 = vpop.f32.mrb[80].mxu1 }
0x83c7   :  { %v7546_v25 = vadd.f32 %v7541_v5, %v6376_v38  ;;  %v7543_v29 = vpop.f32.mrb[81].mxu1 }
0x83c8   :  { %v7547_v42 = vadd.f32 %v7543_v29, %v6354_v54 }
0x83c9   :  { %10102 = vtanh.f32 %v7546_v25  ;;  %v8350_v45 = vmul.f32 -1.442695, %v7546_v25 }
0x83ca   :  { %10104 = vtanh.f32 %v7547_v42  ;;  %v8351_v6 = vmul.f32 -1.442695, %v7547_v42 }
0x83cb   :  { %10106 = vpow2.f32 %v8350_v45 }
0x83cc   :  { %10108 = vpow2.f32 %v8351_v6 }
0x83d3   :  { %v10103_v1 = vpop.eup %10102 }
0x83d4   :  { %v10105_v37 = vpop.eup %10104  ;;  %7557 = vrot.lane.b32.xlu0 %v10103_v1, %s10183_s4 }
0x83d5   :  { %7581 = vrot.lane.b32.xlu1 %v10105_v37, %s10183_s4  ;;  %v10107_v4 = vpop.eup %10106 }
0x83d6   :  { %v10109_v15 = vpop.eup %10108  ;;  %v7551_v49 = vadd.f32 1.0, %v10107_v4 }
0x83d7   :  { %v7575_v21 = vadd.f32 1.0, %v10109_v15 }
0x83d8   :  { %10110 = vrcp.f32 %v7551_v49 }
0x83d9   :  { %10112 = vrcp.f32 %v7575_v21 }
0x83e2   :  { %v10111_v41 = vpop.eup %10110 }
0x83e3   :  { %v10113_v53 = vpop.eup %10112  ;;  %v7555_v56 = vmul.f32 %v10111_v41, %v7432_v19 }
0x83e4   :  { %v7579_v31 = vmul.f32 %v10113_v53, %v7456_v33  ;;  %v6348_v33 = vadd.f32 %v12377_v55, %v12411_v59 }
0x8446   :  { %v7558_v32 = vpop.permute.xlu0 %7557 }
0x8447   :  { %v7560_v57 = vmul.f32 %v10111_v41, %v7558_v32  ;;  %v7582_v52 = vpop.permute.xlu1 %7581 }
0x8448   :  { %v7584_v13 = vmul.f32 %v10113_v53, %v7582_v52 }
0x8449   :  { %7562 = vrot.lane.b32.xlu0 %v7560_v57, %s10183_s4 }
0x844a   :  { %7586 = vrot.lane.b32.xlu1 %v7584_v13, %s10183_s4 }
0x84bb   :  { %v7563_v9 = vpop.permute.xlu0 %7562 }
0x84bc   :  { %v7565_v11 = vadd.f32 %v7563_v9, %v7555_v56  ;;  %v7587_v35 = vpop.permute.xlu1 %7586 }
0x84bd   :  { %v7589_v36 = vadd.f32 %v7587_v35, %v7579_v31  ;;  %v6388_v31 = vadd.f32 %v12404_v62, %v12362_v16 }
0x84be   :  { %10114 = vtanh.f32 %v7565_v11 }
0x84bf   :  { %10116 = vtanh.f32 %v7589_v36 }
0x84c8   :  { %v10115_v63 = vpop.eup %10114 }
0x84c9   :  { %v10117_v22 = vpop.eup %10116  ;;  %7568 = vrot.lane.b32.xlu0 %v10115_v63, %s10183_s4 }
0x84ca   :  { %7592 = vrot.lane.b32.xlu1 %v10117_v22, %s10183_s4 }
0x853b   :  { %v7569_v51 = vpop.permute.xlu0 %7568 }
0x853c   :  { %v7571_v8 = vmul.f32 %v10111_v41, %v7569_v51  ;;  %v7593_v50 = vpop.permute.xlu1 %7592 }
0x853d   :  { %v7595_v40 = vmul.f32 %v10113_v53, %v7593_v50 }
0x853e   :  { %7597 = vrot.lane.b32.xlu0 %v7571_v8, %s10184_s8 }
0x853f   :  { %7601 = vrot.lane.b32.xlu1 %v7595_v40, %s10185_s30 }
0x85b0   :  { %v7598_v48 = vpop.permute.xlu0 %7597 }
0x85b1   :  { %v7602_v10 = vpop.permute.xlu1 %7601 }
0x85b2   :  { %v7604_v19 = vsel %vm443_vm2, %v7598_v48, %v7602_v10 }
0x85b3   :  { %8352 = vmatmul.mubr.msk.f32.vlgmr.msra.gmra.mrb[136].mxu0 %vm306_vm1, %v7604_v19 }
0x85b4   :  { %9299 = vmatpush1.bf16.msra.mxu0 %v12177_v2  ;;  %7938 = vmatprep.mubr.f32.mxu0 %v10182_v3 }
0x85b5   :  { %9301 = vmatprep.subr.bf16.mxu0 %v12199_v43 }
0x85b8   :  { %9303 = vmatpush1.bf16.msra.mxu0 %v12210_v0 }
0x85b9   :  { %9305 = vmatprep.subr.bf16.mxu0 %v12231_v58 }
0x85bc   :  { %9307 = vmatpush1.bf16.msra.mxu0 %v12241_v61 }
0x85bd   :  { %9309 = vmatprep.subr.bf16.mxu0 %v12259_v20 }
0x85c0   :  { %9311 = vmatpush1.bf16.msra.mxu0 %v12267_v23 }
0x8686   :  { %v7674_v30 = vpop.f32.mrb[136].mxu0 }
0x8687   :  { %v7679_v60 = vadd.f32 %v7674_v30, %v6382_v34  ;;  %v7676_v26 = vpop.f32.mrb[137].mxu0 }
0x8688   :  { %v7680_v7 = vadd.f32 %v7676_v26, %v6348_v33 }
0x8689   :  { %10118 = vtanh.f32 %v7679_v60  ;;  %v8353_v18 = vmul.f32 -1.442695, %v7679_v60 }
0x868a   :  { %10120 = vtanh.f32 %v7680_v7  ;;  %v8354_v47 = vmul.f32 -1.442695, %v7680_v7 }
0x868b   :  { %10122 = vpow2.f32 %v8353_v18 }
0x868c   :  { %10124 = vpow2.f32 %v8354_v47 }
0x8693   :  { %v10119_v44 = vpop.eup %10118 }
0x8694   :  { %v10121_v24 = vpop.eup %10120  ;;  %7690 = vrot.lane.b32.xlu0 %v10119_v44, %s10183_s4 }
0x8695   :  { %7714 = vrot.lane.b32.xlu1 %v10121_v24, %s10183_s4  ;;  %v10123_v17 = vpop.eup %10122 }
0x8696   :  { %v10125_v28 = vpop.eup %10124  ;;  %v7684_v38 = vadd.f32 1.0, %v10123_v17 }
0x8697   :  { %v7708_v55 = vadd.f32 1.0, %v10125_v28 }
0x8698   :  { %10126 = vrcp.f32 %v7684_v38  ;;  %v6394_v38 = vadd.f32 %v12408_v46, %v12362_v16 }
0x8699   :  { %10128 = vrcp.f32 %v7708_v55  ;;  %v6336_v55 = vadd.f32 %v12369_v39, %v12411_v59 }
0x86a2   :  { %v10127_v54 = vpop.eup %10126 }
0x86a3   :  { %v10129_v25 = vpop.eup %10128  ;;  %v7688_v37 = vmul.f32 %v10127_v54, %v7565_v11 }
0x86a4   :  { %v7712_v6 = vmul.f32 %v10129_v25, %v7589_v36 }
0x8706   :  { %v7691_v5 = vpop.permute.xlu0 %7690 }
0x8707   :  { %v7693_v29 = vmul.f32 %v10127_v54, %v7691_v5  ;;  %v7715_v42 = vpop.permute.xlu1 %7714 }
0x8708   :  { %v7717_v1 = vmul.f32 %v10129_v25, %v7715_v42 }
0x8709   :  { %7695 = vrot.lane.b32.xlu0 %v7693_v29, %s10183_s4 }
0x870a   :  { %7719 = vrot.lane.b32.xlu1 %v7717_v1, %s10183_s4 }
0x877b   :  { %v7696_v45 = vpop.permute.xlu0 %7695 }
0x877c   :  { %v7698_v4 = vadd.f32 %v7696_v45, %v7688_v37  ;;  %v7720_v15 = vpop.permute.xlu1 %7719 }
0x877d   :  { %v7722_v49 = vadd.f32 %v7720_v15, %v7712_v6 }
0x877e   :  { %10130 = vtanh.f32 %v7698_v4 }
0x877f   :  { %10132 = vtanh.f32 %v7722_v49 }
0x8788   :  { %v10131_v21 = vpop.eup %10130 }
0x8789   :  { %v10133_v41 = vpop.eup %10132  ;;  %7701 = vrot.lane.b32.xlu0 %v10131_v21, %s10183_s4 }
0x878a   :  { %7725 = vrot.lane.b32.xlu1 %v10133_v41, %s10183_s4 }
0x87fb   :  { %v7702_v32 = vpop.permute.xlu0 %7701 }
0x87fc   :  { %v7704_v53 = vmul.f32 %v10127_v54, %v7702_v32  ;;  %v7726_v57 = vpop.permute.xlu1 %7725 }
0x87fd   :  { %v7728_v52 = vmul.f32 %v10129_v25, %v7726_v57 }
0x87fe   :  { %7730 = vrot.lane.b32.xlu0 %v7704_v53, %s10184_s8 }
0x87ff   :  { %7734 = vrot.lane.b32.xlu1 %v7728_v52, %s10185_s30 }
0x8870   :  { %v7731_v13 = vpop.permute.xlu0 %7730 }
0x8871   :  { %v7735_v56 = vpop.permute.xlu1 %7734 }
0x8872   :  { %v7737_v9 = vsel %vm443_vm2, %v7731_v13, %v7735_v56 }
0x8873   :  { %8355 = vmatmul.mubr.msk.f32.vlgmr.msra.gmra.mrb[82].mxu1 %vm306_vm1, %v7737_v9 }
0x8874   :  { %9315 = vmatpush1.bf16.msra.mxu1 %v12177_v2  ;;  %8071 = vmatprep.mubr.f32.mxu1 %v10182_v3  ;;  %v6342_v2 = vadd.f32 %v12373_v14, %v12411_v59 }
0x8875   :  { %9317 = vmatprep.subr.bf16.mxu1 %v12199_v43 }
0x8878   :  { %9319 = vmatpush1.bf16.msra.mxu1 %v12210_v0 }
0x8879   :  { %9321 = vmatprep.subr.bf16.mxu1 %v12231_v58 }
0x887c   :  { %9323 = vmatpush1.bf16.msra.mxu1 %v12241_v61 }
0x887d   :  { %9325 = vmatprep.subr.bf16.mxu1 %v12259_v20 }
0x8880   :  { %9327 = vmatpush1.bf16.msra.mxu1 %v12267_v23 }
0x8946   :  { %v7807_v11 = vpop.f32.mrb[82].mxu1 }
0x8947   :  { %v7812_v3 = vadd.f32 %v7807_v11, %v6388_v31  ;;  %v7809_v35 = vpop.f32.mrb[83].mxu1 }
0x8948   :  { %v7813_v43 = vadd.f32 %v7809_v35, %v6342_v2 }
0x8949   :  { %10134 = vtanh.f32 %v7812_v3  ;;  %v8356_v61 = vmul.f32 -1.442695, %v7812_v3 }
0x894a   :  { %10136 = vtanh.f32 %v7813_v43  ;;  %v8357_v20 = vmul.f32 -1.442695, %v7813_v43 }
0x894b   :  { %10138 = vpow2.f32 %v8356_v61 }
0x894c   :  { %10140 = vpow2.f32 %v8357_v20 }
0x8953   :  { %v10135_v0 = vpop.eup %10134 }
0x8954   :  { %v10137_v58 = vpop.eup %10136  ;;  %7823 = vrot.lane.b32.xlu0 %v10135_v0, %s10183_s4 }
0x8955   :  { %7847 = vrot.lane.b32.xlu1 %v10137_v58, %s10183_s4  ;;  %v10139_v23 = vpop.eup %10138 }
0x8956   :  { %v10141_v62 = vpop.eup %10140  ;;  %v7817_v36 = vadd.f32 1.0, %v10139_v23  ;;  %v6400_v23 = vadd.f32 %v12413_v27, %v12362_v16 }
0x8957   :  { %v7841_v14 = vadd.f32 1.0, %v10141_v62  ;;  %v6330_v62 = vadd.f32 %v12365_v12, %v12411_v59 }
0x8958   :  { %10142 = vrcp.f32 %v7817_v36 }
0x8959   :  { %10144 = vrcp.f32 %v7841_v14 }
0x8962   :  { %v10143_v63 = vpop.eup %10142 }
0x8963   :  { %v10145_v51 = vpop.eup %10144  ;;  %v7821_v48 = vmul.f32 %v10143_v63, %v7698_v4 }
0x8964   :  { %v7845_v19 = vmul.f32 %v10145_v51, %v7722_v49 }
0x89c6   :  { %v7824_v22 = vpop.permute.xlu0 %7823 }
0x89c7   :  { %v7826_v8 = vmul.f32 %v10143_v63, %v7824_v22  ;;  %v7848_v50 = vpop.permute.xlu1 %7847 }
0x89c8   :  { %v7850_v40 = vmul.f32 %v10145_v51, %v7848_v50 }
0x89c9   :  { %7828 = vrot.lane.b32.xlu0 %v7826_v8, %s10183_s4 }
0x89ca   :  { %7852 = vrot.lane.b32.xlu1 %v7850_v40, %s10183_s4 }
0x8a3b   :  { %v7829_v10 = vpop.permute.xlu0 %7828 }
0x8a3c   :  { %v7831_v34 = vadd.f32 %v7829_v10, %v7821_v48  ;;  %v7853_v33 = vpop.permute.xlu1 %7852 }
0x8a3d   :  { %v7855_v30 = vadd.f32 %v7853_v33, %v7845_v19 }
0x8a3e   :  { %10146 = vtanh.f32 %v7831_v34 }
0x8a3f   :  { %10148 = vtanh.f32 %v7855_v30 }
0x8a48   :  { %v10147_v60 = vpop.eup %10146 }
0x8a49   :  { %v10149_v26 = vpop.eup %10148  ;;  %7834 = vrot.lane.b32.xlu0 %v10147_v60, %s10183_s4 }
0x8a4a   :  { %7858 = vrot.lane.b32.xlu1 %v10149_v26, %s10183_s4 }
0x8abb   :  { %v7835_v7 = vpop.permute.xlu0 %7834 }
0x8abc   :  { %v7837_v44 = vmul.f32 %v10143_v63, %v7835_v7  ;;  %v7859_v24 = vpop.permute.xlu1 %7858 }
0x8abd   :  { %v7861_v18 = vmul.f32 %v10145_v51, %v7859_v24 }
0x8abe   :  { %7863 = vrot.lane.b32.xlu0 %v7837_v44, %s10184_s8 }
0x8abf   :  { %7867 = vrot.lane.b32.xlu1 %v7861_v18, %s10185_s30 }
0x8b30   :  { %v7864_v47 = vpop.permute.xlu0 %7863 }
0x8b31   :  { %v7868_v17 = vpop.permute.xlu1 %7867 }
0x8b32   :  { %v7870_v28 = vsel %vm443_vm2, %v7864_v47, %v7868_v17 }
0x8b33   :  { %8358 = vmatmul.mubr.msk.f32.vlgmr.msra.gmra.mrb[138].mxu0 %vm306_vm1, %v7870_v28 }
0x8c06   :  { %v7940_v54 = vpop.f32.mrb[138].mxu0 }
0x8c07   :  { %v7945_v5 = vadd.f32 %v7940_v54, %v6394_v38  ;;  %v7942_v25 = vpop.f32.mrb[139].mxu0 }
0x8c08   :  { %v7946_v29 = vadd.f32 %v7942_v25, %v6336_v55 }
0x8c09   :  { %10150 = vtanh.f32 %v7945_v5  ;;  %v8359_v37 = vmul.f32 -1.442695, %v7945_v5 }
0x8c0a   :  { %10152 = vtanh.f32 %v7946_v29  ;;  %v8360_v45 = vmul.f32 -1.442695, %v7946_v29 }
0x8c0b   :  { %10154 = vpow2.f32 %v8359_v37 }
0x8c0c   :  { %10156 = vpow2.f32 %v8360_v45 }
0x8c13   :  { %v10151_v42 = vpop.eup %10150 }
0x8c14   :  { %v10153_v1 = vpop.eup %10152  ;;  %7956 = vrot.lane.b32.xlu0 %v10151_v42, %s10183_s4 }
0x8c15   :  { %7980 = vrot.lane.b32.xlu1 %v10153_v1, %s10183_s4  ;;  %v10155_v46 = vpop.eup %10154 }
0x8c16   :  { %v10157_v6 = vpop.eup %10156  ;;  %v7950_v4 = vadd.f32 1.0, %v10155_v46 }
0x8c17   :  { %v7974_v39 = vadd.f32 1.0, %v10157_v6 }
0x8c18   :  { %10158 = vrcp.f32 %v7950_v4 }
0x8c19   :  { %10160 = vrcp.f32 %v7974_v39 }
0x8c22   :  { %v10159_v15 = vpop.eup %10158 }
0x8c23   :  { %v10161_v21 = vpop.eup %10160  ;;  %v7954_v57 = vmul.f32 %v10159_v15, %v7831_v34 }
0x8c24   :  { %v7978_v13 = vmul.f32 %v10161_v21, %v7855_v30 }
0x8c86   :  { %v7957_v49 = vpop.permute.xlu0 %7956 }
0x8c87   :  { %v7959_v41 = vmul.f32 %v10159_v15, %v7957_v49  ;;  %v7981_v32 = vpop.permute.xlu1 %7980 }
0x8c88   :  { %v7983_v53 = vmul.f32 %v10161_v21, %v7981_v32 }
0x8c89   :  { %7961 = vrot.lane.b32.xlu0 %v7959_v41, %s10183_s4 }
0x8c8a   :  { %7985 = vrot.lane.b32.xlu1 %v7983_v53, %s10183_s4 }
0x8cfb   :  { %v7962_v52 = vpop.permute.xlu0 %7961 }
0x8cfc   :  { %v7964_v56 = vadd.f32 %v7962_v52, %v7954_v57  ;;  %v7986_v9 = vpop.permute.xlu1 %7985 }
0x8cfd   :  { %v7988_v31 = vadd.f32 %v7986_v9, %v7978_v13 }
0x8cfe   :  { %10162 = vtanh.f32 %v7964_v56 }
0x8cff   :  { %10164 = vtanh.f32 %v7988_v31 }
0x8d08   :  { %v10163_v2 = vpop.eup %10162 }
0x8d09   :  { %v10165_v11 = vpop.eup %10164  ;;  %7967 = vrot.lane.b32.xlu0 %v10163_v2, %s10183_s4 }
0x8d0a   :  { %7991 = vrot.lane.b32.xlu1 %v10165_v11, %s10183_s4 }
0x8d7b   :  { %v7968_v3 = vpop.permute.xlu0 %7967 }
0x8d7c   :  { %v7970_v35 = vmul.f32 %v10159_v15, %v7968_v3  ;;  %v7992_v43 = vpop.permute.xlu1 %7991 }
0x8d7d   :  { %v7994_v0 = vmul.f32 %v10161_v21, %v7992_v43 }
0x8d7e   :  { %7996 = vrot.lane.b32.xlu0 %v7970_v35, %s10184_s8 }
0x8d7f   :  { %8000 = vrot.lane.b32.xlu1 %v7994_v0, %s10185_s30 }
0x8df0   :  { %v7997_v58 = vpop.permute.xlu0 %7996 }
0x8df1   :  { %v8001_v61 = vpop.permute.xlu1 %8000 }
0x8df2   :  { %v8003_v20 = vsel %vm443_vm2, %v7997_v58, %v8001_v61 }
0x8df3   :  { %8361 = vmatmul.mubr.msk.f32.vlgmr.msra.gmra.mrb[84].mxu1 %vm306_vm1, %v8003_v20 }
0x8ec6   :  { %v8073_v36 = vpop.f32.mrb[84].mxu1 }
0x8ec7   :  { %v8078_v14 = vadd.f32 %v8073_v36, %v6400_v23  ;;  %v8075_v63 = vpop.f32.mrb[85].mxu1 }
0x8ec8   :  { %v8079_v22 = vadd.f32 %v8075_v63, %v6330_v62 }
0x8ec9   :  { %10166 = vtanh.f32 %v8078_v14  ;;  %v8362_v50 = vmul.f32 -1.442695, %v8078_v14 }
0x8eca   :  { %10168 = vtanh.f32 %v8079_v22  ;;  %v8363_v40 = vmul.f32 -1.442695, %v8079_v22 }
0x8ecb   :  { %10170 = vpow2.f32 %v8362_v50 }
0x8ecc   :  { %10172 = vpow2.f32 %v8363_v40 }
0x8ed3   :  { %v10167_v51 = vpop.eup %10166 }
0x8ed4   :  { %v10169_v8 = vpop.eup %10168  ;;  %8089 = vrot.lane.b32.xlu0 %v10167_v51, %s10183_s4 }
0x8ed5   :  { %8113 = vrot.lane.b32.xlu1 %v10169_v8, %s10183_s4  ;;  %v10171_v16 = vpop.eup %10170 }
0x8ed6   :  { %v10173_v27 = vpop.eup %10172  ;;  %v8083_v48 = vadd.f32 1.0, %v10171_v16 }
0x8ed7   :  { %v8107_v12 = vadd.f32 1.0, %v10173_v27 }
0x8ed8   :  { %10174 = vrcp.f32 %v8083_v48 }
0x8ed9   :  { %10176 = vrcp.f32 %v8107_v12 }
0x8ee2   :  { %v10175_v59 = vpop.eup %10174 }
0x8ee3   :  { %v10177_v19 = vpop.eup %10176  ;;  %v8087_v60 = vmul.f32 %v10175_v59, %v7964_v56 }
0x8ee4   :  { %v8111_v7 = vmul.f32 %v10177_v19, %v7988_v31 }
0x8f46   :  { %v8090_v10 = vpop.permute.xlu0 %8089 }
0x8f47   :  { %v8092_v34 = vmul.f32 %v10175_v59, %v8090_v10  ;;  %v8114_v33 = vpop.permute.xlu1 %8113 }
0x8f48   :  { %v8116_v30 = vmul.f32 %v10177_v19, %v8114_v33 }
0x8f49   :  { %8094 = vrot.lane.b32.xlu0 %v8092_v34, %s10183_s4 }
0x8f4a   :  { %8118 = vrot.lane.b32.xlu1 %v8116_v30, %s10183_s4 }
0x8fbb   :  { %v8095_v26 = vpop.permute.xlu0 %8094 }
0x8fbc   :  { %v8097_v44 = vadd.f32 %v8095_v26, %v8087_v60  ;;  %v8119_v24 = vpop.permute.xlu1 %8118 }
0x8fbd   :  { %v8121_v18 = vadd.f32 %v8119_v24, %v8111_v7 }
0x8fbe   :  { %10178 = vtanh.f32 %v8097_v44 }
0x8fbf   :  { %10180 = vtanh.f32 %v8121_v18 }
0x8fc8   :  { %v10179_v47 = vpop.eup %10178 }
0x8fc9   :  { %v10181_v17 = vpop.eup %10180  ;;  %8100 = vrot.lane.b32.xlu0 %v10179_v47, %s10183_s4 }
0x8fca   :  { %8124 = vrot.lane.b32.xlu1 %v10181_v17, %s10183_s4 }
0x903b   :  { %v8101_v28 = vpop.permute.xlu0 %8100 }
0x903c   :  { %v8103_v38 = vmul.f32 %v10175_v59, %v8101_v28  ;;  %v8125_v55 = vpop.permute.xlu1 %8124 }
0x903d   :  { %v8127_v54 = vmul.f32 %v10177_v19, %v8125_v55 }
0x903e   :  { %8129 = vrot.lane.b32.xlu0 %v8103_v38, %s10184_s8 }
0x903f   :  { %8133 = vrot.lane.b32.xlu1 %v8127_v54, %s10185_s30 }
0x90b0   :  { %v8130_v5 = vpop.permute.xlu0 %8129 }
0x90b1   :  { %v8134_v25 = vpop.permute.xlu1 %8133 }
0x90b2   :  { %v8136_v29 = vsel %vm443_vm2, %v8130_v5, %v8134_v25 }
0x90b3   :  { %8137 = vst.msk [vmem:[%s12704_s23] sm:$0xff] %vm306_vm1, %v8136_v29 }

</bundles_post_ra>
